<compile_context>
chip_gen: v7x
topology: tpu7x:2x2x1
jax: 0.10.0
libtpu: 0.0.40
codegen_flags: <defaults>
</compile_context>

<pallas_src>
import functools
import math

import jax
import jax.numpy as jnp
from jax.experimental import pallas as pl
from jax.experimental.pallas import tpu as pltpu

_EPS = 1e-6  # LayerNorm eps (matches the PyTorch module)


# ----------------------------- in-kernel helpers -----------------------------

def _ln_rows(x, w, b):
    # channels_first LayerNorm semantics: biased variance over the channel (lane) axis.
    u = jnp.mean(x, axis=-1, keepdims=True)
    xc = x - u
    s = jnp.mean(xc * xc, axis=-1, keepdims=True)
    return xc * jax.lax.rsqrt(s + _EPS) * w + b        # rsqrt -> EUP slot


def _erf(x):
    # Abramowitz & Stegun 7.1.26 (|err| < 1.5e-7): exp/VPU-only ops, safe Mosaic lowering.
    # TODO(synk): switch to jax.lax.erf for bit-exact nn.GELU once its Mosaic lowering
    # is confirmed on all target generations.
    a1, a2, a3, a4, a5 = 0.254829592, -0.284496736, 1.421413741, -1.453152027, 1.061405429
    p = 0.3275911
    sgn = jnp.where(x >= 0.0, 1.0, -1.0)
    ax = jnp.abs(x)
    t = 1.0 / (1.0 + p * ax)
    poly = ((((a5 * t + a4) * t + a3) * t + a2) * t + a1) * t
    return sgn * (1.0 - poly * jnp.exp(-ax * ax))


def _gelu_exact(x):
    return 0.5 * x * (1.0 + _erf(x * (1.0 / math.sqrt(2.0))))


# ------------------------------ Pallas kernels -------------------------------

def layernorm_kernel(x_ref, w_ref, b_ref, o_ref):
    o_ref[...] = _ln_rows(x_ref[...], w_ref[...], b_ref[...])


def fft_mlp_kernel(x_ref, w1_ref, b1_ref, w2_ref, b2_ref, o_ref):
    # FFML.main_fft: conv1x1 -> ReLU -> conv1x1 over the [real | imag] channel vector.
    # bf16 MXU operands, f32 accumulation.
    x = x_ref[...].astype(jnp.bfloat16)
    h = jnp.dot(x, w1_ref[...], preferred_element_type=jnp.float32) + b1_ref[...]
    h = jnp.maximum(h, 0.0).astype(jnp.bfloat16)
    o_ref[...] = jnp.dot(h, w2_ref[...], preferred_element_type=jnp.float32) + b2_ref[...]


def fused_mul_ln_fc_kernel(y3_ref, y1_ref, wmask_ref, lnw_ref, lnb_ref,
                           w1_ref, b1_ref, w2_ref, b2_ref, o_ref, pad_ref,
                           *, img_w, pad_top):
    # One image per grid step (rows = H*W in raster order):
    #   prod = irfft_result * norm1(x)        (FFML output; also the residual)
    #   y5   = LayerNorm2(prod)
    #   FC   = conv3x3(y5) -> GELU -> conv1x1
    #   out  = FC + prod
    # conv3x3 is computed as 9 shifted (R,C)x(C,hidden) matmuls against a
    # zero-padded VMEM slab (no im2col, no y4/y5 HBM round trip).
    R, _ = y3_ref.shape
    W = img_w

    prod = y3_ref[...] * y1_ref[...]
    y5 = _ln_rows(prod, lnw_ref[...], lnb_ref[...])

    # zero-padded slab: pad_top zero rows | R data rows | zero tail
    pad_ref[...] = jnp.zeros_like(pad_ref)
    pad_ref[pad_top:pad_top + R, :] = y5.astype(jnp.bfloat16)

    # width-border masks (1.0 / 0.0 in bf16): col 0 -> "not leftmost", col 1 -> "not rightmost"
    m_l = wmask_ref[:, 0:1]
    m_r = wmask_ref[:, 1:2]

    acc = None
    for k in range(9):                      # static unrolled 3x3 taps
        di, dj = divmod(k, 3)
        start = pad_top + (di - 1) * W + (dj - 1)
        patch = pad_ref[start:start + R, :]
        if dj == 0:
            patch = patch * m_l             # zero contributions that wrapped across rows
        elif dj == 2:
            patch = patch * m_r
        term = jnp.dot(patch, w1_ref[k], preferred_element_type=jnp.float32)
        acc = term if acc is None else acc + term

    h = _gelu_exact(acc + b1_ref[...]).astype(jnp.bfloat16)
    fc = jnp.dot(h, w2_ref[...], preferred_element_type=jnp.float32) + b2_ref[...]
    o_ref[...] = fc + prod


# ------------------------------ pallas_call wrappers --------------------------

def _cparams():
    return pltpu.CompilerParams(dimension_semantics=("parallel",),
                                vmem_limit_bytes=32 * 1024 * 1024)


def _row_tile(rows, cap):
    # cap must be a multiple of 8; partial last blocks are handled by Pallas.
    return rows if rows <= cap else cap


def _layernorm(x_rows, w, b, row_tile):
    rows, C = x_rows.shape
    tm = _row_tile(rows, row_tile)
    return pl.pallas_call(
        layernorm_kernel,
        out_shape=jax.ShapeDtypeStruct((rows, C), jnp.float32),
        grid=(pl.cdiv(rows, tm),),
        in_specs=[pl.BlockSpec((tm, C), lambda i: (i, 0)),
                  pl.BlockSpec((1, C), lambda i: (0, 0)),
                  pl.BlockSpec((1, C), lambda i: (0, 0))],
        out_specs=pl.BlockSpec((tm, C), lambda i: (i, 0)),
        compiler_params=_cparams(),
    )(x_rows, w, b)


def _fft_mlp(x_rows, w1, b1, w2, b2, row_tile):
    rows, C2 = x_rows.shape
    tm = _row_tile(rows, row_tile)
    return pl.pallas_call(
        fft_mlp_kernel,
        out_shape=jax.ShapeDtypeStruct((rows, C2), jnp.float32),
        grid=(pl.cdiv(rows, tm),),
        in_specs=[pl.BlockSpec((tm, C2), lambda i: (i, 0)),
                  pl.BlockSpec(w1.shape, lambda i: (0, 0)),
                  pl.BlockSpec((1, C2), lambda i: (0, 0)),
                  pl.BlockSpec(w2.shape, lambda i: (0, 0)),
                  pl.BlockSpec((1, C2), lambda i: (0, 0))],
        out_specs=pl.BlockSpec((tm, C2), lambda i: (i, 0)),
        compiler_params=_cparams(),
    )(x_rows, w1, b1, w2, b2)


def _fused_mul_ln_fc(y3_rows, y1_rows, wmask, ln2_w, ln2_b, w1, b1, w2, b2, N, H, W):
    # TODO(synk): for very large H*W (block > VMEM budget) tile along H with a 1-row halo.
    R = H * W
    C = y3_rows.shape[1]
    hidden = b1.shape[1]
    pad_top = ((W + 1 + 7) // 8) * 8            # >= W+1, 8-aligned store offset
    pad_rows = pad_top + R + pad_top            # >= pad_top + R + W + 1
    kern = functools.partial(fused_mul_ln_fc_kernel, img_w=W, pad_top=pad_top)
    return pl.pallas_call(
        kern,
        out_shape=jax.ShapeDtypeStruct((N * R, C), jnp.float32),
        grid=(N,),
        in_specs=[pl.BlockSpec((R, C), lambda n: (n, 0)),            # y3 (irfft result)
                  pl.BlockSpec((R, C), lambda n: (n, 0)),            # y1 (norm1 output)
                  pl.BlockSpec((R, 2), lambda n: (0, 0)),            # width-border masks
                  pl.BlockSpec((1, C), lambda n: (0, 0)),            # ln2 weight
                  pl.BlockSpec((1, C), lambda n: (0, 0)),            # ln2 bias
                  pl.BlockSpec((9, C, hidden), lambda n: (0, 0, 0)),  # conv3x3 weights
                  pl.BlockSpec((1, hidden), lambda n: (0, 0)),        # conv3x3 bias
                  pl.BlockSpec((hidden, C), lambda n: (0, 0)),        # conv1x1 weights
                  pl.BlockSpec((1, C), lambda n: (0, 0))],            # conv1x1 bias
        out_specs=pl.BlockSpec((R, C), lambda n: (n, 0)),
        scratch_shapes=[pltpu.VMEM((pad_rows, C), jnp.bfloat16)],
        compiler_params=_cparams(),
    )(y3_rows, y1_rows, wmask, ln2_w, ln2_b, w1, b1, w2, b2)


# ------------------------------ parameters -----------------------------------

def init_params(key, dim, ffn_scale=2.0):
    # PyTorch-layout parameters (for fidelity with the reference module).
    hidden = int(dim * ffn_scale)
    ks = jax.random.split(key, 8)

    def conv_w(k, shape):  # uniform(-1/sqrt(fan_in), 1/sqrt(fan_in))
        fan_in = shape[1] * shape[2] * shape[3]
        bound = 1.0 / math.sqrt(fan_in)
        return jax.random.uniform(k, shape, jnp.float32, -bound, bound)

    def conv_b(k, out_ch, fan_in):
        bound = 1.0 / math.sqrt(fan_in)
        return jax.random.uniform(k, (out_ch,), jnp.float32, -bound, bound)

    return dict(
        ln1_w=jnp.ones((dim,), jnp.float32), ln1_b=jnp.zeros((dim,), jnp.float32),
        ln2_w=jnp.ones((dim,), jnp.float32), ln2_b=jnp.zeros((dim,), jnp.float32),
        fft_w1=conv_w(ks[0], (2 * dim, 2 * dim, 1, 1)), fft_b1=conv_b(ks[1], 2 * dim, 2 * dim),
        fft_w2=conv_w(ks[2], (2 * dim, 2 * dim, 1, 1)), fft_b2=conv_b(ks[3], 2 * dim, 2 * dim),
        fc_w1=conv_w(ks[4], (hidden, dim, 3, 3)), fc_b1=conv_b(ks[5], hidden, dim * 9),
        fc_w2=conv_w(ks[6], (dim, hidden, 1, 1)), fc_b2=conv_b(ks[7], dim, hidden),
    )


def pack_params(p):
    # One-time (outside jit) reshape/transpose into the layouts the kernels want;
    # matmul weights pre-cast to bf16 (f32 accumulation keeps numerics).
    C2 = p['fft_w1'].shape[0]
    C = C2 // 2
    hidden = p['fc_w1'].shape[0]
    row = lambda v: v.reshape(1, -1).astype(jnp.float32)
    return dict(
        ln1_w=row(p['ln1_w']), ln1_b=row(p['ln1_b']),
        ln2_w=row(p['ln2_w']), ln2_b=row(p['ln2_b']),
        fft_w1=p['fft_w1'].reshape(C2, C2).T.astype(jnp.bfloat16),   # (in, out)
        fft_b1=row(p['fft_b1']),
        fft_w2=p['fft_w2'].reshape(C2, C2).T.astype(jnp.bfloat16),
        fft_b2=row(p['fft_b2']),
        # (hidden, C, 3, 3) -> (3, 3, C, hidden) -> (9, C, hidden), k = di*3 + dj
        fc_w1=p['fc_w1'].transpose(2, 3, 1, 0).reshape(9, C, hidden).astype(jnp.bfloat16),
        fc_b1=row(p['fc_b1']),
        fc_w2=p['fc_w2'].reshape(C, hidden).T.astype(jnp.bfloat16),  # (hidden, C)
        fc_b2=row(p['fc_b2']),
    )


# ------------------------------ forward pass ----------------------------------

def ffmb_forward(x, pp, row_tile=512):
    N, C, H, W = x.shape

    # single NCHW -> channels-last conversion at the module boundary
    x_rows = x.astype(jnp.float32).transpose(0, 2, 3, 1).reshape(N * H * W, C)

    # ---- y1 = norm1(x)  (Pallas, row-tiled) ----
    y1_rows = _layernorm(x_rows, pp['ln1_w'], pp['ln1_b'], row_tile)

    # ---- FFML: rfft2 -> (conv1x1, ReLU, conv1x1) on [real|imag] -> irfft2 ----
    # TODO(synk): rfft2/irfft2 have no Pallas TPU primitive; they remain plain JAX.
    y1 = y1_rows.reshape(N, H, W, C)
    yc = jnp.fft.rfft2(y1, axes=(1, 2), norm='backward')            # (N, H, Wf, C) complex64
    Wf = yc.shape[2]
    yf_rows = jnp.concatenate([yc.real, yc.imag], axis=-1).reshape(N * H * Wf, 2 * C)
    z_rows = _fft_mlp(yf_rows, pp['fft_w1'], pp['fft_b1'],
                      pp['fft_w2'], pp['fft_b2'], row_tile)
    z = z_rows.reshape(N, H, Wf, 2 * C)
    zc = jax.lax.complex(z[..., :C], z[..., C:])
    y3 = jnp.fft.irfft2(zc, s=(H, W), axes=(1, 2), norm='backward')  # (N, H, W, C)
    y3_rows = y3.reshape(N * H * W, C)

    # ---- fused: prod = y3*y1 ; LN2 ; conv3x3 + GELU + conv1x1 ; + prod  (Pallas) ----
    col = jnp.arange(H * W, dtype=jnp.int32) % W
    wmask = jnp.stack([col != 0, col != W - 1], axis=1).astype(jnp.bfloat16)  # (H*W, 2)
    out_rows = _fused_mul_ln_fc(y3_rows, y1_rows, wmask,
                                pp['ln2_w'], pp['ln2_b'],
                                pp['fc_w1'], pp['fc_b1'],
                                pp['fc_w2'], pp['fc_b2'], N, H, W)
    return out_rows.reshape(N, H, W, C).transpose(0, 3, 1, 2)


if __name__ == "__main__":
    key = jax.random.PRNGKey(0)
    kx, kp = jax.random.split(key)
    N, C, H, W = 2, 4, 16, 16
    x = jax.random.normal(kx, (N, C, H, W), jnp.float32)
    params = init_params(kp, C, ffn_scale=2.0)
    packed = pack_params(params)          # weight repack once, outside jit

    out = jax.jit(ffmb_forward)(x, packed)
    jax.block_until_ready(out)
    assert out.shape == (N, C, H, W) and out.dtype == jnp.float32
    print("KERNEL_OK")
</pallas_src>

<mosaic_0001>
module attributes {stable_mosaic.version = 11 : i64} {
  func.func @layernorm_kernel(%arg0: i32, %arg1: memref<512x4xf32, #tpu.memory_space<vmem>>, %arg2: memref<1x4xf32, #tpu.memory_space<vmem>>, %arg3: memref<1x4xf32, #tpu.memory_space<vmem>>, %arg4: memref<512x4xf32, #tpu.memory_space<vmem>>) attributes {dimension_semantics = [#tpu.dimension_semantics<parallel>], iteration_bounds = array<i64: 1>, scalar_prefetch = 0 : i64, scratch_operands = 0 : i64, tpu.core_type = #tpu.core_type<tc>, window_params = [{transform_indices = @transform_0, window_bounds = array<i64: 512, 4>}, {pipeline_mode = #tpu.pipeline_mode<synchronous>, transform_indices = @transform_1, window_bounds = array<i64: 1, 4>}, {pipeline_mode = #tpu.pipeline_mode<synchronous>, transform_indices = @transform_2, window_bounds = array<i64: 1, 4>}, {transform_indices = @transform_3, window_bounds = array<i64: 512, 4>}]} {
    %c0 = arith.constant 0 : index
    %c0_0 = arith.constant 0 : index
    %0 = vector.load %arg1[%c0, %c0_0] : memref<512x4xf32, #tpu.memory_space<vmem>>, vector<512x4xf32>
    %c0_1 = arith.constant 0 : index
    %c0_2 = arith.constant 0 : index
    %1 = vector.load %arg2[%c0_1, %c0_2] : memref<1x4xf32, #tpu.memory_space<vmem>>, vector<1x4xf32>
    %c0_3 = arith.constant 0 : index
    %c0_4 = arith.constant 0 : index
    %2 = vector.load %arg3[%c0_3, %c0_4] : memref<1x4xf32, #tpu.memory_space<vmem>>, vector<1x4xf32>
    %cst = arith.constant dense<0.000000e+00> : vector<512xf32>
    %3 = vector.multi_reduction <add>, %0, %cst [1] : vector<512x4xf32> to vector<512xf32>
    %4 = vector.shape_cast %3 : vector<512xf32> to vector<512x1xf32>
    %cst_5 = arith.constant 4.000000e+00 : f32
    %5 = vector.broadcast %cst_5 : f32 to vector<512x1xf32>
    %6 = arith.divf %4, %5 : vector<512x1xf32>
    %7 = vector.broadcast %6 : vector<512x1xf32> to vector<512x4xf32>
    %8 = arith.subf %0, %7 : vector<512x4xf32>
    %9 = arith.mulf %8, %8 : vector<512x4xf32>
    %cst_6 = arith.constant dense<0.000000e+00> : vector<512xf32>
    %10 = vector.multi_reduction <add>, %9, %cst_6 [1] : vector<512x4xf32> to vector<512xf32>
    %11 = vector.shape_cast %10 : vector<512xf32> to vector<512x1xf32>
    %cst_7 = arith.constant 4.000000e+00 : f32
    %12 = vector.broadcast %cst_7 : f32 to vector<512x1xf32>
    %13 = arith.divf %11, %12 : vector<512x1xf32>
    %cst_8 = arith.constant 9.99999997E-7 : f32
    %14 = vector.broadcast %cst_8 : f32 to vector<512x1xf32>
    %15 = arith.addf %13, %14 : vector<512x1xf32>
    %16 = math.rsqrt %15 : vector<512x1xf32>
    %17 = vector.broadcast %16 : vector<512x1xf32> to vector<512x4xf32>
    %18 = arith.mulf %8, %17 : vector<512x4xf32>
    %19 = vector.broadcast %1 : vector<1x4xf32> to vector<512x4xf32>
    %20 = arith.mulf %18, %19 : vector<512x4xf32>
    %21 = vector.broadcast %2 : vector<1x4xf32> to vector<512x4xf32>
    %22 = arith.addf %20, %21 : vector<512x4xf32>
    %c0_9 = arith.constant 0 : index
    %c0_10 = arith.constant 0 : index
    %23 = vector.load %arg4[%c0_9, %c0_10] : memref<512x4xf32, #tpu.memory_space<vmem>>, vector<512x4xf32>
    tpu.vector_store %arg4[%c0_9, %c0_10], %22 {strides = array<i32>} : memref<512x4xf32, #tpu.memory_space<vmem>>, vector<512x4xf32>,
    return
  }
  func.func @transform_0(%arg0: i32) -> (i32, i32) {
    %c0_i32 = arith.constant 0 : i32
    %c0_i32_0 = arith.constant 0 : i32
    return %arg0, %c0_i32 : i32, i32
  }
  func.func @transform_1(%arg0: i32) -> (i32, i32) {
    %c0_i32 = arith.constant 0 : i32
    %c0_i32_0 = arith.constant 0 : i32
    %c0_i32_1 = arith.constant 0 : i32
    return %c0_i32, %c0_i32_0 : i32, i32
  }
  func.func @transform_2(%arg0: i32) -> (i32, i32) {
    %c0_i32 = arith.constant 0 : i32
    %c0_i32_0 = arith.constant 0 : i32
    %c0_i32_1 = arith.constant 0 : i32
    return %c0_i32, %c0_i32_0 : i32, i32
  }
  func.func @transform_3(%arg0: i32) -> (i32, i32) {
    %c0_i32 = arith.constant 0 : i32
    %c0_i32_0 = arith.constant 0 : i32
    return %arg0, %c0_i32 : i32, i32
  }
}

module attributes {stable_mosaic.version = 11 : i64} {
  func.func @fft_mlp_kernel(%arg0: i32, %arg1: memref<288x8xf32, #tpu.memory_space<vmem>>, %arg2: memref<8x8xbf16, #tpu.memory_space<vmem>>, %arg3: memref<1x8xf32, #tpu.memory_space<vmem>>, %arg4: memref<8x8xbf16, #tpu.memory_space<vmem>>, %arg5: memref<1x8xf32, #tpu.memory_space<vmem>>, %arg6: memref<288x8xf32, #tpu.memory_space<vmem>>) attributes {dimension_semantics = [#tpu.dimension_semantics<parallel>], iteration_bounds = array<i64: 1>, scalar_prefetch = 0 : i64, scratch_operands = 0 : i64, tpu.core_type = #tpu.core_type<tc>, window_params = [{transform_indices = @transform_0, window_bounds = array<i64: 288, 8>}, {pipeline_mode = #tpu.pipeline_mode<synchronous>, transform_indices = @transform_1, window_bounds = array<i64: 8, 8>}, {pipeline_mode = #tpu.pipeline_mode<synchronous>, transform_indices = @transform_2, window_bounds = array<i64: 1, 8>}, {pipeline_mode = #tpu.pipeline_mode<synchronous>, transform_indices = @transform_3, window_bounds = array<i64: 8, 8>}, {pipeline_mode = #tpu.pipeline_mode<synchronous>, transform_indices = @transform_4, window_bounds = array<i64: 1, 8>}, {transform_indices = @transform_5, window_bounds = array<i64: 288, 8>}]} {
    %c0 = arith.constant 0 : index
    %c0_0 = arith.constant 0 : index
    %0 = vector.load %arg1[%c0, %c0_0] : memref<288x8xf32, #tpu.memory_space<vmem>>, vector<288x8xf32>
    %1 = arith.truncf %0 : vector<288x8xf32> to vector<288x8xbf16>
    %c0_1 = arith.constant 0 : index
    %c0_2 = arith.constant 0 : index
    %2 = vector.load %arg2[%c0_1, %c0_2] : memref<8x8xbf16, #tpu.memory_space<vmem>>, vector<8x8xbf16>
    %cst = arith.constant dense<0.000000e+00> : vector<288x8xf32>
    %3 = tpu.matmul %1, %2, %cst {dimension_numbers = #tpu.dot_dimension_numbers<[1], [0], [0], [1], [0, 0, 1, 1], [], []>} : vector<288x8xbf16>, vector<8x8xbf16>, vector<288x8xf32> -> vector<288x8xf32>
    %c0_3 = arith.constant 0 : index
    %c0_4 = arith.constant 0 : index
    %4 = vector.load %arg3[%c0_3, %c0_4] : memref<1x8xf32, #tpu.memory_space<vmem>>, vector<1x8xf32>
    %5 = vector.broadcast %4 : vector<1x8xf32> to vector<288x8xf32>
    %6 = arith.addf %3, %5 : vector<288x8xf32>
    %cst_5 = arith.constant 0.000000e+00 : f32
    %7 = vector.broadcast %cst_5 : f32 to vector<288x8xf32>
    %8 = arith.maximumf %6, %7 : vector<288x8xf32>
    %9 = arith.truncf %8 : vector<288x8xf32> to vector<288x8xbf16>
    %c0_6 = arith.constant 0 : index
    %c0_7 = arith.constant 0 : index
    %10 = vector.load %arg4[%c0_6, %c0_7] : memref<8x8xbf16, #tpu.memory_space<vmem>>, vector<8x8xbf16>
    %cst_8 = arith.constant dense<0.000000e+00> : vector<288x8xf32>
    %11 = tpu.matmul %9, %10, %cst_8 {dimension_numbers = #tpu.dot_dimension_numbers<[1], [0], [0], [1], [0, 0, 1, 1], [], []>} : vector<288x8xbf16>, vector<8x8xbf16>, vector<288x8xf32> -> vector<288x8xf32>
    %c0_9 = arith.constant 0 : index
    %c0_10 = arith.constant 0 : index
    %12 = vector.load %arg5[%c0_9, %c0_10] : memref<1x8xf32, #tpu.memory_space<vmem>>, vector<1x8xf32>
    %13 = vector.broadcast %12 : vector<1x8xf32> to vector<288x8xf32>
    %14 = arith.addf %11, %13 : vector<288x8xf32>
    %c0_11 = arith.constant 0 : index
    %c0_12 = arith.constant 0 : index
    %15 = vector.load %arg6[%c0_11, %c0_12] : memref<288x8xf32, #tpu.memory_space<vmem>>, vector<288x8xf32>
    tpu.vector_store %arg6[%c0_11, %c0_12], %14 {strides = array<i32>} : memref<288x8xf32, #tpu.memory_space<vmem>>, vector<288x8xf32>,
    return
  }
  func.func @transform_0(%arg0: i32) -> (i32, i32) {
    %c0_i32 = arith.constant 0 : i32
    %c0_i32_0 = arith.constant 0 : i32
    return %arg0, %c0_i32 : i32, i32
  }
  func.func @transform_1(%arg0: i32) -> (i32, i32) {
    %c0_i32 = arith.constant 0 : i32
    %c0_i32_0 = arith.constant 0 : i32
    %c0_i32_1 = arith.constant 0 : i32
    return %c0_i32, %c0_i32_0 : i32, i32
  }
  func.func @transform_2(%arg0: i32) -> (i32, i32) {
    %c0_i32 = arith.constant 0 : i32
    %c0_i32_0 = arith.constant 0 : i32
    %c0_i32_1 = arith.constant 0 : i32
    return %c0_i32, %c0_i32_0 : i32, i32
  }
  func.func @transform_3(%arg0: i32) -> (i32, i32) {
    %c0_i32 = arith.constant 0 : i32
    %c0_i32_0 = arith.constant 0 : i32
    %c0_i32_1 = arith.constant 0 : i32
    return %c0_i32, %c0_i32_0 : i32, i32
  }
  func.func @transform_4(%arg0: i32) -> (i32, i32) {
    %c0_i32 = arith.constant 0 : i32
    %c0_i32_0 = arith.constant 0 : i32
    %c0_i32_1 = arith.constant 0 : i32
    return %c0_i32, %c0_i32_0 : i32, i32
  }
  func.func @transform_5(%arg0: i32) -> (i32, i32) {
    %c0_i32 = arith.constant 0 : i32
    %c0_i32_0 = arith.constant 0 : i32
    return %arg0, %c0_i32 : i32, i32
  }
}

module attributes {stable_mosaic.version = 11 : i64} {
  func.func @fused_mul_ln_fc_kernel(%arg0: i32, %arg1: memref<256x4xf32, #tpu.memory_space<vmem>>, %arg2: memref<256x4xf32, #tpu.memory_space<vmem>>, %arg3: memref<256x2xbf16, #tpu.memory_space<vmem>>, %arg4: memref<1x4xf32, #tpu.memory_space<vmem>>, %arg5: memref<1x4xf32, #tpu.memory_space<vmem>>, %arg6: memref<9x4x8xbf16, #tpu.memory_space<vmem>>, %arg7: memref<1x8xf32, #tpu.memory_space<vmem>>, %arg8: memref<8x4xbf16, #tpu.memory_space<vmem>>, %arg9: memref<1x4xf32, #tpu.memory_space<vmem>>, %arg10: memref<256x4xf32, #tpu.memory_space<vmem>>, %arg11: memref<304x4xbf16, #tpu.memory_space<vmem>>) attributes {dimension_semantics = [#tpu.dimension_semantics<parallel>], iteration_bounds = array<i64: 2>, scalar_prefetch = 0 : i64, scratch_operands = 1 : i64, tpu.core_type = #tpu.core_type<tc>, window_params = [{transform_indices = @transform_0, window_bounds = array<i64: 256, 4>}, {transform_indices = @transform_1, window_bounds = array<i64: 256, 4>}, {pipeline_mode = #tpu.pipeline_mode<synchronous>, transform_indices = @transform_2, window_bounds = array<i64: 256, 2>}, {pipeline_mode = #tpu.pipeline_mode<synchronous>, transform_indices = @transform_3, window_bounds = array<i64: 1, 4>}, {pipeline_mode = #tpu.pipeline_mode<synchronous>, transform_indices = @transform_4, window_bounds = array<i64: 1, 4>}, {pipeline_mode = #tpu.pipeline_mode<synchronous>, transform_indices = @transform_5, window_bounds = array<i64: 9, 4, 8>}, {pipeline_mode = #tpu.pipeline_mode<synchronous>, transform_indices = @transform_6, window_bounds = array<i64: 1, 8>}, {pipeline_mode = #tpu.pipeline_mode<synchronous>, transform_indices = @transform_7, window_bounds = array<i64: 8, 4>}, {pipeline_mode = #tpu.pipeline_mode<synchronous>, transform_indices = @transform_8, window_bounds = array<i64: 1, 4>}, {transform_indices = @transform_9, window_bounds = array<i64: 256, 4>}]} {
    %c0 = arith.constant 0 : index
    %c0_0 = arith.constant 0 : index
    %0 = vector.load %arg1[%c0, %c0_0] : memref<256x4xf32, #tpu.memory_space<vmem>>, vector<256x4xf32>
    %c0_1 = arith.constant 0 : index
    %c0_2 = arith.constant 0 : index
    %1 = vector.load %arg2[%c0_1, %c0_2] : memref<256x4xf32, #tpu.memory_space<vmem>>, vector<256x4xf32>
    %2 = arith.mulf %0, %1 : vector<256x4xf32>
    %c0_3 = arith.constant 0 : index
    %c0_4 = arith.constant 0 : index
    %3 = vector.load %arg4[%c0_3, %c0_4] : memref<1x4xf32, #tpu.memory_space<vmem>>, vector<1x4xf32>
    %c0_5 = arith.constant 0 : index
    %c0_6 = arith.constant 0 : index
    %4 = vector.load %arg5[%c0_5, %c0_6] : memref<1x4xf32, #tpu.memory_space<vmem>>, vector<1x4xf32>
    %cst = arith.constant dense<0.000000e+00> : vector<256xf32>
    %5 = vector.multi_reduction <add>, %2, %cst [1] : vector<256x4xf32> to vector<256xf32>
    %6 = vector.shape_cast %5 : vector<256xf32> to vector<256x1xf32>
    %cst_7 = arith.constant 4.000000e+00 : f32
    %7 = vector.broadcast %cst_7 : f32 to vector<256x1xf32>
    %8 = arith.divf %6, %7 : vector<256x1xf32>
    %9 = vector.broadcast %8 : vector<256x1xf32> to vector<256x4xf32>
    %10 = arith.subf %2, %9 : vector<256x4xf32>
    %11 = arith.mulf %10, %10 : vector<256x4xf32>
    %cst_8 = arith.constant dense<0.000000e+00> : vector<256xf32>
    %12 = vector.multi_reduction <add>, %11, %cst_8 [1] : vector<256x4xf32> to vector<256xf32>
    %13 = vector.shape_cast %12 : vector<256xf32> to vector<256x1xf32>
    %cst_9 = arith.constant 4.000000e+00 : f32
    %14 = vector.broadcast %cst_9 : f32 to vector<256x1xf32>
    %15 = arith.divf %13, %14 : vector<256x1xf32>
    %cst_10 = arith.constant 9.99999997E-7 : f32
    %16 = vector.broadcast %cst_10 : f32 to vector<256x1xf32>
    %17 = arith.addf %15, %16 : vector<256x1xf32>
    %18 = math.rsqrt %17 : vector<256x1xf32>
    %19 = vector.broadcast %18 : vector<256x1xf32> to vector<256x4xf32>
    %20 = arith.mulf %10, %19 : vector<256x4xf32>
    %21 = vector.broadcast %3 : vector<1x4xf32> to vector<256x4xf32>
    %22 = arith.mulf %20, %21 : vector<256x4xf32>
    %23 = vector.broadcast %4 : vector<1x4xf32> to vector<256x4xf32>
    %24 = arith.addf %22, %23 : vector<256x4xf32>
    %cst_11 = arith.constant 0.000000e+00 : bf16
    %25 = vector.broadcast %cst_11 : bf16 to vector<304x4xbf16>
    %c0_12 = arith.constant 0 : index
    %c0_13 = arith.constant 0 : index
    %26 = vector.load %arg11[%c0_12, %c0_13] : memref<304x4xbf16, #tpu.memory_space<vmem>>, vector<304x4xbf16>
    tpu.vector_store %arg11[%c0_12, %c0_13], %25 {strides = array<i32>} : memref<304x4xbf16, #tpu.memory_space<vmem>>, vector<304x4xbf16>,
    %27 = arith.truncf %24 : vector<256x4xf32> to vector<256x4xbf16>
    %c24 = arith.constant 24 : index
    %c0_14 = arith.constant 0 : index
    %28 = vector.load %arg11[%c24, %c0_14] : memref<304x4xbf16, #tpu.memory_space<vmem>>, vector<256x4xbf16>
    tpu.vector_store %arg11[%c24, %c0_14], %27 {strides = array<i32>} : memref<304x4xbf16, #tpu.memory_space<vmem>>, vector<256x4xbf16>,
    %c0_15 = arith.constant 0 : index
    %c0_16 = arith.constant 0 : index
    %29 = vector.load %arg3[%c0_15, %c0_16] : memref<256x2xbf16, #tpu.memory_space<vmem>>, vector<256x1xbf16>
    %c0_17 = arith.constant 0 : index
    %c1 = arith.constant 1 : index
    %30 = vector.load %arg3[%c0_17, %c1] : memref<256x2xbf16, #tpu.memory_space<vmem>>, vector<256x1xbf16>
    %c7 = arith.constant 7 : index
    %c0_18 = arith.constant 0 : index
    %31 = vector.load %arg11[%c7, %c0_18] : memref<304x4xbf16, #tpu.memory_space<vmem>>, vector<256x4xbf16>
    %32 = vector.broadcast %29 : vector<256x1xbf16> to vector<256x4xbf16>
    %33 = arith.mulf %31, %32 : vector<256x4xbf16>
    %c0_19 = arith.constant 0 : index
    %c0_20 = arith.constant 0 : index
    %c0_21 = arith.constant 0 : index
    %34 = vector.load %arg6[%c0_19, %c0_20, %c0_21] : memref<9x4x8xbf16, #tpu.memory_space<vmem>>, vector<1x4x8xbf16>
    %35 = vector.shape_cast %34 : vector<1x4x8xbf16> to vector<4x8xbf16>
    %cst_22 = arith.constant dense<0.000000e+00> : vector<256x8xf32>
    %36 = tpu.matmul %33, %35, %cst_22 {dimension_numbers = #tpu.dot_dimension_numbers<[1], [0], [0], [1], [0, 0, 1, 1], [], []>} : vector<256x4xbf16>, vector<4x8xbf16>, vector<256x8xf32> -> vector<256x8xf32>
    %c8 = arith.constant 8 : index
    %c0_23 = arith.constant 0 : index
    %37 = vector.load %arg11[%c8, %c0_23] : memref<304x4xbf16, #tpu.memory_space<vmem>>, vector<256x4xbf16>
    %c1_24 = arith.constant 1 : index
    %c0_25 = arith.constant 0 : index
    %c0_26 = arith.constant 0 : index
    %38 = vector.load %arg6[%c1_24, %c0_25, %c0_26] : memref<9x4x8xbf16, #tpu.memory_space<vmem>>, vector<1x4x8xbf16>
    %39 = vector.shape_cast %38 : vector<1x4x8xbf16> to vector<4x8xbf16>
    %cst_27 = arith.constant dense<0.000000e+00> : vector<256x8xf32>
    %40 = tpu.matmul %37, %39, %cst_27 {dimension_numbers = #tpu.dot_dimension_numbers<[1], [0], [0], [1], [0, 0, 1, 1], [], []>} : vector<256x4xbf16>, vector<4x8xbf16>, vector<256x8xf32> -> vector<256x8xf32>
    %41 = arith.addf %36, %40 : vector<256x8xf32>
    %c9 = arith.constant 9 : index
    %c0_28 = arith.constant 0 : index
    %42 = vector.load %arg11[%c9, %c0_28] : memref<304x4xbf16, #tpu.memory_space<vmem>>, vector<256x4xbf16>
    %43 = vector.broadcast %30 : vector<256x1xbf16> to vector<256x4xbf16>
    %44 = arith.mulf %42, %43 : vector<256x4xbf16>
    %c2 = arith.constant 2 : index
    %c0_29 = arith.constant 0 : index
    %c0_30 = arith.constant 0 : index
    %45 = vector.load %arg6[%c2, %c0_29, %c0_30] : memref<9x4x8xbf16, #tpu.memory_space<vmem>>, vector<1x4x8xbf16>
    %46 = vector.shape_cast %45 : vector<1x4x8xbf16> to vector<4x8xbf16>
    %cst_31 = arith.constant dense<0.000000e+00> : vector<256x8xf32>
    %47 = tpu.matmul %44, %46, %cst_31 {dimension_numbers = #tpu.dot_dimension_numbers<[1], [0], [0], [1], [0, 0, 1, 1], [], []>} : vector<256x4xbf16>, vector<4x8xbf16>, vector<256x8xf32> -> vector<256x8xf32>
    %48 = arith.addf %41, %47 : vector<256x8xf32>
    %c23 = arith.constant 23 : index
    %c0_32 = arith.constant 0 : index
    %49 = vector.load %arg11[%c23, %c0_32] : memref<304x4xbf16, #tpu.memory_space<vmem>>, vector<256x4xbf16>
    %50 = vector.broadcast %29 : vector<256x1xbf16> to vector<256x4xbf16>
    %51 = arith.mulf %49, %50 : vector<256x4xbf16>
    %c3 = arith.constant 3 : index
    %c0_33 = arith.constant 0 : index
    %c0_34 = arith.constant 0 : index
    %52 = vector.load %arg6[%c3, %c0_33, %c0_34] : memref<9x4x8xbf16, #tpu.memory_space<vmem>>, vector<1x4x8xbf16>
    %53 = vector.shape_cast %52 : vector<1x4x8xbf16> to vector<4x8xbf16>
    %cst_35 = arith.constant dense<0.000000e+00> : vector<256x8xf32>
    %54 = tpu.matmul %51, %53, %cst_35 {dimension_numbers = #tpu.dot_dimension_numbers<[1], [0], [0], [1], [0, 0, 1, 1], [], []>} : vector<256x4xbf16>, vector<4x8xbf16>, vector<256x8xf32> -> vector<256x8xf32>
    %55 = arith.addf %48, %54 : vector<256x8xf32>
    %c24_36 = arith.constant 24 : index
    %c0_37 = arith.constant 0 : index
    %56 = vector.load %arg11[%c24_36, %c0_37] : memref<304x4xbf16, #tpu.memory_space<vmem>>, vector<256x4xbf16>
    %c4 = arith.constant 4 : index
    %c0_38 = arith.constant 0 : index
    %c0_39 = arith.constant 0 : index
    %57 = vector.load %arg6[%c4, %c0_38, %c0_39] : memref<9x4x8xbf16, #tpu.memory_space<vmem>>, vector<1x4x8xbf16>
    %58 = vector.shape_cast %57 : vector<1x4x8xbf16> to vector<4x8xbf16>
    %cst_40 = arith.constant dense<0.000000e+00> : vector<256x8xf32>
    %59 = tpu.matmul %56, %58, %cst_40 {dimension_numbers = #tpu.dot_dimension_numbers<[1], [0], [0], [1], [0, 0, 1, 1], [], []>} : vector<256x4xbf16>, vector<4x8xbf16>, vector<256x8xf32> -> vector<256x8xf32>
    %60 = arith.addf %55, %59 : vector<256x8xf32>
    %c25 = arith.constant 25 : index
    %c0_41 = arith.constant 0 : index
    %61 = vector.load %arg11[%c25, %c0_41] : memref<304x4xbf16, #tpu.memory_space<vmem>>, vector<256x4xbf16>
    %62 = vector.broadcast %30 : vector<256x1xbf16> to vector<256x4xbf16>
    %63 = arith.mulf %61, %62 : vector<256x4xbf16>
    %c5 = arith.constant 5 : index
    %c0_42 = arith.constant 0 : index
    %c0_43 = arith.constant 0 : index
    %64 = vector.load %arg6[%c5, %c0_42, %c0_43] : memref<9x4x8xbf16, #tpu.memory_space<vmem>>, vector<1x4x8xbf16>
    %65 = vector.shape_cast %64 : vector<1x4x8xbf16> to vector<4x8xbf16>
    %cst_44 = arith.constant dense<0.000000e+00> : vector<256x8xf32>
    %66 = tpu.matmul %63, %65, %cst_44 {dimension_numbers = #tpu.dot_dimension_numbers<[1], [0], [0], [1], [0, 0, 1, 1], [], []>} : vector<256x4xbf16>, vector<4x8xbf16>, vector<256x8xf32> -> vector<256x8xf32>
    %67 = arith.addf %60, %66 : vector<256x8xf32>
    %c39 = arith.constant 39 : index
    %c0_45 = arith.constant 0 : index
    %68 = vector.load %arg11[%c39, %c0_45] : memref<304x4xbf16, #tpu.memory_space<vmem>>, vector<256x4xbf16>
    %69 = vector.broadcast %29 : vector<256x1xbf16> to vector<256x4xbf16>
    %70 = arith.mulf %68, %69 : vector<256x4xbf16>
    %c6 = arith.constant 6 : index
    %c0_46 = arith.constant 0 : index
    %c0_47 = arith.constant 0 : index
    %71 = vector.load %arg6[%c6, %c0_46, %c0_47] : memref<9x4x8xbf16, #tpu.memory_space<vmem>>, vector<1x4x8xbf16>
    %72 = vector.shape_cast %71 : vector<1x4x8xbf16> to vector<4x8xbf16>
    %cst_48 = arith.constant dense<0.000000e+00> : vector<256x8xf32>
    %73 = tpu.matmul %70, %72, %cst_48 {dimension_numbers = #tpu.dot_dimension_numbers<[1], [0], [0], [1], [0, 0, 1, 1], [], []>} : vector<256x4xbf16>, vector<4x8xbf16>, vector<256x8xf32> -> vector<256x8xf32>
    %74 = arith.addf %67, %73 : vector<256x8xf32>
    %c40 = arith.constant 40 : index
    %c0_49 = arith.constant 0 : index
    %75 = vector.load %arg11[%c40, %c0_49] : memref<304x4xbf16, #tpu.memory_space<vmem>>, vector<256x4xbf16>
    %c7_50 = arith.constant 7 : index
    %c0_51 = arith.constant 0 : index
    %c0_52 = arith.constant 0 : index
    %76 = vector.load %arg6[%c7_50, %c0_51, %c0_52] : memref<9x4x8xbf16, #tpu.memory_space<vmem>>, vector<1x4x8xbf16>
    %77 = vector.shape_cast %76 : vector<1x4x8xbf16> to vector<4x8xbf16>
    %cst_53 = arith.constant dense<0.000000e+00> : vector<256x8xf32>
    %78 = tpu.matmul %75, %77, %cst_53 {dimension_numbers = #tpu.dot_dimension_numbers<[1], [0], [0], [1], [0, 0, 1, 1], [], []>} : vector<256x4xbf16>, vector<4x8xbf16>, vector<256x8xf32> -> vector<256x8xf32>
    %79 = arith.addf %74, %78 : vector<256x8xf32>
    %c41 = arith.constant 41 : index
    %c0_54 = arith.constant 0 : index
    %80 = vector.load %arg11[%c41, %c0_54] : memref<304x4xbf16, #tpu.memory_space<vmem>>, vector<256x4xbf16>
    %81 = vector.broadcast %30 : vector<256x1xbf16> to vector<256x4xbf16>
    %82 = arith.mulf %80, %81 : vector<256x4xbf16>
    %c8_55 = arith.constant 8 : index
    %c0_56 = arith.constant 0 : index
    %c0_57 = arith.constant 0 : index
    %83 = vector.load %arg6[%c8_55, %c0_56, %c0_57] : memref<9x4x8xbf16, #tpu.memory_space<vmem>>, vector<1x4x8xbf16>
    %84 = vector.shape_cast %83 : vector<1x4x8xbf16> to vector<4x8xbf16>
    %cst_58 = arith.constant dense<0.000000e+00> : vector<256x8xf32>
    %85 = tpu.matmul %82, %84, %cst_58 {dimension_numbers = #tpu.dot_dimension_numbers<[1], [0], [0], [1], [0, 0, 1, 1], [], []>} : vector<256x4xbf16>, vector<4x8xbf16>, vector<256x8xf32> -> vector<256x8xf32>
    %86 = arith.addf %79, %85 : vector<256x8xf32>
    %c0_59 = arith.constant 0 : index
    %c0_60 = arith.constant 0 : index
    %87 = vector.load %arg7[%c0_59, %c0_60] : memref<1x8xf32, #tpu.memory_space<vmem>>, vector<1x8xf32>
    %88 = vector.broadcast %87 : vector<1x8xf32> to vector<256x8xf32>
    %89 = arith.addf %86, %88 : vector<256x8xf32>
    %cst_61 = arith.constant 5.000000e-01 : f32
    %90 = vector.broadcast %cst_61 : f32 to vector<256x8xf32>
    %91 = arith.mulf %90, %89 : vector<256x8xf32>
    %cst_62 = arith.constant 0.707106769 : f32
    %92 = vector.broadcast %cst_62 : f32 to vector<256x8xf32>
    %93 = arith.mulf %89, %92 : vector<256x8xf32>
    %cst_63 = arith.constant 0.000000e+00 : f32
    %94 = vector.broadcast %cst_63 : f32 to vector<256x8xf32>
    %95 = arith.cmpf oge, %93, %94 : vector<256x8xf32>
    %cst_64 = arith.constant 1.000000e+00 : f32
    %cst_65 = arith.constant -1.000000e+00 : f32
    %96 = vector.broadcast %cst_64 : f32 to vector<256x8xf32>
    %97 = vector.broadcast %cst_65 : f32 to vector<256x8xf32>
    %98 = arith.select %95, %96, %97 : vector<256x8xi1>, vector<256x8xf32>
    %99 = math.absf %93 : vector<256x8xf32>
    %cst_66 = arith.constant 0.327591091 : f32
    %100 = vector.broadcast %cst_66 : f32 to vector<256x8xf32>
    %101 = arith.mulf %100, %99 : vector<256x8xf32>
    %cst_67 = arith.constant 1.000000e+00 : f32
    %102 = vector.broadcast %cst_67 : f32 to vector<256x8xf32>
    %103 = arith.addf %102, %101 : vector<256x8xf32>
    %cst_68 = arith.constant 1.000000e+00 : f32
    %104 = vector.broadcast %cst_68 : f32 to vector<256x8xf32>
    %105 = arith.divf %104, %103 : vector<256x8xf32>
    %cst_69 = arith.constant 1.06140542 : f32
    %106 = vector.broadcast %cst_69 : f32 to vector<256x8xf32>
    %107 = arith.mulf %106, %105 : vector<256x8xf32>
    %cst_70 = arith.constant -1.45315206 : f32
    %108 = vector.broadcast %cst_70 : f32 to vector<256x8xf32>
    %109 = arith.addf %107, %108 : vector<256x8xf32>
    %110 = arith.mulf %109, %105 : vector<256x8xf32>
    %cst_71 = arith.constant 1.42141378 : f32
    %111 = vector.broadcast %cst_71 : f32 to vector<256x8xf32>
    %112 = arith.addf %110, %111 : vector<256x8xf32>
    %113 = arith.mulf %112, %105 : vector<256x8xf32>
    %cst_72 = arith.constant -0.284496725 : f32
    %114 = vector.broadcast %cst_72 : f32 to vector<256x8xf32>
    %115 = arith.addf %113, %114 : vector<256x8xf32>
    %116 = arith.mulf %115, %105 : vector<256x8xf32>
    %cst_73 = arith.constant 0.254829586 : f32
    %117 = vector.broadcast %cst_73 : f32 to vector<256x8xf32>
    %118 = arith.addf %116, %117 : vector<256x8xf32>
    %119 = arith.mulf %118, %105 : vector<256x8xf32>
    %cst_74 = arith.constant 0.000000e+00 : f32
    %120 = vector.broadcast %cst_74 : f32 to vector<256x8xf32>
    %121 = arith.subf %120, %99 : vector<256x8xf32>
    %122 = arith.mulf %121, %99 : vector<256x8xf32>
    %123 = math.exp %122 : vector<256x8xf32>
    %124 = arith.mulf %119, %123 : vector<256x8xf32>
    %cst_75 = arith.constant 1.000000e+00 : f32
    %125 = vector.broadcast %cst_75 : f32 to vector<256x8xf32>
    %126 = arith.subf %125, %124 : vector<256x8xf32>
    %127 = arith.mulf %98, %126 : vector<256x8xf32>
    %cst_76 = arith.constant 1.000000e+00 : f32
    %128 = vector.broadcast %cst_76 : f32 to vector<256x8xf32>
    %129 = arith.addf %128, %127 : vector<256x8xf32>
    %130 = arith.mulf %91, %129 : vector<256x8xf32>
    %131 = arith.truncf %130 : vector<256x8xf32> to vector<256x8xbf16>
    %c0_77 = arith.constant 0 : index
    %c0_78 = arith.constant 0 : index
    %132 = vector.load %arg8[%c0_77, %c0_78] : memref<8x4xbf16, #tpu.memory_space<vmem>>, vector<8x4xbf16>
    %cst_79 = arith.constant dense<0.000000e+00> : vector<256x4xf32>
    %133 = tpu.matmul %131, %132, %cst_79 {dimension_numbers = #tpu.dot_dimension_numbers<[1], [0], [0], [1], [0, 0, 1, 1], [], []>} : vector<256x8xbf16>, vector<8x4xbf16>, vector<256x4xf32> -> vector<256x4xf32>
    %c0_80 = arith.constant 0 : index
    %c0_81 = arith.constant 0 : index
    %134 = vector.load %arg9[%c0_80, %c0_81] : memref<1x4xf32, #tpu.memory_space<vmem>>, vector<1x4xf32>
    %135 = vector.broadcast %134 : vector<1x4xf32> to vector<256x4xf32>
    %136 = arith.addf %133, %135 : vector<256x4xf32>
    %137 = arith.addf %136, %2 : vector<256x4xf32>
    %c0_82 = arith.constant 0 : index
    %c0_83 = arith.constant 0 : index
    %138 = vector.load %arg10[%c0_82, %c0_83] : memref<256x4xf32, #tpu.memory_space<vmem>>, vector<256x4xf32>
    tpu.vector_store %arg10[%c0_82, %c0_83], %137 {strides = array<i32>} : memref<256x4xf32, #tpu.memory_space<vmem>>, vector<256x4xf32>,
    return
  }
  func.func @transform_0(%arg0: i32) -> (i32, i32) {
    %c0_i32 = arith.constant 0 : i32
    %c0_i32_0 = arith.constant 0 : i32
    return %arg0, %c0_i32 : i32, i32
  }
  func.func @transform_1(%arg0: i32) -> (i32, i32) {
    %c0_i32 = arith.constant 0 : i32
    %c0_i32_0 = arith.constant 0 : i32
    return %arg0, %c0_i32 : i32, i32
  }
  func.func @transform_2(%arg0: i32) -> (i32, i32) {
    %c0_i32 = arith.constant 0 : i32
    %c0_i32_0 = arith.constant 0 : i32
    %c0_i32_1 = arith.constant 0 : i32
    return %c0_i32, %c0_i32_0 : i32, i32
  }
  func.func @transform_3(%arg0: i32) -> (i32, i32) {
    %c0_i32 = arith.constant 0 : i32
    %c0_i32_0 = arith.constant 0 : i32
    %c0_i32_1 = arith.constant 0 : i32
    return %c0_i32, %c0_i32_0 : i32, i32
  }
  func.func @transform_4(%arg0: i32) -> (i32, i32) {
    %c0_i32 = arith.constant 0 : i32
    %c0_i32_0 = arith.constant 0 : i32
    %c0_i32_1 = arith.constant 0 : i32
    return %c0_i32, %c0_i32_0 : i32, i32
  }
  func.func @transform_5(%arg0: i32) -> (i32, i32, i32) {
    %c0_i32 = arith.constant 0 : i32
    %c0_i32_0 = arith.constant 0 : i32
    %c0_i32_1 = arith.constant 0 : i32
    %c0_i32_2 = arith.constant 0 : i32
    return %c0_i32, %c0_i32_0, %c0_i32_1 : i32, i32, i32
  }
  func.func @transform_6(%arg0: i32) -> (i32, i32) {
    %c0_i32 = arith.constant 0 : i32
    %c0_i32_0 = arith.constant 0 : i32
    %c0_i32_1 = arith.constant 0 : i32
    return %c0_i32, %c0_i32_0 : i32, i32
  }
  func.func @transform_7(%arg0: i32) -> (i32, i32) {
    %c0_i32 = arith.constant 0 : i32
    %c0_i32_0 = arith.constant 0 : i32
    %c0_i32_1 = arith.constant 0 : i32
    return %c0_i32, %c0_i32_0 : i32, i32
  }
  func.func @transform_8(%arg0: i32) -> (i32, i32) {
    %c0_i32 = arith.constant 0 : i32
    %c0_i32_0 = arith.constant 0 : i32
    %c0_i32_1 = arith.constant 0 : i32
    return %c0_i32, %c0_i32_0 : i32, i32
  }
  func.func @transform_9(%arg0: i32) -> (i32, i32) {
    %c0_i32 = arith.constant 0 : i32
    %c0_i32_0 = arith.constant 0 : i32
    return %arg0, %c0_i32 : i32, i32
  }
}

</mosaic_0001>

<bundles_post_ra>
// kernel: ffmb_forward.3
= control target key start
LH: loop header
LB: loop body
LE: loop exit
PB: predicated region body
PF: predicated region fallthrough
CT: control target
= control target key end

     0   :  { %vm80_vm0 = vcmask 31744   ;;  %s2554_s0 = inlined_call_operand.vmem [shape: f32[512,4], index: 0, kind: input, shape index: {}]   ;;  %s2555_s1 = inlined_call_operand.vmem [shape: f32[1,4], index: 1, kind: input, shape index: {}]   ;;  %s2556_s2 = inlined_call_operand.vmem [shape: f32[1,4], index: 2, kind: input, shape index: {}]   ;;  %s2557_s3 = inlined_call_operand.vmem [shape: f32[512,4], index: 3, kind: output, shape index: {}]  }
   0x1   :  { %v1277_v0 = vld [vmem:[%s2554_s0] sm:$0xff]  ;;  %v1282_v1 = vld [vmem:[%s2554_s0 + $0x10] sm:$0xff]  ;;  %v1287_v2 = vld [vmem:[%s2554_s0 + $0x8] sm:$0xff] }
   0x2   :  { %v81_v3 = vsel %vm80_vm0, %v1277_v0, 0.0  ;;  %v87_v4 = vsel %vm80_vm0, %v1282_v1, 0.0  ;;  %v1296_v5 = vld [vmem:[%s2554_s0 + $0x18] sm:$0xff]  ;;  %v84_v6 = vsel %vm80_vm0, %v1287_v2, 0.0  ;;  %v1305_v8 = vld [vmem:[%s2554_s0 + $0x20] sm:$0xff]  ;;  %v1310_v9 = vld [vmem:[%s2554_s0 + $0x28] sm:$0xff] }
   0x3   :  { %82 = vadd.xlane.f32.xlu0 %v81_v3  ;;  %88 = vadd.xlane.f32.xlu1 %v87_v4  ;;  %v90_v7 = vsel %vm80_vm0, %v1296_v5, 0.0  ;;  %v93_v10 = vsel %vm80_vm0, %v1305_v8, 0.0  ;;  %v96_v11 = vsel %vm80_vm0, %v1310_v9, 0.0  ;;  %v1319_v12 = vld [vmem:[%s2554_s0 + $0x30] sm:$0xff]  ;;  %v1324_v13 = vld [vmem:[%s2554_s0 + $0x38] sm:$0xff]  ;;  %v1333_v16 = vld [vmem:[%s2554_s0 + $0x40] sm:$0xff] }
   0x4   :  { %v99_v14 = vsel %vm80_vm0, %v1319_v12, 0.0  ;;  %v102_v15 = vsel %vm80_vm0, %v1324_v13, 0.0  ;;  %v1338_v17 = vld [vmem:[%s2554_s0 + $0x48] sm:$0xff]  ;;  %v105_v18 = vsel %vm80_vm0, %v1333_v16, 0.0  ;;  %v1347_v20 = vld [vmem:[%s2554_s0 + $0x50] sm:$0xff]  ;;  %v1352_v21 = vld [vmem:[%s2554_s0 + $0x58] sm:$0xff] }
   0x5   :  { %v108_v19 = vsel %vm80_vm0, %v1338_v17, 0.0  ;;  %v111_v22 = vsel %vm80_vm0, %v1347_v20, 0.0  ;;  %v114_v23 = vsel %vm80_vm0, %v1352_v21, 0.0  ;;  %v1361_v24 = vld [vmem:[%s2554_s0 + $0x60] sm:$0xff]  ;;  %v1366_v25 = vld [vmem:[%s2554_s0 + $0x68] sm:$0xff]  ;;  %v1375_v28 = vld [vmem:[%s2554_s0 + $0x70] sm:$0xff] }
   0x6   :  { %v117_v26 = vsel %vm80_vm0, %v1361_v24, 0.0  ;;  %v120_v27 = vsel %vm80_vm0, %v1366_v25, 0.0  ;;  %v1380_v29 = vld [vmem:[%s2554_s0 + $0x78] sm:$0xff]  ;;  %v123_v30 = vsel %vm80_vm0, %v1375_v28, 0.0  ;;  %v1389_v32 = vld [vmem:[%s2554_s0 + $0x80] sm:$0xff]  ;;  %v1394_v33 = vld [vmem:[%s2554_s0 + $0x88] sm:$0xff] }
   0x7   :  { %85 = vadd.xlane.f32.xlu0 %v84_v6  ;;  %91 = vadd.xlane.f32.xlu1 %v90_v7  ;;  %v126_v31 = vsel %vm80_vm0, %v1380_v29, 0.0  ;;  %v129_v34 = vsel %vm80_vm0, %v1389_v32, 0.0  ;;  %v132_v35 = vsel %vm80_vm0, %v1394_v33, 0.0  ;;  %v1403_v36 = vld [vmem:[%s2554_s0 + $0x90] sm:$0xff]  ;;  %v1408_v37 = vld [vmem:[%s2554_s0 + $0x98] sm:$0xff]  ;;  %v1417_v40 = vld [vmem:[%s2554_s0 + $0xa0] sm:$0xff] }
   0x8   :  { %v135_v38 = vsel %vm80_vm0, %v1403_v36, 0.0  ;;  %v138_v39 = vsel %vm80_vm0, %v1408_v37, 0.0  ;;  %v1422_v41 = vld [vmem:[%s2554_s0 + $0xa8] sm:$0xff]  ;;  %v141_v42 = vsel %vm80_vm0, %v1417_v40, 0.0  ;;  %v1431_v44 = vld [vmem:[%s2554_s0 + $0xb0] sm:$0xff]  ;;  %v1436_v45 = vld [vmem:[%s2554_s0 + $0xb8] sm:$0xff] }
   0x9   :  { %v144_v43 = vsel %vm80_vm0, %v1422_v41, 0.0  ;;  %v147_v46 = vsel %vm80_vm0, %v1431_v44, 0.0  ;;  %v150_v47 = vsel %vm80_vm0, %v1436_v45, 0.0  ;;  %v1445_v48 = vld [vmem:[%s2554_s0 + $0xc0] sm:$0xff]  ;;  %v1450_v49 = vld [vmem:[%s2554_s0 + $0xc8] sm:$0xff]  ;;  %v1459_v52 = vld [vmem:[%s2554_s0 + $0xd0] sm:$0xff] }
   0xa   :  { %v153_v50 = vsel %vm80_vm0, %v1445_v48, 0.0  ;;  %v156_v51 = vsel %vm80_vm0, %v1450_v49, 0.0  ;;  %v1464_v53 = vld [vmem:[%s2554_s0 + $0xd8] sm:$0xff]  ;;  %v159_v54 = vsel %vm80_vm0, %v1459_v52, 0.0  ;;  %v1473_v56 = vld [vmem:[%s2554_s0 + $0xe0] sm:$0xff]  ;;  %v1478_v57 = vld [vmem:[%s2554_s0 + $0xe8] sm:$0xff] }
   0xb   :  { %94 = vadd.xlane.f32.xlu0 %v93_v10  ;;  %97 = vadd.xlane.f32.xlu1 %v96_v11  ;;  %v162_v55 = vsel %vm80_vm0, %v1464_v53, 0.0  ;;  %v165_v58 = vsel %vm80_vm0, %v1473_v56, 0.0  ;;  %v168_v59 = vsel %vm80_vm0, %v1478_v57, 0.0  ;;  %v1487_v60 = vld [vmem:[%s2554_s0 + $0xf0] sm:$0xff]  ;;  %v1492_v61 = vld [vmem:[%s2554_s0 + $0xf8] sm:$0xff]  ;;  %v1501_v3 = vld [vmem:[%s2554_s0 + $0x100] sm:$0xff] }
   0xc   :  { %v171_v62 = vsel %vm80_vm0, %v1487_v60, 0.0  ;;  %v174_v63 = vsel %vm80_vm0, %v1492_v61, 0.0  ;;  %v1506_v4 = vld [vmem:[%s2554_s0 + $0x108] sm:$0xff]  ;;  %v177_v6 = vsel %vm80_vm0, %v1501_v3, 0.0  ;;  %v1515_v10 = vld [vmem:[%s2554_s0 + $0x110] sm:$0xff]  ;;  %v1520_v11 = vld [vmem:[%s2554_s0 + $0x118] sm:$0xff] }
   0xd   :  { %v180_v7 = vsel %vm80_vm0, %v1506_v4, 0.0 }
   0xf   :  { %100 = vadd.xlane.f32.xlu0 %v99_v14  ;;  %103 = vadd.xlane.f32.xlu1 %v102_v15  ;;  %v183_v14 = vsel %vm80_vm0, %v1515_v10, 0.0  ;;  %v186_v15 = vsel %vm80_vm0, %v1520_v11, 0.0 }
  0x13   :  { %106 = vadd.xlane.f32.xlu0 %v105_v18  ;;  %109 = vadd.xlane.f32.xlu1 %v108_v19  ;;  %v1529_v18 = vld [vmem:[%s2554_s0 + $0x120] sm:$0xff]  ;;  %v1534_v19 = vld [vmem:[%s2554_s0 + $0x128] sm:$0xff] }
  0x17   :  { %112 = vadd.xlane.f32.xlu0 %v111_v22  ;;  %115 = vadd.xlane.f32.xlu1 %v114_v23  ;;  %v189_v22 = vsel %vm80_vm0, %v1529_v18, 0.0  ;;  %v192_v23 = vsel %vm80_vm0, %v1534_v19, 0.0 }
  0x1b   :  { %118 = vadd.xlane.f32.xlu0 %v117_v26  ;;  %121 = vadd.xlane.f32.xlu1 %v120_v27  ;;  %v1543_v26 = vld [vmem:[%s2554_s0 + $0x130] sm:$0xff]  ;;  %v1548_v27 = vld [vmem:[%s2554_s0 + $0x138] sm:$0xff] }
  0x1f   :  { %124 = vadd.xlane.f32.xlu0 %v123_v30  ;;  %127 = vadd.xlane.f32.xlu1 %v126_v31  ;;  %v195_v30 = vsel %vm80_vm0, %v1543_v26, 0.0  ;;  %v198_v31 = vsel %vm80_vm0, %v1548_v27, 0.0 }
  0x23   :  { %130 = vadd.xlane.f32.xlu0 %v129_v34  ;;  %133 = vadd.xlane.f32.xlu1 %v132_v35  ;;  %v1557_v34 = vld [vmem:[%s2554_s0 + $0x140] sm:$0xff]  ;;  %v1562_v35 = vld [vmem:[%s2554_s0 + $0x148] sm:$0xff] }
  0x27   :  { %136 = vadd.xlane.f32.xlu0 %v135_v38  ;;  %139 = vadd.xlane.f32.xlu1 %v138_v39  ;;  %v201_v38 = vsel %vm80_vm0, %v1557_v34, 0.0  ;;  %v204_v39 = vsel %vm80_vm0, %v1562_v35, 0.0 }
  0x2b   :  { %142 = vadd.xlane.f32.xlu0 %v141_v42  ;;  %145 = vadd.xlane.f32.xlu1 %v144_v43  ;;  %v1571_v42 = vld [vmem:[%s2554_s0 + $0x150] sm:$0xff]  ;;  %v1576_v43 = vld [vmem:[%s2554_s0 + $0x158] sm:$0xff] }
  0x2f   :  { %148 = vadd.xlane.f32.xlu0 %v147_v46  ;;  %151 = vadd.xlane.f32.xlu1 %v150_v47  ;;  %v207_v46 = vsel %vm80_vm0, %v1571_v42, 0.0  ;;  %v210_v47 = vsel %vm80_vm0, %v1576_v43, 0.0 }
  0x33   :  { %154 = vadd.xlane.f32.xlu0 %v153_v50  ;;  %157 = vadd.xlane.f32.xlu1 %v156_v51  ;;  %v1585_v50 = vld [vmem:[%s2554_s0 + $0x160] sm:$0xff]  ;;  %v1590_v51 = vld [vmem:[%s2554_s0 + $0x168] sm:$0xff] }
  0x37   :  { %160 = vadd.xlane.f32.xlu0 %v159_v54  ;;  %163 = vadd.xlane.f32.xlu1 %v162_v55  ;;  %v213_v54 = vsel %vm80_vm0, %v1585_v50, 0.0  ;;  %v216_v55 = vsel %vm80_vm0, %v1590_v51, 0.0 }
  0x3b   :  { %166 = vadd.xlane.f32.xlu0 %v165_v58  ;;  %169 = vadd.xlane.f32.xlu1 %v168_v59  ;;  %v1599_v58 = vld [vmem:[%s2554_s0 + $0x170] sm:$0xff]  ;;  %v1604_v59 = vld [vmem:[%s2554_s0 + $0x178] sm:$0xff] }
  0x3f   :  { %172 = vadd.xlane.f32.xlu0 %v171_v62  ;;  %175 = vadd.xlane.f32.xlu1 %v174_v63  ;;  %v219_v62 = vsel %vm80_vm0, %v1599_v58, 0.0  ;;  %v222_v63 = vsel %vm80_vm0, %v1604_v59, 0.0 }
  0x43   :  { %178 = vadd.xlane.f32.xlu0 %v177_v6  ;;  %181 = vadd.xlane.f32.xlu1 %v180_v7  ;;  %v1613_v6 = vld [vmem:[%s2554_s0 + $0x180] sm:$0xff]  ;;  %v1618_v7 = vld [vmem:[%s2554_s0 + $0x188] sm:$0xff] }
  0x47   :  { %184 = vadd.xlane.f32.xlu0 %v183_v14  ;;  %187 = vadd.xlane.f32.xlu1 %v186_v15  ;;  %v225_v14 = vsel %vm80_vm0, %v1613_v6, 0.0  ;;  %v228_v15 = vsel %vm80_vm0, %v1618_v7, 0.0 }
  0x4b   :  { %190 = vadd.xlane.f32.xlu0 %v189_v22  ;;  %193 = vadd.xlane.f32.xlu1 %v192_v23  ;;  %v1627_v22 = vld [vmem:[%s2554_s0 + $0x190] sm:$0xff]  ;;  %v1632_v23 = vld [vmem:[%s2554_s0 + $0x198] sm:$0xff] }
  0x4c   :  { %2591 = vst [vmem:[#allocation2_spill] sm:$0xff] %v1627_v22  ;;  %2592 = vst [vmem:[#allocation3_spill] sm:$0xff] %v1632_v23 }
  0x4f   :  { %196 = vadd.xlane.f32.xlu0 %v195_v30  ;;  %199 = vadd.xlane.f32.xlu1 %v198_v31  ;;  %v231_v30 = vsel %vm80_vm0, %v1627_v22, 0.0  ;;  %v234_v31 = vsel %vm80_vm0, %v1632_v23, 0.0 }
  0x53   :  { %202 = vadd.xlane.f32.xlu0 %v201_v38  ;;  %205 = vadd.xlane.f32.xlu1 %v204_v39  ;;  %v1641_v38 = vld [vmem:[%s2554_s0 + $0x1a0] sm:$0xff]  ;;  %v1646_v39 = vld [vmem:[%s2554_s0 + $0x1a8] sm:$0xff] }
  0x54   :  { %2593 = vst [vmem:[#allocation4_spill] sm:$0xff] %v1641_v38  ;;  %2594 = vst [vmem:[#allocation5_spill] sm:$0xff] %v1646_v39 }
  0x57   :  { %208 = vadd.xlane.f32.xlu0 %v207_v46  ;;  %211 = vadd.xlane.f32.xlu1 %v210_v47  ;;  %v237_v46 = vsel %vm80_vm0, %v1641_v38, 0.0  ;;  %v240_v47 = vsel %vm80_vm0, %v1646_v39, 0.0 }
  0x5b   :  { %214 = vadd.xlane.f32.xlu0 %v213_v54  ;;  %217 = vadd.xlane.f32.xlu1 %v216_v55  ;;  %v1655_v54 = vld [vmem:[%s2554_s0 + $0x1b0] sm:$0xff]  ;;  %v1660_v55 = vld [vmem:[%s2554_s0 + $0x1b8] sm:$0xff] }
  0x5c   :  { %2595 = vst [vmem:[#allocation6_spill] sm:$0xff] %v1655_v54  ;;  %2596 = vst [vmem:[#allocation7_spill] sm:$0xff] %v1660_v55 }
  0x5f   :  { %220 = vadd.xlane.f32.xlu0 %v219_v62  ;;  %223 = vadd.xlane.f32.xlu1 %v222_v63  ;;  %v243_v62 = vsel %vm80_vm0, %v1655_v54, 0.0  ;;  %v246_v63 = vsel %vm80_vm0, %v1660_v55, 0.0 }
  0x63   :  { %226 = vadd.xlane.f32.xlu0 %v225_v14  ;;  %229 = vadd.xlane.f32.xlu1 %v228_v15  ;;  %v1669_v14 = vld [vmem:[%s2554_s0 + $0x1c0] sm:$0xff]  ;;  %v1674_v15 = vld [vmem:[%s2554_s0 + $0x1c8] sm:$0xff] }
  0x64   :  { %2597 = vst [vmem:[#allocation8_spill] sm:$0xff] %v1669_v14  ;;  %2598 = vst [vmem:[#allocation9_spill] sm:$0xff] %v1674_v15 }
  0x67   :  { %232 = vadd.xlane.f32.xlu0 %v231_v30  ;;  %235 = vadd.xlane.f32.xlu1 %v234_v31  ;;  %v249_v30 = vsel %vm80_vm0, %v1669_v14, 0.0  ;;  %v252_v31 = vsel %vm80_vm0, %v1674_v15, 0.0  ;;  %v1697_v15 = vld [vmem:[%s2554_s0 + $0x1e0] sm:$0xff]  ;;  %v1702_v14 = vld [vmem:[%s2554_s0 + $0x1e8] sm:$0xff] }
  0x68   :  { %2601 = vst [vmem:[#allocation12_spill] sm:$0xff] %v1697_v15  ;;  %2602 = vst [vmem:[#allocation13_spill] sm:$0xff] %v1702_v14 }
  0x6b   :  { %238 = vadd.xlane.f32.xlu0 %v237_v46  ;;  %241 = vadd.xlane.f32.xlu1 %v240_v47  ;;  %v1683_v46 = vld [vmem:[%s2554_s0 + $0x1d0] sm:$0xff]  ;;  %v1688_v47 = vld [vmem:[%s2554_s0 + $0x1d8] sm:$0xff] }
  0x6c   :  { %2599 = vst [vmem:[#allocation10_spill] sm:$0xff] %v1683_v46  ;;  %2600 = vst [vmem:[#allocation11_spill] sm:$0xff] %v1688_v47 }
  0x6f   :  { %244 = vadd.xlane.f32.xlu0 %v243_v62  ;;  %247 = vadd.xlane.f32.xlu1 %v246_v63  ;;  %v255_v62 = vsel %vm80_vm0, %v1683_v46, 0.0  ;;  %v258_v63 = vsel %vm80_vm0, %v1688_v47, 0.0  ;;  %v1711_v47 = vld [vmem:[%s2554_s0 + $0x1f0] sm:$0xff]  ;;  %v1716_v46 = vld [vmem:[%s2554_s0 + $0x1f8] sm:$0xff] }
  0x70   :  { %2603 = vst [vmem:[#allocation14_spill] sm:$0xff] %v1711_v47 }
  0x73   :  { %250 = vadd.xlane.f32.xlu0 %v249_v30  ;;  %253 = vadd.xlane.f32.xlu1 %v252_v31  ;;  %v261_v30 = vsel %vm80_vm0, %v1697_v15, 0.0  ;;  %v264_v31 = vsel %vm80_vm0, %v1702_v14, 0.0 }
  0x77   :  { %256 = vadd.xlane.f32.xlu0 %v255_v62  ;;  %259 = vadd.xlane.f32.xlu1 %v258_v63  ;;  %v267_v62 = vsel %vm80_vm0, %v1711_v47, 0.0  ;;  %v270_v63 = vsel %vm80_vm0, %v1716_v46, 0.0 }
  0x7b   :  { %262 = vadd.xlane.f32.xlu0 %v261_v30  ;;  %265 = vadd.xlane.f32.xlu1 %v264_v31 }
  0x7f   :  { %268 = vadd.xlane.f32.xlu0 %v267_v62  ;;  %271 = vadd.xlane.f32.xlu1 %v270_v63 }
  0x90   :  { %v83_v14 = vpop.xlane.xlu0 %82  ;;  %v89_v15 = vpop.xlane.xlu1 %88 }
  0x91   :  { %v274_v55 = vmul.f32 0.25, %v83_v14  ;;  %v276_v54 = vmul.f32 0.25, %v89_v15 }
  0x93   :  { %v1723_v39 = vsub.f32 %v1277_v0, %v274_v55  ;;  %v1726_v38 = vsub.f32 %v1282_v1, %v276_v54 }
  0x94   :  { %v86_v30 = vpop.xlane.xlu0 %85  ;;  %v92_v31 = vpop.xlane.xlu1 %91 }
  0x95   :  { %2604 = vst [vmem:[#allocation15_spill] sm:$0xff] %v1726_v38  ;;  %v275_v23 = vmul.f32 0.25, %v86_v30  ;;  %v277_v22 = vmul.f32 0.25, %v92_v31  ;;  %v402_v47 = vmul.f32 %v1723_v39, %v1723_v39  ;;  %v404_v62 = vmul.f32 %v1726_v38, %v1726_v38 }
  0x97   :  { %v1733_v63 = vsub.f32 %v1287_v2, %v275_v23  ;;  %v1736_v14 = vsub.f32 %v1296_v5, %v277_v22  ;;  %v466_v0 = vsel %vm80_vm0, %v402_v47, 0.0  ;;  %v472_v55 = vsel %vm80_vm0, %v404_v62, 0.0 }
  0x98   :  { %467 = vadd.xlane.f32.xlu0 %v466_v0  ;;  %v95_v1 = vpop.xlane.xlu0 %94  ;;  %v98_v54 = vpop.xlane.xlu1 %97 }
  0x99   :  { %v278_v15 = vmul.f32 0.25, %v95_v1  ;;  %v279_v30 = vmul.f32 0.25, %v98_v54  ;;  %v403_v31 = vmul.f32 %v1733_v63, %v1733_v63  ;;  %v405_v38 = vmul.f32 %v1736_v14, %v1736_v14 }
  0x9b   :  { %v1745_v2 = vsub.f32 %v1305_v8, %v278_v15  ;;  %v1748_v5 = vsub.f32 %v1310_v9, %v279_v30  ;;  %v469_v22 = vsel %vm80_vm0, %v403_v31, 0.0  ;;  %v475_v62 = vsel %vm80_vm0, %v405_v38, 0.0 }
  0x9c   :  { %473 = vadd.xlane.f32.xlu0 %v472_v55  ;;  %470 = vadd.xlane.f32.xlu1 %v469_v22  ;;  %v101_v23 = vpop.xlane.xlu0 %100  ;;  %v104_v47 = vpop.xlane.xlu1 %103 }
  0x9d   :  { %v280_v0 = vmul.f32 0.25, %v101_v23  ;;  %v281_v1 = vmul.f32 0.25, %v104_v47  ;;  %v406_v54 = vmul.f32 %v1745_v2, %v1745_v2  ;;  %v407_v8 = vmul.f32 %v1748_v5, %v1748_v5 }
  0x9f   :  { %v1757_v15 = vsub.f32 %v1319_v12, %v280_v0  ;;  %v1760_v9 = vsub.f32 %v1324_v13, %v281_v1  ;;  %v478_v55 = vsel %vm80_vm0, %v406_v54, 0.0  ;;  %v481_v31 = vsel %vm80_vm0, %v407_v8, 0.0 }
  0xa0   :  { %476 = vadd.xlane.f32.xlu1 %v475_v62  ;;  %479 = vadd.xlane.f32.xlu0 %v478_v55  ;;  %v107_v30 = vpop.xlane.xlu0 %106  ;;  %v110_v38 = vpop.xlane.xlu1 %109 }
  0xa1   :  { %v282_v22 = vmul.f32 0.25, %v107_v30  ;;  %v283_v23 = vmul.f32 0.25, %v110_v38  ;;  %v408_v47 = vmul.f32 %v1757_v15, %v1757_v15  ;;  %v409_v12 = vmul.f32 %v1760_v9, %v1760_v9 }
  0xa3   :  { %v1769_v0 = vsub.f32 %v1333_v16, %v282_v22  ;;  %v1772_v13 = vsub.f32 %v1338_v17, %v283_v23  ;;  %v484_v62 = vsel %vm80_vm0, %v408_v47, 0.0  ;;  %v487_v8 = vsel %vm80_vm0, %v409_v12, 0.0 }
  0xa4   :  { %482 = vadd.xlane.f32.xlu1 %v481_v31  ;;  %485 = vadd.xlane.f32.xlu0 %v484_v62  ;;  %v113_v1 = vpop.xlane.xlu0 %112  ;;  %v116_v54 = vpop.xlane.xlu1 %115 }
  0xa5   :  { %v284_v55 = vmul.f32 0.25, %v113_v1  ;;  %v285_v30 = vmul.f32 0.25, %v116_v54  ;;  %v410_v38 = vmul.f32 %v1769_v0, %v1769_v0  ;;  %v411_v16 = vmul.f32 %v1772_v13, %v1772_v13 }
  0xa7   :  { %v1781_v22 = vsub.f32 %v1347_v20, %v284_v55  ;;  %v1784_v17 = vsub.f32 %v1352_v21, %v285_v30  ;;  %v490_v31 = vsel %vm80_vm0, %v410_v38, 0.0  ;;  %v493_v12 = vsel %vm80_vm0, %v411_v16, 0.0 }
  0xa8   :  { %488 = vadd.xlane.f32.xlu1 %v487_v8  ;;  %491 = vadd.xlane.f32.xlu0 %v490_v31  ;;  %v119_v23 = vpop.xlane.xlu0 %118  ;;  %v122_v47 = vpop.xlane.xlu1 %121 }
  0xa9   :  { %v286_v62 = vmul.f32 0.25, %v119_v23  ;;  %v287_v1 = vmul.f32 0.25, %v122_v47  ;;  %v412_v54 = vmul.f32 %v1781_v22, %v1781_v22  ;;  %v413_v20 = vmul.f32 %v1784_v17, %v1784_v17 }
  0xab   :  { %v1793_v55 = vsub.f32 %v1361_v24, %v286_v62  ;;  %v1796_v21 = vsub.f32 %v1366_v25, %v287_v1  ;;  %v496_v8 = vsel %vm80_vm0, %v412_v54, 0.0  ;;  %v499_v16 = vsel %vm80_vm0, %v413_v20, 0.0 }
  0xac   :  { %494 = vadd.xlane.f32.xlu1 %v493_v12  ;;  %497 = vadd.xlane.f32.xlu0 %v496_v8  ;;  %v125_v30 = vpop.xlane.xlu0 %124  ;;  %v128_v38 = vpop.xlane.xlu1 %127 }
  0xad   :  { %v288_v31 = vmul.f32 0.25, %v125_v30  ;;  %v289_v23 = vmul.f32 0.25, %v128_v38  ;;  %v414_v47 = vmul.f32 %v1793_v55, %v1793_v55  ;;  %v415_v24 = vmul.f32 %v1796_v21, %v1796_v21 }
  0xaf   :  { %v1805_v62 = vsub.f32 %v1375_v28, %v288_v31  ;;  %v1808_v25 = vsub.f32 %v1380_v29, %v289_v23  ;;  %v502_v12 = vsel %vm80_vm0, %v414_v47, 0.0  ;;  %v505_v20 = vsel %vm80_vm0, %v415_v24, 0.0 }
  0xb0   :  { %500 = vadd.xlane.f32.xlu1 %v499_v16  ;;  %503 = vadd.xlane.f32.xlu0 %v502_v12  ;;  %v131_v1 = vpop.xlane.xlu0 %130  ;;  %v134_v54 = vpop.xlane.xlu1 %133 }
  0xb1   :  { %v290_v8 = vmul.f32 0.25, %v131_v1  ;;  %v291_v30 = vmul.f32 0.25, %v134_v54  ;;  %v416_v38 = vmul.f32 %v1805_v62, %v1805_v62  ;;  %v417_v28 = vmul.f32 %v1808_v25, %v1808_v25 }
  0xb3   :  { %v1817_v31 = vsub.f32 %v1389_v32, %v290_v8  ;;  %v1820_v29 = vsub.f32 %v1394_v33, %v291_v30  ;;  %v508_v16 = vsel %vm80_vm0, %v416_v38, 0.0  ;;  %v511_v24 = vsel %vm80_vm0, %v417_v28, 0.0 }
  0xb4   :  { %506 = vadd.xlane.f32.xlu1 %v505_v20  ;;  %509 = vadd.xlane.f32.xlu0 %v508_v16  ;;  %v137_v23 = vpop.xlane.xlu0 %136  ;;  %v140_v47 = vpop.xlane.xlu1 %139 }
  0xb5   :  { %v292_v12 = vmul.f32 0.25, %v137_v23  ;;  %v293_v1 = vmul.f32 0.25, %v140_v47  ;;  %v418_v54 = vmul.f32 %v1817_v31, %v1817_v31  ;;  %v419_v32 = vmul.f32 %v1820_v29, %v1820_v29 }
  0xb7   :  { %v1829_v8 = vsub.f32 %v1403_v36, %v292_v12  ;;  %v1832_v33 = vsub.f32 %v1408_v37, %v293_v1  ;;  %v514_v20 = vsel %vm80_vm0, %v418_v54, 0.0  ;;  %v517_v28 = vsel %vm80_vm0, %v419_v32, 0.0 }
  0xb8   :  { %512 = vadd.xlane.f32.xlu1 %v511_v24  ;;  %515 = vadd.xlane.f32.xlu0 %v514_v20  ;;  %v143_v30 = vpop.xlane.xlu0 %142  ;;  %v146_v38 = vpop.xlane.xlu1 %145 }
  0xb9   :  { %v294_v16 = vmul.f32 0.25, %v143_v30  ;;  %v295_v23 = vmul.f32 0.25, %v146_v38  ;;  %v420_v47 = vmul.f32 %v1829_v8, %v1829_v8  ;;  %v421_v36 = vmul.f32 %v1832_v33, %v1832_v33 }
  0xbb   :  { %v1841_v12 = vsub.f32 %v1417_v40, %v294_v16  ;;  %v1844_v37 = vsub.f32 %v1422_v41, %v295_v23  ;;  %v520_v24 = vsel %vm80_vm0, %v420_v47, 0.0  ;;  %v523_v32 = vsel %vm80_vm0, %v421_v36, 0.0 }
  0xbc   :  { %518 = vadd.xlane.f32.xlu1 %v517_v28  ;;  %521 = vadd.xlane.f32.xlu0 %v520_v24  ;;  %v149_v1 = vpop.xlane.xlu0 %148  ;;  %v152_v54 = vpop.xlane.xlu1 %151 }
  0xbd   :  { %v296_v20 = vmul.f32 0.25, %v149_v1  ;;  %v297_v30 = vmul.f32 0.25, %v152_v54  ;;  %v422_v38 = vmul.f32 %v1841_v12, %v1841_v12  ;;  %v423_v40 = vmul.f32 %v1844_v37, %v1844_v37 }
  0xbf   :  { %v1853_v16 = vsub.f32 %v1431_v44, %v296_v20  ;;  %v1856_v41 = vsub.f32 %v1436_v45, %v297_v30  ;;  %v526_v28 = vsel %vm80_vm0, %v422_v38, 0.0  ;;  %v529_v36 = vsel %vm80_vm0, %v423_v40, 0.0 }
  0xc0   :  { %524 = vadd.xlane.f32.xlu1 %v523_v32  ;;  %527 = vadd.xlane.f32.xlu0 %v526_v28  ;;  %v155_v23 = vpop.xlane.xlu0 %154  ;;  %v158_v47 = vpop.xlane.xlu1 %157 }
  0xc1   :  { %v298_v24 = vmul.f32 0.25, %v155_v23  ;;  %v299_v1 = vmul.f32 0.25, %v158_v47  ;;  %v424_v54 = vmul.f32 %v1853_v16, %v1853_v16  ;;  %v425_v44 = vmul.f32 %v1856_v41, %v1856_v41 }
  0xc3   :  { %v1865_v20 = vsub.f32 %v1445_v48, %v298_v24  ;;  %v1868_v45 = vsub.f32 %v1450_v49, %v299_v1  ;;  %v532_v32 = vsel %vm80_vm0, %v424_v54, 0.0  ;;  %v535_v40 = vsel %vm80_vm0, %v425_v44, 0.0 }
  0xc4   :  { %530 = vadd.xlane.f32.xlu1 %v529_v36  ;;  %533 = vadd.xlane.f32.xlu0 %v532_v32  ;;  %v161_v30 = vpop.xlane.xlu0 %160  ;;  %v164_v38 = vpop.xlane.xlu1 %163 }
  0xc5   :  { %v300_v28 = vmul.f32 0.25, %v161_v30  ;;  %v301_v23 = vmul.f32 0.25, %v164_v38  ;;  %v426_v47 = vmul.f32 %v1865_v20, %v1865_v20  ;;  %v427_v48 = vmul.f32 %v1868_v45, %v1868_v45 }
  0xc7   :  { %v1877_v24 = vsub.f32 %v1459_v52, %v300_v28  ;;  %v1880_v49 = vsub.f32 %v1464_v53, %v301_v23  ;;  %v538_v36 = vsel %vm80_vm0, %v426_v47, 0.0  ;;  %v541_v44 = vsel %vm80_vm0, %v427_v48, 0.0 }
  0xc8   :  { %536 = vadd.xlane.f32.xlu1 %v535_v40  ;;  %539 = vadd.xlane.f32.xlu0 %v538_v36  ;;  %v167_v1 = vpop.xlane.xlu0 %166  ;;  %v170_v54 = vpop.xlane.xlu1 %169 }
  0xc9   :  { %v302_v32 = vmul.f32 0.25, %v167_v1  ;;  %v303_v30 = vmul.f32 0.25, %v170_v54  ;;  %v428_v38 = vmul.f32 %v1877_v24, %v1877_v24  ;;  %v429_v52 = vmul.f32 %v1880_v49, %v1880_v49 }
  0xcb   :  { %v1889_v28 = vsub.f32 %v1473_v56, %v302_v32  ;;  %v1892_v53 = vsub.f32 %v1478_v57, %v303_v30  ;;  %v544_v40 = vsel %vm80_vm0, %v428_v38, 0.0  ;;  %v547_v48 = vsel %vm80_vm0, %v429_v52, 0.0 }
  0xcc   :  { %542 = vadd.xlane.f32.xlu1 %v541_v44  ;;  %545 = vadd.xlane.f32.xlu0 %v544_v40  ;;  %v173_v23 = vpop.xlane.xlu0 %172  ;;  %v176_v47 = vpop.xlane.xlu1 %175 }
  0xcd   :  { %v304_v36 = vmul.f32 0.25, %v173_v23  ;;  %v305_v1 = vmul.f32 0.25, %v176_v47  ;;  %v430_v54 = vmul.f32 %v1889_v28, %v1889_v28  ;;  %v431_v56 = vmul.f32 %v1892_v53, %v1892_v53 }
  0xcf   :  { %v1901_v32 = vsub.f32 %v1487_v60, %v304_v36  ;;  %v1904_v57 = vsub.f32 %v1492_v61, %v305_v1  ;;  %v550_v44 = vsel %vm80_vm0, %v430_v54, 0.0  ;;  %v553_v52 = vsel %vm80_vm0, %v431_v56, 0.0 }
  0xd0   :  { %548 = vadd.xlane.f32.xlu1 %v547_v48  ;;  %551 = vadd.xlane.f32.xlu0 %v550_v44  ;;  %v179_v30 = vpop.xlane.xlu0 %178  ;;  %v182_v38 = vpop.xlane.xlu1 %181 }
  0xd1   :  { %v306_v40 = vmul.f32 0.25, %v179_v30  ;;  %v307_v23 = vmul.f32 0.25, %v182_v38  ;;  %v432_v47 = vmul.f32 %v1901_v32, %v1901_v32  ;;  %v433_v60 = vmul.f32 %v1904_v57, %v1904_v57 }
  0xd3   :  { %v1913_v36 = vsub.f32 %v1501_v3, %v306_v40  ;;  %v1916_v61 = vsub.f32 %v1506_v4, %v307_v23  ;;  %v556_v48 = vsel %vm80_vm0, %v432_v47, 0.0  ;;  %v559_v56 = vsel %vm80_vm0, %v433_v60, 0.0 }
  0xd4   :  { %554 = vadd.xlane.f32.xlu1 %v553_v52  ;;  %557 = vadd.xlane.f32.xlu0 %v556_v48  ;;  %v185_v1 = vpop.xlane.xlu0 %184  ;;  %v188_v54 = vpop.xlane.xlu1 %187 }
  0xd5   :  { %v308_v44 = vmul.f32 0.25, %v185_v1  ;;  %v309_v30 = vmul.f32 0.25, %v188_v54  ;;  %v434_v38 = vmul.f32 %v1913_v36, %v1913_v36  ;;  %v435_v3 = vmul.f32 %v1916_v61, %v1916_v61 }
  0xd7   :  { %v1925_v40 = vsub.f32 %v1515_v10, %v308_v44  ;;  %v1928_v4 = vsub.f32 %v1520_v11, %v309_v30  ;;  %v562_v52 = vsel %vm80_vm0, %v434_v38, 0.0  ;;  %v565_v60 = vsel %vm80_vm0, %v435_v3, 0.0 }
  0xd8   :  { %560 = vadd.xlane.f32.xlu1 %v559_v56  ;;  %563 = vadd.xlane.f32.xlu0 %v562_v52  ;;  %v191_v23 = vpop.xlane.xlu0 %190  ;;  %v194_v47 = vpop.xlane.xlu1 %193 }
  0xd9   :  { %v310_v48 = vmul.f32 0.25, %v191_v23  ;;  %v311_v1 = vmul.f32 0.25, %v194_v47  ;;  %v436_v54 = vmul.f32 %v1925_v40, %v1925_v40  ;;  %v437_v10 = vmul.f32 %v1928_v4, %v1928_v4 }
  0xdb   :  { %v1937_v44 = vsub.f32 %v1529_v18, %v310_v48  ;;  %v1940_v11 = vsub.f32 %v1534_v19, %v311_v1  ;;  %v568_v56 = vsel %vm80_vm0, %v436_v54, 0.0  ;;  %v571_v3 = vsel %vm80_vm0, %v437_v10, 0.0 }
  0xdc   :  { %566 = vadd.xlane.f32.xlu1 %v565_v60  ;;  %569 = vadd.xlane.f32.xlu0 %v568_v56  ;;  %v197_v30 = vpop.xlane.xlu0 %196  ;;  %v200_v38 = vpop.xlane.xlu1 %199 }
  0xdd   :  { %v312_v52 = vmul.f32 0.25, %v197_v30  ;;  %v313_v23 = vmul.f32 0.25, %v200_v38  ;;  %v438_v47 = vmul.f32 %v1937_v44, %v1937_v44  ;;  %v439_v18 = vmul.f32 %v1940_v11, %v1940_v11 }
  0xdf   :  { %v1949_v48 = vsub.f32 %v1543_v26, %v312_v52  ;;  %v1952_v19 = vsub.f32 %v1548_v27, %v313_v23  ;;  %v574_v60 = vsel %vm80_vm0, %v438_v47, 0.0  ;;  %v577_v10 = vsel %vm80_vm0, %v439_v18, 0.0 }
  0xe0   :  { %572 = vadd.xlane.f32.xlu1 %v571_v3  ;;  %575 = vadd.xlane.f32.xlu0 %v574_v60  ;;  %v203_v1 = vpop.xlane.xlu0 %202  ;;  %v206_v54 = vpop.xlane.xlu1 %205 }
  0xe1   :  { %v314_v56 = vmul.f32 0.25, %v203_v1  ;;  %v315_v30 = vmul.f32 0.25, %v206_v54  ;;  %v440_v38 = vmul.f32 %v1949_v48, %v1949_v48  ;;  %v441_v26 = vmul.f32 %v1952_v19, %v1952_v19 }
  0xe3   :  { %v1961_v52 = vsub.f32 %v1557_v34, %v314_v56  ;;  %v1964_v27 = vsub.f32 %v1562_v35, %v315_v30  ;;  %v580_v3 = vsel %vm80_vm0, %v440_v38, 0.0  ;;  %v583_v18 = vsel %vm80_vm0, %v441_v26, 0.0 }
  0xe4   :  { %578 = vadd.xlane.f32.xlu1 %v577_v10  ;;  %581 = vadd.xlane.f32.xlu0 %v580_v3  ;;  %v209_v23 = vpop.xlane.xlu0 %208  ;;  %v212_v47 = vpop.xlane.xlu1 %211 }
  0xe5   :  { %v316_v60 = vmul.f32 0.25, %v209_v23  ;;  %v317_v1 = vmul.f32 0.25, %v212_v47  ;;  %v442_v54 = vmul.f32 %v1961_v52, %v1961_v52  ;;  %v443_v34 = vmul.f32 %v1964_v27, %v1964_v27 }
  0xe7   :  { %v1973_v56 = vsub.f32 %v1571_v42, %v316_v60  ;;  %v1976_v35 = vsub.f32 %v1576_v43, %v317_v1  ;;  %v586_v10 = vsel %vm80_vm0, %v442_v54, 0.0  ;;  %v589_v26 = vsel %vm80_vm0, %v443_v34, 0.0 }
  0xe8   :  { %584 = vadd.xlane.f32.xlu1 %v583_v18  ;;  %587 = vadd.xlane.f32.xlu0 %v586_v10  ;;  %v215_v30 = vpop.xlane.xlu0 %214  ;;  %v218_v38 = vpop.xlane.xlu1 %217 }
  0xe9   :  { %v318_v3 = vmul.f32 0.25, %v215_v30  ;;  %v319_v23 = vmul.f32 0.25, %v218_v38  ;;  %v444_v47 = vmul.f32 %v1973_v56, %v1973_v56  ;;  %v445_v42 = vmul.f32 %v1976_v35, %v1976_v35 }
  0xeb   :  { %v1985_v60 = vsub.f32 %v1585_v50, %v318_v3  ;;  %v1988_v43 = vsub.f32 %v1590_v51, %v319_v23  ;;  %v592_v18 = vsel %vm80_vm0, %v444_v47, 0.0  ;;  %v595_v34 = vsel %vm80_vm0, %v445_v42, 0.0 }
  0xec   :  { %590 = vadd.xlane.f32.xlu1 %v589_v26  ;;  %593 = vadd.xlane.f32.xlu0 %v592_v18  ;;  %v221_v1 = vpop.xlane.xlu0 %220  ;;  %v224_v54 = vpop.xlane.xlu1 %223 }
  0xed   :  { %2605 = vst [vmem:[#allocation16_spill] sm:$0xff] %v1988_v43  ;;  %v320_v10 = vmul.f32 0.25, %v221_v1  ;;  %v321_v30 = vmul.f32 0.25, %v224_v54  ;;  %v446_v38 = vmul.f32 %v1985_v60, %v1985_v60  ;;  %v447_v50 = vmul.f32 %v1988_v43, %v1988_v43 }
  0xef   :  { %v1997_v3 = vsub.f32 %v1599_v58, %v320_v10  ;;  %v2000_v51 = vsub.f32 %v1604_v59, %v321_v30  ;;  %v598_v26 = vsel %vm80_vm0, %v446_v38, 0.0  ;;  %v601_v42 = vsel %vm80_vm0, %v447_v50, 0.0 }
  0xf0   :  { %596 = vadd.xlane.f32.xlu1 %v595_v34  ;;  %599 = vadd.xlane.f32.xlu0 %v598_v26  ;;  %v227_v23 = vpop.xlane.xlu0 %226  ;;  %v230_v47 = vpop.xlane.xlu1 %229 }
  0xf1   :  { %2606 = vst [vmem:[#allocation17_spill] sm:$0xff] %v1997_v3  ;;  %2607 = vst [vmem:[#allocation18_spill] sm:$0xff] %v2000_v51  ;;  %v322_v18 = vmul.f32 0.25, %v227_v23  ;;  %v323_v1 = vmul.f32 0.25, %v230_v47  ;;  %v448_v54 = vmul.f32 %v1997_v3, %v1997_v3  ;;  %v449_v58 = vmul.f32 %v2000_v51, %v2000_v51 }
  0xf3   :  { %v2009_v10 = vsub.f32 %v1613_v6, %v322_v18  ;;  %v2012_v59 = vsub.f32 %v1618_v7, %v323_v1  ;;  %v604_v34 = vsel %vm80_vm0, %v448_v54, 0.0  ;;  %v607_v50 = vsel %vm80_vm0, %v449_v58, 0.0  ;;  %v2610_v18 = vld [vmem:[#allocation2_spill] sm:$0xff]  ;;  %v2612_v7 = vld [vmem:[#allocation3_spill] sm:$0xff] }
  0xf4   :  { %602 = vadd.xlane.f32.xlu1 %v601_v42  ;;  %605 = vadd.xlane.f32.xlu0 %v604_v34  ;;  %v233_v30 = vpop.xlane.xlu0 %232  ;;  %v236_v38 = vpop.xlane.xlu1 %235 }
  0xf5   :  { %2608 = vst [vmem:[#allocation19_spill] sm:$0xff] %v2009_v10  ;;  %2609 = vst [vmem:[#allocation20_spill] sm:$0xff] %v2012_v59  ;;  %v324_v26 = vmul.f32 0.25, %v233_v30  ;;  %v325_v23 = vmul.f32 0.25, %v236_v38  ;;  %v450_v47 = vmul.f32 %v2009_v10, %v2009_v10  ;;  %v451_v6 = vmul.f32 %v2012_v59, %v2012_v59 }
  0xf7   :  { %v2021_v51 = vsub.f32 %v2610_v18, %v324_v26  ;;  %v2024_v1 = vsub.f32 %v2612_v7, %v325_v23  ;;  %v610_v42 = vsel %vm80_vm0, %v450_v47, 0.0  ;;  %v613_v34 = vsel %vm80_vm0, %v451_v6, 0.0  ;;  %v2614_v18 = vld [vmem:[#allocation4_spill] sm:$0xff]  ;;  %v2616_v23 = vld [vmem:[#allocation5_spill] sm:$0xff] }
  0xf8   :  { %608 = vadd.xlane.f32.xlu1 %v607_v50  ;;  %611 = vadd.xlane.f32.xlu0 %v610_v42  ;;  %v239_v54 = vpop.xlane.xlu0 %238  ;;  %v242_v58 = vpop.xlane.xlu1 %241 }
  0xf9   :  { %2611 = vst [vmem:[#allocation2_spill] sm:$0xff] %v2021_v51  ;;  %2613 = vst [vmem:[#allocation3_spill] sm:$0xff] %v2024_v1  ;;  %v326_v30 = vmul.f32 0.25, %v239_v54  ;;  %v327_v38 = vmul.f32 0.25, %v242_v58  ;;  %v452_v10 = vmul.f32 %v2021_v51, %v2021_v51  ;;  %v453_v26 = vmul.f32 %v2024_v1, %v2024_v1 }
  0xfb   :  { %v2033_v59 = vsub.f32 %v2614_v18, %v326_v30  ;;  %v2036_v7 = vsub.f32 %v2616_v23, %v327_v38  ;;  %v616_v50 = vsel %vm80_vm0, %v452_v10, 0.0  ;;  %v619_v42 = vsel %vm80_vm0, %v453_v26, 0.0  ;;  %v2618_v18 = vld [vmem:[#allocation6_spill] sm:$0xff]  ;;  %v2620_v38 = vld [vmem:[#allocation7_spill] sm:$0xff] }
  0xfc   :  { %614 = vadd.xlane.f32.xlu1 %v613_v34  ;;  %617 = vadd.xlane.f32.xlu0 %v616_v50  ;;  %v245_v47 = vpop.xlane.xlu0 %244  ;;  %v248_v6 = vpop.xlane.xlu1 %247 }
  0xfd   :  { %2615 = vst [vmem:[#allocation4_spill] sm:$0xff] %v2033_v59  ;;  %2617 = vst [vmem:[#allocation5_spill] sm:$0xff] %v2036_v7  ;;  %v328_v54 = vmul.f32 0.25, %v245_v47  ;;  %v329_v58 = vmul.f32 0.25, %v248_v6  ;;  %v454_v51 = vmul.f32 %v2033_v59, %v2033_v59  ;;  %v455_v30 = vmul.f32 %v2036_v7, %v2036_v7 }
  0xff   :  { %v2045_v1 = vsub.f32 %v2618_v18, %v328_v54  ;;  %v2048_v23 = vsub.f32 %v2620_v38, %v329_v58  ;;  %v622_v10 = vsel %vm80_vm0, %v454_v51, 0.0  ;;  %v625_v50 = vsel %vm80_vm0, %v455_v30, 0.0  ;;  %v2622_v18 = vld [vmem:[#allocation8_spill] sm:$0xff]  ;;  %v2624_v58 = vld [vmem:[#allocation9_spill] sm:$0xff] }
 0x100   :  { %620 = vadd.xlane.f32.xlu1 %v619_v42  ;;  %623 = vadd.xlane.f32.xlu0 %v622_v10  ;;  %v251_v34 = vpop.xlane.xlu0 %250  ;;  %v254_v26 = vpop.xlane.xlu1 %253 }
 0x101   :  { %2619 = vst [vmem:[#allocation6_spill] sm:$0xff] %v2045_v1  ;;  %2621 = vst [vmem:[#allocation7_spill] sm:$0xff] %v2048_v23  ;;  %v330_v47 = vmul.f32 0.25, %v251_v34  ;;  %v331_v6 = vmul.f32 0.25, %v254_v26  ;;  %v456_v59 = vmul.f32 %v2045_v1, %v2045_v1  ;;  %v457_v54 = vmul.f32 %v2048_v23, %v2048_v23 }
 0x103   :  { %v2057_v7 = vsub.f32 %v2622_v18, %v330_v47  ;;  %v2060_v38 = vsub.f32 %v2624_v58, %v331_v6  ;;  %v628_v51 = vsel %vm80_vm0, %v456_v59, 0.0  ;;  %v631_v10 = vsel %vm80_vm0, %v457_v54, 0.0  ;;  %v2626_v18 = vld [vmem:[#allocation10_spill] sm:$0xff]  ;;  %v2628_v6 = vld [vmem:[#allocation11_spill] sm:$0xff] }
 0x104   :  { %626 = vadd.xlane.f32.xlu1 %v625_v50  ;;  %629 = vadd.xlane.f32.xlu0 %v628_v51  ;;  %v257_v42 = vpop.xlane.xlu0 %256  ;;  %v260_v30 = vpop.xlane.xlu1 %259 }
 0x105   :  { %2623 = vst [vmem:[#allocation8_spill] sm:$0xff] %v2057_v7  ;;  %2625 = vst [vmem:[#allocation9_spill] sm:$0xff] %v2060_v38  ;;  %v332_v34 = vmul.f32 0.25, %v257_v42  ;;  %v333_v26 = vmul.f32 0.25, %v260_v30  ;;  %v458_v1 = vmul.f32 %v2057_v7, %v2057_v7  ;;  %v459_v47 = vmul.f32 %v2060_v38, %v2060_v38 }
 0x107   :  { %v2069_v23 = vsub.f32 %v2626_v18, %v332_v34  ;;  %v2072_v58 = vsub.f32 %v2628_v6, %v333_v26  ;;  %v634_v59 = vsel %vm80_vm0, %v458_v1, 0.0  ;;  %v637_v51 = vsel %vm80_vm0, %v459_v47, 0.0  ;;  %v2630_v18 = vld [vmem:[#allocation12_spill] sm:$0xff]  ;;  %v2632_v26 = vld [vmem:[#allocation13_spill] sm:$0xff] }
 0x108   :  { %632 = vadd.xlane.f32.xlu1 %v631_v10  ;;  %635 = vadd.xlane.f32.xlu0 %v634_v59  ;;  %v263_v50 = vpop.xlane.xlu0 %262  ;;  %v266_v54 = vpop.xlane.xlu1 %265 }
 0x109   :  { %2627 = vst [vmem:[#allocation10_spill] sm:$0xff] %v2069_v23  ;;  %2629 = vst [vmem:[#allocation11_spill] sm:$0xff] %v2072_v58  ;;  %v334_v42 = vmul.f32 0.25, %v263_v50  ;;  %v335_v30 = vmul.f32 0.25, %v266_v54  ;;  %v460_v7 = vmul.f32 %v2069_v23, %v2069_v23  ;;  %v461_v34 = vmul.f32 %v2072_v58, %v2072_v58 }
 0x10b   :  { %v2081_v38 = vsub.f32 %v2630_v18, %v334_v42  ;;  %v2084_v6 = vsub.f32 %v2632_v26, %v335_v30  ;;  %v640_v1 = vsel %vm80_vm0, %v460_v7, 0.0  ;;  %v643_v59 = vsel %vm80_vm0, %v461_v34, 0.0  ;;  %v2634_v18 = vld [vmem:[#allocation14_spill] sm:$0xff] }
 0x10c   :  { %638 = vadd.xlane.f32.xlu1 %v637_v51  ;;  %641 = vadd.xlane.f32.xlu0 %v640_v1  ;;  %v269_v10 = vpop.xlane.xlu0 %268  ;;  %v272_v47 = vpop.xlane.xlu1 %271 }
 0x10d   :  { %2631 = vst [vmem:[#allocation12_spill] sm:$0xff] %v2081_v38  ;;  %2633 = vst [vmem:[#allocation13_spill] sm:$0xff] %v2084_v6  ;;  %v336_v50 = vmul.f32 0.25, %v269_v10  ;;  %v337_v54 = vmul.f32 0.25, %v272_v47  ;;  %v462_v23 = vmul.f32 %v2081_v38, %v2081_v38  ;;  %v463_v42 = vmul.f32 %v2084_v6, %v2084_v6 }
 0x10f   :  { %v2093_v58 = vsub.f32 %v2634_v18, %v336_v50  ;;  %v2096_v30 = vsub.f32 %v1716_v46, %v337_v54  ;;  %v646_v7 = vsel %vm80_vm0, %v462_v23, 0.0  ;;  %v649_v51 = vsel %vm80_vm0, %v463_v42, 0.0 }
 0x110   :  { %644 = vadd.xlane.f32.xlu1 %v643_v59  ;;  %647 = vadd.xlane.f32.xlu0 %v646_v7 }
 0x111   :  { %2635 = vst [vmem:[#allocation14_spill] sm:$0xff] %v2093_v58  ;;  %2636 = vst [vmem:[#allocation21_spill] sm:$0xff] %v2096_v30  ;;  %v464_v34 = vmul.f32 %v2093_v58, %v2093_v58  ;;  %v465_v26 = vmul.f32 %v2096_v30, %v2096_v30 }
 0x113   :  { %v652_v1 = vsel %vm80_vm0, %v464_v34, 0.0  ;;  %v655_v10 = vsel %vm80_vm0, %v465_v26, 0.0 }
 0x114   :  { %650 = vadd.xlane.f32.xlu1 %v649_v51  ;;  %653 = vadd.xlane.f32.xlu0 %v652_v1 }
 0x118   :  { %656 = vadd.xlane.f32.xlu1 %v655_v10 }
 0x125   :  { %v468_v46 = vpop.xlane.xlu0 %467 }
 0x126   :  { %v658_v47 = vmul.f32 0.25, %v468_v46 }
 0x128   :  { %v722_v23 = vadd.f32 1e-06, %v658_v47 }
 0x129   :  { %v471_v59 = vpop.xlane.xlu1 %470  ;;  %v474_v50 = vpop.xlane.xlu0 %473 }
 0x12a   :  { %1124 = vrsqrt.f32 %v722_v23  ;;  %v659_v54 = vmul.f32 0.25, %v471_v59  ;;  %v660_v42 = vmul.f32 0.25, %v474_v50  ;;  %v2109_v23 = vld [vmem:[%s2555_s1] ss:$0 sm:$0xff] }
 0x12c   :  { %v723_v18 = vadd.f32 1e-06, %v659_v54  ;;  %v724_v7 = vadd.f32 1e-06, %v660_v42 }
 0x12d   :  { %v477_v58 = vpop.xlane.xlu1 %476  ;;  %v480_v6 = vpop.xlane.xlu0 %479 }
 0x12e   :  { %1126 = vrsqrt.f32 %v723_v18  ;;  %v661_v30 = vmul.f32 0.25, %v477_v58  ;;  %v662_v34 = vmul.f32 0.25, %v480_v6 }
 0x12f   :  { %1128 = vrsqrt.f32 %v724_v7 }
 0x130   :  { %v725_v51 = vadd.f32 1e-06, %v661_v30  ;;  %v726_v1 = vadd.f32 1e-06, %v662_v34  ;;  %v2115_v30 = vld [vmem:[%s2556_s2] ss:$0 sm:$0xff] }
 0x131   :  { %v483_v26 = vpop.xlane.xlu1 %482  ;;  %v486_v10 = vpop.xlane.xlu0 %485 }
 0x132   :  { %1130 = vrsqrt.f32 %v725_v51  ;;  %v663_v46 = vmul.f32 0.25, %v483_v26  ;;  %v664_v47 = vmul.f32 0.25, %v486_v10 }
 0x133   :  { %1132 = vrsqrt.f32 %v726_v1 }
 0x134   :  { %v1125_v38 = vpop.eup %1124  ;;  %v727_v59 = vadd.f32 1e-06, %v663_v46  ;;  %v728_v50 = vadd.f32 1e-06, %v664_v47  ;;  %v2637_v47 = vld [vmem:[#allocation15_spill] sm:$0xff] }
 0x135   :  { %v850_v58 = vmul.f32 %v1125_v38, %v1723_v39  ;;  %v489_v6 = vpop.xlane.xlu1 %488  ;;  %v492_v54 = vpop.xlane.xlu0 %491 }
 0x136   :  { %1134 = vrsqrt.f32 %v727_v59  ;;  %v665_v42 = vmul.f32 0.25, %v489_v6  ;;  %v666_v18 = vmul.f32 0.25, %v492_v54 }
 0x137   :  { %v920_v7 = vmul.f32 %v2109_v23, %v850_v58  ;;  %1136 = vrsqrt.f32 %v728_v50 }
 0x138   :  { %v1127_v34 = vpop.eup %1126  ;;  %v729_v51 = vadd.f32 1e-06, %v665_v42  ;;  %v730_v1 = vadd.f32 1e-06, %v666_v18 }
 0x139   :  { %v1129_v26 = vpop.eup %1128  ;;  %v990_v10 = vadd.f32 %v2115_v30, %v920_v7  ;;  %v851_v39 = vmul.f32 %v1127_v34, %v1733_v63  ;;  %v495_v38 = vpop.xlane.xlu1 %494 }
 0x13a   :  { %v498_v46 = vpop.xlane.xlu0 %497  ;;  %v852_v3 = vmul.f32 %v1129_v26, %v2637_v47  ;;  %1138 = vrsqrt.f32 %v729_v51  ;;  %v667_v43 = vmul.f32 0.25, %v495_v38 }
 0x13b   :  { %v668_v59 = vmul.f32 0.25, %v498_v46  ;;  %1054 = vst.msk [vmem:[%s2557_s3] sm:$0xff] %vm80_vm0, %v990_v10  ;;  %v921_v50 = vmul.f32 %v2109_v23, %v851_v39  ;;  %1140 = vrsqrt.f32 %v730_v1 }
 0x13c   :  { %v1131_v58 = vpop.eup %1130  ;;  %v922_v6 = vmul.f32 %v2109_v23, %v852_v3  ;;  %v731_v54 = vadd.f32 1e-06, %v667_v43 }
 0x13d   :  { %v732_v63 = vadd.f32 1e-06, %v668_v59  ;;  %v1133_v42 = vpop.eup %1132  ;;  %v991_v18 = vadd.f32 %v2115_v30, %v921_v50  ;;  %v853_v7 = vmul.f32 %v1131_v58, %v1736_v14  ;;  %v501_v34 = vpop.xlane.xlu1 %500 }
 0x13e   :  { %v504_v51 = vpop.xlane.xlu0 %503  ;;  %v992_v26 = vadd.f32 %v2115_v30, %v922_v6  ;;  %v854_v38 = vmul.f32 %v1133_v42, %v1745_v2  ;;  %1142 = vrsqrt.f32 %v731_v54  ;;  %v669_v10 = vmul.f32 0.25, %v501_v34 }
 0x13f   :  { %1055 = vst.msk [vmem:[%s2557_s3 + $0x8] sm:$0xff] %vm80_vm0, %v991_v18  ;;  %v923_v43 = vmul.f32 %v2109_v23, %v853_v7  ;;  %1144 = vrsqrt.f32 %v732_v63  ;;  %v670_v3 = vmul.f32 0.25, %v504_v51 }
 0x140   :  { %v1135_v1 = vpop.eup %1134  ;;  %1056 = vst.msk [vmem:[%s2557_s3 + $0x10] sm:$0xff] %vm80_vm0, %v992_v26  ;;  %v924_v14 = vmul.f32 %v2109_v23, %v854_v38  ;;  %v733_v2 = vadd.f32 1e-06, %v669_v10 }
 0x141   :  { %v1137_v39 = vpop.eup %1136  ;;  %v993_v46 = vadd.f32 %v2115_v30, %v923_v43  ;;  %v855_v47 = vmul.f32 %v1135_v1, %v1748_v5  ;;  %v734_v59 = vadd.f32 1e-06, %v670_v3  ;;  %v507_v50 = vpop.xlane.xlu1 %506 }
 0x142   :  { %v510_v58 = vpop.xlane.xlu0 %509  ;;  %v994_v6 = vadd.f32 %v2115_v30, %v924_v14  ;;  %v856_v54 = vmul.f32 %v1137_v39, %v1757_v15  ;;  %1146 = vrsqrt.f32 %v733_v2  ;;  %v671_v63 = vmul.f32 0.25, %v507_v50 }
 0x143   :  { %1057 = vst.msk [vmem:[%s2557_s3 + $0x18] sm:$0xff] %vm80_vm0, %v993_v46  ;;  %v925_v42 = vmul.f32 %v2109_v23, %v855_v47  ;;  %1148 = vrsqrt.f32 %v734_v59  ;;  %v672_v18 = vmul.f32 0.25, %v510_v58 }
 0x144   :  { %v1139_v7 = vpop.eup %1138  ;;  %1058 = vst.msk [vmem:[%s2557_s3 + $0x20] sm:$0xff] %vm80_vm0, %v994_v6  ;;  %v926_v5 = vmul.f32 %v2109_v23, %v856_v54  ;;  %v735_v15 = vadd.f32 1e-06, %v671_v63 }
 0x145   :  { %v1141_v34 = vpop.eup %1140  ;;  %v995_v51 = vadd.f32 %v2115_v30, %v925_v42  ;;  %v857_v26 = vmul.f32 %v1139_v7, %v1760_v9  ;;  %v736_v38 = vadd.f32 1e-06, %v672_v18  ;;  %v513_v10 = vpop.xlane.xlu1 %512 }
 0x146   :  { %v516_v43 = vpop.xlane.xlu0 %515  ;;  %v996_v3 = vadd.f32 %v2115_v30, %v926_v5  ;;  %v858_v1 = vmul.f32 %v1141_v34, %v1769_v0  ;;  %1150 = vrsqrt.f32 %v735_v15  ;;  %v673_v14 = vmul.f32 0.25, %v513_v10 }
 0x147   :  { %1059 = vst.msk [vmem:[%s2557_s3 + $0x28] sm:$0xff] %vm80_vm0, %v995_v51  ;;  %v927_v2 = vmul.f32 %v2109_v23, %v857_v26  ;;  %1152 = vrsqrt.f32 %v736_v38  ;;  %v674_v39 = vmul.f32 0.25, %v516_v43 }
 0x148   :  { %v1143_v46 = vpop.eup %1142  ;;  %1060 = vst.msk [vmem:[%s2557_s3 + $0x30] sm:$0xff] %vm80_vm0, %v996_v3  ;;  %v928_v9 = vmul.f32 %v2109_v23, %v858_v1  ;;  %v737_v0 = vadd.f32 1e-06, %v673_v14 }
 0x149   :  { %v1145_v47 = vpop.eup %1144  ;;  %v997_v59 = vadd.f32 %v2115_v30, %v927_v2  ;;  %v859_v50 = vmul.f32 %v1143_v46, %v1772_v13  ;;  %v738_v58 = vadd.f32 1e-06, %v674_v39  ;;  %v519_v6 = vpop.xlane.xlu1 %518 }
 0x14a   :  { %v522_v54 = vpop.xlane.xlu0 %521  ;;  %v998_v63 = vadd.f32 %v2115_v30, %v928_v9  ;;  %v860_v42 = vmul.f32 %v1145_v47, %v1781_v22  ;;  %1154 = vrsqrt.f32 %v737_v0  ;;  %v675_v18 = vmul.f32 0.25, %v519_v6 }
 0x14b   :  { %1061 = vst.msk [vmem:[%s2557_s3 + $0x38] sm:$0xff] %vm80_vm0, %v997_v59  ;;  %v929_v7 = vmul.f32 %v2109_v23, %v859_v50  ;;  %1156 = vrsqrt.f32 %v738_v58  ;;  %v676_v5 = vmul.f32 0.25, %v522_v54 }
 0x14c   :  { %v1147_v15 = vpop.eup %1146  ;;  %1062 = vst.msk [vmem:[%s2557_s3 + $0x40] sm:$0xff] %vm80_vm0, %v998_v63  ;;  %v930_v13 = vmul.f32 %v2109_v23, %v860_v42  ;;  %v739_v22 = vadd.f32 1e-06, %v675_v18 }
 0x14d   :  { %v1149_v34 = vpop.eup %1148  ;;  %v999_v51 = vadd.f32 %v2115_v30, %v929_v7  ;;  %v861_v26 = vmul.f32 %v1147_v15, %v1784_v17  ;;  %v740_v38 = vadd.f32 1e-06, %v676_v5  ;;  %v525_v10 = vpop.xlane.xlu1 %524 }
 0x14e   :  { %v528_v43 = vpop.xlane.xlu0 %527  ;;  %v1000_v3 = vadd.f32 %v2115_v30, %v930_v13  ;;  %v862_v1 = vmul.f32 %v1149_v34, %v1793_v55  ;;  %1158 = vrsqrt.f32 %v739_v22  ;;  %v677_v14 = vmul.f32 0.25, %v525_v10 }
 0x14f   :  { %1063 = vst.msk [vmem:[%s2557_s3 + $0x48] sm:$0xff] %vm80_vm0, %v999_v51  ;;  %v931_v2 = vmul.f32 %v2109_v23, %v861_v26  ;;  %1160 = vrsqrt.f32 %v740_v38  ;;  %v678_v39 = vmul.f32 0.25, %v528_v43 }
 0x150   :  { %v1151_v46 = vpop.eup %1150  ;;  %1064 = vst.msk [vmem:[%s2557_s3 + $0x50] sm:$0xff] %vm80_vm0, %v1000_v3  ;;  %v932_v17 = vmul.f32 %v2109_v23, %v862_v1  ;;  %v741_v55 = vadd.f32 1e-06, %v677_v14 }
 0x151   :  { %v1153_v9 = vpop.eup %1152  ;;  %v1001_v0 = vadd.f32 %v2115_v30, %v931_v2  ;;  %v863_v47 = vmul.f32 %v1151_v46, %v1796_v21  ;;  %v742_v59 = vadd.f32 1e-06, %v678_v39  ;;  %v531_v50 = vpop.xlane.xlu1 %530 }
 0x152   :  { %v534_v58 = vpop.xlane.xlu0 %533  ;;  %v1002_v6 = vadd.f32 %v2115_v30, %v932_v17  ;;  %v864_v54 = vmul.f32 %v1153_v9, %v1805_v62  ;;  %1162 = vrsqrt.f32 %v741_v55  ;;  %v679_v63 = vmul.f32 0.25, %v531_v50 }
 0x153   :  { %1065 = vst.msk [vmem:[%s2557_s3 + $0x58] sm:$0xff] %vm80_vm0, %v1001_v0  ;;  %v933_v42 = vmul.f32 %v2109_v23, %v863_v47  ;;  %1164 = vrsqrt.f32 %v742_v59  ;;  %v680_v18 = vmul.f32 0.25, %v534_v58 }
 0x154   :  { %v1155_v7 = vpop.eup %1154  ;;  %1066 = vst.msk [vmem:[%s2557_s3 + $0x60] sm:$0xff] %vm80_vm0, %v1002_v6  ;;  %v934_v21 = vmul.f32 %v2109_v23, %v864_v54  ;;  %v743_v62 = vadd.f32 1e-06, %v679_v63 }
 0x155   :  { %v1157_v5 = vpop.eup %1156  ;;  %v1003_v15 = vadd.f32 %v2115_v30, %v933_v42  ;;  %v865_v13 = vmul.f32 %v1155_v7, %v1808_v25  ;;  %v744_v22 = vadd.f32 1e-06, %v680_v18  ;;  %v537_v34 = vpop.xlane.xlu1 %536 }
 0x156   :  { %v540_v51 = vpop.xlane.xlu0 %539  ;;  %v1004_v26 = vadd.f32 %v2115_v30, %v934_v21  ;;  %v866_v38 = vmul.f32 %v1157_v5, %v1817_v31  ;;  %1166 = vrsqrt.f32 %v743_v62  ;;  %v681_v10 = vmul.f32 0.25, %v537_v34 }
 0x157   :  { %1067 = vst.msk [vmem:[%s2557_s3 + $0x68] sm:$0xff] %vm80_vm0, %v1003_v15  ;;  %v935_v43 = vmul.f32 %v2109_v23, %v865_v13  ;;  %1168 = vrsqrt.f32 %v744_v22  ;;  %v682_v3 = vmul.f32 0.25, %v540_v51 }
 0x158   :  { %v1159_v1 = vpop.eup %1158  ;;  %1068 = vst.msk [vmem:[%s2557_s3 + $0x70] sm:$0xff] %vm80_vm0, %v1004_v26  ;;  %v936_v25 = vmul.f32 %v2109_v23, %v866_v38  ;;  %v745_v31 = vadd.f32 1e-06, %v681_v10 }
 0x159   :  { %v1161_v14 = vpop.eup %1160  ;;  %v1005_v2 = vadd.f32 %v2115_v30, %v935_v43  ;;  %v867_v39 = vmul.f32 %v1159_v1, %v1820_v29  ;;  %v746_v46 = vadd.f32 1e-06, %v682_v3  ;;  %v543_v17 = vpop.xlane.xlu1 %542 }
 0x15a   :  { %v546_v55 = vpop.xlane.xlu0 %545  ;;  %v1006_v9 = vadd.f32 %v2115_v30, %v936_v25  ;;  %v868_v0 = vmul.f32 %v1161_v14, %v1829_v8  ;;  %1170 = vrsqrt.f32 %v745_v31  ;;  %v683_v47 = vmul.f32 0.25, %v543_v17 }
 0x15b   :  { %1069 = vst.msk [vmem:[%s2557_s3 + $0x78] sm:$0xff] %vm80_vm0, %v1005_v2  ;;  %v937_v59 = vmul.f32 %v2109_v23, %v867_v39  ;;  %1172 = vrsqrt.f32 %v746_v46  ;;  %v684_v50 = vmul.f32 0.25, %v546_v55 }
 0x15c   :  { %v1163_v58 = vpop.eup %1162  ;;  %1070 = vst.msk [vmem:[%s2557_s3 + $0x80] sm:$0xff] %vm80_vm0, %v1006_v9  ;;  %v938_v29 = vmul.f32 %v2109_v23, %v868_v0  ;;  %v747_v8 = vadd.f32 1e-06, %v683_v47 }
 0x15d   :  { %v1165_v6 = vpop.eup %1164  ;;  %v1007_v54 = vadd.f32 %v2115_v30, %v937_v59  ;;  %v869_v63 = vmul.f32 %v1163_v58, %v1832_v33  ;;  %v748_v42 = vadd.f32 1e-06, %v684_v50  ;;  %v549_v18 = vpop.xlane.xlu1 %548 }
 0x15e   :  { %v552_v7 = vpop.xlane.xlu0 %551  ;;  %v1008_v21 = vadd.f32 %v2115_v30, %v938_v29  ;;  %v870_v62 = vmul.f32 %v1165_v6, %v1841_v12  ;;  %1174 = vrsqrt.f32 %v747_v8  ;;  %v685_v5 = vmul.f32 0.25, %v549_v18 }
 0x15f   :  { %1071 = vst.msk [vmem:[%s2557_s3 + $0x88] sm:$0xff] %vm80_vm0, %v1007_v54  ;;  %v939_v15 = vmul.f32 %v2109_v23, %v869_v63  ;;  %1176 = vrsqrt.f32 %v748_v42  ;;  %v686_v13 = vmul.f32 0.25, %v552_v7 }
 0x160   :  { %v1167_v22 = vpop.eup %1166  ;;  %1072 = vst.msk [vmem:[%s2557_s3 + $0x90] sm:$0xff] %vm80_vm0, %v1008_v21  ;;  %v940_v33 = vmul.f32 %v2109_v23, %v870_v62  ;;  %v749_v12 = vadd.f32 1e-06, %v685_v5 }
 0x161   :  { %v1169_v34 = vpop.eup %1168  ;;  %v1009_v51 = vadd.f32 %v2115_v30, %v939_v15  ;;  %v871_v26 = vmul.f32 %v1167_v22, %v1844_v37  ;;  %v750_v38 = vadd.f32 1e-06, %v686_v13  ;;  %v555_v10 = vpop.xlane.xlu1 %554 }
 0x162   :  { %v558_v43 = vpop.xlane.xlu0 %557  ;;  %v1010_v3 = vadd.f32 %v2115_v30, %v940_v33  ;;  %v872_v1 = vmul.f32 %v1169_v34, %v1853_v16  ;;  %1178 = vrsqrt.f32 %v749_v12  ;;  %v687_v25 = vmul.f32 0.25, %v555_v10 }
 0x163   :  { %1073 = vst.msk [vmem:[%s2557_s3 + $0x98] sm:$0xff] %vm80_vm0, %v1009_v51  ;;  %v941_v31 = vmul.f32 %v2109_v23, %v871_v26  ;;  %1180 = vrsqrt.f32 %v750_v38  ;;  %v688_v14 = vmul.f32 0.25, %v558_v43 }
 0x164   :  { %v1171_v2 = vpop.eup %1170  ;;  %1074 = vst.msk [vmem:[%s2557_s3 + $0xa0] sm:$0xff] %vm80_vm0, %v1010_v3  ;;  %v942_v37 = vmul.f32 %v2109_v23, %v872_v1  ;;  %v751_v16 = vadd.f32 1e-06, %v687_v25 }
 0x165   :  { %v1173_v39 = vpop.eup %1172  ;;  %v1011_v46 = vadd.f32 %v2115_v30, %v941_v31  ;;  %v873_v17 = vmul.f32 %v1171_v2, %v1856_v41  ;;  %v752_v55 = vadd.f32 1e-06, %v688_v14  ;;  %v561_v9 = vpop.xlane.xlu1 %560 }
 0x166   :  { %v564_v0 = vpop.xlane.xlu0 %563  ;;  %v1012_v47 = vadd.f32 %v2115_v30, %v942_v37  ;;  %v874_v59 = vmul.f32 %v1173_v39, %v1865_v20  ;;  %1182 = vrsqrt.f32 %v751_v16  ;;  %v689_v50 = vmul.f32 0.25, %v561_v9 }
 0x167   :  { %1075 = vst.msk [vmem:[%s2557_s3 + $0xa8] sm:$0xff] %vm80_vm0, %v1011_v46  ;;  %v943_v58 = vmul.f32 %v2109_v23, %v873_v17  ;;  %1184 = vrsqrt.f32 %v752_v55  ;;  %v690_v29 = vmul.f32 0.25, %v564_v0 }
 0x168   :  { %v1175_v8 = vpop.eup %1174  ;;  %1076 = vst.msk [vmem:[%s2557_s3 + $0xb0] sm:$0xff] %vm80_vm0, %v1012_v47  ;;  %v944_v41 = vmul.f32 %v2109_v23, %v874_v59  ;;  %v753_v20 = vadd.f32 1e-06, %v689_v50 }
 0x169   :  { %v1177_v6 = vpop.eup %1176  ;;  %v1013_v54 = vadd.f32 %v2115_v30, %v943_v58  ;;  %v875_v63 = vmul.f32 %v1175_v8, %v1868_v45  ;;  %v754_v42 = vadd.f32 1e-06, %v690_v29  ;;  %v567_v18 = vpop.xlane.xlu1 %566 }
 0x16a   :  { %v570_v7 = vpop.xlane.xlu0 %569  ;;  %v1014_v21 = vadd.f32 %v2115_v30, %v944_v41  ;;  %v876_v62 = vmul.f32 %v1177_v6, %v1877_v24  ;;  %1186 = vrsqrt.f32 %v753_v20  ;;  %v691_v5 = vmul.f32 0.25, %v567_v18 }
 0x16b   :  { %1077 = vst.msk [vmem:[%s2557_s3 + $0xb8] sm:$0xff] %vm80_vm0, %v1013_v54  ;;  %v945_v15 = vmul.f32 %v2109_v23, %v875_v63  ;;  %1188 = vrsqrt.f32 %v754_v42  ;;  %v692_v13 = vmul.f32 0.25, %v570_v7 }
 0x16c   :  { %v1179_v22 = vpop.eup %1178  ;;  %1078 = vst.msk [vmem:[%s2557_s3 + $0xc0] sm:$0xff] %vm80_vm0, %v1014_v21  ;;  %v946_v45 = vmul.f32 %v2109_v23, %v876_v62  ;;  %v755_v24 = vadd.f32 1e-06, %v691_v5 }
 0x16d   :  { %v1181_v33 = vpop.eup %1180  ;;  %v1015_v12 = vadd.f32 %v2115_v30, %v945_v15  ;;  %v877_v34 = vmul.f32 %v1179_v22, %v1880_v49  ;;  %v756_v51 = vadd.f32 1e-06, %v692_v13  ;;  %v573_v26 = vpop.xlane.xlu1 %572 }
 0x16e   :  { %v576_v38 = vpop.xlane.xlu0 %575  ;;  %v1016_v10 = vadd.f32 %v2115_v30, %v946_v45  ;;  %v878_v43 = vmul.f32 %v1181_v33, %v1889_v28  ;;  %1190 = vrsqrt.f32 %v755_v24  ;;  %v693_v3 = vmul.f32 0.25, %v573_v26 }
 0x16f   :  { %1079 = vst.msk [vmem:[%s2557_s3 + $0xc8] sm:$0xff] %vm80_vm0, %v1015_v12  ;;  %v947_v1 = vmul.f32 %v2109_v23, %v877_v34  ;;  %1192 = vrsqrt.f32 %v756_v51  ;;  %v694_v25 = vmul.f32 0.25, %v576_v38 }
 0x170   :  { %v1183_v31 = vpop.eup %1182  ;;  %1080 = vst.msk [vmem:[%s2557_s3 + $0xd0] sm:$0xff] %vm80_vm0, %v1016_v10  ;;  %v948_v49 = vmul.f32 %v2109_v23, %v878_v43  ;;  %v757_v28 = vadd.f32 1e-06, %v693_v3 }
 0x171   :  { %v1185_v14 = vpop.eup %1184  ;;  %v1017_v2 = vadd.f32 %v2115_v30, %v947_v1  ;;  %v879_v37 = vmul.f32 %v1183_v31, %v1892_v53  ;;  %v758_v16 = vadd.f32 1e-06, %v694_v25  ;;  %v579_v39 = vpop.xlane.xlu1 %578 }
 0x172   :  { %v582_v46 = vpop.xlane.xlu0 %581  ;;  %v1018_v17 = vadd.f32 %v2115_v30, %v948_v49  ;;  %v880_v55 = vmul.f32 %v1185_v14, %v1901_v32  ;;  %1194 = vrsqrt.f32 %v757_v28  ;;  %v695_v9 = vmul.f32 0.25, %v579_v39 }
 0x173   :  { %1081 = vst.msk [vmem:[%s2557_s3 + $0xd8] sm:$0xff] %vm80_vm0, %v1017_v2  ;;  %v949_v0 = vmul.f32 %v2109_v23, %v879_v37  ;;  %1196 = vrsqrt.f32 %v758_v16  ;;  %v696_v47 = vmul.f32 0.25, %v582_v46 }
 0x174   :  { %v1187_v59 = vpop.eup %1186  ;;  %1082 = vst.msk [vmem:[%s2557_s3 + $0xe0] sm:$0xff] %vm80_vm0, %v1018_v17  ;;  %v950_v53 = vmul.f32 %v2109_v23, %v880_v55  ;;  %v759_v32 = vadd.f32 1e-06, %v695_v9 }
 0x175   :  { %v1189_v50 = vpop.eup %1188  ;;  %v1019_v58 = vadd.f32 %v2115_v30, %v949_v0  ;;  %v881_v29 = vmul.f32 %v1187_v59, %v1904_v57  ;;  %v760_v8 = vadd.f32 1e-06, %v696_v47  ;;  %v585_v41 = vpop.xlane.xlu1 %584 }
 0x176   :  { %v588_v20 = vpop.xlane.xlu0 %587  ;;  %v1020_v6 = vadd.f32 %v2115_v30, %v950_v53  ;;  %v882_v54 = vmul.f32 %v1189_v50, %v1913_v36  ;;  %1198 = vrsqrt.f32 %v759_v32  ;;  %v697_v63 = vmul.f32 0.25, %v585_v41 }
 0x177   :  { %1083 = vst.msk [vmem:[%s2557_s3 + $0xe8] sm:$0xff] %vm80_vm0, %v1019_v58  ;;  %v951_v42 = vmul.f32 %v2109_v23, %v881_v29  ;;  %1200 = vrsqrt.f32 %v760_v8  ;;  %v698_v18 = vmul.f32 0.25, %v588_v20 }
 0x178   :  { %v1191_v7 = vpop.eup %1190  ;;  %1084 = vst.msk [vmem:[%s2557_s3 + $0xf0] sm:$0xff] %vm80_vm0, %v1020_v6  ;;  %v952_v57 = vmul.f32 %v2109_v23, %v882_v54  ;;  %v761_v36 = vadd.f32 1e-06, %v697_v63 }
 0x179   :  { %v1193_v21 = vpop.eup %1192  ;;  %v1021_v62 = vadd.f32 %v2115_v30, %v951_v42  ;;  %v883_v5 = vmul.f32 %v1191_v7, %v1916_v61  ;;  %v762_v15 = vadd.f32 1e-06, %v698_v18  ;;  %v591_v13 = vpop.xlane.xlu1 %590 }
 0x17a   :  { %v594_v22 = vpop.xlane.xlu0 %593  ;;  %v1022_v45 = vadd.f32 %v2115_v30, %v952_v57  ;;  %v884_v24 = vmul.f32 %v1193_v21, %v1925_v40  ;;  %1202 = vrsqrt.f32 %v761_v36  ;;  %v699_v33 = vmul.f32 0.25, %v591_v13 }
 0x17b   :  { %1085 = vst.msk [vmem:[%s2557_s3 + $0xf8] sm:$0xff] %vm80_vm0, %v1021_v62  ;;  %v953_v12 = vmul.f32 %v2109_v23, %v883_v5  ;;  %1204 = vrsqrt.f32 %v762_v15  ;;  %v700_v34 = vmul.f32 0.25, %v594_v22 }
 0x17c   :  { %v1195_v51 = vpop.eup %1194  ;;  %1086 = vst.msk [vmem:[%s2557_s3 + $0x100] sm:$0xff] %vm80_vm0, %v1022_v45  ;;  %v954_v61 = vmul.f32 %v2109_v23, %v884_v24  ;;  %v763_v40 = vadd.f32 1e-06, %v699_v33 }
 0x17d   :  { %v1197_v26 = vpop.eup %1196  ;;  %v1023_v38 = vadd.f32 %v2115_v30, %v953_v12  ;;  %v885_v10 = vmul.f32 %v1195_v51, %v1928_v4  ;;  %v764_v43 = vadd.f32 1e-06, %v700_v34  ;;  %v597_v3 = vpop.xlane.xlu1 %596 }
 0x17e   :  { %v600_v1 = vpop.xlane.xlu0 %599  ;;  %v1024_v25 = vadd.f32 %v2115_v30, %v954_v61  ;;  %v886_v31 = vmul.f32 %v1197_v26, %v1937_v44  ;;  %1206 = vrsqrt.f32 %v763_v40  ;;  %v701_v49 = vmul.f32 0.25, %v597_v3 }
 0x17f   :  { %1087 = vst.msk [vmem:[%s2557_s3 + $0x108] sm:$0xff] %vm80_vm0, %v1023_v38  ;;  %v955_v28 = vmul.f32 %v2109_v23, %v885_v10  ;;  %1208 = vrsqrt.f32 %v764_v43  ;;  %v702_v14 = vmul.f32 0.25, %v600_v1 }
 0x180   :  { %v1199_v2 = vpop.eup %1198  ;;  %1088 = vst.msk [vmem:[%s2557_s3 + $0x110] sm:$0xff] %vm80_vm0, %v1024_v25  ;;  %v956_v4 = vmul.f32 %v2109_v23, %v886_v31  ;;  %v765_v44 = vadd.f32 1e-06, %v701_v49 }
 0x181   :  { %v1201_v37 = vpop.eup %1200  ;;  %v1025_v16 = vadd.f32 %v2115_v30, %v955_v28  ;;  %v887_v39 = vmul.f32 %v1199_v2, %v1940_v11  ;;  %v766_v46 = vadd.f32 1e-06, %v702_v14  ;;  %v603_v17 = vpop.xlane.xlu1 %602  ;;  %v2638_v14 = vld [vmem:[#allocation16_spill] sm:$0xff] }
 0x182   :  { %v606_v55 = vpop.xlane.xlu0 %605  ;;  %v1026_v9 = vadd.f32 %v2115_v30, %v956_v4  ;;  %v888_v0 = vmul.f32 %v1201_v37, %v1949_v48  ;;  %1210 = vrsqrt.f32 %v765_v44  ;;  %v703_v47 = vmul.f32 0.25, %v603_v17 }
 0x183   :  { %1089 = vst.msk [vmem:[%s2557_s3 + $0x118] sm:$0xff] %vm80_vm0, %v1025_v16  ;;  %v957_v59 = vmul.f32 %v2109_v23, %v887_v39  ;;  %1212 = vrsqrt.f32 %v766_v46  ;;  %v704_v53 = vmul.f32 0.25, %v606_v55  ;;  %v2639_v39 = vld [vmem:[#allocation17_spill] sm:$0xff] }
 0x184   :  { %v1203_v32 = vpop.eup %1202  ;;  %1090 = vst.msk [vmem:[%s2557_s3 + $0x120] sm:$0xff] %vm80_vm0, %v1026_v9  ;;  %v958_v11 = vmul.f32 %v2109_v23, %v888_v0  ;;  %v767_v48 = vadd.f32 1e-06, %v703_v47 }
 0x185   :  { %v1205_v50 = vpop.eup %1204  ;;  %v1027_v58 = vadd.f32 %v2115_v30, %v957_v59  ;;  %v889_v29 = vmul.f32 %v1203_v32, %v1952_v19  ;;  %v768_v8 = vadd.f32 1e-06, %v704_v53  ;;  %v609_v41 = vpop.xlane.xlu1 %608 }
 0x186   :  { %v612_v20 = vpop.xlane.xlu0 %611  ;;  %v1028_v6 = vadd.f32 %v2115_v30, %v958_v11  ;;  %v890_v54 = vmul.f32 %v1205_v50, %v1961_v52  ;;  %1214 = vrsqrt.f32 %v767_v48  ;;  %v705_v63 = vmul.f32 0.25, %v609_v41  ;;  %v2640_v11 = vld [vmem:[#allocation18_spill] sm:$0xff]  ;;  %v2641_v41 = vld [vmem:[#allocation19_spill] sm:$0xff] }
 0x187   :  { %1091 = vst.msk [vmem:[%s2557_s3 + $0x128] sm:$0xff] %vm80_vm0, %v1027_v58  ;;  %v959_v42 = vmul.f32 %v2109_v23, %v889_v29  ;;  %1216 = vrsqrt.f32 %v768_v8  ;;  %v706_v18 = vmul.f32 0.25, %v612_v20 }
 0x188   :  { %v1207_v7 = vpop.eup %1206  ;;  %1092 = vst.msk [vmem:[%s2557_s3 + $0x130] sm:$0xff] %vm80_vm0, %v1028_v6  ;;  %v960_v19 = vmul.f32 %v2109_v23, %v890_v54  ;;  %v769_v52 = vadd.f32 1e-06, %v705_v63 }
 0x189   :  { %v1209_v57 = vpop.eup %1208  ;;  %v1029_v36 = vadd.f32 %v2115_v30, %v959_v42  ;;  %v891_v21 = vmul.f32 %v1207_v7, %v1964_v27  ;;  %v770_v62 = vadd.f32 1e-06, %v706_v18  ;;  %v615_v5 = vpop.xlane.xlu1 %614 }
 0x18a   :  { %v618_v15 = vpop.xlane.xlu0 %617  ;;  %v1030_v13 = vadd.f32 %v2115_v30, %v960_v19  ;;  %v892_v22 = vmul.f32 %v1209_v57, %v1973_v56  ;;  %1218 = vrsqrt.f32 %v769_v52  ;;  %v707_v45 = vmul.f32 0.25, %v615_v5  ;;  %v2642_v57 = vld [vmem:[#allocation20_spill] sm:$0xff] }
 0x18b   :  { %1093 = vst.msk [vmem:[%s2557_s3 + $0x138] sm:$0xff] %vm80_vm0, %v1029_v36  ;;  %v961_v24 = vmul.f32 %v2109_v23, %v891_v21  ;;  %1220 = vrsqrt.f32 %v770_v62  ;;  %v708_v33 = vmul.f32 0.25, %v618_v15 }
 0x18c   :  { %v1211_v12 = vpop.eup %1210  ;;  %1094 = vst.msk [vmem:[%s2557_s3 + $0x140] sm:$0xff] %vm80_vm0, %v1030_v13  ;;  %v962_v27 = vmul.f32 %v2109_v23, %v892_v22  ;;  %v771_v56 = vadd.f32 1e-06, %v707_v45  ;;  %v2643_v13 = vld [vmem:[#allocation2_spill] sm:$0xff] }
 0x18d   :  { %v1213_v34 = vpop.eup %1212  ;;  %v1031_v51 = vadd.f32 %v2115_v30, %v961_v24  ;;  %v893_v61 = vmul.f32 %v1211_v12, %v1976_v35  ;;  %v772_v40 = vadd.f32 1e-06, %v708_v33  ;;  %v621_v26 = vpop.xlane.xlu1 %620 }
 0x18e   :  { %v624_v38 = vpop.xlane.xlu0 %623  ;;  %v1032_v10 = vadd.f32 %v2115_v30, %v962_v27  ;;  %v894_v43 = vmul.f32 %v1213_v34, %v1985_v60  ;;  %1222 = vrsqrt.f32 %v771_v56  ;;  %v709_v3 = vmul.f32 0.25, %v621_v26 }
 0x18f   :  { %1095 = vst.msk [vmem:[%s2557_s3 + $0x148] sm:$0xff] %vm80_vm0, %v1031_v51  ;;  %v963_v1 = vmul.f32 %v2109_v23, %v893_v61  ;;  %1224 = vrsqrt.f32 %v772_v40  ;;  %v710_v25 = vmul.f32 0.25, %v624_v38  ;;  %v2644_v61 = vld [vmem:[#allocation3_spill] sm:$0xff] }
 0x190   :  { %v1215_v31 = vpop.eup %1214  ;;  %1096 = vst.msk [vmem:[%s2557_s3 + $0x150] sm:$0xff] %vm80_vm0, %v1032_v10  ;;  %v964_v35 = vmul.f32 %v2109_v23, %v894_v43  ;;  %v773_v60 = vadd.f32 1e-06, %v709_v3  ;;  %v2645_v3 = vld [vmem:[#allocation4_spill] sm:$0xff] }
 0x191   :  { %v1217_v49 = vpop.eup %1216  ;;  %v1033_v28 = vadd.f32 %v2115_v30, %v963_v1  ;;  %v895_v2 = vmul.f32 %v1215_v31, %v2638_v14  ;;  %v774_v4 = vadd.f32 1e-06, %v710_v25  ;;  %v627_v44 = vpop.xlane.xlu1 %626 }
 0x192   :  { %v630_v37 = vpop.xlane.xlu0 %629  ;;  %v1034_v16 = vadd.f32 %v2115_v30, %v964_v35  ;;  %v896_v46 = vmul.f32 %v1217_v49, %v2639_v39  ;;  %1226 = vrsqrt.f32 %v773_v60  ;;  %v711_v17 = vmul.f32 0.25, %v627_v44 }
 0x193   :  { %1097 = vst.msk [vmem:[%s2557_s3 + $0x158] sm:$0xff] %vm80_vm0, %v1033_v28  ;;  %v965_v55 = vmul.f32 %v2109_v23, %v895_v2  ;;  %1228 = vrsqrt.f32 %v774_v4  ;;  %v712_v9 = vmul.f32 0.25, %v630_v37  ;;  %v2646_v4 = vld [vmem:[#allocation5_spill] sm:$0xff] }
 0x194   :  { %v1219_v0 = vpop.eup %1218  ;;  %1098 = vst.msk [vmem:[%s2557_s3 + $0x160] sm:$0xff] %vm80_vm0, %v1034_v16  ;;  %v966_v47 = vmul.f32 %v2109_v23, %v896_v46  ;;  %v775_v59 = vadd.f32 1e-06, %v711_v17  ;;  %v2647_v17 = vld [vmem:[#allocation6_spill] sm:$0xff] }
 0x195   :  { %v1221_v53 = vpop.eup %1220  ;;  %v1035_v32 = vadd.f32 %v2115_v30, %v965_v55  ;;  %v897_v48 = vmul.f32 %v1219_v0, %v2640_v11  ;;  %v776_v50 = vadd.f32 1e-06, %v712_v9  ;;  %v633_v58 = vpop.xlane.xlu1 %632 }
 0x196   :  { %v636_v29 = vpop.xlane.xlu0 %635  ;;  %v1036_v8 = vadd.f32 %v2115_v30, %v966_v47  ;;  %v898_v20 = vmul.f32 %v1221_v53, %v2641_v41  ;;  %1230 = vrsqrt.f32 %v775_v59  ;;  %v713_v6 = vmul.f32 0.25, %v633_v58 }
 0x197   :  { %1099 = vst.msk [vmem:[%s2557_s3 + $0x168] sm:$0xff] %vm80_vm0, %v1035_v32  ;;  %v967_v54 = vmul.f32 %v2109_v23, %v897_v48  ;;  %1232 = vrsqrt.f32 %v776_v50  ;;  %v714_v63 = vmul.f32 0.25, %v636_v29  ;;  %v2648_v50 = vld [vmem:[#allocation7_spill] sm:$0xff] }
 0x198   :  { %v1223_v42 = vpop.eup %1222  ;;  %1100 = vst.msk [vmem:[%s2557_s3 + $0x170] sm:$0xff] %vm80_vm0, %v1036_v8  ;;  %v968_v18 = vmul.f32 %v2109_v23, %v898_v20  ;;  %v777_v7 = vadd.f32 1e-06, %v713_v6  ;;  %v2649_v20 = vld [vmem:[#allocation8_spill] sm:$0xff] }
 0x199   :  { %v1225_v19 = vpop.eup %1224  ;;  %v1037_v52 = vadd.f32 %v2115_v30, %v967_v54  ;;  %v899_v36 = vmul.f32 %v1223_v42, %v2642_v57  ;;  %v778_v21 = vadd.f32 1e-06, %v714_v63  ;;  %v639_v62 = vpop.xlane.xlu1 %638 }
 0x19a   :  { %v642_v5 = vpop.xlane.xlu0 %641  ;;  %v1038_v15 = vadd.f32 %v2115_v30, %v968_v18  ;;  %v900_v22 = vmul.f32 %v1225_v19, %v2643_v13  ;;  %1234 = vrsqrt.f32 %v777_v7  ;;  %v715_v45 = vmul.f32 0.25, %v639_v62  ;;  %v1252_v18 = vld [vmem:[%s2555_s1] ss:$0 sm:$0xff] }
 0x19b   :  { %1101 = vst.msk [vmem:[%s2557_s3 + $0x178] sm:$0xff] %vm80_vm0, %v1037_v52  ;;  %v969_v24 = vmul.f32 %v2109_v23, %v899_v36  ;;  %1236 = vrsqrt.f32 %v778_v21  ;;  %v716_v33 = vmul.f32 0.25, %v642_v5  ;;  %v2650_v36 = vld [vmem:[#allocation9_spill] sm:$0xff]  ;;  %v2651_v5 = vld [vmem:[#allocation10_spill] sm:$0xff] }
 0x19c   :  { %v1227_v12 = vpop.eup %1226  ;;  %1102 = vst.msk [vmem:[%s2557_s3 + $0x180] sm:$0xff] %vm80_vm0, %v1038_v15  ;;  %v970_v27 = vmul.f32 %v2109_v23, %v900_v22  ;;  %v779_v56 = vadd.f32 1e-06, %v715_v45 }
 0x19d   :  { %v1229_v34 = vpop.eup %1228  ;;  %v1039_v51 = vadd.f32 %v2115_v30, %v969_v24  ;;  %v901_v40 = vmul.f32 %v1227_v12, %v2644_v61  ;;  %v780_v26 = vadd.f32 1e-06, %v716_v33  ;;  %v645_v38 = vpop.xlane.xlu1 %644  ;;  %v2652_v33 = vld [vmem:[#allocation11_spill] sm:$0xff] }
 0x19e   :  { %v648_v10 = vpop.xlane.xlu0 %647  ;;  %v1040_v43 = vadd.f32 %v2115_v30, %v970_v27  ;;  %v902_v1 = vmul.f32 %v1229_v34, %v2645_v3  ;;  %1238 = vrsqrt.f32 %v779_v56  ;;  %v717_v25 = vmul.f32 0.25, %v645_v38  ;;  %v2653_v56 = vld [vmem:[#allocation12_spill] sm:$0xff] }
 0x19f   :  { %1103 = vst.msk [vmem:[%s2557_s3 + $0x188] sm:$0xff] %vm80_vm0, %v1039_v51  ;;  %v971_v31 = vmul.f32 %v2109_v23, %v901_v40  ;;  %1240 = vrsqrt.f32 %v780_v26  ;;  %v718_v35 = vmul.f32 0.25, %v648_v10  ;;  %v2654_v10 = vld [vmem:[#allocation13_spill] sm:$0xff] }
 0x1a0   :  { %v1231_v60 = vpop.eup %1230  ;;  %1104 = vst.msk [vmem:[%s2557_s3 + $0x190] sm:$0xff] %vm80_vm0, %v1040_v43  ;;  %v972_v49 = vmul.f32 %v2109_v23, %v902_v1  ;;  %v781_v28 = vadd.f32 1e-06, %v717_v25  ;;  %v2655_v1 = vld [vmem:[#allocation14_spill] sm:$0xff] }
 0x1a1   :  { %v1233_v14 = vpop.eup %1232  ;;  %v1041_v2 = vadd.f32 %v2115_v30, %v971_v31  ;;  %v903_v44 = vmul.f32 %v1231_v60, %v2646_v4  ;;  %v782_v37 = vadd.f32 1e-06, %v718_v35  ;;  %v651_v16 = vpop.xlane.xlu1 %650 }
 0x1a2   :  { %v654_v39 = vpop.xlane.xlu0 %653  ;;  %v1042_v46 = vadd.f32 %v2115_v30, %v972_v49  ;;  %v904_v55 = vmul.f32 %v1233_v14, %v2647_v17  ;;  %1242 = vrsqrt.f32 %v781_v28  ;;  %v719_v9 = vmul.f32 0.25, %v651_v16  ;;  %v2656_v28 = vld [vmem:[#allocation21_spill] sm:$0xff] }
 0x1a3   :  { %1105 = vst.msk [vmem:[%s2557_s3 + $0x198] sm:$0xff] %vm80_vm0, %v1041_v2  ;;  %v973_v0 = vmul.f32 %v2109_v23, %v903_v44  ;;  %1244 = vrsqrt.f32 %v782_v37  ;;  %v720_v47 = vmul.f32 0.25, %v654_v39 }
 0x1a4   :  { %v1235_v59 = vpop.eup %1234  ;;  %1106 = vst.msk [vmem:[%s2557_s3 + $0x1a0] sm:$0xff] %vm80_vm0, %v1042_v46  ;;  %v974_v53 = vmul.f32 %v2109_v23, %v904_v55  ;;  %v783_v32 = vadd.f32 1e-06, %v719_v9 }
 0x1a5   :  { %v1237_v11 = vpop.eup %1236  ;;  %v1043_v48 = vadd.f32 %v2115_v30, %v973_v0  ;;  %v905_v58 = vmul.f32 %v1235_v59, %v2648_v50  ;;  %v784_v29 = vadd.f32 1e-06, %v720_v47  ;;  %v657_v8 = vpop.xlane.xlu1 %656 }
 0x1a6   :  { %v1044_v41 = vadd.f32 %v2115_v30, %v974_v53  ;;  %v906_v6 = vmul.f32 %v1237_v11, %v2649_v20  ;;  %1246 = vrsqrt.f32 %v783_v32  ;;  %v721_v54 = vmul.f32 0.25, %v657_v8 }
 0x1a7   :  { %1107 = vst.msk [vmem:[%s2557_s3 + $0x1a8] sm:$0xff] %vm80_vm0, %v1043_v48  ;;  %v975_v63 = vmul.f32 %v2109_v23, %v905_v58  ;;  %1248 = vrsqrt.f32 %v784_v29  ;;  %v1253_v23 = vld [vmem:[%s2556_s2] ss:$0 sm:$0xff] }
 0x1a8   :  { %v1239_v42 = vpop.eup %1238  ;;  %1108 = vst.msk [vmem:[%s2557_s3 + $0x1b0] sm:$0xff] %vm80_vm0, %v1044_v41  ;;  %v976_v7 = vmul.f32 %v1252_v18, %v906_v6  ;;  %v785_v19 = vadd.f32 1e-06, %v721_v54 }
 0x1a9   :  { %v1241_v52 = vpop.eup %1240  ;;  %v1045_v57 = vadd.f32 %v2115_v30, %v975_v63  ;;  %v907_v21 = vmul.f32 %v1239_v42, %v2650_v36 }
 0x1aa   :  { %v1046_v62 = vadd.f32 %v1253_v23, %v976_v7  ;;  %v908_v15 = vmul.f32 %v1241_v52, %v2651_v5  ;;  %1250 = vrsqrt.f32 %v785_v19 }
 0x1ab   :  { %1109 = vst.msk [vmem:[%s2557_s3 + $0x1b8] sm:$0xff] %vm80_vm0, %v1045_v57  ;;  %v977_v13 = vmul.f32 %v1252_v18, %v907_v21 }
 0x1ac   :  { %v1243_v22 = vpop.eup %1242  ;;  %1110 = vst.msk [vmem:[%s2557_s3 + $0x1c0] sm:$0xff] %vm80_vm0, %v1046_v62  ;;  %v978_v30 = vmul.f32 %v1252_v18, %v908_v15 }
 0x1ad   :  { %v1245_v45 = vpop.eup %1244  ;;  %v1047_v24 = vadd.f32 %v1253_v23, %v977_v13  ;;  %v909_v12 = vmul.f32 %v1243_v22, %v2652_v33 }
 0x1ae   :  { %v1048_v27 = vadd.f32 %v1253_v23, %v978_v30  ;;  %v910_v34 = vmul.f32 %v1245_v45, %v2653_v56 }
 0x1af   :  { %1111 = vst.msk [vmem:[%s2557_s3 + $0x1c8] sm:$0xff] %vm80_vm0, %v1047_v24  ;;  %v979_v51 = vmul.f32 %v1252_v18, %v909_v12 }
 0x1b0   :  { %v1247_v61 = vpop.eup %1246  ;;  %1112 = vst.msk [vmem:[%s2557_s3 + $0x1d0] sm:$0xff] %vm80_vm0, %v1048_v27  ;;  %v980_v40 = vmul.f32 %v1252_v18, %v910_v34 }
 0x1b1   :  { %v1249_v26 = vpop.eup %1248  ;;  %v1049_v38 = vadd.f32 %v1253_v23, %v979_v51  ;;  %v911_v43 = vmul.f32 %v1247_v61, %v2654_v10 }
 0x1b2   :  { %v1050_v3 = vadd.f32 %v1253_v23, %v980_v40  ;;  %v912_v25 = vmul.f32 %v1249_v26, %v2655_v1 }
 0x1b3   :  { %1113 = vst.msk [vmem:[%s2557_s3 + $0x1d8] sm:$0xff] %vm80_vm0, %v1049_v38  ;;  %v981_v31 = vmul.f32 %v1252_v18, %v911_v43 }
 0x1b4   :  { %v1251_v35 = vpop.eup %1250  ;;  %1114 = vst.msk [vmem:[%s2557_s3 + $0x1e0] sm:$0xff] %vm80_vm0, %v1050_v3  ;;  %v982_v60 = vmul.f32 %v1252_v18, %v912_v25 }
 0x1b5   :  { %v1051_v49 = vadd.f32 %v1253_v23, %v981_v31  ;;  %v913_v14 = vmul.f32 %v1251_v35, %v2656_v28 }
 0x1b6   :  { %v1052_v2 = vadd.f32 %v1253_v23, %v982_v60 }
 0x1b7   :  { %1115 = vst.msk [vmem:[%s2557_s3 + $0x1e8] sm:$0xff] %vm80_vm0, %v1051_v49  ;;  %v983_v4 = vmul.f32 %v1252_v18, %v913_v14 }
 0x1b8   :  { %1116 = vst.msk [vmem:[%s2557_s3 + $0x1f0] sm:$0xff] %vm80_vm0, %v1052_v2 }
 0x1b9   :  { %v1053_v44 = vadd.f32 %v1253_v23, %v983_v4 }
 0x1bb   :  { %1117 = vst.msk [vmem:[%s2557_s3 + $0x1f8] sm:$0xff] %vm80_vm0, %v1053_v44 }

// kernel: ffmb_forward.4
= control target key start
LH: loop header
LB: loop body
LE: loop exit
PB: predicated region body
PF: predicated region fallthrough
CT: control target
= control target key end

     0   :  { %vm138_vm0 = vcmask 1043456   ;;  %vm83_vm1 = vcmask 64512   ;;  %s1219_s1 = inlined_call_operand.vmem [shape: bf16[8,8], index: 1, kind: input, shape index: {}]   ;;  %s1220_s0 = inlined_call_operand.vmem [shape: f32[288,8], index: 0, kind: input, shape index: {}]   ;;  %s1221_s3 = inlined_call_operand.vmem [shape: bf16[8,8], index: 3, kind: input, shape index: {}]   ;;  %s1222_s2 = inlined_call_operand.vmem [shape: f32[1,8], index: 2, kind: input, shape index: {}]   ;;  %s1223_s4 = inlined_call_operand.vmem [shape: f32[1,8], index: 4, kind: input, shape index: {}]   ;;  %s1224_s5 = inlined_call_operand.vmem [shape: f32[288,8], index: 5, kind: output, shape index: {}]  }
   0x1   :  { %v75_v0 = vld [vmem:[%s1219_s1] sm:$0xf]  ;;  %v22_v2 = vld [vmem:[%s1220_s0 + $0x8] sm:$0xff]  ;;  %v23_v5 = vld [vmem:[%s1220_s0 + $0x10] sm:$0xff] }
   0x2   :  { %v21_v1 = vld [vmem:[%s1220_s0] sm:$0xff]  ;;  %807 = vmatprep.subr.msk.bf16.mxu0 %vm138_vm0, %v75_v0  ;;  %v140_v3 = vsel %vm138_vm0, %v75_v0, 0  ;;  %v24_v6 = vld [vmem:[%s1220_s0 + $0x18] sm:$0xff]  ;;  %v26_v9 = vld [vmem:[%s1220_s0 + $0x28] sm:$0xff] }
   0x3   :  { %v57_v4 = vpack.c.bf16 %v22_v2, %v21_v1  ;;  %v25_v7 = vld [vmem:[%s1220_s0 + $0x20] sm:$0xff]  ;;  %732 = vmatpush3.bf16.msra.mxu0 %v140_v3  ;;  %v58_v8 = vpack.c.bf16 %v24_v6, %v23_v5  ;;  %v27_v11 = vld [vmem:[%s1220_s0 + $0x30] sm:$0xff]  ;;  %v28_v12 = vld [vmem:[%s1220_s0 + $0x38] sm:$0xff] }
   0x4   :  { %v59_v10 = vpack.c.bf16 %v26_v9, %v25_v7  ;;  %v29_v13 = vld [vmem:[%s1220_s0 + $0x40] sm:$0xff]  ;;  %v30_v14 = vld [vmem:[%s1220_s0 + $0x48] sm:$0xff]  ;;  %v60_v15 = vpack.c.bf16 %v28_v12, %v27_v11  ;;  %v31_v17 = vld [vmem:[%s1220_s0 + $0x50] sm:$0xff] }
   0x5   :  { %733 = vmatprep.mubr.msk.bf16.mxu0 %vm83_vm1, %v57_v4  ;;  %v61_v16 = vpack.c.bf16 %v30_v14, %v29_v13  ;;  %v32_v18 = vld [vmem:[%s1220_s0 + $0x58] sm:$0xff]  ;;  %v33_v19 = vld [vmem:[%s1220_s0 + $0x60] sm:$0xff]  ;;  %v34_v20 = vld [vmem:[%s1220_s0 + $0x68] sm:$0xff] }
   0x6   :  { %734 = vmatmul.mubr.msk.bf16.vlgmr.msra.gmra.mrb[0].mxu0 %vm83_vm1, %v58_v8  ;;  %v62_v21 = vpack.c.bf16 %v32_v18, %v31_v17  ;;  %v63_v22 = vpack.c.bf16 %v34_v20, %v33_v19  ;;  %v35_v23 = vld [vmem:[%s1220_s0 + $0x70] sm:$0xff]  ;;  %v36_v24 = vld [vmem:[%s1220_s0 + $0x78] sm:$0xff]  ;;  %v37_v25 = vld [vmem:[%s1220_s0 + $0x80] sm:$0xff] }
   0x7   :  { %737 = vmatprep.mubr.msk.bf16.mxu0 %vm83_vm1, %v59_v10  ;;  %v38_v26 = vld [vmem:[%s1220_s0 + $0x88] sm:$0xff]  ;;  %v64_v27 = vpack.c.bf16 %v36_v24, %v35_v23  ;;  %v39_v29 = vld [vmem:[%s1220_s0 + $0x90] sm:$0xff]  ;;  %v40_v30 = vld [vmem:[%s1220_s0 + $0x98] sm:$0xff] }
   0x8   :  { %v65_v28 = vpack.c.bf16 %v38_v26, %v37_v25  ;;  %v41_v31 = vld [vmem:[%s1220_s0 + $0xa0] sm:$0xff]  ;;  %v42_v32 = vld [vmem:[%s1220_s0 + $0xa8] sm:$0xff]  ;;  %v66_v33 = vpack.c.bf16 %v40_v30, %v39_v29  ;;  %v43_v35 = vld [vmem:[%s1220_s0 + $0xb0] sm:$0xff] }
   0x9   :  { %v67_v34 = vpack.c.bf16 %v42_v32, %v41_v31  ;;  %v44_v36 = vld [vmem:[%s1220_s0 + $0xb8] sm:$0xff]  ;;  %v45_v37 = vld [vmem:[%s1220_s0 + $0xc0] sm:$0xff]  ;;  %v46_v38 = vld [vmem:[%s1220_s0 + $0xc8] sm:$0xff] }
   0xa   :  { %v68_v39 = vpack.c.bf16 %v44_v36, %v43_v35  ;;  %v69_v40 = vpack.c.bf16 %v46_v38, %v45_v37  ;;  %v47_v41 = vld [vmem:[%s1220_s0 + $0xd0] sm:$0xff]  ;;  %v48_v42 = vld [vmem:[%s1220_s0 + $0xd8] sm:$0xff]  ;;  %v49_v43 = vld [vmem:[%s1220_s0 + $0xe0] sm:$0xff] }
   0xb   :  { %v50_v44 = vld [vmem:[%s1220_s0 + $0xe8] sm:$0xff]  ;;  %v70_v45 = vpack.c.bf16 %v48_v42, %v47_v41  ;;  %v51_v47 = vld [vmem:[%s1220_s0 + $0xf0] sm:$0xff]  ;;  %v52_v48 = vld [vmem:[%s1220_s0 + $0xf8] sm:$0xff] }
   0xc   :  { %v71_v46 = vpack.c.bf16 %v50_v44, %v49_v43  ;;  %v53_v49 = vld [vmem:[%s1220_s0 + $0x100] sm:$0xff]  ;;  %v54_v50 = vld [vmem:[%s1220_s0 + $0x108] sm:$0xff]  ;;  %v72_v51 = vpack.c.bf16 %v52_v48, %v51_v47  ;;  %v55_v53 = vld [vmem:[%s1220_s0 + $0x110] sm:$0xff] }
   0xd   :  { %v73_v52 = vpack.c.bf16 %v54_v50, %v53_v49  ;;  %v56_v54 = vld [vmem:[%s1220_s0 + $0x118] sm:$0xff]  ;;  %v373_v56 = vld [vmem:[%s1221_s3] sm:$0xf] }
   0xe   :  { %738 = vmatmul.mubr.msk.bf16.gmra.mrb[4].mxu0 %vm83_vm1, %v60_v15  ;;  %v74_v55 = vpack.c.bf16 %v56_v54, %v55_v53  ;;  %808 = vmatprep.subr.msk.bf16.mxu1 %vm138_vm0, %v373_v56  ;;  %v436_v57 = vsel %vm138_vm0, %v373_v56, 0  ;;  %v978_v58 = vld [vmem:[%s1222_s2] ss:$0 sm:$0xff] }
   0xf   :  { %741 = vmatprep.mubr.msk.bf16.mxu0 %vm83_vm1, %v61_v16  ;;  %770 = vmatpush3.bf16.msra.mxu1 %v436_v57 }
  0x16   :  { %742 = vmatmul.mubr.msk.bf16.gmra.mrb[8].mxu0 %vm83_vm1, %v62_v21 }
  0x17   :  { %745 = vmatprep.mubr.msk.bf16.mxu0 %vm83_vm1, %v63_v22 }
  0x1e   :  { %746 = vmatmul.mubr.msk.bf16.gmra.mrb[12].mxu0 %vm83_vm1, %v64_v27 }
  0x1f   :  { %749 = vmatprep.mubr.msk.bf16.mxu0 %vm83_vm1, %v65_v28 }
  0x26   :  { %750 = vmatmul.mubr.msk.bf16.gmra.mrb[16].mxu0 %vm83_vm1, %v66_v33 }
  0x27   :  { %753 = vmatprep.mubr.msk.bf16.mxu0 %vm83_vm1, %v67_v34 }
  0x2e   :  { %754 = vmatmul.mubr.msk.bf16.gmra.mrb[20].mxu0 %vm83_vm1, %v68_v39 }
  0x2f   :  { %757 = vmatprep.mubr.msk.bf16.mxu0 %vm83_vm1, %v69_v40 }
  0x36   :  { %758 = vmatmul.mubr.msk.bf16.gmra.mrb[24].mxu0 %vm83_vm1, %v70_v45 }
  0x37   :  { %761 = vmatprep.mubr.msk.bf16.mxu0 %vm83_vm1, %v71_v46 }
  0x3e   :  { %762 = vmatmul.mubr.msk.bf16.gmra.mrb[28].mxu0 %vm83_vm1, %v72_v51 }
  0x3f   :  { %765 = vmatprep.mubr.msk.bf16.mxu0 %vm83_vm1, %v73_v52 }
  0x46   :  { %766 = vmatmul.mubr.msk.bf16.gmra.mrb[32].mxu0 %vm83_vm1, %v74_v55 }
  0xd9   :  { %v735_v59 = vpop.f32.mrb[0].mxu0 }
  0xda   :  { %v185_v60 = vadd.f32 %v735_v59, %v978_v58  ;;  %v176_v61 = vpop.f32.mrb[1].mxu0 }
  0xdb   :  { %v177_v62 = vadd.f32 %v978_v58, %v176_v61  ;;  %v736_v63 = vpop.f32.mrb[2].mxu0 }
  0xdc   :  { %v188_v0 = vadd.f32 %v736_v63, %v978_v58  ;;  %v179_v1 = vpop.f32.mrb[3].mxu0  ;;  %v321_v3 = vmax.f32 %v185_v60, 0.0 }
  0xdd   :  { %v180_v2 = vadd.f32 %v978_v58, %v179_v1  ;;  %v319_v5 = vmax.f32 %v177_v62, 0.0 }
  0xde   :  { %v322_v4 = vmax.f32 %v188_v0, 0.0 }
  0xdf   :  { %v320_v6 = vmax.f32 %v180_v2, 0.0 }
  0xe0   :  { %v356_v7 = vpack.c.bf16 %v322_v4, %v321_v3 }
  0xe1   :  { %v739_v8 = vpop.f32.mrb[4].mxu0  ;;  %v355_v9 = vpack.c.bf16 %v320_v6, %v319_v5 }
  0xe2   :  { %v201_v10 = vadd.f32 %v739_v8, %v978_v58  ;;  %v192_v11 = vpop.f32.mrb[5].mxu0 }
  0xe3   :  { %v193_v12 = vadd.f32 %v978_v58, %v192_v11  ;;  %v740_v13 = vpop.f32.mrb[6].mxu0  ;;  %771 = vmatprep.mubr.msk.bf16.mxu1 %vm83_vm1, %v355_v9 }
  0xe4   :  { %v204_v14 = vadd.f32 %v740_v13, %v978_v58  ;;  %v195_v15 = vpop.f32.mrb[7].mxu0  ;;  %772 = vmatmul.mubr.msk.bf16.vlgmr.msra.gmra.mrb[0].mxu1 %vm83_vm1, %v356_v7  ;;  %v325_v17 = vmax.f32 %v201_v10, 0.0 }
  0xe5   :  { %v196_v16 = vadd.f32 %v978_v58, %v195_v15  ;;  %v323_v19 = vmax.f32 %v193_v12, 0.0 }
  0xe6   :  { %v326_v18 = vmax.f32 %v204_v14, 0.0 }
  0xe7   :  { %v324_v20 = vmax.f32 %v196_v16, 0.0 }
  0xe8   :  { %v358_v21 = vpack.c.bf16 %v326_v18, %v325_v17 }
  0xe9   :  { %v357_v22 = vpack.c.bf16 %v324_v20, %v323_v19  ;;  %v743_v23 = vpop.f32.mrb[8].mxu0 }
  0xea   :  { %v217_v24 = vadd.f32 %v743_v23, %v978_v58  ;;  %v208_v25 = vpop.f32.mrb[9].mxu0 }
  0xeb   :  { %v209_v26 = vadd.f32 %v978_v58, %v208_v25  ;;  %v744_v27 = vpop.f32.mrb[10].mxu0  ;;  %775 = vmatprep.mubr.msk.bf16.mxu1 %vm83_vm1, %v357_v22 }
  0xec   :  { %v220_v28 = vadd.f32 %v744_v27, %v978_v58  ;;  %v211_v29 = vpop.f32.mrb[11].mxu0  ;;  %776 = vmatmul.mubr.msk.bf16.gmra.mrb[4].mxu1 %vm83_vm1, %v358_v21  ;;  %v329_v31 = vmax.f32 %v217_v24, 0.0 }
  0xed   :  { %v212_v30 = vadd.f32 %v978_v58, %v211_v29  ;;  %v327_v33 = vmax.f32 %v209_v26, 0.0 }
  0xee   :  { %v330_v32 = vmax.f32 %v220_v28, 0.0 }
  0xef   :  { %v328_v34 = vmax.f32 %v212_v30, 0.0 }
  0xf0   :  { %v360_v35 = vpack.c.bf16 %v330_v32, %v329_v31 }
  0xf1   :  { %v359_v36 = vpack.c.bf16 %v328_v34, %v327_v33  ;;  %v747_v37 = vpop.f32.mrb[12].mxu0 }
  0xf2   :  { %v233_v38 = vadd.f32 %v747_v37, %v978_v58  ;;  %v224_v39 = vpop.f32.mrb[13].mxu0 }
  0xf3   :  { %v225_v40 = vadd.f32 %v978_v58, %v224_v39  ;;  %v748_v41 = vpop.f32.mrb[14].mxu0  ;;  %779 = vmatprep.mubr.msk.bf16.mxu1 %vm83_vm1, %v359_v36 }
  0xf4   :  { %v236_v42 = vadd.f32 %v748_v41, %v978_v58  ;;  %v227_v43 = vpop.f32.mrb[15].mxu0  ;;  %780 = vmatmul.mubr.msk.bf16.gmra.mrb[8].mxu1 %vm83_vm1, %v360_v35  ;;  %v333_v45 = vmax.f32 %v233_v38, 0.0 }
  0xf5   :  { %v228_v44 = vadd.f32 %v978_v58, %v227_v43  ;;  %v331_v47 = vmax.f32 %v225_v40, 0.0 }
  0xf6   :  { %v334_v46 = vmax.f32 %v236_v42, 0.0 }
  0xf7   :  { %v332_v48 = vmax.f32 %v228_v44, 0.0 }
  0xf8   :  { %v362_v49 = vpack.c.bf16 %v334_v46, %v333_v45 }
  0xf9   :  { %v361_v50 = vpack.c.bf16 %v332_v48, %v331_v47  ;;  %v751_v51 = vpop.f32.mrb[16].mxu0 }
  0xfa   :  { %v249_v52 = vadd.f32 %v751_v51, %v978_v58  ;;  %v240_v53 = vpop.f32.mrb[17].mxu0 }
  0xfb   :  { %v241_v54 = vadd.f32 %v978_v58, %v240_v53  ;;  %v752_v55 = vpop.f32.mrb[18].mxu0  ;;  %783 = vmatprep.mubr.msk.bf16.mxu1 %vm83_vm1, %v361_v50 }
  0xfc   :  { %v252_v56 = vadd.f32 %v752_v55, %v978_v58  ;;  %v243_v57 = vpop.f32.mrb[19].mxu0  ;;  %784 = vmatmul.mubr.msk.bf16.gmra.mrb[12].mxu1 %vm83_vm1, %v362_v49  ;;  %v337_v60 = vmax.f32 %v249_v52, 0.0 }
  0xfd   :  { %v244_v59 = vadd.f32 %v978_v58, %v243_v57  ;;  %v335_v62 = vmax.f32 %v241_v54, 0.0 }
  0xfe   :  { %v338_v61 = vmax.f32 %v252_v56, 0.0 }
  0xff   :  { %v336_v63 = vmax.f32 %v244_v59, 0.0  ;;  %v1037_v59 = vld [vmem:[%s1223_s4] ss:$0 sm:$0xff] }
 0x100   :  { %v364_v0 = vpack.c.bf16 %v338_v61, %v337_v60 }
 0x101   :  { %v363_v1 = vpack.c.bf16 %v336_v63, %v335_v62  ;;  %v755_v2 = vpop.f32.mrb[20].mxu0 }
 0x102   :  { %v265_v3 = vadd.f32 %v755_v2, %v978_v58  ;;  %v256_v4 = vpop.f32.mrb[21].mxu0 }
 0x103   :  { %v257_v5 = vadd.f32 %v978_v58, %v256_v4  ;;  %v756_v6 = vpop.f32.mrb[22].mxu0  ;;  %787 = vmatprep.mubr.msk.bf16.mxu1 %vm83_vm1, %v363_v1 }
 0x104   :  { %v268_v7 = vadd.f32 %v756_v6, %v978_v58  ;;  %v259_v8 = vpop.f32.mrb[23].mxu0  ;;  %788 = vmatmul.mubr.msk.bf16.gmra.mrb[16].mxu1 %vm83_vm1, %v364_v0  ;;  %v341_v10 = vmax.f32 %v265_v3, 0.0 }
 0x105   :  { %v260_v9 = vadd.f32 %v978_v58, %v259_v8  ;;  %v339_v12 = vmax.f32 %v257_v5, 0.0 }
 0x106   :  { %v342_v11 = vmax.f32 %v268_v7, 0.0 }
 0x107   :  { %v340_v13 = vmax.f32 %v260_v9, 0.0 }
 0x108   :  { %v366_v14 = vpack.c.bf16 %v342_v11, %v341_v10 }
 0x109   :  { %v365_v15 = vpack.c.bf16 %v340_v13, %v339_v12  ;;  %v759_v16 = vpop.f32.mrb[24].mxu0 }
 0x10a   :  { %v281_v17 = vadd.f32 %v759_v16, %v978_v58  ;;  %v272_v18 = vpop.f32.mrb[25].mxu0 }
 0x10b   :  { %v273_v19 = vadd.f32 %v978_v58, %v272_v18  ;;  %v760_v20 = vpop.f32.mrb[26].mxu0  ;;  %791 = vmatprep.mubr.msk.bf16.mxu1 %vm83_vm1, %v365_v15 }
 0x10c   :  { %v284_v21 = vadd.f32 %v760_v20, %v978_v58  ;;  %v275_v22 = vpop.f32.mrb[27].mxu0  ;;  %792 = vmatmul.mubr.msk.bf16.gmra.mrb[20].mxu1 %vm83_vm1, %v366_v14  ;;  %v345_v24 = vmax.f32 %v281_v17, 0.0 }
 0x10d   :  { %v276_v23 = vadd.f32 %v978_v58, %v275_v22  ;;  %v343_v26 = vmax.f32 %v273_v19, 0.0 }
 0x10e   :  { %v346_v25 = vmax.f32 %v284_v21, 0.0 }
 0x10f   :  { %v344_v27 = vmax.f32 %v276_v23, 0.0 }
 0x110   :  { %v368_v28 = vpack.c.bf16 %v346_v25, %v345_v24 }
 0x111   :  { %v367_v29 = vpack.c.bf16 %v344_v27, %v343_v26  ;;  %v763_v30 = vpop.f32.mrb[28].mxu0 }
 0x112   :  { %v297_v31 = vadd.f32 %v763_v30, %v978_v58  ;;  %v288_v32 = vpop.f32.mrb[29].mxu0 }
 0x113   :  { %v289_v33 = vadd.f32 %v978_v58, %v288_v32  ;;  %v764_v34 = vpop.f32.mrb[30].mxu0  ;;  %795 = vmatprep.mubr.msk.bf16.mxu1 %vm83_vm1, %v367_v29 }
 0x114   :  { %v300_v35 = vadd.f32 %v764_v34, %v978_v58  ;;  %v291_v36 = vpop.f32.mrb[31].mxu0  ;;  %796 = vmatmul.mubr.msk.bf16.gmra.mrb[24].mxu1 %vm83_vm1, %v368_v28  ;;  %v349_v38 = vmax.f32 %v297_v31, 0.0 }
 0x115   :  { %v292_v37 = vadd.f32 %v978_v58, %v291_v36  ;;  %v347_v40 = vmax.f32 %v289_v33, 0.0 }
 0x116   :  { %v350_v39 = vmax.f32 %v300_v35, 0.0 }
 0x117   :  { %v348_v41 = vmax.f32 %v292_v37, 0.0 }
 0x118   :  { %v370_v42 = vpack.c.bf16 %v350_v39, %v349_v38 }
 0x119   :  { %v369_v43 = vpack.c.bf16 %v348_v41, %v347_v40  ;;  %v767_v44 = vpop.f32.mrb[32].mxu0 }
 0x11a   :  { %v313_v45 = vadd.f32 %v767_v44, %v978_v58  ;;  %v304_v46 = vpop.f32.mrb[33].mxu0 }
 0x11b   :  { %v305_v47 = vadd.f32 %v978_v58, %v304_v46  ;;  %v768_v48 = vpop.f32.mrb[34].mxu0  ;;  %799 = vmatprep.mubr.msk.bf16.mxu1 %vm83_vm1, %v369_v43 }
 0x11c   :  { %v316_v49 = vadd.f32 %v768_v48, %v978_v58  ;;  %v307_v50 = vpop.f32.mrb[35].mxu0  ;;  %800 = vmatmul.mubr.msk.bf16.gmra.mrb[28].mxu1 %vm83_vm1, %v370_v42  ;;  %v353_v52 = vmax.f32 %v313_v45, 0.0 }
 0x11d   :  { %v308_v51 = vadd.f32 %v978_v58, %v307_v50  ;;  %v351_v54 = vmax.f32 %v305_v47, 0.0 }
 0x11e   :  { %v354_v53 = vmax.f32 %v316_v49, 0.0 }
 0x11f   :  { %v352_v55 = vmax.f32 %v308_v51, 0.0 }
 0x120   :  { %v372_v56 = vpack.c.bf16 %v354_v53, %v353_v52 }
 0x121   :  { %v371_v57 = vpack.c.bf16 %v352_v55, %v351_v54 }
 0x123   :  { %803 = vmatprep.mubr.msk.bf16.mxu1 %vm83_vm1, %v371_v57 }
 0x124   :  { %804 = vmatmul.mubr.msk.bf16.gmra.mrb[32].mxu1 %vm83_vm1, %v372_v56 }
 0x1b7   :  { %v773_v60 = vpop.f32.mrb[0].mxu1 }
 0x1b8   :  { %v481_v61 = vadd.f32 %v773_v60, %v1037_v59  ;;  %v472_v62 = vpop.f32.mrb[1].mxu1 }
 0x1b9   :  { %v473_v58 = vadd.f32 %v1037_v59, %v472_v62  ;;  %v774_v63 = vpop.f32.mrb[2].mxu1 }
 0x1ba   :  { %617 = vst.msk [vmem:[%s1224_s5 + $0x10] sm:$0xff] %vm83_vm1, %v481_v61  ;;  %v484_v0 = vadd.f32 %v774_v63, %v1037_v59  ;;  %v475_v1 = vpop.f32.mrb[3].mxu1 }
 0x1bb   :  { %615 = vst.msk [vmem:[%s1224_s5] sm:$0xff] %vm83_vm1, %v473_v58  ;;  %v476_v2 = vadd.f32 %v1037_v59, %v475_v1 }
 0x1bc   :  { %618 = vst.msk [vmem:[%s1224_s5 + $0x18] sm:$0xff] %vm83_vm1, %v484_v0 }
 0x1bd   :  { %616 = vst.msk [vmem:[%s1224_s5 + $0x8] sm:$0xff] %vm83_vm1, %v476_v2 }
 0x1bf   :  { %v777_v3 = vpop.f32.mrb[4].mxu1 }
 0x1c0   :  { %v497_v4 = vadd.f32 %v777_v3, %v1037_v59  ;;  %v488_v5 = vpop.f32.mrb[5].mxu1 }
 0x1c1   :  { %v489_v6 = vadd.f32 %v1037_v59, %v488_v5  ;;  %v778_v7 = vpop.f32.mrb[6].mxu1 }
 0x1c2   :  { %621 = vst.msk [vmem:[%s1224_s5 + $0x30] sm:$0xff] %vm83_vm1, %v497_v4  ;;  %v500_v8 = vadd.f32 %v778_v7, %v1037_v59  ;;  %v491_v9 = vpop.f32.mrb[7].mxu1 }
 0x1c3   :  { %619 = vst.msk [vmem:[%s1224_s5 + $0x20] sm:$0xff] %vm83_vm1, %v489_v6  ;;  %v492_v10 = vadd.f32 %v1037_v59, %v491_v9 }
 0x1c4   :  { %622 = vst.msk [vmem:[%s1224_s5 + $0x38] sm:$0xff] %vm83_vm1, %v500_v8 }
 0x1c5   :  { %620 = vst.msk [vmem:[%s1224_s5 + $0x28] sm:$0xff] %vm83_vm1, %v492_v10 }
 0x1c7   :  { %v781_v11 = vpop.f32.mrb[8].mxu1 }
 0x1c8   :  { %v513_v12 = vadd.f32 %v781_v11, %v1037_v59  ;;  %v504_v13 = vpop.f32.mrb[9].mxu1 }
 0x1c9   :  { %v505_v14 = vadd.f32 %v1037_v59, %v504_v13  ;;  %v782_v15 = vpop.f32.mrb[10].mxu1 }
 0x1ca   :  { %625 = vst.msk [vmem:[%s1224_s5 + $0x50] sm:$0xff] %vm83_vm1, %v513_v12  ;;  %v516_v16 = vadd.f32 %v782_v15, %v1037_v59  ;;  %v507_v17 = vpop.f32.mrb[11].mxu1 }
 0x1cb   :  { %623 = vst.msk [vmem:[%s1224_s5 + $0x40] sm:$0xff] %vm83_vm1, %v505_v14  ;;  %v508_v18 = vadd.f32 %v1037_v59, %v507_v17 }
 0x1cc   :  { %626 = vst.msk [vmem:[%s1224_s5 + $0x58] sm:$0xff] %vm83_vm1, %v516_v16 }
 0x1cd   :  { %624 = vst.msk [vmem:[%s1224_s5 + $0x48] sm:$0xff] %vm83_vm1, %v508_v18 }
 0x1cf   :  { %v785_v19 = vpop.f32.mrb[12].mxu1 }
 0x1d0   :  { %v529_v20 = vadd.f32 %v785_v19, %v1037_v59  ;;  %v520_v21 = vpop.f32.mrb[13].mxu1 }
 0x1d1   :  { %v521_v22 = vadd.f32 %v1037_v59, %v520_v21  ;;  %v786_v23 = vpop.f32.mrb[14].mxu1 }
 0x1d2   :  { %629 = vst.msk [vmem:[%s1224_s5 + $0x70] sm:$0xff] %vm83_vm1, %v529_v20  ;;  %v532_v24 = vadd.f32 %v786_v23, %v1037_v59  ;;  %v523_v25 = vpop.f32.mrb[15].mxu1 }
 0x1d3   :  { %627 = vst.msk [vmem:[%s1224_s5 + $0x60] sm:$0xff] %vm83_vm1, %v521_v22  ;;  %v524_v26 = vadd.f32 %v1037_v59, %v523_v25 }
 0x1d4   :  { %630 = vst.msk [vmem:[%s1224_s5 + $0x78] sm:$0xff] %vm83_vm1, %v532_v24 }
 0x1d5   :  { %628 = vst.msk [vmem:[%s1224_s5 + $0x68] sm:$0xff] %vm83_vm1, %v524_v26 }
 0x1d7   :  { %v789_v27 = vpop.f32.mrb[16].mxu1 }
 0x1d8   :  { %v545_v28 = vadd.f32 %v789_v27, %v1037_v59  ;;  %v536_v29 = vpop.f32.mrb[17].mxu1 }
 0x1d9   :  { %v537_v30 = vadd.f32 %v1037_v59, %v536_v29  ;;  %v790_v31 = vpop.f32.mrb[18].mxu1 }
 0x1da   :  { %633 = vst.msk [vmem:[%s1224_s5 + $0x90] sm:$0xff] %vm83_vm1, %v545_v28  ;;  %v548_v32 = vadd.f32 %v790_v31, %v1037_v59  ;;  %v539_v33 = vpop.f32.mrb[19].mxu1 }
 0x1db   :  { %631 = vst.msk [vmem:[%s1224_s5 + $0x80] sm:$0xff] %vm83_vm1, %v537_v30  ;;  %v540_v34 = vadd.f32 %v1037_v59, %v539_v33 }
 0x1dc   :  { %634 = vst.msk [vmem:[%s1224_s5 + $0x98] sm:$0xff] %vm83_vm1, %v548_v32 }
 0x1dd   :  { %632 = vst.msk [vmem:[%s1224_s5 + $0x88] sm:$0xff] %vm83_vm1, %v540_v34 }
 0x1df   :  { %v793_v35 = vpop.f32.mrb[20].mxu1 }
 0x1e0   :  { %v561_v36 = vadd.f32 %v793_v35, %v1037_v59  ;;  %v552_v37 = vpop.f32.mrb[21].mxu1 }
 0x1e1   :  { %v553_v38 = vadd.f32 %v1037_v59, %v552_v37  ;;  %v794_v39 = vpop.f32.mrb[22].mxu1 }
 0x1e2   :  { %637 = vst.msk [vmem:[%s1224_s5 + $0xb0] sm:$0xff] %vm83_vm1, %v561_v36  ;;  %v564_v40 = vadd.f32 %v794_v39, %v1037_v59  ;;  %v555_v41 = vpop.f32.mrb[23].mxu1 }
 0x1e3   :  { %635 = vst.msk [vmem:[%s1224_s5 + $0xa0] sm:$0xff] %vm83_vm1, %v553_v38  ;;  %v556_v42 = vadd.f32 %v1037_v59, %v555_v41 }
 0x1e4   :  { %638 = vst.msk [vmem:[%s1224_s5 + $0xb8] sm:$0xff] %vm83_vm1, %v564_v40 }
 0x1e5   :  { %636 = vst.msk [vmem:[%s1224_s5 + $0xa8] sm:$0xff] %vm83_vm1, %v556_v42 }
 0x1e7   :  { %v797_v43 = vpop.f32.mrb[24].mxu1 }
 0x1e8   :  { %v577_v44 = vadd.f32 %v797_v43, %v1037_v59  ;;  %v568_v45 = vpop.f32.mrb[25].mxu1 }
 0x1e9   :  { %v569_v46 = vadd.f32 %v1037_v59, %v568_v45  ;;  %v798_v47 = vpop.f32.mrb[26].mxu1 }
 0x1ea   :  { %641 = vst.msk [vmem:[%s1224_s5 + $0xd0] sm:$0xff] %vm83_vm1, %v577_v44  ;;  %v580_v48 = vadd.f32 %v798_v47, %v1037_v59  ;;  %v571_v49 = vpop.f32.mrb[27].mxu1 }
 0x1eb   :  { %639 = vst.msk [vmem:[%s1224_s5 + $0xc0] sm:$0xff] %vm83_vm1, %v569_v46  ;;  %v572_v50 = vadd.f32 %v1037_v59, %v571_v49 }
 0x1ec   :  { %642 = vst.msk [vmem:[%s1224_s5 + $0xd8] sm:$0xff] %vm83_vm1, %v580_v48 }
 0x1ed   :  { %640 = vst.msk [vmem:[%s1224_s5 + $0xc8] sm:$0xff] %vm83_vm1, %v572_v50 }
 0x1ef   :  { %v801_v51 = vpop.f32.mrb[28].mxu1 }
 0x1f0   :  { %v593_v52 = vadd.f32 %v801_v51, %v1037_v59  ;;  %v584_v53 = vpop.f32.mrb[29].mxu1 }
 0x1f1   :  { %v585_v54 = vadd.f32 %v1037_v59, %v584_v53  ;;  %v802_v55 = vpop.f32.mrb[30].mxu1 }
 0x1f2   :  { %645 = vst.msk [vmem:[%s1224_s5 + $0xf0] sm:$0xff] %vm83_vm1, %v593_v52  ;;  %v596_v56 = vadd.f32 %v802_v55, %v1037_v59  ;;  %v587_v57 = vpop.f32.mrb[31].mxu1 }
 0x1f3   :  { %643 = vst.msk [vmem:[%s1224_s5 + $0xe0] sm:$0xff] %vm83_vm1, %v585_v54  ;;  %v588_v60 = vadd.f32 %v1037_v59, %v587_v57 }
 0x1f4   :  { %646 = vst.msk [vmem:[%s1224_s5 + $0xf8] sm:$0xff] %vm83_vm1, %v596_v56 }
 0x1f5   :  { %644 = vst.msk [vmem:[%s1224_s5 + $0xe8] sm:$0xff] %vm83_vm1, %v588_v60 }
 0x1f7   :  { %v805_v61 = vpop.f32.mrb[32].mxu1 }
 0x1f8   :  { %v609_v62 = vadd.f32 %v805_v61, %v1037_v59  ;;  %v600_v58 = vpop.f32.mrb[33].mxu1 }
 0x1f9   :  { %v601_v63 = vadd.f32 %v1037_v59, %v600_v58  ;;  %v806_v0 = vpop.f32.mrb[34].mxu1 }
 0x1fa   :  { %649 = vst.msk [vmem:[%s1224_s5 + $0x110] sm:$0xff] %vm83_vm1, %v609_v62  ;;  %v612_v1 = vadd.f32 %v806_v0, %v1037_v59  ;;  %v603_v2 = vpop.f32.mrb[35].mxu1 }
 0x1fb   :  { %647 = vst.msk [vmem:[%s1224_s5 + $0x100] sm:$0xff] %vm83_vm1, %v601_v63  ;;  %v604_v3 = vadd.f32 %v1037_v59, %v603_v2 }
 0x1fc   :  { %650 = vst.msk [vmem:[%s1224_s5 + $0x118] sm:$0xff] %vm83_vm1, %v612_v1 }
 0x1fd   :  { %648 = vst.msk [vmem:[%s1224_s5 + $0x108] sm:$0xff] %vm83_vm1, %v604_v3 }

// kernel: reverse.1
= control target key start
LH: loop header
LB: loop body
LE: loop exit
PB: predicated region body
PF: predicated region fallthrough
CT: control target
= control target key end

     0   :  { %v71_v3 = vlaneseq  ;;  %v64_v9 = vld [vmem:[#allocation0 + $0x7] ss:$-1 sm:$0xff]  ;;  %v78_v12 = vld [vmem:[#allocation0 + $0x17] ss:$-1 sm:$0xff]  ;;  %s329_s0 = inlined_call_operand.vmem [shape: f32[2,4,16,7], index: 0, kind: input, shape index: {}]   ;;  %s330_s1 = inlined_call_operand.vmem [shape: f32[2,4,16,7], index: 1, kind: output, shape index: {}]  }
   0x1   :  { %v44_v0 = vld [vmem:[%s329_s0] sm:$0xff]  ;;  %v46_v1 = vld [vmem:[%s329_s0 + $0x8] sm:$0xff]  ;;  %v48_v2 = vld [vmem:[%s329_s0 + $0x10] sm:$0xff]  ;;  %v65_v10 = vrot.slane %v64_v9, 1  ;;  %v79_v14 = vrot.slane %v78_v12, 1 }
   0x2   :  { %45 = vst [vmem:[#allocation0 + $0x8] sm:$0xff] %v44_v0  ;;  %47 = vst [vmem:[#allocation0 + $0x18] sm:$0xff] %v46_v1  ;;  %v50_v4 = vld [vmem:[%s329_s0 + $0x18] sm:$0xff]  ;;  %v52_v5 = vld [vmem:[%s329_s0 + $0x20] sm:$0xff]  ;;  %v72_v11 = vshrl.u32 %v71_v3, 7 }
   0x3   :  { %49 = vst [vmem:[#allocation0 + $0x28] sm:$0xff] %v48_v2  ;;  %v54_v6 = vld [vmem:[%s329_s0 + $0x28] sm:$0xff]  ;;  %51 = vst [vmem:[#allocation0 + $0x38] sm:$0xff] %v50_v4  ;;  %v56_v7 = vld [vmem:[%s329_s0 + $0x30] sm:$0xff] }
   0x4   :  { %53 = vst [vmem:[#allocation0 + $0x48] sm:$0xff] %v52_v5  ;;  %55 = vst [vmem:[#allocation0 + $0x58] sm:$0xff] %v54_v6  ;;  %v58_v8 = vld [vmem:[%s329_s0 + $0x38] sm:$0xff]  ;;  %v92_v13 = vld [vmem:[#allocation0 + $0x27] ss:$-1 sm:$0xff]  ;;  %vm73_vm0 = vcmp.lt.s32.totalorder %v72_v11, 7 }
   0x5   :  { %57 = vst [vmem:[#allocation0 + $0x68] sm:$0xff] %v56_v7  ;;  %59 = vst [vmem:[#allocation0 + $0x78] sm:$0xff] %v58_v8  ;;  %v93_v15 = vrot.slane %v92_v13, 1  ;;  %v106_v16 = vld [vmem:[#allocation0 + $0x37] ss:$-1 sm:$0xff] }
   0x6   :  { %66 = vst [vmem:[#allocation1] sm:$0xff] %v65_v10  ;;  %v107_v17 = vrot.slane %v106_v16, 1  ;;  %v120_v18 = vld [vmem:[#allocation0 + $0x47] ss:$-1 sm:$0xff]  ;;  %v134_v19 = vld [vmem:[#allocation0 + $0x57] ss:$-1 sm:$0xff] }
   0x7   :  { %80 = vst [vmem:[#allocation1 + $0x8] sm:$0xff] %v79_v14  ;;  %94 = vst [vmem:[#allocation1 + $0x10] sm:$0xff] %v93_v15  ;;  %v121_v20 = vrot.slane %v120_v18, 1  ;;  %v135_v21 = vrot.slane %v134_v19, 1  ;;  %v148_v22 = vld [vmem:[#allocation0 + $0x67] ss:$-1 sm:$0xff] }
   0x8   :  { %v162_v23 = vld [vmem:[#allocation0 + $0x77] ss:$-1 sm:$0xff]  ;;  %108 = vst [vmem:[#allocation1 + $0x18] sm:$0xff] %v107_v17  ;;  %v149_v24 = vrot.slane %v148_v22, 1 }
   0x9   :  { %v163_v25 = vrot.slane %v162_v23, 1  ;;  %v69_v26 = vld [vmem:[#allocation0 + $0xf] ss:$-1 sm:$0xff]  ;;  %v83_v27 = vld [vmem:[#allocation0 + $0x1f] ss:$-1 sm:$0xff]  ;;  %122 = vst [vmem:[#allocation1 + $0x20] sm:$0xff] %v121_v20 }
   0xa   :  { %v97_v28 = vld [vmem:[#allocation0 + $0x2f] ss:$-1 sm:$0xff]  ;;  %136 = vst [vmem:[#allocation1 + $0x28] sm:$0xff] %v135_v21  ;;  %v70_v29 = vrot.slane %v69_v26, 1  ;;  %v84_v30 = vrot.slane %v83_v27, 1  ;;  %150 = vst [vmem:[#allocation1 + $0x30] sm:$0xff] %v149_v24 }
   0xb   :  { %v98_v31 = vrot.slane %v97_v28, 1  ;;  %v111_v32 = vld [vmem:[#allocation0 + $0x3f] ss:$-1 sm:$0xff]  ;;  %164 = vst [vmem:[#allocation1 + $0x38] sm:$0xff] %v163_v25  ;;  %v125_v34 = vld [vmem:[#allocation0 + $0x4f] ss:$-1 sm:$0xff] }
   0xc   :  { %v112_v33 = vrot.slane %v111_v32, 1  ;;  %v139_v35 = vld [vmem:[#allocation0 + $0x5f] ss:$-1 sm:$0xff]  ;;  %74 = vst.msk [vmem:[#allocation1] sm:$0xff] %vm73_vm0, %v70_v29  ;;  %88 = vst.msk [vmem:[#allocation1 + $0x8] sm:$0xff] %vm73_vm0, %v84_v30  ;;  %v126_v36 = vrot.slane %v125_v34, 1 }
   0xd   :  { %102 = vst.msk [vmem:[#allocation1 + $0x10] sm:$0xff] %vm73_vm0, %v98_v31  ;;  %v140_v37 = vrot.slane %v139_v35, 1  ;;  %v153_v38 = vld [vmem:[#allocation0 + $0x6f] ss:$-1 sm:$0xff]  ;;  %v167_v39 = vld [vmem:[#allocation0 + $0x7f] ss:$-1 sm:$0xff] }
   0xe   :  { %116 = vst.msk [vmem:[#allocation1 + $0x18] sm:$0xff] %vm73_vm0, %v112_v33  ;;  %v154_v40 = vrot.slane %v153_v38, 1  ;;  %v168_v41 = vrot.slane %v167_v39, 1  ;;  %130 = vst.msk [vmem:[#allocation1 + $0x20] sm:$0xff] %vm73_vm0, %v126_v36 }
   0xf   :  { %144 = vst.msk [vmem:[#allocation1 + $0x28] sm:$0xff] %vm73_vm0, %v140_v37 }
  0x10   :  { %158 = vst.msk [vmem:[#allocation1 + $0x30] sm:$0xff] %vm73_vm0, %v154_v40  ;;  %172 = vst.msk [vmem:[#allocation1 + $0x38] sm:$0xff] %vm73_vm0, %v168_v41 }
  0x13   :  { %v214_v42 = vld [vmem:[#allocation1] sm:$0xff]  ;;  %v216_v43 = vld [vmem:[#allocation1 + $0x8] sm:$0xff] }
  0x14   :  { %v218_v44 = vld [vmem:[#allocation1 + $0x10] sm:$0xff]  ;;  %215 = vst [vmem:[%s330_s1] sm:$0xff] %v214_v42  ;;  %217 = vst [vmem:[%s330_s1 + $0x8] sm:$0xff] %v216_v43 }
  0x15   :  { %219 = vst [vmem:[%s330_s1 + $0x10] sm:$0xff] %v218_v44  ;;  %v220_v45 = vld [vmem:[#allocation1 + $0x18] sm:$0xff]  ;;  %v222_v46 = vld [vmem:[#allocation1 + $0x20] sm:$0xff] }
  0x16   :  { %221 = vst [vmem:[%s330_s1 + $0x18] sm:$0xff] %v220_v45  ;;  %v224_v47 = vld [vmem:[#allocation1 + $0x28] sm:$0xff]  ;;  %223 = vst [vmem:[%s330_s1 + $0x20] sm:$0xff] %v222_v46 }
  0x17   :  { %225 = vst [vmem:[%s330_s1 + $0x28] sm:$0xff] %v224_v47  ;;  %v226_v48 = vld [vmem:[#allocation1 + $0x30] sm:$0xff]  ;;  %v228_v49 = vld [vmem:[#allocation1 + $0x38] sm:$0xff] }
  0x18   :  { %227 = vst [vmem:[%s330_s1 + $0x30] sm:$0xff] %v226_v48  ;;  %229 = vst [vmem:[%s330_s1 + $0x38] sm:$0xff] %v228_v49 }

// kernel: ffmb_forward.5
= control target key start
LH: loop header
LB: loop body
LE: loop exit
PB: predicated region body
PF: predicated region fallthrough
CT: control target
= control target key end

     0   :  { %s8261_s30 = smov 0   ;;  %s11388_s0 = inlined_call_operand.vmem [shape: f32[512,4], index: 0, kind: input, shape index: {}]   ;;  %s11389_s1 = inlined_call_operand.vmem [shape: f32[512,4], index: 1, kind: input, shape index: {}]   ;;  %s11390_s2 = inlined_call_operand.vmem [shape: bf16[256,2], index: 2, kind: input, shape index: {}]   ;;  %s11391_s3 = inlined_call_operand.vmem [shape: f32[1,4], index: 3, kind: input, shape index: {}]   ;;  %s11392_s4 = inlined_call_operand.vmem [shape: f32[1,4], index: 4, kind: input, shape index: {}]   ;;  %s11393_s5 = inlined_call_operand.vmem [shape: bf16[9,4,8], index: 5, kind: input, shape index: {}]   ;;  %s11394_s6 = inlined_call_operand.vmem [shape: f32[1,8], index: 6, kind: input, shape index: {}]   ;;  %s11395_s7 = inlined_call_operand.vmem [shape: bf16[8,4], index: 7, kind: input, shape index: {}]   ;;  %s11396_s8 = inlined_call_operand.vmem [shape: f32[1,4], index: 8, kind: input, shape index: {}]   ;;  %s11397_s9 = inlined_call_operand.vmem [shape: f32[512,4], index: 9, kind: output, shape index: {}]  }
   0x1 LB: > { %s6964_s10 = sadd.s32 4294967295, %s8205_s30   ;;  %p6968_p0 = scmp.ge.s32.totalorder %s8205_s30, 1  ;;  %s8205_s30 = sphi %s8261_s30, %s19_s30  }
   0x2   : > { %p299_p1 = scmp.lt.s32.totalorder %s8205_s30, 3 }
   0x4   : > { %p300_p2 = pnand %p6968_p0, %p299_p1 }
   0x6   : > { %303 = sbr.rel (%p300_p2) target bundleno = 1389 (0x56d), region = 56 }
   0xd   : > { %s6969_s11 = sshll.u32 %s6964_s10, 5  ;;  %vm457_vm0 = vcmask 31744   ;;  %vm1863_vm1 = vcmask 1041408   ;;  %vm1051_vm2 = vcmask 31748   ;;  %vm1002_vm3 = vcmask 1043456  }
   0xe   : > { %p341_p3 = scmp.lt.s32.totalorder %s6969_s11, 63  ;;  %vm2028_vm4 = vsmask.f32 4352  ;;  %vm1583_vm5 = vsmask.f32 3328  ;;  %vm1068_vm6 = vcmask 27648  }
  0x10   : > { %s11687_s11 = smov (!%p341_p3, %s6969_s11), 63 }
  0x11   : > { %s8269_s12 = sshll.u32 %s11687_s11, 3 }
  0x12   : > { %s8275_s15 = scalar_lea.vmem %s11388_s0, %s8269_s12  ;;  %s8281_s18 = scalar_lea.vmem %s11389_s1, %s8269_s12 }
  0x13   : > { %v359_v0 = vld [vmem:[%s8275_s15] sm:$0xff]  ;;  %v361_v2 = vld [vmem:[%s8275_s15 + $0x10] sm:$0xff]  ;;  %v360_v5 = vld [vmem:[%s8275_s15 + $0x8] sm:$0xff]  ;;  %s11256_s21 = scalar_lea.vmem %s11397_s9, %s8269_s12 }
  0x14   : > { %v391_v1 = vld [vmem:[%s8281_s18] sm:$0xff]  ;;  %v393_v4 = vld [vmem:[%s8281_s18 + $0x10] sm:$0xff]  ;;  %v392_v6 = vld [vmem:[%s8281_s18 + $0x8] sm:$0xff] }
  0x15   : > { %v8286_v3 = vmul.f32 %v391_v1, %v359_v0  ;;  %v8291_v7 = vmul.f32 %v393_v4, %v361_v2  ;;  %v8293_v8 = vmul.f32 %v392_v6, %v360_v5  ;;  %v362_v9 = vld [vmem:[%s8275_s15 + $0x18] sm:$0xff]  ;;  %v363_v11 = vld [vmem:[%s8275_s15 + $0x20] sm:$0xff]  ;;  %v364_v15 = vld [vmem:[%s8275_s15 + $0x28] sm:$0xff] }
  0x16   : > { %v394_v10 = vld [vmem:[%s8281_s18 + $0x18] sm:$0xff]  ;;  %v395_v14 = vld [vmem:[%s8281_s18 + $0x20] sm:$0xff]  ;;  %v396_v16 = vld [vmem:[%s8281_s18 + $0x28] sm:$0xff] }
  0x17   : > { %11468 = vst [vmem:[#allocation3_spill] sm:$0xff] %v8286_v3  ;;  %11469 = vst [vmem:[#allocation4_spill] sm:$0xff] %v8291_v7  ;;  %v458_v12 = vsel %vm457_vm0, %v8286_v3, 0.0  ;;  %v8300_v13 = vmul.f32 %v394_v10, %v362_v9  ;;  %v464_v17 = vsel %vm457_vm0, %v8291_v7, 0.0  ;;  %v461_v18 = vsel %vm457_vm0, %v8293_v8, 0.0  ;;  %v365_v22 = vld [vmem:[%s8275_s15 + $0x30] sm:$0xff] }
  0x18   : > { %11470 = vst [vmem:[#allocation5_spill] sm:$0xff] %v8293_v8  ;;  %459 = vadd.xlane.f32.xlu0 %v458_v12  ;;  %465 = vadd.xlane.f32.xlu1 %v464_v17  ;;  %v8309_v19 = vmul.f32 %v395_v14, %v363_v11  ;;  %v8313_v21 = vmul.f32 %v396_v16, %v364_v15  ;;  %v397_v23 = vld [vmem:[%s8281_s18 + $0x30] sm:$0xff]  ;;  %v366_v24 = vld [vmem:[%s8275_s15 + $0x38] sm:$0xff]  ;;  %v367_v30 = vld [vmem:[%s8275_s15 + $0x40] sm:$0xff] }
  0x19   : > { %11471 = vst [vmem:[#allocation6_spill] sm:$0xff] %v8300_v13  ;;  %v467_v20 = vsel %vm457_vm0, %v8300_v13, 0.0  ;;  %v398_v25 = vld [vmem:[%s8281_s18 + $0x38] sm:$0xff]  ;;  %v8321_v27 = vmul.f32 %v397_v23, %v365_v22  ;;  %v399_v31 = vld [vmem:[%s8281_s18 + $0x40] sm:$0xff]  ;;  %v368_v32 = vld [vmem:[%s8275_s15 + $0x48] sm:$0xff] }
  0x1a   : > { %11472 = vst [vmem:[#allocation7_spill] sm:$0xff] %v8309_v19  ;;  %11473 = vst [vmem:[#allocation8_spill] sm:$0xff] %v8313_v21  ;;  %v470_v26 = vsel %vm457_vm0, %v8309_v19, 0.0  ;;  %v473_v28 = vsel %vm457_vm0, %v8313_v21, 0.0  ;;  %v8325_v29 = vmul.f32 %v398_v25, %v366_v24  ;;  %v400_v33 = vld [vmem:[%s8281_s18 + $0x48] sm:$0xff]  ;;  %v8333_v35 = vmul.f32 %v399_v31, %v367_v30  ;;  %v369_v38 = vld [vmem:[%s8275_s15 + $0x50] sm:$0xff] }
  0x1b   : > { %11474 = vst [vmem:[#allocation9_spill] sm:$0xff] %v8321_v27  ;;  %v476_v34 = vsel %vm457_vm0, %v8321_v27, 0.0  ;;  %v8337_v37 = vmul.f32 %v400_v33, %v368_v32  ;;  %v401_v39 = vld [vmem:[%s8281_s18 + $0x50] sm:$0xff]  ;;  %v370_v40 = vld [vmem:[%s8275_s15 + $0x58] sm:$0xff]  ;;  %v371_v46 = vld [vmem:[%s8275_s15 + $0x60] sm:$0xff] }
  0x1c   : > { %462 = vadd.xlane.f32.xlu0 %v461_v18  ;;  %468 = vadd.xlane.f32.xlu1 %v467_v20  ;;  %11475 = vst [vmem:[#allocation10_spill] sm:$0xff] %v8325_v29  ;;  %11476 = vst [vmem:[#allocation11_spill] sm:$0xff] %v8333_v35  ;;  %v479_v36 = vsel %vm457_vm0, %v8325_v29, 0.0  ;;  %v402_v41 = vld [vmem:[%s8281_s18 + $0x58] sm:$0xff]  ;;  %v482_v42 = vsel %vm457_vm0, %v8333_v35, 0.0  ;;  %v8345_v43 = vmul.f32 %v401_v39, %v369_v38  ;;  %v403_v47 = vld [vmem:[%s8281_s18 + $0x60] sm:$0xff] }
  0x1d   : > { %11477 = vst [vmem:[#allocation12_spill] sm:$0xff] %v8337_v37  ;;  %v485_v44 = vsel %vm457_vm0, %v8337_v37, 0.0  ;;  %v8349_v45 = vmul.f32 %v402_v41, %v370_v40  ;;  %v372_v48 = vld [vmem:[%s8275_s15 + $0x68] sm:$0xff]  ;;  %v8357_v51 = vmul.f32 %v403_v47, %v371_v46  ;;  %v373_v54 = vld [vmem:[%s8275_s15 + $0x70] sm:$0xff]  ;;  %v374_v56 = vld [vmem:[%s8275_s15 + $0x78] sm:$0xff] }
  0x1e   : > { %11478 = vst [vmem:[#allocation13_spill] sm:$0xff] %v8345_v43  ;;  %v404_v49 = vld [vmem:[%s8281_s18 + $0x68] sm:$0xff]  ;;  %v488_v50 = vsel %vm457_vm0, %v8345_v43, 0.0  ;;  %v405_v55 = vld [vmem:[%s8281_s18 + $0x70] sm:$0xff]  ;;  %v406_v57 = vld [vmem:[%s8281_s18 + $0x78] sm:$0xff] }
  0x1f   : > { %11479 = vst [vmem:[#allocation14_spill] sm:$0xff] %v8349_v45  ;;  %11480 = vst [vmem:[#allocation15_spill] sm:$0xff] %v8357_v51  ;;  %v491_v52 = vsel %vm457_vm0, %v8349_v45, 0.0  ;;  %v8361_v53 = vmul.f32 %v404_v49, %v372_v48  ;;  %v494_v58 = vsel %vm457_vm0, %v8357_v51, 0.0  ;;  %v8369_v59 = vmul.f32 %v405_v55, %v373_v54  ;;  %v375_v62 = vld [vmem:[%s8275_s15 + $0x80] sm:$0xff]  ;;  %v376_v0 = vld [vmem:[%s8275_s15 + $0x88] sm:$0xff] }
  0x20   : > { %471 = vadd.xlane.f32.xlu0 %v470_v26  ;;  %474 = vadd.xlane.f32.xlu1 %v473_v28  ;;  %v8373_v61 = vmul.f32 %v406_v57, %v374_v56  ;;  %v407_v63 = vld [vmem:[%s8281_s18 + $0x80] sm:$0xff]  ;;  %v408_v1 = vld [vmem:[%s8281_s18 + $0x88] sm:$0xff]  ;;  %v377_v9 = vld [vmem:[%s8275_s15 + $0x90] sm:$0xff] }
  0x21   : > { %11481 = vst [vmem:[#allocation16_spill] sm:$0xff] %v8361_v53  ;;  %11482 = vst [vmem:[#allocation17_spill] sm:$0xff] %v8369_v59  ;;  %v497_v60 = vsel %vm457_vm0, %v8361_v53, 0.0  ;;  %v500_v2 = vsel %vm457_vm0, %v8369_v59, 0.0  ;;  %v8381_v4 = vmul.f32 %v407_v63, %v375_v62  ;;  %v8385_v6 = vmul.f32 %v408_v1, %v376_v0  ;;  %v409_v10 = vld [vmem:[%s8281_s18 + $0x90] sm:$0xff]  ;;  %v378_v11 = vld [vmem:[%s8275_s15 + $0x98] sm:$0xff] }
  0x22   : > { %11483 = vst [vmem:[#allocation18_spill] sm:$0xff] %v8373_v61  ;;  %v503_v5 = vsel %vm457_vm0, %v8373_v61, 0.0  ;;  %v410_v12 = vld [vmem:[%s8281_s18 + $0x98] sm:$0xff]  ;;  %v8393_v15 = vmul.f32 %v409_v10, %v377_v9  ;;  %v379_v18 = vld [vmem:[%s8275_s15 + $0xa0] sm:$0xff]  ;;  %v380_v22 = vld [vmem:[%s8275_s15 + $0xa8] sm:$0xff] }
  0x23   : > { %11484 = vst [vmem:[#allocation19_spill] sm:$0xff] %v8381_v4  ;;  %11485 = vst [vmem:[#allocation20_spill] sm:$0xff] %v8385_v6  ;;  %v506_v14 = vsel %vm457_vm0, %v8381_v4, 0.0  ;;  %v509_v16 = vsel %vm457_vm0, %v8385_v6, 0.0  ;;  %v8397_v17 = vmul.f32 %v410_v12, %v378_v11  ;;  %v411_v20 = vld [vmem:[%s8281_s18 + $0xa0] sm:$0xff]  ;;  %v412_v23 = vld [vmem:[%s8281_s18 + $0xa8] sm:$0xff] }
  0x24   : > { %477 = vadd.xlane.f32.xlu0 %v476_v34  ;;  %480 = vadd.xlane.f32.xlu1 %v479_v36  ;;  %11486 = vst [vmem:[#allocation21_spill] sm:$0xff] %v8393_v15  ;;  %v512_v24 = vsel %vm457_vm0, %v8393_v15, 0.0  ;;  %v8405_v25 = vmul.f32 %v411_v20, %v379_v18  ;;  %v8409_v28 = vmul.f32 %v412_v23, %v380_v22  ;;  %v381_v30 = vld [vmem:[%s8275_s15 + $0xb0] sm:$0xff]  ;;  %v382_v32 = vld [vmem:[%s8275_s15 + $0xb8] sm:$0xff]  ;;  %v383_v40 = vld [vmem:[%s8275_s15 + $0xc0] sm:$0xff] }
  0x25   : > { %11487 = vst [vmem:[#allocation22_spill] sm:$0xff] %v8397_v17  ;;  %v515_v26 = vsel %vm457_vm0, %v8397_v17, 0.0  ;;  %v413_v31 = vld [vmem:[%s8281_s18 + $0xb0] sm:$0xff]  ;;  %v414_v33 = vld [vmem:[%s8281_s18 + $0xb8] sm:$0xff]  ;;  %v415_v41 = vld [vmem:[%s8281_s18 + $0xc0] sm:$0xff] }
  0x26   : > { %11488 = vst [vmem:[#allocation23_spill] sm:$0xff] %v8405_v25  ;;  %11489 = vst [vmem:[#allocation24_spill] sm:$0xff] %v8409_v28  ;;  %v518_v34 = vsel %vm457_vm0, %v8405_v25, 0.0  ;;  %v8417_v36 = vmul.f32 %v413_v31, %v381_v30  ;;  %v521_v38 = vsel %vm457_vm0, %v8409_v28, 0.0  ;;  %v8421_v39 = vmul.f32 %v414_v33, %v382_v32  ;;  %v386_v54 = vld [vmem:[%s8275_s15 + $0xd8] sm:$0xff]  ;;  %v387_v62 = vld [vmem:[%s8275_s15 + $0xe0] sm:$0xff] }
  0x27   : > { %v8429_v47 = vmul.f32 %v415_v41, %v383_v40  ;;  %v418_v55 = vld [vmem:[%s8281_s18 + $0xd8] sm:$0xff]  ;;  %v419_v63 = vld [vmem:[%s8281_s18 + $0xe0] sm:$0xff]  ;;  %v388_v0 = vld [vmem:[%s8275_s15 + $0xe8] sm:$0xff]  ;;  %v11398_v30 = vmov 1  }
  0x28   : > { %483 = vadd.xlane.f32.xlu0 %v482_v42  ;;  %486 = vadd.xlane.f32.xlu1 %v485_v44  ;;  %11490 = vst [vmem:[#allocation25_spill] sm:$0xff] %v8417_v36  ;;  %11491 = vst [vmem:[#allocation26_spill] sm:$0xff] %v8421_v39  ;;  %v384_v42 = vld [vmem:[%s8275_s15 + $0xc8] sm:$0xff]  ;;  %v524_v46 = vsel %vm457_vm0, %v8417_v36, 0.0  ;;  %v527_v48 = vsel %vm457_vm0, %v8421_v39, 0.0  ;;  %v389_v11 = vld [vmem:[%s8275_s15 + $0xf0] sm:$0xff] }
  0x29   : > { %v416_v44 = vld [vmem:[%s8281_s18 + $0xc8] sm:$0xff]  ;;  %11492 = vst [vmem:[#allocation27_spill] sm:$0xff] %v8429_v47  ;;  %v530_v56 = vsel %vm457_vm0, %v8429_v47, 0.0  ;;  %v421_v12 = vld [vmem:[%s8281_s18 + $0xf0] sm:$0xff]  ;;  %7970 = vset.pattern.permute.xlu1 %v11398_v30  ;;  %7969 = vset.pattern.permute.xlu0 %v11398_v30 }
  0x2a   : > { %v8433_v49 = vmul.f32 %v416_v44, %v384_v42  ;;  %v420_v1 = vld [vmem:[%s8281_s18 + $0xe8] sm:$0xff]  ;;  %v8465_v20 = vmul.f32 %v421_v12, %v389_v11 }
  0x2b   : > { %v8457_v10 = vmul.f32 %v420_v1, %v388_v0 }
  0x2c   : > { %489 = vadd.xlane.f32.xlu0 %v488_v50  ;;  %492 = vadd.xlane.f32.xlu1 %v491_v52  ;;  %11493 = vst [vmem:[#allocation28_spill] sm:$0xff] %v8433_v49  ;;  %v385_v50 = vld [vmem:[%s8275_s15 + $0xd0] sm:$0xff]  ;;  %11498 = vst [vmem:[#allocation33_spill] sm:$0xff] %v8465_v20 }
  0x2d   : > { %v417_v52 = vld [vmem:[%s8281_s18 + $0xd0] sm:$0xff]  ;;  %11497 = vst [vmem:[#allocation32_spill] sm:$0xff] %v8457_v10  ;;  %v545_v22 = vsel %vm457_vm0, %v8457_v10, 0.0 }
  0x2e   : > { %v8441_v57 = vmul.f32 %v417_v52, %v385_v50 }
  0x30   : > { %495 = vadd.xlane.f32.xlu0 %v494_v58  ;;  %498 = vadd.xlane.f32.xlu1 %v497_v60  ;;  %11494 = vst [vmem:[#allocation29_spill] sm:$0xff] %v8441_v57  ;;  %v533_v58 = vsel %vm457_vm0, %v8433_v49, 0.0  ;;  %v8445_v60 = vmul.f32 %v418_v55, %v386_v54 }
  0x32   : > { %11495 = vst [vmem:[#allocation30_spill] sm:$0xff] %v8445_v60  ;;  %v539_v9 = vsel %vm457_vm0, %v8445_v60, 0.0 }
  0x34   : > { %501 = vadd.xlane.f32.xlu0 %v500_v2  ;;  %504 = vadd.xlane.f32.xlu1 %v503_v5  ;;  %v536_v2 = vsel %vm457_vm0, %v8441_v57, 0.0  ;;  %v8453_v5 = vmul.f32 %v419_v63, %v387_v62 }
  0x36   : > { %11496 = vst [vmem:[#allocation31_spill] sm:$0xff] %v8453_v5  ;;  %v542_v18 = vsel %vm457_vm0, %v8453_v5, 0.0 }
  0x38   : > { %507 = vadd.xlane.f32.xlu0 %v506_v14  ;;  %510 = vadd.xlane.f32.xlu1 %v509_v16  ;;  %v390_v14 = vld [vmem:[%s8275_s15 + $0xf8] sm:$0xff] }
  0x39   : > { %v422_v16 = vld [vmem:[%s8281_s18 + $0xf8] sm:$0xff] }
  0x3a   : > { %v8469_v23 = vmul.f32 %v422_v16, %v390_v14 }
  0x3c   : > { %513 = vadd.xlane.f32.xlu0 %v512_v24  ;;  %516 = vadd.xlane.f32.xlu1 %v515_v26  ;;  %11499 = vst [vmem:[#allocation34_spill] sm:$0xff] %v8469_v23  ;;  %v548_v24 = vsel %vm457_vm0, %v8465_v20, 0.0  ;;  %v551_v26 = vsel %vm457_vm0, %v8469_v23, 0.0 }
  0x40   : > { %519 = vadd.xlane.f32.xlu0 %v518_v34  ;;  %522 = vadd.xlane.f32.xlu1 %v521_v38 }
  0x44   : > { %525 = vadd.xlane.f32.xlu0 %v524_v46  ;;  %528 = vadd.xlane.f32.xlu1 %v527_v48 }
  0x48   : > { %531 = vadd.xlane.f32.xlu0 %v530_v56  ;;  %534 = vadd.xlane.f32.xlu1 %v533_v58 }
  0x4c   : > { %537 = vadd.xlane.f32.xlu0 %v536_v2  ;;  %540 = vadd.xlane.f32.xlu1 %v539_v9 }
  0x50   : > { %543 = vadd.xlane.f32.xlu0 %v542_v18  ;;  %546 = vadd.xlane.f32.xlu1 %v545_v22 }
  0x54   : > { %549 = vadd.xlane.f32.xlu0 %v548_v24  ;;  %552 = vadd.xlane.f32.xlu1 %v551_v26 }
  0xa5   : > { %v460_v31 = vpop.xlane.xlu0 %459  ;;  %v466_v33 = vpop.xlane.xlu1 %465 }
  0xa6   : > { %v555_v32 = vmul.f32 0.25, %v460_v31  ;;  %v557_v34 = vmul.f32 0.25, %v466_v33 }
  0xa8   : > { %v8478_v38 = vsub.f32 %v8286_v3, %v555_v32  ;;  %v8481_v40 = vsub.f32 %v8291_v7, %v557_v34 }
  0xa9   : > { %v463_v41 = vpop.xlane.xlu0 %462  ;;  %v469_v44 = vpop.xlane.xlu1 %468 }
  0xaa   : > { %v556_v42 = vmul.f32 0.25, %v463_v41  ;;  %v619_v46 = vmul.f32 %v8478_v38, %v8478_v38  ;;  %v558_v48 = vmul.f32 0.25, %v469_v44  ;;  %v621_v50 = vmul.f32 %v8481_v40, %v8481_v40 }
  0xac   : > { %v8488_v52 = vsub.f32 %v8293_v8, %v556_v42  ;;  %v651_v54 = vsel %vm457_vm0, %v619_v46, 0.0  ;;  %v8492_v55 = vsub.f32 %v8300_v13, %v558_v48  ;;  %v657_v63 = vsel %vm457_vm0, %v621_v50, 0.0 }
  0xad   : > { %652 = vadd.xlane.f32.xlu0 %v651_v54  ;;  %v472_v56 = vpop.xlane.xlu0 %471  ;;  %v475_v62 = vpop.xlane.xlu1 %474 }
  0xae   : > { %v559_v58 = vmul.f32 0.25, %v472_v56  ;;  %v620_v0 = vmul.f32 %v8488_v52, %v8488_v52  ;;  %v560_v1 = vmul.f32 0.25, %v475_v62  ;;  %v622_v2 = vmul.f32 %v8492_v55, %v8492_v55 }
  0xb0   : > { %v8500_v9 = vsub.f32 %v8309_v19, %v559_v58  ;;  %v654_v11 = vsel %vm457_vm0, %v620_v0, 0.0  ;;  %v8504_v12 = vsub.f32 %v8313_v21, %v560_v1  ;;  %v660_v22 = vsel %vm457_vm0, %v622_v2, 0.0 }
  0xb1   : > { %658 = vadd.xlane.f32.xlu0 %v657_v63  ;;  %655 = vadd.xlane.f32.xlu1 %v654_v11  ;;  %v478_v14 = vpop.xlane.xlu0 %477  ;;  %v481_v18 = vpop.xlane.xlu1 %480 }
  0xb2   : > { %v561_v16 = vmul.f32 0.25, %v478_v14  ;;  %v623_v24 = vmul.f32 %v8500_v9, %v8500_v9  ;;  %v562_v26 = vmul.f32 0.25, %v481_v18  ;;  %v624_v31 = vmul.f32 %v8504_v12, %v8504_v12 }
  0xb4   : > { %v8512_v32 = vsub.f32 %v8321_v27, %v561_v16  ;;  %v663_v33 = vsel %vm457_vm0, %v623_v24, 0.0  ;;  %v8516_v34 = vsub.f32 %v8325_v29, %v562_v26  ;;  %v666_v46 = vsel %vm457_vm0, %v624_v31, 0.0 }
  0xb5   : > { %661 = vadd.xlane.f32.xlu1 %v660_v22  ;;  %664 = vadd.xlane.f32.xlu0 %v663_v33  ;;  %v484_v41 = vpop.xlane.xlu0 %483  ;;  %v487_v44 = vpop.xlane.xlu1 %486 }
  0xb6   : > { %v563_v42 = vmul.f32 0.25, %v484_v41  ;;  %v625_v48 = vmul.f32 %v8512_v32, %v8512_v32  ;;  %v564_v50 = vmul.f32 0.25, %v487_v44  ;;  %v626_v54 = vmul.f32 %v8516_v34, %v8516_v34 }
  0xb8   : > { %v8524_v56 = vsub.f32 %v8333_v35, %v563_v42  ;;  %v669_v58 = vsel %vm457_vm0, %v625_v48, 0.0  ;;  %v8528_v62 = vsub.f32 %v8337_v37, %v564_v50  ;;  %v672_v2 = vsel %vm457_vm0, %v626_v54, 0.0 }
  0xb9   : > { %667 = vadd.xlane.f32.xlu1 %v666_v46  ;;  %670 = vadd.xlane.f32.xlu0 %v669_v58  ;;  %v490_v63 = vpop.xlane.xlu0 %489  ;;  %v493_v1 = vpop.xlane.xlu1 %492 }
  0xba   : > { %v565_v0 = vmul.f32 0.25, %v490_v63  ;;  %v627_v11 = vmul.f32 %v8524_v56, %v8524_v56  ;;  %v566_v14 = vmul.f32 0.25, %v493_v1  ;;  %v628_v16 = vmul.f32 %v8528_v62, %v8528_v62 }
  0xbc   : > { %v8536_v18 = vsub.f32 %v8345_v43, %v565_v0  ;;  %v675_v22 = vsel %vm457_vm0, %v627_v11, 0.0  ;;  %v8540_v24 = vsub.f32 %v8349_v45, %v566_v14  ;;  %v678_v41 = vsel %vm457_vm0, %v628_v16, 0.0 }
  0xbd   : > { %673 = vadd.xlane.f32.xlu1 %v672_v2  ;;  %676 = vadd.xlane.f32.xlu0 %v675_v22  ;;  %v496_v26 = vpop.xlane.xlu0 %495  ;;  %v499_v33 = vpop.xlane.xlu1 %498 }
  0xbe   : > { %v567_v31 = vmul.f32 0.25, %v496_v26  ;;  %v629_v42 = vmul.f32 %v8536_v18, %v8536_v18  ;;  %v568_v44 = vmul.f32 0.25, %v499_v33  ;;  %v630_v46 = vmul.f32 %v8540_v24, %v8540_v24 }
  0xc0   : > { %v8548_v48 = vsub.f32 %v8357_v51, %v567_v31  ;;  %v681_v50 = vsel %vm457_vm0, %v629_v42, 0.0  ;;  %v8552_v54 = vsub.f32 %v8361_v53, %v568_v44  ;;  %v684_v1 = vsel %vm457_vm0, %v630_v46, 0.0  ;;  %v1076_v51 = vld [vmem:[%s11390_s2 + $0x18] sm:$0xf] }
  0xc1   : > { %679 = vadd.xlane.f32.xlu1 %v678_v41  ;;  %682 = vadd.xlane.f32.xlu0 %v681_v50  ;;  %v502_v58 = vpop.xlane.xlu0 %501  ;;  %v505_v0 = vpop.xlane.xlu1 %504 }
  0xc2   : > { %v569_v63 = vmul.f32 0.25, %v502_v58  ;;  %v631_v2 = vmul.f32 %v8548_v48, %v8548_v48  ;;  %v570_v11 = vmul.f32 0.25, %v505_v0  ;;  %v632_v14 = vmul.f32 %v8552_v54, %v8552_v54 }
  0xc4   : > { %v8560_v16 = vsub.f32 %v8369_v59, %v569_v63  ;;  %v687_v22 = vsel %vm457_vm0, %v631_v2, 0.0  ;;  %v8564_v26 = vsub.f32 %v8373_v61, %v570_v11  ;;  %v690_v42 = vsel %vm457_vm0, %v632_v14, 0.0 }
  0xc5   : > { %685 = vadd.xlane.f32.xlu1 %v684_v1  ;;  %688 = vadd.xlane.f32.xlu0 %v687_v22  ;;  %v508_v31 = vpop.xlane.xlu0 %507  ;;  %v511_v41 = vpop.xlane.xlu1 %510 }
  0xc6   : > { %v571_v33 = vmul.f32 0.25, %v508_v31  ;;  %v633_v44 = vmul.f32 %v8560_v16, %v8560_v16  ;;  %v572_v46 = vmul.f32 0.25, %v511_v41  ;;  %v634_v50 = vmul.f32 %v8564_v26, %v8564_v26 }
  0xc8   : > { %v8572_v58 = vsub.f32 %v8381_v4, %v571_v33  ;;  %v693_v63 = vsel %vm457_vm0, %v633_v44, 0.0  ;;  %v8576_v0 = vsub.f32 %v8385_v6, %v572_v46  ;;  %v696_v14 = vsel %vm457_vm0, %v634_v50, 0.0 }
  0xc9   : > { %691 = vadd.xlane.f32.xlu1 %v690_v42  ;;  %694 = vadd.xlane.f32.xlu0 %v693_v63  ;;  %v514_v1 = vpop.xlane.xlu0 %513  ;;  %v517_v11 = vpop.xlane.xlu1 %516  ;;  %v11402_v6 = vmov 0  }
  0xca   : > { %v573_v2 = vmul.f32 0.25, %v514_v1  ;;  %v635_v22 = vmul.f32 %v8572_v58, %v8572_v58  ;;  %v574_v31 = vmul.f32 0.25, %v517_v11  ;;  %v636_v33 = vmul.f32 %v8576_v0, %v8576_v0  ;;  %952 = vst.msk [vmem:[#allocation2 + $0x8] sm:$0xff] %vm457_vm0, %v11402_v6  ;;  %951 = vst.msk [vmem:[#allocation2] sm:$0xff] %vm457_vm0, %v11402_v6 }
  0xcb   : > { %953 = vst.msk [vmem:[#allocation2 + $0x10] sm:$0xff] %vm457_vm0, %v11402_v6  ;;  %954 = vst.msk [vmem:[#allocation2 + $0x18] sm:$0xff] %vm457_vm0, %v11402_v6 }
  0xcc   : > { %v8584_v41 = vsub.f32 %v8393_v15, %v573_v2  ;;  %v699_v44 = vsel %vm457_vm0, %v635_v22, 0.0  ;;  %v8588_v42 = vsub.f32 %v8397_v17, %v574_v31  ;;  %v702_v1 = vsel %vm457_vm0, %v636_v33, 0.0  ;;  %955 = vst.msk [vmem:[#allocation2 + $0x20] sm:$0xff] %vm457_vm0, %v11402_v6  ;;  %956 = vst.msk [vmem:[#allocation2 + $0x28] sm:$0xff] %vm457_vm0, %v11402_v6 }
  0xcd   : > { %697 = vadd.xlane.f32.xlu1 %v696_v14  ;;  %700 = vadd.xlane.f32.xlu0 %v699_v44  ;;  %v520_v46 = vpop.xlane.xlu0 %519  ;;  %v523_v50 = vpop.xlane.xlu1 %522  ;;  %957 = vst.msk [vmem:[#allocation2 + $0x30] sm:$0xff] %vm457_vm0, %v11402_v6  ;;  %958 = vst.msk [vmem:[#allocation2 + $0x38] sm:$0xff] %vm457_vm0, %v11402_v6 }
  0xce   : > { %v575_v63 = vmul.f32 0.25, %v520_v46  ;;  %v637_v11 = vmul.f32 %v8584_v41, %v8584_v41  ;;  %v576_v30 = vmul.f32 0.25, %v523_v50  ;;  %v638_v2 = vmul.f32 %v8588_v42, %v8588_v42  ;;  %959 = vst.msk [vmem:[#allocation2 + $0x40] sm:$0xff] %vm457_vm0, %v11402_v6  ;;  %960 = vst.msk [vmem:[#allocation2 + $0x48] sm:$0xff] %vm457_vm0, %v11402_v6 }
  0xcf   : > { %961 = vst.msk [vmem:[#allocation2 + $0x50] sm:$0xff] %vm457_vm0, %v11402_v6  ;;  %962 = vst.msk [vmem:[#allocation2 + $0x58] sm:$0xff] %vm457_vm0, %v11402_v6 }
  0xd0   : > { %963 = vst.msk [vmem:[#allocation2 + $0x60] sm:$0xff] %vm457_vm0, %v11402_v6  ;;  %964 = vst.msk [vmem:[#allocation2 + $0x68] sm:$0xff] %vm457_vm0, %v11402_v6  ;;  %v8634_v14 = vsub.f32 %v8405_v25, %v575_v63  ;;  %v705_v22 = vsel %vm457_vm0, %v637_v11, 0.0  ;;  %v8638_v31 = vsub.f32 %v8409_v28, %v576_v30  ;;  %v708_v50 = vsel %vm457_vm0, %v638_v2, 0.0 }
  0xd1   : > { %965 = vst.msk [vmem:[#allocation2 + $0x70] sm:$0xff] %vm457_vm0, %v11402_v6  ;;  %966 = vst.msk [vmem:[#allocation2 + $0x78] sm:$0xff] %vm457_vm0, %v11402_v6  ;;  %703 = vadd.xlane.f32.xlu1 %v702_v1  ;;  %706 = vadd.xlane.f32.xlu0 %v705_v22  ;;  %v526_v33 = vpop.xlane.xlu0 %525  ;;  %v529_v46 = vpop.xlane.xlu1 %528 }
  0xd2   : > { %967 = vst.msk [vmem:[#allocation2 + $0x80] sm:$0xff] %vm457_vm0, %v11402_v6  ;;  %968 = vst.msk [vmem:[#allocation2 + $0x88] sm:$0xff] %vm457_vm0, %v11402_v6  ;;  %v577_v44 = vmul.f32 0.25, %v526_v33  ;;  %v639_v17 = vmul.f32 %v8634_v14, %v8634_v14  ;;  %v578_v4 = vmul.f32 0.25, %v529_v46  ;;  %v640_v63 = vmul.f32 %v8638_v31, %v8638_v31 }
  0xd3   : > { %969 = vst.msk [vmem:[#allocation2 + $0x90] sm:$0xff] %vm457_vm0, %v11402_v6 }
  0xd4   : > { %v8646_v6 = vsub.f32 %v8417_v36, %v577_v44  ;;  %v711_v30 = vsel %vm457_vm0, %v639_v17, 0.0  ;;  %v8650_v1 = vsub.f32 %v8421_v39, %v578_v4  ;;  %v714_v33 = vsel %vm457_vm0, %v640_v63, 0.0  ;;  %v1093_v36 = vld [vmem:[%s11390_s2 + $0x5c] sm:$0xf] }
  0xd5   : > { %709 = vadd.xlane.f32.xlu1 %v708_v50  ;;  %712 = vadd.xlane.f32.xlu0 %v711_v30  ;;  %v532_v11 = vpop.xlane.xlu0 %531  ;;  %v535_v2 = vpop.xlane.xlu1 %534 }
  0xd6   : > { %v579_v22 = vmul.f32 0.25, %v532_v11  ;;  %v641_v46 = vmul.f32 %v8646_v6, %v8646_v6  ;;  %v580_v28 = vmul.f32 0.25, %v535_v2  ;;  %v642_v44 = vmul.f32 %v8650_v1, %v8650_v1 }
  0xd8   : > { %v8658_v25 = vsub.f32 %v8429_v47, %v579_v22  ;;  %v717_v4 = vsel %vm457_vm0, %v641_v46, 0.0  ;;  %v8662_v17 = vsub.f32 %v8433_v49, %v580_v28  ;;  %v720_v11 = vsel %vm457_vm0, %v642_v44, 0.0 }
  0xd9   : > { %715 = vadd.xlane.f32.xlu1 %v714_v33  ;;  %718 = vadd.xlane.f32.xlu0 %v717_v4  ;;  %v538_v50 = vpop.xlane.xlu0 %537  ;;  %v541_v63 = vpop.xlane.xlu1 %540 }
  0xda   : > { %v581_v30 = vmul.f32 0.25, %v538_v50  ;;  %v643_v2 = vmul.f32 %v8658_v25, %v8658_v25  ;;  %v582_v39 = vmul.f32 0.25, %v541_v63  ;;  %v644_v22 = vmul.f32 %v8662_v17, %v8662_v17 }
  0xdc   : > { %v8670_v47 = vsub.f32 %v8441_v57, %v581_v30  ;;  %v723_v28 = vsel %vm457_vm0, %v643_v2, 0.0  ;;  %v8674_v33 = vsub.f32 %v8445_v60, %v582_v39  ;;  %v726_v50 = vsel %vm457_vm0, %v644_v22, 0.0 }
  0xdd   : > { %721 = vadd.xlane.f32.xlu1 %v720_v11  ;;  %724 = vadd.xlane.f32.xlu0 %v723_v28  ;;  %v544_v46 = vpop.xlane.xlu0 %543  ;;  %v547_v44 = vpop.xlane.xlu1 %546 }
  0xde   : > { %v583_v4 = vmul.f32 0.25, %v544_v46  ;;  %v645_v63 = vmul.f32 %v8670_v47, %v8670_v47  ;;  %v584_v49 = vmul.f32 0.25, %v547_v44  ;;  %v646_v30 = vmul.f32 %v8674_v33, %v8674_v33 }
  0xe0   : > { %v8682_v57 = vsub.f32 %v8453_v5, %v583_v4  ;;  %v729_v39 = vsel %vm457_vm0, %v645_v63, 0.0  ;;  %v8686_v11 = vsub.f32 %v8457_v10, %v584_v49  ;;  %v732_v22 = vsel %vm457_vm0, %v646_v30, 0.0  ;;  %v6993_v30 = vld [vmem:[%s11393_s5 + $0x2] sm:$0x3]  ;;  %v1087_v10 = vld [vmem:[%s11390_s2 + $0x44] sm:$0xf] }
  0xe1   : > { %727 = vadd.xlane.f32.xlu1 %v726_v50  ;;  %730 = vadd.xlane.f32.xlu0 %v729_v39  ;;  %v550_v2 = vpop.xlane.xlu0 %549  ;;  %v1089_v5 = vld [vmem:[%s11390_s2 + $0x4c] sm:$0xf]  ;;  %v553_v60 = vpop.xlane.xlu1 %552 }
  0xe2   : > { %v585_v28 = vmul.f32 0.25, %v550_v2  ;;  %v647_v46 = vmul.f32 %v8682_v57, %v8682_v57  ;;  %v648_v44 = vmul.f32 %v8686_v11, %v8686_v11  ;;  %7947 = vmatprep.subr.msk.bf16.mxu1 %vm1863_vm1, %v6993_v30  ;;  %v1865_v2 = vsel %vm1863_vm1, %v6993_v30, 0  ;;  %v1074_v30 = vld [vmem:[%s11390_s2 + $0x10] sm:$0xf] }
  0xe3   : > { %7352 = vmatpush3.bf16.msra.mxu1 %v1865_v2  ;;  %v8749_v2 = vld [vmem:[%s11390_s2 + $0x14] sm:$0xf]  ;;  %v586_v15 = vmul.f32 0.25, %v553_v60  ;;  %v8794_v60 = vld [vmem:[%s11393_s5 + $0xa] sm:$0x3] }
  0xe4   : > { %v8694_v4 = vsub.f32 %v8465_v20, %v585_v28  ;;  %v735_v63 = vsel %vm457_vm0, %v647_v46, 0.0  ;;  %v738_v49 = vsel %vm457_vm0, %v648_v44, 0.0  ;;  %v7076_v28 = vld [vmem:[%s11393_s5 + $0x8] sm:$0x3]  ;;  %v1071_v46 = vld [vmem:[%s11390_s2 + $0x4] sm:$0xf] }
  0xe5   : > { %733 = vadd.xlane.f32.xlu1 %v732_v22  ;;  %736 = vadd.xlane.f32.xlu0 %v735_v63  ;;  %v3935_v22 = vsel %vm1863_vm1, %v7076_v28, 0  ;;  %v8717_v44 = vld [vmem:[%s11390_s2 + $0x8] sm:$0xf]  ;;  %v8722_v63 = vld [vmem:[%s11390_s2] sm:$0xf]  ;;  %v8781_v53 = vsub.f32 %v8469_v23, %v586_v15 }
  0xe6   : > { %v649_v50 = vmul.f32 %v8694_v4, %v8694_v4  ;;  %7951 = vmatprep.subr.msk.bf16.mxu0 %vm1863_vm1, %v7076_v28  ;;  %v8755_v28 = vld [vmem:[%s11390_s2 + $0x34] sm:$0xf] }
  0xe7   : > { %7488 = vmatpush3.bf16.msra.mxu0 %v3935_v22  ;;  %v8762_v22 = vld [vmem:[%s11390_s2 + $0x3c] sm:$0xf]  ;;  %v1091_v20 = vld [vmem:[%s11390_s2 + $0x54] sm:$0xf] }
  0xe8   : > { %v741_v39 = vsel %vm457_vm0, %v649_v50, 0.0  ;;  %v8734_v50 = vld [vmem:[%s11390_s2 + $0x24] sm:$0xf]  ;;  %7952 = vmatprep.subr.msk.bf16.mxu0 %vm1863_vm1, %v8794_v60 }
  0xe9   : > { %739 = vadd.xlane.f32.xlu1 %v738_v49  ;;  %742 = vadd.xlane.f32.xlu0 %v741_v39  ;;  %v8729_v49 = vld [vmem:[%s11390_s2 + $0xc] sm:$0xf] }
  0xea   : > { %v8744_v39 = vld [vmem:[%s11390_s2 + $0x2c] sm:$0xf] }
  0xfa   : > { %2406 = vperm.xlu1 %7970, %v1071_v46  }
  0xfe   : > { %2417 = vperm.xlu1 %7970, %v8717_v44  }
  0xff   : > { %2395 = vperm.xlu0 %7969, %v8722_v63  }
 0x102   : > { %2428 = vperm.xlu1 %7970, %v8729_v49  }
 0x103   : > { %2494 = vperm.xlu0 %7969, %v8734_v50  }
 0x106   : > { %2439 = vperm.xlu1 %7970, %v1074_v30  }
 0x107   : > { %2516 = vperm.xlu0 %7969, %v8744_v39  }
 0x10a   : > { %2450 = vperm.xlu1 %7970, %v8749_v2  }
 0x10b   : > { %2538 = vperm.xlu0 %7969, %v8755_v28  }
 0x10f   : > { %2560 = vperm.xlu0 %7969, %v8762_v22  }
 0x113   : > { %2582 = vperm.xlu0 %7969, %v1087_v10   ;;  %v1095_v10 = vld [vmem:[%s11390_s2 + $0x64] sm:$0xf] }
 0x117   : > { %2604 = vperm.xlu0 %7969, %v1089_v5   ;;  %v1097_v5 = vld [vmem:[%s11390_s2 + $0x6c] sm:$0xf] }
 0x11b   : > { %2626 = vperm.xlu0 %7969, %v1091_v20   ;;  %v650_v20 = vmul.f32 %v8781_v53, %v8781_v53 }
 0x11d   : > { %v744_v15 = vsel %vm457_vm0, %v650_v20, 0.0 }
 0x11f   : > { %2648 = vperm.xlu0 %7969, %v1093_v36   ;;  %v1099_v36 = vld [vmem:[%s11390_s2 + $0x74] sm:$0xf] }
 0x123   : > { %2670 = vperm.xlu0 %7969, %v1095_v10   ;;  %v1101_v10 = vld [vmem:[%s11390_s2 + $0x7c] sm:$0xf] }
 0x127   : > { %2692 = vperm.xlu0 %7969, %v1097_v5   ;;  %v11500_v5 = vmov 0  }
 0x12b   : > { %2714 = vperm.xlu0 %7969, %v1099_v36  }
 0x12e   : > { %745 = vadd.xlane.f32.xlu1 %v744_v15  ;;  %v1078_v15 = vld [vmem:[%s11390_s2 + $0x20] sm:$0xf] }
 0x12f   : > { %2736 = vperm.xlu0 %7969, %v1101_v10  }
 0x133   : > { %7972 = vset.pattern.permute.xlu0 %v11500_v5 }
 0x134   : > { %1133 = vperm.xlu0 %7972, %v1071_v46  }
 0x138   : > { %1169 = vperm.xlu0 %7972, %v1074_v30  }
 0x13a   : > { %v653_v23 = vpop.xlane.xlu0 %652 }
 0x13b   : > { %v747_v61 = vmul.f32 0.25, %v653_v23  ;;  %v8812_v23 = vld [vmem:[%s11390_s2 + $0x1c] sm:$0xf] }
 0x13c   : > { %1193 = vperm.xlu0 %7972, %v1076_v51  }
 0x13d   : > { %v779_v59 = vadd.f32 1e-06, %v747_v61 }
 0x13e   : > { %v656_v20 = vpop.xlane.xlu1 %655  ;;  %v659_v36 = vpop.xlane.xlu0 %658 }
 0x13f   : > { %7974 = vrsqrt.f32 %v779_v59  ;;  %v748_v37 = vmul.f32 0.25, %v656_v20  ;;  %v749_v45 = vmul.f32 0.25, %v659_v36  ;;  %2461 = vperm.xlu1 %7970, %v1076_v51   ;;  %v1080_v51 = vld [vmem:[%s11390_s2 + $0x28] sm:$0xf] }
 0x140   : > { %1217 = vperm.xlu0 %7972, %v1078_v15  }
 0x141   : > { %v780_v46 = vadd.f32 1e-06, %v748_v37  ;;  %v781_v30 = vadd.f32 1e-06, %v749_v45 }
 0x142   : > { %v662_v10 = vpop.xlane.xlu1 %661  ;;  %v665_v61 = vpop.xlane.xlu0 %664 }
 0x143   : > { %7976 = vrsqrt.f32 %v780_v46  ;;  %v750_v35 = vmul.f32 0.25, %v662_v10  ;;  %v751_v59 = vmul.f32 0.25, %v665_v61  ;;  %2472 = vperm.xlu1 %7970, %v8812_v23   ;;  %v1082_v46 = vld [vmem:[%s11390_s2 + $0x30] sm:$0xf] }
 0x144   : > { %7978 = vrsqrt.f32 %v781_v30  ;;  %1241 = vperm.xlu0 %7972, %v1080_v51  }
 0x145   : > { %v782_v20 = vadd.f32 1e-06, %v750_v35  ;;  %v783_v36 = vadd.f32 1e-06, %v751_v59  ;;  %v8825_v59 = vld [vmem:[%s11391_s3] ss:$0 sm:$0xff] }
 0x146   : > { %v668_v43 = vpop.xlane.xlu1 %667  ;;  %v671_v21 = vpop.xlane.xlu0 %670 }
 0x147   : > { %7980 = vrsqrt.f32 %v782_v20  ;;  %v752_v37 = vmul.f32 0.25, %v668_v43  ;;  %v753_v45 = vmul.f32 0.25, %v671_v21  ;;  %2483 = vperm.xlu1 %7970, %v1078_v15   ;;  %v1084_v15 = vld [vmem:[%s11390_s2 + $0x38] sm:$0xf] }
 0x148   : > { %7982 = vrsqrt.f32 %v783_v36  ;;  %1265 = vperm.xlu0 %7972, %v1082_v46  }
 0x149   : > { %v7975_v10 = vpop.eup %7974  ;;  %v784_v61 = vadd.f32 1e-06, %v752_v37  ;;  %v785_v29 = vadd.f32 1e-06, %v753_v45 }
 0x14a   : > { %v843_v30 = vmul.f32 %v7975_v10, %v8478_v38  ;;  %v674_v19 = vpop.xlane.xlu1 %673  ;;  %v677_v35 = vpop.xlane.xlu0 %676 }
 0x14b   : > { %7984 = vrsqrt.f32 %v784_v61  ;;  %v754_v21 = vmul.f32 0.25, %v674_v19  ;;  %v755_v43 = vmul.f32 0.25, %v677_v35  ;;  %2505 = vperm.xlu1 %7970, %v1080_v51   ;;  %v8835_v19 = vld [vmem:[%s11392_s4] ss:$0 sm:$0xff] }
 0x14c   : > { %7986 = vrsqrt.f32 %v785_v29  ;;  %1289 = vperm.xlu0 %7972, %v1084_v15   ;;  %v881_v45 = vmul.f32 %v8825_v59, %v843_v30  ;;  %v1086_v35 = vld [vmem:[%s11390_s2 + $0x40] sm:$0xf]  ;;  %v8842_v30 = vld [vmem:[#allocation2] sm:$0xf0] }
 0x14d   : > { %v7977_v20 = vpop.eup %7976  ;;  %v786_v36 = vadd.f32 1e-06, %v754_v21  ;;  %v787_v38 = vadd.f32 1e-06, %v755_v43 }
 0x14e   : > { %v7979_v37 = vpop.eup %7978  ;;  %v844_v10 = vmul.f32 %v7977_v20, %v8488_v52  ;;  %v680_v27 = vpop.xlane.xlu1 %679 }
 0x14f   : > { %v683_v8 = vpop.xlane.xlu0 %682  ;;  %v845_v51 = vmul.f32 %v7979_v37, %v8481_v40  ;;  %7988 = vrsqrt.f32 %v786_v36  ;;  %v756_v29 = vmul.f32 0.25, %v680_v27  ;;  %2527 = vperm.xlu1 %7970, %v1082_v46  }
 0x150   : > { %v757_v61 = vmul.f32 0.25, %v683_v8  ;;  %v882_v52 = vmul.f32 %v8825_v59, %v844_v10  ;;  %7990 = vrsqrt.f32 %v787_v38  ;;  %1313 = vperm.xlu0 %7972, %v1086_v35   ;;  %v919_v8 = vadd.f32 %v8835_v19, %v881_v45 }
 0x151   : > { %v7981_v21 = vpop.eup %7980  ;;  %v883_v43 = vmul.f32 %v8825_v59, %v845_v51  ;;  %v788_v40 = vadd.f32 1e-06, %v756_v29  ;;  %v1088_v51 = vld [vmem:[%s11390_s2 + $0x48] sm:$0xf] }
 0x152   : > { %v789_v20 = vadd.f32 1e-06, %v757_v61  ;;  %v7983_v27 = vpop.eup %7982  ;;  %v920_v46 = vadd.f32 %v8835_v19, %v882_v52  ;;  %v846_v36 = vmul.f32 %v7981_v21, %v8492_v55  ;;  %v686_v37 = vpop.xlane.xlu1 %685 }
 0x153   : > { %v689_v13 = vpop.xlane.xlu0 %688  ;;  %v847_v38 = vmul.f32 %v7983_v27, %v8500_v9  ;;  %7992 = vrsqrt.f32 %v788_v40  ;;  %v758_v10 = vmul.f32 0.25, %v686_v37  ;;  %2549 = vperm.xlu1 %7970, %v1084_v15   ;;  %v921_v21 = vadd.f32 %v8835_v19, %v883_v43  ;;  %v1090_v43 = vld [vmem:[%s11390_s2 + $0x50] sm:$0xf] }
 0x154   : > { %v970_v61 = vpack.c.bf16 %v920_v46, %v919_v8  ;;  %v884_v45 = vmul.f32 %v8825_v59, %v846_v36  ;;  %7994 = vrsqrt.f32 %v789_v20  ;;  %v759_v52 = vmul.f32 0.25, %v689_v13  ;;  %1337 = vperm.xlu0 %7972, %v1088_v51  }
 0x155   : > { %v7985_v55 = vpop.eup %7984  ;;  %v885_v9 = vmul.f32 %v8825_v59, %v847_v38  ;;  %v790_v40 = vadd.f32 1e-06, %v758_v10  ;;  %v8209_v27 = vmov 839922192   ;;  %v1127_v38 = vlaneseq }
 0x156   : > { %v8856_v15 = vunpack.c.l.s4 %v8209_v27  ;;  %v7987_v37 = vpop.eup %7986  ;;  %v1003_v3 = vrot.slane %v970_v61, 4  ;;  %v922_v7 = vadd.f32 %v8835_v19, %v884_v45  ;;  %v848_v8 = vmul.f32 %v7985_v55, %v8504_v12  ;;  %v692_v36 = vpop.xlane.xlu1 %691 }
 0x157   : > { %v791_v46 = vadd.f32 1e-06, %v759_v52  ;;  %v695_v20 = vpop.xlane.xlu0 %694  ;;  %v849_v13 = vmul.f32 %v7987_v37, %v8512_v32  ;;  %7996 = vrsqrt.f32 %v790_v40  ;;  %v760_v29 = vmul.f32 0.25, %v692_v36  ;;  %2571 = vperm.xlu1 %7970, %v1086_v35  }
 0x158   : > { %1052 = vst.msk [vmem:[#allocation2 + $0x8] sm:$0xf0] %vm1051_vm2, %v1003_v3  ;;  %v971_v10 = vpack.c.bf16 %v922_v7, %v921_v21  ;;  %v886_v61 = vmul.f32 %v8825_v59, %v848_v8  ;;  %v761_v12 = vmul.f32 0.25, %v695_v20  ;;  %1361 = vperm.xlu0 %7972, %v1090_v43   ;;  %v923_v52 = vadd.f32 %v8835_v19, %v885_v9 }
 0x159   : > { %7998 = vrsqrt.f32 %v791_v46  ;;  %v7989_v45 = vpop.eup %7988  ;;  %v887_v32 = vmul.f32 %v8825_v59, %v849_v13  ;;  %v792_v55 = vadd.f32 1e-06, %v760_v29  ;;  %v1126_v35 = vunpack.c.0.s8 %v8856_v15  ;;  %v1092_v29 = vld [vmem:[%s11390_s2 + $0x58] sm:$0xf] }
 0x15a   : > { %v7991_v40 = vpop.eup %7990  ;;  %v1004_v27 = vrot.slane %v971_v10, 4  ;;  %v924_v37 = vadd.f32 %v8835_v19, %v886_v61  ;;  %v850_v36 = vmul.f32 %v7989_v45, %v8516_v34  ;;  %v793_v7 = vadd.f32 1e-06, %v761_v12  ;;  %v698_v21 = vpop.xlane.xlu1 %697 }
 0x15b   : > { %v701_v8 = vpop.xlane.xlu0 %700  ;;  %v851_v46 = vmul.f32 %v7991_v40, %v8524_v56  ;;  %8000 = vrsqrt.f32 %v792_v55  ;;  %v762_v20 = vmul.f32 0.25, %v698_v21  ;;  %2593 = vperm.xlu1 %7970, %v1088_v51   ;;  %v8875_v9 = vshrl.u32 %v1127_v38, 7 }
 0x15c   : > { %v1005_v13 = vsel %vm1002_vm3, %v1003_v3, %v1004_v27  ;;  %v972_v10 = vpack.c.bf16 %v924_v37, %v923_v52  ;;  %v888_v61 = vmul.f32 %v8825_v59, %v850_v36  ;;  %8002 = vrsqrt.f32 %v793_v7  ;;  %1385 = vperm.xlu0 %7972, %v1092_v29  }
 0x15d   : > { %v7993_v34 = vpop.eup %7992  ;;  %1053 = vst.msk [vmem:[#allocation2 + $0x10] sm:$0xff] %vm457_vm0, %v1005_v13  ;;  %v889_v56 = vmul.f32 %v8825_v59, %v851_v46  ;;  %v794_v12 = vadd.f32 1e-06, %v762_v20  ;;  %v763_v51 = vmul.f32 0.25, %v701_v8  ;;  %v8883_v45 = vsel %vm1863_vm1, %v8794_v60, 0 }
 0x15e   : > { %v7995_v38 = vpop.eup %7994  ;;  %v1006_v55 = vrot.slane %v972_v10, 4  ;;  %v925_v3 = vadd.f32 %v8835_v19, %v887_v32  ;;  %v926_v52 = vadd.f32 %v8835_v19, %v888_v61  ;;  %v852_v40 = vmul.f32 %v7993_v34, %v8528_v62  ;;  %v704_v37 = vpop.xlane.xlu1 %703  ;;  %v1094_v60 = vld [vmem:[%s11390_s2 + $0x60] sm:$0xf] }
 0x15f   : > { %v707_v36 = vpop.xlane.xlu0 %706  ;;  %v927_v7 = vadd.f32 %v8835_v19, %v889_v56  ;;  %v853_v21 = vmul.f32 %v7995_v38, %v8536_v18  ;;  %8004 = vrsqrt.f32 %v794_v12  ;;  %v795_v8 = vadd.f32 1e-06, %v763_v51  ;;  %2615 = vperm.xlu1 %7970, %v1090_v43   ;;  %v8890_v46 = vld [vmem:[#allocation2 + $0x8] sm:$0xff] }
 0x160   : > { %v1007_v32 = vsel %vm1002_vm3, %v1004_v27, %v1006_v55  ;;  %v973_v20 = vpack.c.bf16 %v926_v52, %v925_v3  ;;  %v890_v62 = vmul.f32 %v8825_v59, %v852_v40  ;;  %v764_v13 = vmul.f32 0.25, %v704_v37  ;;  %1409 = vperm.xlu0 %7972, %v1094_v60  }
 0x161   : > { %v7997_v10 = vpop.eup %7996  ;;  %1054 = vst.msk [vmem:[#allocation2 + $0x18] sm:$0xff] %vm457_vm0, %v1007_v32  ;;  %v891_v18 = vmul.f32 %v8825_v59, %v853_v21  ;;  %8006 = vrsqrt.f32 %v795_v8  ;;  %v765_v43 = vmul.f32 0.25, %v707_v36  ;;  %v1783_v61 = vrot.slane %v8890_v46, 4  ;;  %v1096_v36 = vld [vmem:[%s11390_s2 + $0x68] sm:$0xf] }
 0x162   : > { %v1008_v56 = vrot.slane %v973_v20, 4  ;;  %v928_v12 = vadd.f32 %v8835_v19, %v890_v62  ;;  %v854_v27 = vmul.f32 %v7997_v10, %v8540_v24  ;;  %v796_v51 = vadd.f32 1e-06, %v764_v13  ;;  %v710_v38 = vpop.xlane.xlu1 %709 }
 0x163   : > { %v7999_v34 = vpop.eup %7998  ;;  %v713_v3 = vpop.xlane.xlu0 %712  ;;  %v929_v52 = vadd.f32 %v8835_v19, %v891_v18  ;;  %v797_v37 = vadd.f32 1e-06, %v765_v43  ;;  %v766_v32 = vmul.f32 0.25, %v710_v38  ;;  %2637 = vperm.xlu1 %7970, %v1092_v29  }
 0x164   : > { %v855_v40 = vmul.f32 %v7999_v34, %v8548_v48  ;;  %v1009_v21 = vsel %vm1002_vm3, %v1006_v55, %v1008_v56  ;;  %v974_v8 = vpack.c.bf16 %v928_v12, %v927_v7  ;;  %v892_v20 = vmul.f32 %v8825_v59, %v854_v27  ;;  %1433 = vperm.xlu0 %7972, %v1096_v36   ;;  %v8916_v27 = vld [vmem:[#allocation2 + $0x10] sm:$0xff] }
 0x165   : > { %8008 = vrsqrt.f32 %v796_v51  ;;  %v8001_v24 = vpop.eup %8000  ;;  %1055 = vst.msk [vmem:[#allocation2 + $0x20] sm:$0xff] %vm457_vm0, %v1009_v21  ;;  %v798_v48 = vadd.f32 1e-06, %v766_v32  ;;  %v767_v13 = vmul.f32 0.25, %v713_v3  ;;  %v11501_v55 = vrot.slane %v8842_v30, 4 }
 0x166   : > { %v893_v62 = vmul.f32 %v8825_v59, %v855_v40  ;;  %8010 = vrsqrt.f32 %v797_v37  ;;  %v8003_v29 = vpop.eup %8002  ;;  %v1010_v10 = vrot.slane %v974_v8, 4  ;;  %v930_v18 = vadd.f32 %v8835_v19, %v892_v20  ;;  %v716_v34 = vpop.xlane.xlu1 %715  ;;  %v8926_v8 = vld [vmem:[#allocation2 + $0x8] sm:$0xf0] }
 0x167   : > { %v856_v43 = vmul.f32 %v8001_v24, %v8552_v54  ;;  %v1784_v7 = vsel %vm1002_vm3, %v11501_v55, %v1783_v61  ;;  %v719_v12 = vpop.xlane.xlu0 %718  ;;  %v857_v38 = vmul.f32 %v8003_v29, %v8560_v16  ;;  %8012 = vrsqrt.f32 %v798_v48  ;;  %2659 = vperm.xlu1 %7970, %v1094_v60   ;;  %v1098_v54 = vld [vmem:[%s11390_s2 + $0x70] sm:$0xf] }
 0x168   : > { %v931_v51 = vadd.f32 %v8835_v19, %v893_v62  ;;  %v799_v3 = vadd.f32 1e-06, %v767_v13  ;;  %7353 = vmatprep.mubr.msk.bf16.mxu1 %vm457_vm0, %v1784_v7  ;;  %v1011_v40 = vsel %vm1002_vm3, %v1008_v56, %v1010_v10  ;;  %v975_v37 = vpack.c.bf16 %v930_v18, %v929_v52  ;;  %1457 = vperm.xlu0 %7972, %v1098_v54  }
 0x169   : > { %v894_v32 = vmul.f32 %v8825_v59, %v856_v43  ;;  %v768_v21 = vmul.f32 0.25, %v716_v34  ;;  %v8005_v20 = vpop.eup %8004  ;;  %1056 = vst.msk [vmem:[#allocation2 + $0x28] sm:$0xff] %vm457_vm0, %v1011_v40  ;;  %v895_v16 = vmul.f32 %v8825_v59, %v857_v38  ;;  %v769_v60 = vmul.f32 0.25, %v719_v12 }
 0x16a   : > { %8014 = vrsqrt.f32 %v799_v3  ;;  %v1785_v24 = vrot.slane %v8916_v27, 4  ;;  %v1012_v62 = vrot.slane %v975_v37, 4  ;;  %v858_v56 = vmul.f32 %v8005_v20, %v8564_v26  ;;  %v722_v13 = vpop.xlane.xlu1 %721  ;;  %v8940_v26 = vld [vmem:[#allocation2 + $0x18] sm:$0xff] }
 0x16b   : > { %v932_v48 = vadd.f32 %v8835_v19, %v894_v32  ;;  %v800_v52 = vadd.f32 1e-06, %v768_v21  ;;  %v725_v29 = vpop.xlane.xlu0 %724  ;;  %v8007_v18 = vpop.eup %8006  ;;  %v933_v43 = vadd.f32 %v8835_v19, %v895_v16  ;;  %v801_v55 = vadd.f32 1e-06, %v769_v60  ;;  %2681 = vperm.xlu1 %7970, %v1096_v36   ;;  %v1100_v37 = vld [vmem:[%s11390_s2 + $0x78] sm:$0xf] }
 0x16c   : > { %v1786_v7 = vsel %vm1002_vm3, %v1783_v61, %v1785_v24  ;;  %v3853_v34 = vrot.slane %v8926_v8, 4  ;;  %v1013_v12 = vsel %vm1002_vm3, %v1010_v10, %v1012_v62  ;;  %v896_v3 = vmul.f32 %v8825_v59, %v858_v56  ;;  %1481 = vperm.xlu0 %7972, %v1100_v37  }
 0x16d   : > { %v976_v38 = vpack.c.bf16 %v932_v48, %v931_v51  ;;  %v859_v40 = vmul.f32 %v8007_v18, %v8572_v58  ;;  %7354 = vmatmul.mubr.msk.bf16.vlgmr.msra.gmra.mrb[0].mxu1 %vm457_vm0, %v1786_v7  ;;  %1057 = vst.msk [vmem:[#allocation2 + $0x30] sm:$0xff] %vm457_vm0, %v1013_v12  ;;  %8016 = vrsqrt.f32 %v800_v52  ;;  %v770_v36 = vmul.f32 0.25, %v722_v13 }
 0x16e   : > { %v3855_v61 = vsel %vm1002_vm3, %v3853_v34, %v1785_v24  ;;  %v771_v10 = vmul.f32 0.25, %v725_v29  ;;  %v934_v58 = vadd.f32 %v8835_v19, %v896_v3  ;;  %8018 = vrsqrt.f32 %v801_v55  ;;  %v728_v20 = vpop.xlane.xlu1 %727  ;;  %v8955_v55 = vld [vmem:[#allocation2 + $0x20] sm:$0xff] }
 0x16f   : > { %v8009_v51 = vpop.eup %8008  ;;  %v1014_v32 = vrot.slane %v976_v38, 4  ;;  %v897_v21 = vmul.f32 %v8825_v59, %v859_v40  ;;  %7489 = vmatprep.mubr.msk.bf16.mxu0 %vm457_vm0, %v3855_v61  ;;  %v731_v16 = vpop.xlane.xlu0 %730  ;;  %v802_v56 = vadd.f32 1e-06, %v770_v36  ;;  %v1787_v13 = vrot.slane %v8940_v26, 4  ;;  %2703 = vperm.xlu1 %7970, %v1098_v54   ;;  %v8968_v61 = vld [vmem:[%s11393_s5] sm:$0x3] }
 0x170   : > { %v8011_v60 = vpop.eup %8010  ;;  %v860_v48 = vmul.f32 %v8009_v51, %v8576_v0  ;;  %v803_v52 = vadd.f32 1e-06, %v771_v10  ;;  %v977_v18 = vpack.c.bf16 %v934_v58, %v933_v43  ;;  %v772_v3 = vmul.f32 0.25, %v728_v20  ;;  %7948 = vmatprep.subr.msk.bf16.mxu1 %vm1863_vm1, %v8968_v61 }
 0x171   : > { %v1015_v29 = vsel %vm1002_vm3, %v1012_v62, %v1014_v32  ;;  %v935_v7 = vadd.f32 %v8835_v19, %v897_v21  ;;  %v861_v34 = vmul.f32 %v8011_v60, %v8584_v41  ;;  %v8013_v12 = vpop.eup %8012  ;;  %8020 = vrsqrt.f32 %v802_v56 }
 0x172   : > { %1058 = vst.msk [vmem:[#allocation2 + $0x38] sm:$0xff] %vm457_vm0, %v1015_v29  ;;  %v898_v38 = vmul.f32 %v8825_v59, %v860_v48  ;;  %v1788_v0 = vsel %vm1002_vm3, %v1785_v24, %v1787_v13  ;;  %v11502_v40 = vmov 1   ;;  %v1016_v54 = vrot.slane %v977_v18, 4  ;;  %v734_v41 = vpop.xlane.xlu1 %733  ;;  %v8973_v24 = vld [vmem:[%s11393_s5 + $0xc] sm:$0x3] }
 0x173   : > { %7973 = vset.pattern.permute.xlu0 %v11502_v40  ;;  %v899_v62 = vmul.f32 %v8825_v59, %v861_v34  ;;  %v862_v43 = vmul.f32 %v8013_v12, %v8588_v42  ;;  %8022 = vrsqrt.f32 %v803_v52  ;;  %7357 = vmatprep.mubr.msk.bf16.mxu1 %vm457_vm0, %v1788_v0  ;;  %v804_v42 = vadd.f32 1e-06, %v772_v3  ;;  %v737_v21 = vpop.xlane.xlu0 %736  ;;  %v8982_v52 = vld [vmem:[#allocation2 + $0x28] sm:$0xff] }
 0x174   : > { %7490 = vmatmul.mubr.msk.bf16.vlgmr.msra.gmra.mrb[0].mxu0 %vm457_vm0, %v1788_v0  ;;  %v8015_v36 = vpop.eup %8014  ;;  %v936_v10 = vadd.f32 %v8835_v19, %v898_v38  ;;  %v773_v51 = vmul.f32 0.25, %v731_v16  ;;  %v1789_v58 = vrot.slane %v8955_v55, 4  ;;  %2725 = vperm.xlu1 %7970, %v1100_v37   ;;  %v1017_v20 = vsel %vm1002_vm3, %v1014_v32, %v1016_v54 }
 0x175   : > { %7522 = vmatpush3.bf16.msra.mxu0 %v8883_v45  ;;  %v937_v60 = vadd.f32 %v8835_v19, %v899_v62  ;;  %v900_v48 = vmul.f32 %v8825_v59, %v862_v43  ;;  %v863_v56 = vmul.f32 %v8015_v36, %v8634_v14  ;;  %1059 = vst.msk [vmem:[#allocation2 + $0x40] sm:$0xff] %vm457_vm0, %v1017_v20  ;;  %8024 = vrsqrt.f32 %v804_v42  ;;  %v8998_v43 = vld [vmem:[#allocation2 + $0x30] sm:$0xff] }
 0x176   : > { %v978_v16 = vpack.c.bf16 %v936_v10, %v935_v7  ;;  %v805_v37 = vadd.f32 1e-06, %v773_v51  ;;  %v1790_v45 = vsel %vm1002_vm3, %v1787_v13, %v1789_v58  ;;  %7953 = vmatprep.subr.msk.bf16.mxu0 %vm1863_vm1, %v8973_v24  ;;  %v774_v14 = vmul.f32 0.25, %v734_v41  ;;  %v740_v34 = vpop.xlane.xlu1 %739 }
 0x177   : > { %v938_v32 = vadd.f32 %v8835_v19, %v900_v48  ;;  %v901_v29 = vmul.f32 %v8825_v59, %v863_v56  ;;  %7358 = vmatmul.mubr.msk.bf16.gmra.mrb[4].mxu1 %vm457_vm0, %v1790_v45  ;;  %7493 = vmatprep.mubr.msk.bf16.mxu0 %vm457_vm0, %v1790_v45  ;;  %v775_v18 = vmul.f32 0.25, %v737_v21  ;;  %v8017_v12 = vpop.eup %8016  ;;  %v1791_v38 = vrot.slane %v8982_v52, 4  ;;  %v9012_v15 = vpop.xlane.xlu0 %742 }
 0x178   : > { %v1018_v7 = vrot.slane %v978_v16, 4  ;;  %8026 = vrsqrt.f32 %v805_v37  ;;  %v776_v13 = vmul.f32 0.25, %v740_v34  ;;  %7971 = vset.pattern.permute.xlu1 %v11500_v5  ;;  %v8019_v0 = vpop.eup %8018  ;;  %v864_v40 = vmul.f32 %v8017_v12, %v8638_v31 }
 0x179   : > { %v979_v3 = vpack.c.bf16 %v938_v32, %v937_v60  ;;  %v806_v62 = vadd.f32 1e-06, %v774_v14  ;;  %1121 = vperm.xlu1 %7971, %v8722_v63   ;;  %v9003_v41 = vsub.s32 %v1126_v35, %v8875_v9  ;;  %v865_v10 = vmul.f32 %v8019_v0, %v8646_v6  ;;  %v9017_v21 = vld [vmem:[#allocation2 + $0x38] sm:$0xff] }
 0x17a   : > { %v1019_v36 = vsel %vm1002_vm3, %v1016_v54, %v1018_v7  ;;  %v807_v42 = vadd.f32 1e-06, %v775_v18  ;;  %v1792_v5 = vsel %vm1002_vm3, %v1789_v58, %v1791_v38  ;;  %v902_v51 = vmul.f32 %v8825_v59, %v864_v40  ;;  %v2407_v35 = vpop.permute.xlu1 %2406 }
 0x17b   : > { %1060 = vst.msk [vmem:[#allocation2 + $0x48] sm:$0xff] %vm457_vm0, %v1019_v36  ;;  %v1020_v31 = vrot.slane %v979_v3, 4  ;;  %8028 = vrsqrt.f32 %v806_v62  ;;  %7361 = vmatprep.mubr.msk.bf16.mxu1 %vm457_vm0, %v1792_v5  ;;  %v808_v63 = vadd.f32 1e-06, %v776_v13  ;;  %v8021_v9 = vpop.eup %8020  ;;  %v939_v6 = vadd.f32 %v8835_v19, %v901_v29 }
 0x17c   : > { %7494 = vmatmul.mubr.msk.bf16.gmra.mrb[4].mxu0 %vm457_vm0, %v1792_v5  ;;  %v903_v54 = vmul.f32 %v8825_v59, %v865_v10  ;;  %8030 = vrsqrt.f32 %v807_v42  ;;  %v1793_v58 = vrot.slane %v8998_v43, 4  ;;  %v940_v48 = vadd.f32 %v8835_v19, %v902_v51  ;;  %v9030_v18 = vld [vmem:[#allocation2 + $0x40] sm:$0xff] }
 0x17d   : > { %v8023_v20 = vpop.eup %8022  ;;  %v1021_v60 = vsel %vm1002_vm3, %v1018_v7, %v1020_v31  ;;  %v866_v56 = vmul.f32 %v8021_v9, %v8650_v1  ;;  %8032 = vrsqrt.f32 %v808_v63  ;;  %1145 = vperm.xlu1 %7971, %v8717_v44   ;;  %v1795_v29 = vrot.slane %v9017_v21, 4 }
 0x17e   : > { %1061 = vst.msk [vmem:[#allocation2 + $0x50] sm:$0xff] %vm457_vm0, %v1021_v60  ;;  %v867_v16 = vmul.f32 %v8023_v20, %v8658_v25  ;;  %v1794_v37 = vsel %vm1002_vm3, %v1791_v38, %v1793_v58  ;;  %v980_v45 = vpack.c.bf16 %v940_v48, %v939_v6  ;;  %v2418_v14 = vpop.permute.xlu1 %2417  ;;  %v2396_v1 = vpop.permute.xlu0 %2395  ;;  %v941_v34 = vadd.f32 %v8835_v19, %v903_v54 }
 0x17f   : > { %v904_v32 = vmul.f32 %v8825_v59, %v866_v56  ;;  %7362 = vmatmul.mubr.msk.bf16.gmra.mrb[8].mxu1 %vm457_vm0, %v1794_v37  ;;  %7497 = vmatprep.mubr.msk.bf16.mxu0 %vm457_vm0, %v1794_v37  ;;  %v8025_v44 = vpop.eup %8024  ;;  %v2415_v12 = vrot.slane %v2407_v35, %v9003_v41  ;;  %v2404_v7 = vrot.slane %v2396_v1, %v9003_v41  ;;  %v1797_v10 = vrot.slane %v9030_v18, 4 }
 0x180   : > { %v905_v25 = vmul.f32 %v8825_v59, %v867_v16  ;;  %v1022_v38 = vrot.slane %v980_v45, 4  ;;  %v868_v0 = vmul.f32 %v8025_v44, %v8662_v17  ;;  %v1796_v3 = vsel %vm1002_vm3, %v1793_v58, %v1795_v29 }
 0x181   : > { %v942_v13 = vadd.f32 %v8835_v19, %v904_v32  ;;  %1157 = vperm.xlu1 %7971, %v8729_v49   ;;  %7365 = vmatprep.mubr.msk.bf16.mxu1 %vm457_vm0, %v1796_v3  ;;  %v2426_v62 = vrot.slane %v2418_v14, %v9003_v41  ;;  %v7026_v36 = vcombine.low %v2404_v7, %v2415_v12  ;;  %v2230_v5 = vsel %vm1863_vm1, %v8968_v61, 0 }
 0x182   : > { %v8027_v40 = vpop.eup %8026  ;;  %v9043_v42 = vld [vmem:[#allocation2 + $0x48] sm:$0xff]  ;;  %v1023_v51 = vsel %vm1002_vm3, %v1020_v31, %v1022_v38  ;;  %v906_v63 = vmul.f32 %v8825_v59, %v868_v0  ;;  %v2429_v35 = vpop.permute.xlu1 %2428  ;;  %v1798_v58 = vsel %vm1002_vm3, %v1795_v29, %v1797_v10  ;;  %7386 = vmatpush3.bf16.msra.mxu1 %v2230_v5  ;;  %v943_v60 = vadd.f32 %v8835_v19, %v905_v25 }
 0x183   : > { %v981_v17 = vpack.c.bf16 %v942_v13, %v941_v34  ;;  %v869_v49 = vmul.f32 %v8027_v40, %v8670_v47  ;;  %v9051_v9 = vpop.permute.xlu0 %2494  ;;  %1062 = vst.msk [vmem:[#allocation2 + $0x58] sm:$0xff] %vm457_vm0, %v1023_v51  ;;  %v2827_v6 = vshrl.u32 %v7026_v36, 16  ;;  %v2830_v54 = vshll.u32 %v7026_v36, 16 }
 0x184   : > { %7498 = vmatmul.mubr.msk.bf16.gmra.mrb[8].mxu0 %vm457_vm0, %v1796_v3  ;;  %v2437_v61 = vrot.slane %v2429_v35, %v9003_v41  ;;  %v944_v47 = vadd.f32 %v8835_v19, %v906_v63  ;;  %v1799_v48 = vrot.slane %v9043_v42, 4 }
 0x185   : > { %v8029_v31 = vpop.eup %8028  ;;  %v1024_v20 = vrot.slane %v981_v17, 4  ;;  %7501 = vmatprep.mubr.msk.bf16.mxu0 %vm457_vm0, %v1798_v58  ;;  %1181 = vperm.xlu1 %7971, %v8749_v2   ;;  %v907_v16 = vmul.f32 %v8825_v59, %v869_v49  ;;  %v2829_v44 = vrot.slane %v2827_v6, 3  ;;  %v9074_v3 = vld [vmem:[#allocation2 + $0x50] sm:$0xff] }
 0x186   : > { %v8031_v56 = vpop.eup %8030  ;;  %v870_v37 = vmul.f32 %v8029_v31, %v8674_v33  ;;  %v7027_v45 = vcombine.low %v2426_v62, %v2437_v61  ;;  %v982_v14 = vpack.c.bf16 %v944_v47, %v943_v60  ;;  %v2440_v34 = vpop.permute.xlu1 %2439  ;;  %v2832_v33 = vrot.slane %v2830_v54, 4 }
 0x187   : > { %v8033_v32 = vpop.eup %8032  ;;  %v1025_v29 = vsel %vm1002_vm3, %v1022_v38, %v1024_v20  ;;  %v871_v1 = vmul.f32 %v8031_v56, %v8682_v57  ;;  %7366 = vmatmul.mubr.msk.bf16.gmra.mrb[12].mxu1 %vm457_vm0, %v1798_v58  ;;  %v9066_v25 = vpop.permute.xlu0 %2516  ;;  %v1800_v57 = vsel %vm1002_vm3, %v1797_v10, %v1799_v48  ;;  %v945_v40 = vadd.f32 %v8835_v19, %v907_v16 }
 0x188   : > { %1063 = vst.msk [vmem:[#allocation2 + $0x60] sm:$0xff] %vm457_vm0, %v1025_v29  ;;  %v908_v2 = vmul.f32 %v8825_v59, %v870_v37  ;;  %v872_v12 = vmul.f32 %v8033_v32, %v8686_v11  ;;  %v2835_v7 = vshrl.u32 %v7027_v45, 16  ;;  %v1026_v13 = vrot.slane %v982_v14, 4  ;;  %7369 = vmatprep.mubr.msk.bf16.mxu1 %vm457_vm0, %v1800_v57 }
 0x189   : > { %v909_v38 = vmul.f32 %v8825_v59, %v871_v1  ;;  %v2838_v0 = vshll.u32 %v7027_v45, 16  ;;  %1205 = vperm.xlu1 %7971, %v8812_v23   ;;  %v2448_v23 = vrot.slane %v2440_v34, %v9003_v41  ;;  %v1801_v6 = vrot.slane %v9074_v3, 4 }
 0x18a   : > { %v946_v62 = vadd.f32 %v8835_v19, %v908_v2  ;;  %v910_v36 = vmul.f32 %v8825_v59, %v872_v12  ;;  %v2837_v5 = vrot.slane %v2835_v7, 3  ;;  %v1027_v11 = vsel %vm1002_vm3, %v1024_v20, %v1026_v13  ;;  %v2451_v10 = vpop.permute.xlu1 %2450  ;;  %v9084_v63 = vld [vmem:[#allocation2 + $0x58] sm:$0xff] }
 0x18b   : > { %v947_v51 = vadd.f32 %v8835_v19, %v909_v38  ;;  %v2840_v17 = vrot.slane %v2838_v0, 4  ;;  %v9086_v49 = vpop.permute.xlu0 %2538  ;;  %1064 = vst.msk [vmem:[#allocation2 + $0x68] sm:$0xff] %vm457_vm0, %v1027_v11  ;;  %v2459_v54 = vrot.slane %v2451_v10, %v9003_v41  ;;  %v1803_v58 = vrot.slane %v9084_v63, 4 }
 0x18c   : > { %7502 = vmatmul.mubr.msk.bf16.gmra.mrb[12].mxu0 %vm457_vm0, %v1800_v57  ;;  %v983_v59 = vpack.c.bf16 %v946_v62, %v945_v40  ;;  %v948_v35 = vadd.f32 %v8835_v19, %v910_v36  ;;  %v1802_v20 = vsel %vm1002_vm3, %v1799_v48, %v1801_v6  ;;  %v9095_v47 = vor.u32 %v2832_v33, %v2829_v44 }
 0x18d   : > { %1229 = vperm.xlu1 %7971, %v8734_v50   ;;  %v7028_v60 = vcombine.low %v2448_v23, %v2459_v54  ;;  %v2841_v56 = vor.u32 %v2840_v17, %v2837_v5  ;;  %7505 = vmatprep.mubr.msk.bf16.mxu0 %vm457_vm0, %v1802_v20  ;;  %v1804_v19 = vsel %vm1002_vm3, %v1801_v6, %v1803_v58  ;;  %v8166_v6 = vld [vmem:[%s11390_s2 + $0x44] sm:$0xf] }
 0x18e   : > { %v1028_v61 = vrot.slane %v983_v59, 4  ;;  %v984_v31 = vpack.c.bf16 %v948_v35, %v947_v51  ;;  %v2986_v33 = vmul.bf16 %v9095_v47, %v8842_v30 }
 0x18f   : > { %7370 = vmatmul.mubr.msk.bf16.gmra.mrb[16].mxu1 %vm457_vm0, %v1802_v20  ;;  %v9100_v16 = vld [vmem:[#allocation2 + $0x60] sm:$0xff]  ;;  %v9102_v50 = vpop.permute.xlu0 %2560  ;;  %v2844_v48 = vshrl.u32 %v7028_v60, 16  ;;  %v2847_v32 = vshll.u32 %v7028_v60, 16  ;;  %v9116_v34 = vsel %vm2028_vm4, %v9095_v47, %v2841_v56 }
 0x190   : > { %v1029_v37 = vsel %vm1002_vm3, %v1026_v13, %v1028_v61  ;;  %v9105_v45 = vrot.slane %v984_v31, 4  ;;  %7373 = vmatprep.mubr.msk.bf16.mxu1 %vm457_vm0, %v1804_v19  ;;  %v1805_v29 = vrot.slane %v9100_v16, 4  ;;  %v2987_v57 = vmul.bf16 %v9116_v34, %v8890_v46 }
 0x191   : > { %1065 = vst.msk [vmem:[#allocation2 + $0x70] sm:$0xff] %vm457_vm0, %v1029_v37  ;;  %1253 = vperm.xlu1 %7971, %v8744_v39   ;;  %v2846_v1 = vrot.slane %v2844_v48, 3  ;;  %v2849_v44 = vrot.slane %v2847_v32, 4  ;;  %v3006_v40 = vshrl.u32 %v2986_v33, 16  ;;  %v3009_v62 = vshll.u32 %v2986_v33, 16 }
 0x192   : > { %v1031_v14 = vsel %vm1002_vm3, %v1028_v61, %v9105_v45  ;;  %v1806_v2 = vsel %vm1002_vm3, %v1803_v58, %v1805_v29  ;;  %v9120_v12 = vld [vmem:[#allocation2 + $0x68] sm:$0xff]  ;;  %v3014_v46 = vshrl.u32 %v2987_v57, 16  ;;  %v3017_v51 = vshll.u32 %v2987_v57, 16 }
 0x193   : > { %1066 = vst.msk [vmem:[#allocation2 + $0x78] sm:$0xff] %vm457_vm0, %v1031_v14  ;;  %v9122_v39 = vpop.permute.xlu0 %2582  ;;  %v9126_v7 = vor.u32 %v2849_v44, %v2846_v1  ;;  %v1807_v13 = vrot.slane %v9120_v12, 4  ;;  %v3008_v59 = vrot.slane %v3006_v40, 4  ;;  %v3011_v35 = vrot.slane %v3009_v62, 5  ;;  %v8167_v48 = vld [vmem:[%s11390_s2 + $0x4c] sm:$0xf] }
 0x194   : > { %7506 = vmatmul.mubr.msk.bf16.gmra.mrb[16].mxu0 %vm457_vm0, %v1804_v19  ;;  %v3019_v58 = vrot.slane %v3017_v51, 5  ;;  %v8168_v44 = vld [vmem:[%s11390_s2 + $0x54] sm:$0xf]  ;;  %v777_v33 = vmul.f32 0.25, %v9012_v15  ;;  %v9199_v51 = vld [vmem:[#allocation2 + $0x18] sm:$0xff] }
 0x195   : > { %7509 = vmatprep.mubr.msk.bf16.mxu0 %vm457_vm0, %v1806_v2  ;;  %1277 = vperm.xlu1 %7971, %v8755_v28   ;;  %v9133_v38 = vsel %vm2028_vm4, %v2841_v56, %v9126_v7  ;;  %v1808_v0 = vsel %vm1002_vm3, %v1805_v29, %v1807_v13  ;;  %v3012_v60 = vor.u32 %v3011_v35, %v3008_v59  ;;  %v9209_v35 = vld [vmem:[%s11393_s5 + $0x4] sm:$0x3] }
 0x196   : > { %v2988_v28 = vmul.bf16 %v9133_v38, %v8916_v27  ;;  %v809_v62 = vadd.f32 1e-06, %v777_v33  ;;  %v5277_v59 = vmul.bf16 %v9199_v51, %v9116_v34  ;;  %7949 = vmatprep.subr.msk.bf16.mxu1 %vm1863_vm1, %v9209_v35  ;;  %v4132_v33 = vmul.bf16 %v9116_v34, %v8916_v27 }
 0x197   : > { %7374 = vmatmul.mubr.msk.bf16.gmra.mrb[20].mxu1 %vm457_vm0, %v1806_v2  ;;  %v9139_v30 = vpop.permute.xlu0 %2604 }
 0x198   : > { %7377 = vmatprep.mubr.msk.bf16.mxu1 %vm457_vm0, %v1808_v0  ;;  %v9142_v36 = vld [vmem:[#allocation2 + $0x70] sm:$0xff]  ;;  %v3023_v61 = vshrl.u32 %v2988_v28, 16  ;;  %v3026_v31 = vshll.u32 %v2988_v28, 16  ;;  %v8170_v28 = vld [vmem:[%s11390_s2 + $0x64] sm:$0xf]  ;;  %8034 = vrsqrt.f32 %v809_v62  ;;  %v4159_v27 = vshrl.u32 %v4132_v33, 16 }
 0x199   : > { %1301 = vperm.xlu1 %7971, %v8762_v22   ;;  %v1809_v5 = vrot.slane %v9142_v36, 4  ;;  %v3016_v22 = vrot.slane %v3014_v46, 4 }
 0x19a   : > { %v9148_v11 = vld [vmem:[#allocation2 + $0x78] sm:$0xff]  ;;  %v3025_v19 = vrot.slane %v3023_v61, 4  ;;  %v3028_v37 = vrot.slane %v3026_v31, 5  ;;  %v8172_v31 = vld [vmem:[%s11390_s2 + $0x74] sm:$0xf] }
 0x19b   : > { %v1810_v17 = vsel %vm1002_vm3, %v1807_v13, %v1809_v5  ;;  %v9153_v23 = vrot.slane %v9148_v11, 4  ;;  %v9155_v10 = vpop.permute.xlu0 %2626  ;;  %v3020_v56 = vor.u32 %v3019_v58, %v3016_v22  ;;  %v8169_v13 = vld [vmem:[%s11390_s2 + $0x5c] sm:$0xf]  ;;  %v5307_v58 = vshll.u32 %v5277_v59, 16 }
 0x19c   : > { %7510 = vmatmul.mubr.msk.bf16.gmra.mrb[20].mxu0 %vm457_vm0, %v1808_v0  ;;  %v9173_v29 = vor.u32 %v3028_v37, %v3025_v19  ;;  %v4978_v0 = vld [vmem:[#allocation2 + $0x10] sm:$0xf0]  ;;  %v5278_v19 = vmul.bf16 %v9133_v38, %v8955_v55 }
 0x19d   : > { %7513 = vmatprep.mubr.msk.bf16.mxu0 %vm457_vm0, %v1810_v17  ;;  %1325 = vperm.xlu1 %7971, %v8166_v6   ;;  %v1812_v54 = vsel %vm1002_vm3, %v1809_v5, %v9153_v23  ;;  %v9171_v32 = vsel %vm1583_vm5, %v3012_v60, %v3020_v56  ;;  %v5276_v40 = vmul.bf16 %v4978_v0, %v9095_v47 }
 0x19e   : > { %11503 = vst [vmem:[#allocation35_spill] sm:$0xff] %v9171_v32  ;;  %11504 = vst [vmem:[#allocation36_spill] sm:$0xff] %v9173_v29  ;;  %v9180_v1 = vsel %vm1583_vm5, %v3020_v56, %v9173_v29  ;;  %v5309_v56 = vrot.slane %v5307_v58, 5 }
 0x19f   : > { %7378 = vmatmul.mubr.msk.bf16.gmra.mrb[24].mxu1 %vm457_vm0, %v1810_v17  ;;  %v9164_v20 = vpop.permute.xlu0 %2648  ;;  %11505 = vst [vmem:[#allocation37_spill] sm:$0xff] %v9180_v1  ;;  %v5296_v46 = vshrl.u32 %v5276_v40, 16  ;;  %v5299_v15 = vshll.u32 %v5276_v40, 16  ;;  %v8171_v17 = vld [vmem:[%s11390_s2 + $0x6c] sm:$0xf]  ;;  %v4133_v40 = vmul.bf16 %v9133_v38, %v8940_v26 }
 0x1a0   : > { %7381 = vmatprep.mubr.msk.bf16.mxu1 %vm457_vm0, %v1812_v54 }
 0x1a1   : > { %1349 = vperm.xlu1 %7971, %v8167_v48   ;;  %v5298_v22 = vrot.slane %v5296_v46, 4  ;;  %v5301_v6 = vrot.slane %v5299_v15, 5  ;;  %v5313_v46 = vshrl.u32 %v5278_v19, 16  ;;  %v5316_v15 = vshll.u32 %v5278_v19, 16 }
 0x1a2   : > { %v8035_v62 = vpop.eup %8034  ;;  %v4161_v19 = vrot.slane %v4159_v27, 4 }
 0x1a3   : > { %v9176_v14 = vpop.permute.xlu0 %2670  ;;  %v5302_v37 = vor.u32 %v5301_v6, %v5298_v22  ;;  %v4162_v22 = vshll.u32 %v4132_v33, 16  ;;  %v5315_v6 = vrot.slane %v5313_v46, 4  ;;  %v873_v58 = vmul.f32 %v8035_v62, %v8694_v4  ;;  %v8174_v4 = vld [vmem:[%s11391_s3] ss:$0 sm:$0xff] }
 0x1a4   : > { %7514 = vmatmul.mubr.msk.bf16.gmra.mrb[24].mxu0 %vm457_vm0, %v1812_v54  ;;  %v5304_v54 = vshrl.u32 %v5277_v59, 16 }
 0x1a5   : > { %1373 = vperm.xlu1 %7971, %v8168_v44  }
 0x1a6   : > { %v5306_v60 = vrot.slane %v5304_v54, 4  ;;  %v5318_v54 = vrot.slane %v5316_v15, 5 }
 0x1a7   : > { %v9185_v2 = vpop.permute.xlu0 %2692 }
 0x1a8   : > { %v5310_v48 = vor.u32 %v5309_v56, %v5306_v60  ;;  %v4171_v60 = vshll.u32 %v4133_v40, 16 }
 0x1a9   : > { %1397 = vperm.xlu1 %7971, %v8169_v13   ;;  %v8173_v13 = vld [vmem:[%s11390_s2 + $0x7c] sm:$0xf] }
 0x1aa   : > { %v9228_v0 = vsel %vm1583_vm5, %v5302_v37, %v5310_v48  ;;  %v4173_v46 = vrot.slane %v4171_v60, 5  ;;  %v9263_v60 = vsel %vm1863_vm1, %v8973_v24, 0 }
 0x1ab   : > { %v9191_v57 = vpop.permute.xlu0 %2714  ;;  %11506 = vst [vmem:[#allocation38_spill] sm:$0xff] %v9228_v0  ;;  %v4164_v0 = vrot.slane %v4162_v22, 5 }
 0x1ad   : > { %1421 = vperm.xlu1 %7971, %v8170_v28   ;;  %v4131_v28 = vmul.bf16 %v8926_v8, %v9095_v47  ;;  %v4165_v22 = vor.u32 %v4164_v0, %v4161_v19  ;;  %v2547_v0 = vrot.slane %v9086_v49, %v9003_v41 }
 0x1af   : > { %v9197_v5 = vpop.permute.xlu0 %2736  ;;  %v4151_v38 = vshrl.u32 %v4131_v28, 16  ;;  %v4154_v37 = vshll.u32 %v4131_v28, 16 }
 0x1b1   : > { %1445 = vperm.xlu1 %7971, %v8171_v17   ;;  %v4153_v28 = vrot.slane %v4151_v38, 4  ;;  %v4156_v15 = vrot.slane %v4154_v37, 5 }
 0x1b3   : > { %v9211_v61 = vpop.permute.xlu0 %1133  ;;  %v4157_v37 = vor.u32 %v4156_v15, %v4153_v28  ;;  %v9286_v15 = vld [vmem:[%s11393_s5 + $0xe] sm:$0x3] }
 0x1b5   : > { %1469 = vperm.xlu1 %7971, %v8172_v31   ;;  %v4168_v31 = vshrl.u32 %v4133_v40, 16  ;;  %v911_v40 = vmul.f32 %v8174_v4, %v873_v58  ;;  %v2503_v58 = vrot.slane %v9051_v9, %v9003_v41  ;;  %v9281_v28 = vsel %vm1583_vm5, %v4157_v37, %v4165_v22 }
 0x1b7   : > { %v9220_v44 = vpop.permute.xlu0 %1169  ;;  %v4170_v62 = vrot.slane %v4168_v31, 4 }
 0x1b9   : > { %1493 = vperm.xlu1 %7971, %v8173_v13   ;;  %v9237_v13 = vor.u32 %v5318_v54, %v5315_v6  ;;  %v9259_v31 = vor.u32 %v4173_v46, %v4170_v62 }
 0x1bb   : > { %v746_v17 = vpop.xlane.xlu1 %745  ;;  %v9234_v59 = vpop.permute.xlu0 %1193  ;;  %11507 = vst [vmem:[#allocation39_spill] sm:$0xff] %v9237_v13  ;;  %v9243_v33 = vsel %vm1583_vm5, %v5310_v48, %v9237_v13  ;;  %v8175_v48 = vld [vmem:[%s11392_s4] ss:$0 sm:$0xff] }
 0x1bc   : > { %v778_v34 = vmul.f32 0.25, %v746_v17  ;;  %11508 = vst [vmem:[#allocation40_spill] sm:$0xff] %v9243_v33  ;;  %v9255_v54 = vadd.f32 %v8175_v48, %v911_v40 }
 0x1be   : > { %v810_v56 = vadd.f32 1e-06, %v778_v34 }
 0x1bf   : > { %v2462_v8 = vpop.permute.xlu1 %2461  ;;  %v9239_v47 = vpop.permute.xlu0 %1217 }
 0x1c0   : > { %8036 = vrsqrt.f32 %v810_v56  ;;  %v2470_v6 = vrot.slane %v2462_v8, %v9003_v41  ;;  %v2525_v56 = vrot.slane %v9066_v25, %v9003_v41 }
 0x1c3   : > { %v2473_v17 = vpop.permute.xlu1 %2472  ;;  %v9248_v34 = vpop.permute.xlu0 %1241 }
 0x1c4   : > { %v2481_v27 = vrot.slane %v2473_v17, %v9003_v41 }
 0x1c6   : > { %v7029_v38 = vcombine.low %v2470_v6, %v2481_v27 }
 0x1c7   : > { %v2484_v40 = vpop.permute.xlu1 %2483  ;;  %v9277_v62 = vpop.permute.xlu0 %1265 }
 0x1c8   : > { %v2853_v25 = vshrl.u32 %v7029_v38, 16  ;;  %v2856_v46 = vshll.u32 %v7029_v38, 16  ;;  %v2492_v49 = vrot.slane %v2484_v40, %v9003_v41  ;;  %v9296_v38 = vsel %vm1583_vm5, %v4165_v22, %v9259_v31 }
 0x1c9   : > { %v9307_v22 = vsel %vm1863_vm1, %v9209_v35, 0 }
 0x1ca   : > { %v8037_v37 = vpop.eup %8036  ;;  %v2855_v40 = vrot.slane %v2853_v25, 3  ;;  %v2858_v24 = vrot.slane %v2856_v46, 4  ;;  %v7030_v19 = vcombine.low %v2492_v49, %v2503_v58  ;;  %v9311_v25 = vsel %vm1863_vm1, %v9286_v15, 0 }
 0x1cb   : > { %v874_v17 = vmul.f32 %v8037_v37, %v8781_v53  ;;  %v2506_v8 = vpop.permute.xlu1 %2505  ;;  %v9303_v13 = vpop.permute.xlu0 %1289 }
 0x1cc   : > { %v2859_v58 = vor.u32 %v2858_v24, %v2855_v40  ;;  %v2862_v46 = vshrl.u32 %v7030_v19, 16  ;;  %v2865_v49 = vshll.u32 %v7030_v19, 16  ;;  %v2514_v9 = vrot.slane %v2506_v8, %v9003_v41 }
 0x1cd   : > { %v912_v53 = vmul.f32 %v8174_v4, %v874_v17 }
 0x1ce   : > { %v9322_v27 = vsel %vm2028_vm4, %v9126_v7, %v2859_v58  ;;  %v2864_v33 = vrot.slane %v2862_v46, 3  ;;  %v2867_v24 = vrot.slane %v2865_v49, 4  ;;  %v7031_v40 = vcombine.low %v2514_v9, %v2525_v56 }
 0x1cf   : > { %11509 = vst [vmem:[#allocation41_spill] sm:$0xff] %v9322_v27  ;;  %v950_v19 = vadd.f32 %v8175_v48, %v912_v53  ;;  %v2528_v1 = vpop.permute.xlu1 %2527  ;;  %v4134_v17 = vmul.bf16 %v9322_v27, %v8955_v55  ;;  %v9330_v6 = vpop.permute.xlu0 %1313 }
 0x1d0   : > { %v2868_v35 = vor.u32 %v2867_v24, %v2864_v33  ;;  %v2871_v37 = vshrl.u32 %v7031_v40, 16  ;;  %v2874_v7 = vshll.u32 %v7031_v40, 16  ;;  %v2536_v46 = vrot.slane %v2528_v1, %v9003_v41 }
 0x1d1   : > { %v985_v56 = vpack.c.bf16 %v950_v19, %v9255_v54  ;;  %v4177_v48 = vshrl.u32 %v4134_v17, 16  ;;  %v4180_v9 = vshll.u32 %v4134_v17, 16 }
 0x1d2   : > { %v9337_v53 = vsel %vm2028_vm4, %v2859_v58, %v2868_v35  ;;  %v2873_v8 = vrot.slane %v2871_v37, 3  ;;  %v2876_v4 = vrot.slane %v2874_v7, 4  ;;  %v7032_v55 = vcombine.low %v2536_v46, %v2547_v0 }
 0x1d3   : > { %11510 = vst [vmem:[#allocation42_spill] sm:$0xff] %v9337_v53  ;;  %v1032_v29 = vrot.slane %v985_v56, 4  ;;  %v2550_v32 = vpop.permute.xlu1 %2549  ;;  %v4179_v33 = vrot.slane %v4177_v48, 4  ;;  %v4182_v24 = vrot.slane %v4180_v9, 5  ;;  %v4135_v1 = vmul.bf16 %v9337_v53, %v8982_v52  ;;  %v9341_v40 = vpop.permute.xlu0 %1337 }
 0x1d4   : > { %v2877_v54 = vor.u32 %v2876_v4, %v2873_v8  ;;  %v2880_v19 = vshrl.u32 %v7032_v55, 16  ;;  %v2883_v17 = vshll.u32 %v7032_v55, 16  ;;  %v2558_v49 = vrot.slane %v2550_v32, %v9003_v41 }
 0x1d5   : > { %v1033_v58 = vsel %vm1002_vm3, %v9105_v45, %v1032_v29  ;;  %1069 = vst.msk [vmem:[#allocation2 + $0x88] sm:$0xf] %vm1068_vm6, %v1032_v29  ;;  %v4186_v37 = vshrl.u32 %v4135_v1, 16  ;;  %v4189_v7 = vshll.u32 %v4135_v1, 16  ;;  %v11512_v32 = vrot.slane %v9102_v50, %v9003_v41 }
 0x1d6   : > { %1067 = vst.msk [vmem:[#allocation2 + $0x80] sm:$0xff] %vm457_vm0, %v1033_v58  ;;  %v9351_v52 = vsel %vm2028_vm4, %v2868_v35, %v2877_v54  ;;  %v2882_v4 = vrot.slane %v2880_v19, 3  ;;  %v2885_v8 = vrot.slane %v2883_v17, 4  ;;  %v4183_v45 = vor.u32 %v4182_v24, %v4179_v33 }
 0x1d7   : > { %11511 = vst [vmem:[#allocation43_spill] sm:$0xff] %v9351_v52  ;;  %v7033_v46 = vcombine.low %v2558_v49, %v11512_v32  ;;  %v2572_v56 = vpop.permute.xlu1 %2571  ;;  %v4136_v29 = vmul.bf16 %v9351_v52, %v8998_v43  ;;  %v9362_v9 = vmul.bf16 %v9322_v27, %v8940_v26  ;;  %v9365_v17 = vpop.permute.xlu0 %1361  ;;  %v4188_v50 = vrot.slane %v4186_v37, 4 }
 0x1d8   : > { %v2886_v35 = vor.u32 %v2885_v8, %v2882_v4  ;;  %v2580_v19 = vrot.slane %v2572_v56, %v9003_v41  ;;  %v4191_v49 = vrot.slane %v4189_v7, 5  ;;  %v11513_v26 = vrot.slane %v9122_v39, %v9003_v41 }
 0x1d9   : > { %v2889_v55 = vshrl.u32 %v7033_v46, 16  ;;  %v2892_v1 = vshll.u32 %v7033_v46, 16  ;;  %v4195_v33 = vshrl.u32 %v4136_v29, 16  ;;  %v4198_v24 = vshll.u32 %v4136_v29, 16 }
 0x1da   : > { %v9368_v43 = vsel %vm2028_vm4, %v2877_v54, %v2886_v35  ;;  %v7034_v48 = vcombine.low %v2580_v19, %v11513_v26  ;;  %v9375_v8 = vsel %vm1583_vm5, %v9259_v31, %v4183_v45  ;;  %v4192_v19 = vor.u32 %v4191_v49, %v4188_v50 }
 0x1db   : > { %v2891_v58 = vrot.slane %v2889_v55, 3  ;;  %v2894_v32 = vrot.slane %v2892_v1, 4  ;;  %v2594_v4 = vpop.permute.xlu1 %2593  ;;  %v4197_v46 = vrot.slane %v4195_v33, 4  ;;  %v4200_v56 = vrot.slane %v4198_v24, 5 }
 0x1dc   : > { %v4137_v37 = vmul.bf16 %v9368_v43, %v9017_v21  ;;  %v2898_v29 = vshrl.u32 %v7034_v48, 16  ;;  %v2901_v54 = vshll.u32 %v7034_v48, 16  ;;  %v2602_v55 = vrot.slane %v2594_v4, %v9003_v41  ;;  %v3417_v1 = vld [vmem:[#allocation2 + $0x88] sm:$0xf] }
 0x1dd   : > { %v2895_v7 = vor.u32 %v2894_v32, %v2891_v58  ;;  %v1118_v0 = vld [vmem:[#allocation2 + $0x80] sm:$0xf]  ;;  %v3884_v39 = vrot.slane %v3417_v1, 4  ;;  %v11514_v33 = vrot.slane %v9139_v30, %v9003_v41  ;;  %v9385_v21 = vor.u32 %v4200_v56, %v4197_v46  ;;  %v9387_v58 = vpop.permute.xlu0 %1385 }
 0x1de   : > { %v9380_v27 = vld [vmem:[#allocation2 + $0x80] sm:$0xff]  ;;  %v4204_v26 = vshrl.u32 %v4137_v37, 16  ;;  %v4207_v52 = vshll.u32 %v4137_v37, 16  ;;  %v2900_v31 = vrot.slane %v2898_v29, 3  ;;  %v2903_v53 = vrot.slane %v2901_v54, 4 }
 0x1df   : > { %v7035_v24 = vcombine.low %v2602_v55, %v11514_v33  ;;  %v9390_v48 = vsel %vm2028_vm4, %v2886_v35, %v2895_v7  ;;  %v2616_v32 = vpop.permute.xlu1 %2615  ;;  %v1813_v4 = vrot.slane %v1118_v0, 4  ;;  %v3882_v1 = vrot.slane %v9380_v27, 4 }
 0x1e0   : > { %v4206_v50 = vrot.slane %v4204_v26, 4  ;;  %v2904_v49 = vor.u32 %v2903_v53, %v2900_v31  ;;  %v2624_v54 = vrot.slane %v2616_v32, %v9003_v41  ;;  %v4209_v35 = vrot.slane %v4207_v52, 5 }
 0x1e1   : > { %v2907_v37 = vshrl.u32 %v7035_v24, 16  ;;  %v2910_v29 = vshll.u32 %v7035_v24, 16  ;;  %v1814_v30 = vsel %vm1002_vm3, %v9153_v23, %v1813_v4  ;;  %v3883_v46 = vsel %vm1002_vm3, %v9153_v23, %v3882_v1 }
 0x1e2   : > { %v3885_v56 = vsel %vm1002_vm3, %v3882_v1, %v3884_v39  ;;  %v9400_v55 = vsel %vm2028_vm4, %v2895_v7, %v2904_v49  ;;  %v11515_v53 = vrot.slane %v9155_v10, %v9003_v41  ;;  %7382 = vmatmul.mubr.msk.bf16.gmra.mrb[28].mxu1 %vm457_vm0, %v1814_v30  ;;  %7517 = vmatprep.mubr.msk.bf16.mxu0 %vm457_vm0, %v3883_v46 }
 0x1e3   : > { %v2909_v0 = vrot.slane %v2907_v37, 3  ;;  %v2912_v33 = vrot.slane %v2910_v29, 4  ;;  %7518 = vmatmul.mubr.msk.bf16.gmra.mrb[28].mxu0 %vm457_vm0, %v3885_v56  ;;  %v2638_v31 = vpop.permute.xlu1 %2637  ;;  %v9409_v23 = vsel %vm1583_vm5, %v4183_v45, %v4192_v19  ;;  %v9413_v52 = vsel %vm1583_vm5, %v4192_v19, %v9385_v21  ;;  %v9422_v45 = vpop.permute.xlu0 %1409 }
 0x1e4   : > { %v7036_v26 = vcombine.low %v2624_v54, %v11515_v53  ;;  %v1346_v7 = vrot.slane %v9341_v40, %v9003_v41  ;;  %v4138_v10 = vmul.bf16 %v9390_v48, %v9030_v18  ;;  %v2646_v4 = vrot.slane %v2638_v31, %v9003_v41  ;;  %7523 = vmatprep.mubr.msk.bf16.mxu0 %vm457_vm0, %v9281_v28 }
 0x1e5   : > { %v2913_v39 = vor.u32 %v2912_v33, %v2909_v0  ;;  %v4210_v1 = vor.u32 %v4209_v35, %v4206_v50  ;;  %v4139_v29 = vmul.bf16 %v9400_v55, %v9043_v42  ;;  %v11516_v46 = vrot.slane %v9164_v20, %v9003_v41 }
 0x1e6   : > { %v2916_v24 = vshrl.u32 %v7036_v26, 16  ;;  %v2919_v32 = vshll.u32 %v7036_v26, 16  ;;  %v4213_v37 = vshrl.u32 %v4138_v10, 16  ;;  %v4216_v19 = vshll.u32 %v4138_v10, 16 }
 0x1e7   : > { %v9427_v54 = vsel %vm2028_vm4, %v2904_v49, %v2913_v39  ;;  %v7037_v56 = vcombine.low %v2646_v4, %v11516_v46  ;;  %v2660_v0 = vpop.permute.xlu1 %2659  ;;  %v4222_v53 = vshrl.u32 %v4139_v29, 16  ;;  %v4225_v26 = vshll.u32 %v4139_v29, 16 }
 0x1e8   : > { %v2918_v18 = vrot.slane %v2916_v24, 3  ;;  %v2921_v30 = vrot.slane %v2919_v32, 4  ;;  %v4215_v33 = vrot.slane %v4213_v37, 4  ;;  %v4218_v28 = vrot.slane %v4216_v19, 5 }
 0x1e9   : > { %v2925_v35 = vshrl.u32 %v7037_v56, 16  ;;  %v2928_v31 = vshll.u32 %v7037_v56, 16  ;;  %v2668_v10 = vrot.slane %v2660_v0, %v9003_v41  ;;  %v4224_v49 = vrot.slane %v4222_v53, 4 }
 0x1ea   : > { %v2922_v50 = vor.u32 %v2921_v30, %v2918_v18  ;;  %v4227_v24 = vrot.slane %v4225_v26, 5  ;;  %v4140_v32 = vmul.bf16 %v9427_v54, %v9074_v3  ;;  %v11517_v37 = vrot.slane %v9176_v14, %v9003_v41  ;;  %v9440_v18 = vpop.permute.xlu0 %1433 }
 0x1eb   : > { %v2927_v20 = vrot.slane %v2925_v35, 3  ;;  %v2930_v4 = vrot.slane %v2928_v31, 4  ;;  %v4219_v29 = vor.u32 %v4218_v28, %v4215_v33  ;;  %7524 = vmatmul.mubr.msk.bf16.vlgmr.msra.gmra.mrb[0].mxu0 %vm457_vm0, %v9296_v38  ;;  %v2682_v46 = vpop.permute.xlu1 %2681 }
 0x1ec   : > { %v7038_v19 = vcombine.low %v2668_v10, %v11517_v37  ;;  %v9443_v30 = vsel %vm2028_vm4, %v2913_v39, %v2922_v50  ;;  %v4228_v56 = vor.u32 %v4227_v24, %v4224_v49  ;;  %v4231_v0 = vshrl.u32 %v4140_v32, 16  ;;  %7556 = vmatpush3.bf16.msra.mxu0 %v9263_v60  ;;  %7527 = vmatprep.mubr.msk.bf16.mxu0 %vm457_vm0, %v9375_v8 }
 0x1ed   : > { %v4234_v53 = vshll.u32 %v4140_v32, 16  ;;  %v2931_v3 = vor.u32 %v2930_v4, %v2927_v20  ;;  %v2690_v14 = vrot.slane %v2682_v46, %v9003_v41  ;;  %v9453_v39 = vsel %vm1583_vm5, %v9385_v21, %v4210_v1  ;;  %7954 = vmatprep.subr.msk.bf16.mxu0 %vm1863_vm1, %v9286_v15 }
 0x1ee   : > { %v2934_v26 = vshrl.u32 %v7038_v19, 16  ;;  %v2937_v35 = vshll.u32 %v7038_v19, 16  ;;  %v4233_v33 = vrot.slane %v4231_v0, 4  ;;  %v11518_v8 = vrot.slane %v9185_v2, %v9003_v41  ;;  %v9476_v2 = vpop.permute.xlu0 %1457 }
 0x1ef   : > { %v4236_v28 = vrot.slane %v4234_v53, 5  ;;  %v9460_v31 = vsel %vm2028_vm4, %v2922_v50, %v2931_v3  ;;  %v2704_v24 = vpop.permute.xlu1 %2703  ;;  %v9466_v21 = vsel %vm1583_vm5, %v4210_v1, %v4219_v29  ;;  %v9469_v32 = vsel %vm1583_vm5, %v4219_v29, %v4228_v56 }
 0x1f0   : > { %v2936_v60 = vrot.slane %v2934_v26, 3  ;;  %v2939_v10 = vrot.slane %v2937_v35, 4  ;;  %v7039_v49 = vcombine.low %v2690_v14, %v11518_v8  ;;  %v4141_v20 = vmul.bf16 %v9443_v30, %v9084_v63 }
 0x1f1   : > { %v4142_v15 = vmul.bf16 %v9460_v31, %v9100_v16  ;;  %v2712_v19 = vrot.slane %v2704_v24, %v9003_v41  ;;  %v4237_v46 = vor.u32 %v4236_v28, %v4233_v33  ;;  %v11519_v35 = vrot.slane %v9191_v57, %v9003_v41 }
 0x1f2   : > { %v2940_v50 = vor.u32 %v2939_v10, %v2936_v60  ;;  %v2943_v4 = vshrl.u32 %v7039_v49, 16  ;;  %v2946_v37 = vshll.u32 %v7039_v49, 16  ;;  %v4240_v0 = vshrl.u32 %v4141_v20, 16 }
 0x1f3   : > { %v4243_v1 = vshll.u32 %v4141_v20, 16  ;;  %v4249_v53 = vshrl.u32 %v4142_v15, 16  ;;  %v7040_v63 = vcombine.low %v2712_v19, %v11519_v35  ;;  %7528 = vmatmul.mubr.msk.bf16.gmra.mrb[4].mxu0 %vm457_vm0, %v9409_v23  ;;  %v2726_v60 = vpop.permute.xlu1 %2725  ;;  %v4252_v10 = vshll.u32 %v4142_v15, 16 }
 0x1f4   : > { %v2945_v26 = vrot.slane %v2943_v4, 3  ;;  %v2948_v29 = vrot.slane %v2946_v37, 4  ;;  %v9484_v14 = vsel %vm2028_vm4, %v2931_v3, %v2940_v50  ;;  %v4242_v33 = vrot.slane %v4240_v0, 4  ;;  %7531 = vmatprep.mubr.msk.bf16.mxu0 %vm457_vm0, %v9413_v52 }
 0x1f5   : > { %v4245_v28 = vrot.slane %v4243_v1, 5  ;;  %v2952_v49 = vshrl.u32 %v7040_v63, 16  ;;  %v2955_v24 = vshll.u32 %v7040_v63, 16  ;;  %v2734_v20 = vrot.slane %v2726_v60, %v9003_v41 }
 0x1f6   : > { %v2949_v8 = vor.u32 %v2948_v29, %v2945_v26  ;;  %v9492_v57 = vsel %vm1583_vm5, %v4228_v56, %v4237_v46  ;;  %v4251_v4 = vrot.slane %v4249_v53, 4  ;;  %v4254_v23 = vrot.slane %v4252_v10, 5  ;;  %v9502_v26 = vpop.permute.xlu0 %1481 }
 0x1f7   : > { %v2954_v15 = vrot.slane %v2952_v49, 3  ;;  %v2957_v19 = vrot.slane %v2955_v24, 4  ;;  %v11520_v0 = vrot.slane %v9197_v5, %v9003_v41  ;;  %v4246_v29 = vor.u32 %v4245_v28, %v4242_v33 }
 0x1f8   : > { %v9497_v37 = vsel %vm2028_vm4, %v2940_v50, %v2949_v8  ;;  %v1122_v52 = vpop.permute.xlu1 %1121  ;;  %v4143_v53 = vmul.bf16 %v9484_v14, %v9120_v12  ;;  %v4255_v5 = vor.u32 %v4254_v23, %v4251_v4  ;;  %v11521_v12 = vrot.slane %v9211_v61, %v9003_v41 }
 0x1f9   : > { %v7041_v1 = vcombine.low %v2734_v20, %v11520_v0  ;;  %v4144_v50 = vmul.bf16 %v9497_v37, %v9142_v36  ;;  %v2958_v35 = vor.u32 %v2957_v19, %v2954_v15  ;;  %v1130_v10 = vrot.slane %v1122_v52, %v9003_v41 }
 0x1fa   : > { %v4258_v24 = vshrl.u32 %v4143_v53, 16  ;;  %v4261_v33 = vshll.u32 %v4143_v53, 16 }
 0x1fb   : > { %v2961_v63 = vshrl.u32 %v7041_v1, 16  ;;  %v2964_v60 = vshll.u32 %v7041_v1, 16  ;;  %v9514_v28 = vsel %vm2028_vm4, %v2949_v8, %v2958_v35  ;;  %v6977_v36 = vcombine.low %v1130_v10, %v11521_v12  ;;  %7532 = vmatmul.mubr.msk.bf16.gmra.mrb[8].mxu0 %vm457_vm0, %v9453_v39  ;;  %v1102_v12 = vld [vmem:[#allocation2] sm:$0xf8] }
 0x1fc   : > { %v1146_v15 = vpop.permute.xlu1 %1145  ;;  %v4260_v19 = vrot.slane %v4258_v24, 4  ;;  %v4263_v4 = vrot.slane %v4261_v33, 5  ;;  %v4267_v23 = vshrl.u32 %v4144_v50, 16  ;;  %v4270_v1 = vshll.u32 %v4144_v50, 16  ;;  %7535 = vmatprep.mubr.msk.bf16.mxu0 %vm457_vm0, %v9466_v21  ;;  %v4130_v50 = vld [vmem:[#allocation2 + $0x88] sm:$0x1f] }
 0x1fd   : > { %v2963_v20 = vrot.slane %v2961_v63, 3  ;;  %v2966_v0 = vrot.slane %v2964_v60, 4  ;;  %v1585_v53 = vshrl.u32 %v6977_v36, 16  ;;  %v1588_v49 = vshll.u32 %v6977_v36, 16 }
 0x1fe   : > { %v9526_v8 = vsel %vm1583_vm5, %v4237_v46, %v4246_v29  ;;  %v1154_v61 = vrot.slane %v1146_v15, %v9003_v41  ;;  %v9530_v63 = vsel %vm1583_vm5, %v4246_v29, %v4255_v5  ;;  %v4264_v39 = vor.u32 %v4263_v4, %v4260_v19 }
 0x1ff   : > { %v9521_v52 = vor.u32 %v2966_v0, %v2963_v20  ;;  %v4145_v60 = vmul.bf16 %v9514_v28, %v9148_v11  ;;  %v1587_v10 = vrot.slane %v1585_v53, 4  ;;  %v1590_v24 = vrot.slane %v1588_v49, 5 }
 0x200   : > { %v1158_v46 = vpop.permute.xlu1 %1157  ;;  %v4269_v20 = vrot.slane %v4267_v23, 4  ;;  %v4272_v0 = vrot.slane %v4270_v1, 5  ;;  %v9545_v4 = vsel %vm1583_vm5, %v4255_v5, %v4264_v39 }
 0x201   : > { %11522 = vst [vmem:[#allocation44_spill] sm:$0xff] %v9521_v52  ;;  %v9536_v33 = vsel %vm2028_vm4, %v2958_v35, %v9521_v52  ;;  %v4147_v21 = vmul.bf16 %v4130_v50, %v9521_v52  ;;  %v4276_v36 = vshrl.u32 %v4145_v60, 16  ;;  %v4279_v29 = vshll.u32 %v4145_v60, 16 }
 0x202   : > { %v9539_v15 = vor.u32 %v1590_v24, %v1587_v10  ;;  %v1166_v19 = vrot.slane %v1158_v46, %v9003_v41  ;;  %v4146_v11 = vmul.bf16 %v9380_v27, %v9536_v33  ;;  %v4273_v10 = vor.u32 %v4272_v0, %v4269_v20 }
 0x203   : > { %v4294_v49 = vshrl.u32 %v4147_v21, 16  ;;  %v4278_v35 = vrot.slane %v4276_v36, 4  ;;  %v4281_v53 = vrot.slane %v4279_v29, 5  ;;  %v4297_v50 = vshll.u32 %v4147_v21, 16  ;;  %7536 = vmatmul.mubr.msk.bf16.gmra.mrb[12].mxu0 %vm457_vm0, %v9469_v32  ;;  %v4546_v21 = vld [vmem:[#allocation2 + $0x10] sm:$0xf8] }
 0x204   : > { %11523 = vst [vmem:[#allocation45_spill] sm:$0xff] %v9539_v15  ;;  %v6978_v56 = vcombine.low %v1154_v61, %v1166_v19  ;;  %v1744_v23 = vmul.bf16 %v9539_v15, %v1102_v12  ;;  %v4285_v1 = vshrl.u32 %v4146_v11, 16  ;;  %v4288_v3 = vshll.u32 %v4146_v11, 16  ;;  %v1182_v60 = vpop.permute.xlu1 %1181  ;;  %7539 = vmatprep.mubr.msk.bf16.mxu0 %vm457_vm0, %v9492_v57 }
 0x205   : > { %v4282_v24 = vor.u32 %v4281_v53, %v4278_v35  ;;  %v4296_v46 = vrot.slane %v4294_v49, 4  ;;  %v4299_v27 = vrot.slane %v4297_v50, 5  ;;  %v1190_v5 = vrot.slane %v1182_v60, %v9003_v41 }
 0x206   : > { %v1593_v16 = vshrl.u32 %v6978_v56, 16  ;;  %v1596_v38 = vshll.u32 %v6978_v56, 16  ;;  %v2030_v61 = vshrl.u32 %v1744_v23, 16  ;;  %v2033_v12 = vshll.u32 %v1744_v23, 16 }
 0x207   : > { %v4287_v36 = vrot.slane %v4285_v1, 4  ;;  %v4290_v29 = vrot.slane %v4288_v3, 5  ;;  %v4563_v19 = vmul.bf16 %v4546_v21, %v9539_v15  ;;  %v11524_v20 = vrot.slane %v9220_v44, %v9003_v41 }
 0x208   : > { %v1595_v32 = vrot.slane %v1593_v16, 4  ;;  %v1598_v11 = vrot.slane %v1596_v38, 5  ;;  %v9557_v49 = vrot.slane %v2030_v61, 3  ;;  %v1206_v56 = vpop.permute.xlu1 %1205  ;;  %v9560_v35 = vsel %vm1583_vm5, %v4264_v39, %v4273_v10 }
 0x209   : > { %v6979_v0 = vcombine.low %v11524_v20, %v1190_v5  ;;  %v9562_v57 = vrot.slane %v2033_v12, 4  ;;  %v4291_v53 = vor.u32 %v4290_v29, %v4287_v36  ;;  %v4300_v50 = vor.u32 %v4299_v27, %v4296_v46 }
 0x20a   : > { %v1599_v23 = vor.u32 %v1598_v11, %v1595_v32  ;;  %v1214_v16 = vrot.slane %v1206_v56, %v9003_v41  ;;  %v9568_v44 = vsel %vm1583_vm5, %v4273_v10, %v4282_v24  ;;  %v4583_v39 = vshrl.u32 %v4563_v19, 16  ;;  %v8176_v10 = vld [vmem:[#allocation2 + $0x8] sm:$0xff] }
 0x20b   : > { %v1602_v3 = vshrl.u32 %v6979_v0, 16  ;;  %v1605_v1 = vshll.u32 %v6979_v0, 16  ;;  %v2036_v38 = vor.u32 %v9562_v57, %v9557_v49  ;;  %v9571_v60 = vsel %vm1583_vm5, %v4282_v24, %v4291_v53  ;;  %7540 = vmatmul.mubr.msk.bf16.gmra.mrb[16].mxu0 %vm457_vm0, %v9526_v8 }
 0x20c   : > { %v9575_v5 = vsel %vm1583_vm5, %v9539_v15, %v1599_v23  ;;  %v11526_v61 = vrot.slane %v9234_v59, %v9003_v41  ;;  %v1230_v12 = vpop.permute.xlu1 %1229  ;;  %v9584_v24 = vsel %vm1583_vm5, %v4291_v53, %v4300_v50  ;;  %v4586_v32 = vshll.u32 %v4563_v19, 16  ;;  %7543 = vmatprep.mubr.msk.bf16.mxu0 %vm457_vm0, %v9530_v63 }
 0x20d   : > { %11525 = vst [vmem:[#allocation46_spill] sm:$0xff] %v9575_v5  ;;  %v1604_v46 = vrot.slane %v1602_v3, 4  ;;  %v1607_v27 = vrot.slane %v1605_v1, 5  ;;  %v1745_v36 = vmul.bf16 %v8176_v10, %v9575_v5  ;;  %v9588_v29 = vmul.bf16 %v9199_v51, %v9575_v5  ;;  %v8177_v1 = vld [vmem:[#allocation2 + $0x10] sm:$0xff] }
 0x20e   : > { %v6980_v21 = vcombine.low %v11526_v61, %v1214_v16  ;;  %v1238_v59 = vrot.slane %v1230_v12, %v9003_v41  ;;  %v9593_v56 = vrot.slane %v4583_v39, 3  ;;  %v9595_v57 = vrot.slane %v4586_v32, 4 }
 0x20f   : > { %v1608_v11 = vor.u32 %v1607_v27, %v1604_v46  ;;  %v2038_v8 = vshrl.u32 %v1745_v36, 16  ;;  %v2041_v49 = vshll.u32 %v1745_v36, 16  ;;  %v11528_v19 = vrot.slane %v9239_v47, %v9003_v41  ;;  %v9604_v46 = vld [vmem:[#allocation2 + $0x20] sm:$0xff] }
 0x210   : > { %v1611_v20 = vshrl.u32 %v6980_v21, 16  ;;  %v1614_v0 = vshll.u32 %v6980_v21, 16  ;;  %v1254_v39 = vpop.permute.xlu1 %1253 }
 0x211   : > { %v9598_v53 = vsel %vm1583_vm5, %v1599_v23, %v1608_v11  ;;  %v6981_v3 = vcombine.low %v11528_v19, %v1238_v59  ;;  %v2040_v27 = vrot.slane %v2038_v8, 3  ;;  %v4591_v23 = vshrl.u32 %v9588_v29, 16 }
 0x212   : > { %11527 = vst [vmem:[#allocation47_spill] sm:$0xff] %v9598_v53  ;;  %v1613_v51 = vrot.slane %v1611_v20, 4  ;;  %v1616_v50 = vrot.slane %v1614_v0, 5  ;;  %v1746_v16 = vmul.bf16 %v8177_v1, %v9598_v53  ;;  %v9608_v63 = vmul.bf16 %v9604_v46, %v9598_v53 }
 0x213   : > { %v1620_v21 = vshrl.u32 %v6981_v3, 16  ;;  %v1623_v12 = vshll.u32 %v6981_v3, 16  ;;  %v1262_v10 = vrot.slane %v1254_v39, %v9003_v41  ;;  %v2043_v47 = vrot.slane %v2041_v49, 4  ;;  %7544 = vmatmul.mubr.msk.bf16.gmra.mrb[20].mxu0 %vm457_vm0, %v9545_v4 }
 0x214   : > { %v1617_v61 = vor.u32 %v1616_v50, %v1613_v51  ;;  %v2047_v36 = vshrl.u32 %v1746_v16, 16  ;;  %v2050_v32 = vshll.u32 %v1746_v16, 16  ;;  %v4589_v20 = vor.u32 %v9595_v57, %v9593_v56  ;;  %v1278_v51 = vpop.permute.xlu1 %1277  ;;  %v9622_v16 = vld [vmem:[#allocation2 + $0x18] sm:$0xff]  ;;  %7547 = vmatprep.mubr.msk.bf16.mxu0 %vm457_vm0, %v9560_v35 }
 0x215   : > { %v1622_v59 = vrot.slane %v1620_v21, 4  ;;  %v1625_v19 = vrot.slane %v1623_v12, 5  ;;  %v11530_v8 = vrot.slane %v9248_v34, %v9003_v41  ;;  %v2044_v50 = vor.u32 %v2043_v47, %v2040_v27  ;;  %11531 = vst [vmem:[#allocation49_spill] sm:$0xff] %v9622_v16 }
 0x216   : > { %v9615_v0 = vsel %vm1583_vm5, %v1608_v11, %v1617_v61  ;;  %v2049_v49 = vrot.slane %v2047_v36, 3  ;;  %v2052_v3 = vrot.slane %v2050_v32, 4  ;;  %v1286_v12 = vrot.slane %v1278_v51, %v9003_v41 }
 0x217   : > { %11529 = vst [vmem:[#allocation48_spill] sm:$0xff] %v9615_v0  ;;  %v6982_v1 = vcombine.low %v11530_v8, %v1262_v10  ;;  %v1747_v39 = vmul.bf16 %v9622_v16, %v9615_v0  ;;  %v1626_v11 = vor.u32 %v1625_v19, %v1622_v59  ;;  %v2045_v34 = vsel %vm2028_vm4, %v2036_v38, %v2044_v50 }
 0x218   : > { %v2053_v4 = vor.u32 %v2052_v3, %v2049_v49  ;;  %v11533_v59 = vrot.slane %v9277_v62, %v9003_v41  ;;  %7387 = vmatprep.mubr.msk.bf16.mxu1 %vm457_vm0, %v2045_v34  ;;  %v1302_v8 = vpop.permute.xlu1 %1301 }
 0x219   : > { %v1629_v42 = vshrl.u32 %v6982_v1, 16  ;;  %v1632_v21 = vshll.u32 %v6982_v1, 16  ;;  %v2056_v10 = vshrl.u32 %v1747_v39, 16  ;;  %v2059_v27 = vshll.u32 %v1747_v39, 16 }
 0x21a   : > { %v9631_v47 = vsel %vm1583_vm5, %v1617_v61, %v1626_v11  ;;  %v6983_v19 = vcombine.low %v11533_v59, %v1286_v12  ;;  %v2054_v1 = vsel %vm2028_vm4, %v2044_v50, %v2053_v4  ;;  %v9643_v61 = vld [vmem:[%s11393_s5 + $0x6] sm:$0x3]  ;;  %v1310_v62 = vrot.slane %v1302_v8, %v9003_v41 }
 0x21b   : > { %11532 = vst [vmem:[#allocation50_spill] sm:$0xff] %v9631_v47  ;;  %v1631_v36 = vrot.slane %v1629_v42, 4  ;;  %v1634_v32 = vrot.slane %v1632_v21, 5  ;;  %v2058_v35 = vrot.slane %v2056_v10, 3  ;;  %v2061_v51 = vrot.slane %v2059_v27, 4  ;;  %7388 = vmatmul.mubr.msk.bf16.vlgmr.msra.gmra.mrb[0].mxu1 %vm457_vm0, %v2054_v1  ;;  %7548 = vmatmul.mubr.msk.bf16.gmra.mrb[24].mxu0 %vm457_vm0, %v9568_v44  ;;  %v9664_v44 = vld [vmem:[#allocation2 + $0x28] sm:$0xff] }
 0x21c   : > { %v1748_v38 = vmul.bf16 %v9604_v46, %v9631_v47  ;;  %v1638_v49 = vshrl.u32 %v6983_v19, 16  ;;  %v1641_v3 = vshll.u32 %v6983_v19, 16  ;;  %v4593_v12 = vrot.slane %v4591_v23, 3  ;;  %7420 = vmatpush3.bf16.msra.mxu1 %v9307_v22  ;;  %v1326_v59 = vpop.permute.xlu1 %1325  ;;  %7551 = vmatprep.mubr.msk.bf16.mxu0 %vm457_vm0, %v9571_v60 }
 0x21d   : > { %v1635_v42 = vor.u32 %v1634_v32, %v1631_v36  ;;  %v2062_v39 = vor.u32 %v2061_v51, %v2058_v35  ;;  %v11535_v36 = vrot.slane %v9303_v13, %v9003_v41  ;;  %7950 = vmatprep.subr.msk.bf16.mxu1 %vm1863_vm1, %v9643_v61  ;;  %v1334_v51 = vrot.slane %v1326_v59, %v9003_v41 }
 0x21e   : > { %v2065_v21 = vshrl.u32 %v1748_v38, 16  ;;  %v2068_v50 = vshll.u32 %v1748_v38, 16  ;;  %v1640_v10 = vrot.slane %v1638_v49, 4  ;;  %v1643_v27 = vrot.slane %v1641_v3, 5 }
 0x21f   : > { %v9649_v34 = vsel %vm1583_vm5, %v1626_v11, %v1635_v42  ;;  %v6984_v32 = vcombine.low %v11535_v36, %v1310_v62  ;;  %v2063_v23 = vsel %vm2028_vm4, %v2053_v4, %v2062_v39  ;;  %v4594_v11 = vshll.u32 %v9588_v29, 16 }
 0x220   : > { %11534 = vst [vmem:[#allocation51_spill] sm:$0xff] %v9649_v34  ;;  %v2067_v19 = vrot.slane %v2065_v21, 3  ;;  %v2070_v22 = vrot.slane %v2068_v50, 4  ;;  %v1644_v8 = vor.u32 %v1643_v27, %v1640_v10  ;;  %7391 = vmatprep.mubr.msk.bf16.mxu1 %vm457_vm0, %v2063_v23  ;;  %v1749_v4 = vmul.bf16 %v9664_v44, %v9649_v34  ;;  %v1350_v50 = vpop.permute.xlu1 %1349 }
 0x221   : > { %v1647_v1 = vshrl.u32 %v6984_v32, 16  ;;  %v1650_v35 = vshll.u32 %v6984_v32, 16  ;;  %v4596_v38 = vrot.slane %v4594_v11, 4  ;;  %v4600_v49 = vshrl.u32 %v9608_v63, 16 }
 0x222   : > { %v2071_v13 = vor.u32 %v2070_v22, %v2067_v19  ;;  %v9670_v29 = vsel %vm1583_vm5, %v1635_v42, %v1644_v8  ;;  %v11537_v21 = vrot.slane %v9330_v6, %v9003_v41  ;;  %v2074_v36 = vshrl.u32 %v1749_v4, 16 }
 0x223   : > { %11536 = vst [vmem:[#allocation52_spill] sm:$0xff] %v9670_v29  ;;  %v1649_v3 = vrot.slane %v1647_v1, 4  ;;  %v1652_v62 = vrot.slane %v1650_v35, 5  ;;  %v4597_v27 = vor.u32 %v4596_v38, %v4593_v12  ;;  %v2077_v32 = vshll.u32 %v1749_v4, 16  ;;  %v9682_v1 = vld [vmem:[#allocation2 + $0x30] sm:$0xff]  ;;  %7552 = vmatmul.mubr.msk.bf16.gmra.mrb[28].mxu0 %vm457_vm0, %v9584_v24 }
 0x224   : > { %v6985_v60 = vcombine.low %v11537_v21, %v1334_v51  ;;  %v2072_v10 = vsel %vm2028_vm4, %v2062_v39, %v2071_v13  ;;  %v1358_v22 = vrot.slane %v1350_v50, %v9003_v41  ;;  %v2076_v6 = vrot.slane %v2074_v36, 3  ;;  %v1374_v56 = vpop.permute.xlu1 %1373 }
 0x225   : > { %v1653_v59 = vor.u32 %v1652_v62, %v1649_v3  ;;  %7392 = vmatmul.mubr.msk.bf16.gmra.mrb[4].mxu1 %vm457_vm0, %v2072_v10  ;;  %v4598_v42 = vsel %vm2028_vm4, %v4589_v20, %v4597_v27  ;;  %v2079_v11 = vrot.slane %v2077_v32, 4  ;;  %v1750_v39 = vmul.bf16 %v9682_v1, %v9670_v29 }
 0x226   : > { %v1656_v23 = vshrl.u32 %v6985_v60, 16  ;;  %v1659_v19 = vshll.u32 %v6985_v60, 16  ;;  %v6986_v38 = vcombine.low %v1346_v7, %v1358_v22  ;;  %v4602_v3 = vrot.slane %v4600_v49, 3  ;;  %7557 = vmatprep.mubr.msk.bf16.mxu0 %vm457_vm0, %v4598_v42 }
 0x227   : > { %v9687_v12 = vsel %vm1583_vm5, %v1644_v8, %v1653_v59  ;;  %v2080_v57 = vor.u32 %v2079_v11, %v2076_v6  ;;  %v2083_v20 = vshrl.u32 %v1750_v39, 16  ;;  %v2086_v4 = vshll.u32 %v1750_v39, 16 }
 0x228   : > { %11538 = vst [vmem:[#allocation53_spill] sm:$0xff] %v9687_v12  ;;  %v1658_v35 = vrot.slane %v1656_v23, 4  ;;  %v1661_v51 = vrot.slane %v1659_v19, 5  ;;  %v1665_v21 = vshrl.u32 %v6986_v38, 16  ;;  %v1668_v60 = vshll.u32 %v6986_v38, 16  ;;  %v9705_v19 = vld [vmem:[#allocation2 + $0x28] sm:$0xff]  ;;  %v1398_v22 = vpop.permute.xlu1 %1397 }
 0x229   : > { %v1382_v8 = vrot.slane %v1374_v56, %v9003_v41  ;;  %v2081_v50 = vsel %vm2028_vm4, %v2071_v13, %v2080_v57  ;;  %v2085_v10 = vrot.slane %v2083_v20, 3  ;;  %v2088_v40 = vrot.slane %v2086_v4, 4 }
 0x22a   : > { %v1662_v62 = vor.u32 %v1661_v51, %v1658_v35  ;;  %v4603_v7 = vshll.u32 %v9608_v63, 16  ;;  %v1667_v36 = vrot.slane %v1665_v21, 4  ;;  %v1670_v32 = vrot.slane %v1668_v60, 5  ;;  %7395 = vmatprep.mubr.msk.bf16.mxu1 %vm457_vm0, %v2081_v50  ;;  %v9709_v63 = vld [vmem:[#allocation2 + $0x38] sm:$0xff] }
 0x22b   : > { %v11540_v49 = vrot.slane %v9365_v17, %v9003_v41  ;;  %v2089_v42 = vor.u32 %v2088_v40, %v2085_v10  ;;  %v4566_v6 = vmul.bf16 %v9705_v19, %v9615_v0  ;;  %v1406_v17 = vrot.slane %v1398_v22, %v9003_v41 }
 0x22c   : > { %v9699_v24 = vsel %vm1583_vm5, %v1653_v59, %v1662_v62  ;;  %v4605_v13 = vrot.slane %v4603_v7, 4  ;;  %v1751_v59 = vmul.bf16 %v9709_v63, %v9687_v12  ;;  %v1671_v11 = vor.u32 %v1670_v32, %v1667_v36  ;;  %v1422_v40 = vpop.permute.xlu1 %1421 }
 0x22d   : > { %11539 = vst [vmem:[#allocation54_spill] sm:$0xff] %v9699_v24  ;;  %v6987_v23 = vcombine.low %v11540_v49, %v1382_v8  ;;  %v2090_v51 = vsel %vm2028_vm4, %v2080_v57, %v2089_v42  ;;  %v4609_v56 = vshrl.u32 %v4566_v6, 16  ;;  %v4612_v20 = vshll.u32 %v4566_v6, 16 }
 0x22e   : > { %v4606_v38 = vor.u32 %v4605_v13, %v4602_v3  ;;  %v9716_v4 = vsel %vm1583_vm5, %v1662_v62, %v1671_v11  ;;  %v11542_v8 = vrot.slane %v9387_v58, %v9003_v41  ;;  %7396 = vmatmul.mubr.msk.bf16.gmra.mrb[8].mxu1 %vm457_vm0, %v2090_v51  ;;  %v2092_v57 = vshrl.u32 %v1751_v59, 16  ;;  %v9726_v3 = vld [vmem:[%s11393_s5 + $0x10] sm:$0x3]  ;;  %v9731_v13 = vld [vmem:[#allocation2 + $0x40] sm:$0xff] }
 0x22f   : > { %v1674_v39 = vshrl.u32 %v6987_v23, 16  ;;  %v1677_v35 = vshll.u32 %v6987_v23, 16  ;;  %11541 = vst [vmem:[#allocation55_spill] sm:$0xff] %v9716_v4  ;;  %v4611_v7 = vrot.slane %v4609_v56, 3  ;;  %v4614_v36 = vrot.slane %v4612_v20, 4 }
 0x230   : > { %v6988_v50 = vcombine.low %v11542_v8, %v1406_v17  ;;  %v4607_v10 = vsel %vm2028_vm4, %v4597_v27, %v4606_v38  ;;  %v1430_v58 = vrot.slane %v1422_v40, %v9003_v41  ;;  %v2094_v27 = vrot.slane %v2092_v57, 3  ;;  %v1446_v20 = vpop.permute.xlu1 %1445  ;;  %v9746_v40 = vld [vmem:[#allocation2 + $0x30] sm:$0xff] }
 0x231   : > { %v1676_v21 = vrot.slane %v1674_v39, 4  ;;  %v1679_v60 = vrot.slane %v1677_v35, 5  ;;  %7558 = vmatmul.mubr.msk.bf16.vlgmr.msra.gmra.mrb[0].mxu0 %vm457_vm0, %v4607_v10  ;;  %v4615_v23 = vor.u32 %v4614_v36, %v4611_v7  ;;  %v2095_v22 = vshll.u32 %v1751_v59, 16 }
 0x232   : > { %v1683_v32 = vshrl.u32 %v6988_v50, 16  ;;  %v1686_v49 = vshll.u32 %v6988_v50, 16  ;;  %7590 = vmatpush3.bf16.msra.mxu0 %v9311_v25  ;;  %v1752_v6 = vmul.bf16 %v9731_v13, %v9699_v24  ;;  %v11544_v51 = vrot.slane %v9422_v45, %v9003_v41 }
 0x233   : > { %v1680_v62 = vor.u32 %v1679_v60, %v1676_v21  ;;  %7955 = vmatprep.subr.msk.bf16.mxu0 %vm1863_vm1, %v9726_v3  ;;  %v4616_v25 = vsel %vm2028_vm4, %v4606_v38, %v4615_v23  ;;  %v2097_v59 = vrot.slane %v2095_v22, 4  ;;  %v4567_v57 = vmul.bf16 %v9746_v40, %v9631_v47 }
 0x234   : > { %v1685_v35 = vrot.slane %v1683_v32, 4  ;;  %v1688_v17 = vrot.slane %v1686_v49, 5  ;;  %v6989_v56 = vcombine.low %v11544_v51, %v1430_v58  ;;  %v2101_v21 = vshrl.u32 %v1752_v6, 16  ;;  %7561 = vmatprep.mubr.msk.bf16.mxu0 %vm457_vm0, %v4616_v25  ;;  %v1470_v51 = vpop.permute.xlu1 %1469 }
 0x235   : > { %v9736_v39 = vsel %vm1583_vm5, %v1671_v11, %v1680_v62  ;;  %v2104_v60 = vshll.u32 %v1752_v6, 16  ;;  %v1454_v11 = vrot.slane %v1446_v20, %v9003_v41  ;;  %v2098_v45 = vor.u32 %v2097_v59, %v2094_v27  ;;  %v9761_v20 = vld [vmem:[#allocation2 + $0x38] sm:$0xff] }
 0x236   : > { %11543 = vst [vmem:[#allocation56_spill] sm:$0xff] %v9736_v39  ;;  %v1689_v8 = vor.u32 %v1688_v17, %v1685_v35  ;;  %v1692_v50 = vshrl.u32 %v6989_v56, 16  ;;  %v1695_v10 = vshll.u32 %v6989_v56, 16  ;;  %v2103_v7 = vrot.slane %v2101_v21, 3 }
 0x237   : > { %v2106_v36 = vrot.slane %v2104_v60, 4  ;;  %v11546_v58 = vrot.slane %v9440_v18, %v9003_v41  ;;  %v2099_v6 = vsel %vm2028_vm4, %v2089_v42, %v2098_v45  ;;  %v4618_v17 = vshrl.u32 %v4567_v57, 16 }
 0x238   : > { %v9751_v38 = vsel %vm1583_vm5, %v1680_v62, %v1689_v8  ;;  %v1694_v32 = vrot.slane %v1692_v50, 4  ;;  %v1697_v49 = vrot.slane %v1695_v10, 5  ;;  %v4621_v27 = vshll.u32 %v4567_v57, 16  ;;  %7399 = vmatprep.mubr.msk.bf16.mxu1 %vm457_vm0, %v2099_v6 }
 0x239   : > { %11545 = vst [vmem:[#allocation57_spill] sm:$0xff] %v9751_v38  ;;  %v6990_v22 = vcombine.low %v11546_v58, %v1454_v11  ;;  %v9757_v35 = vor.u32 %v2106_v36, %v2103_v7  ;;  %v1478_v62 = vrot.slane %v1470_v51, %v9003_v41  ;;  %v4620_v21 = vrot.slane %v4618_v17, 3 }
 0x23a   : > { %v1698_v56 = vor.u32 %v1697_v49, %v1694_v32  ;;  %v4623_v60 = vrot.slane %v4621_v27, 4  ;;  %v4568_v42 = vmul.bf16 %v9761_v20, %v9649_v34  ;;  %v11548_v7 = vrot.slane %v9476_v2, %v9003_v41 }
 0x23b   : > { %v1701_v25 = vshrl.u32 %v6990_v22, 16  ;;  %v1704_v59 = vshll.u32 %v6990_v22, 16  ;;  %v2108_v18 = vsel %vm2028_vm4, %v2098_v45, %v9757_v35  ;;  %v9774_v45 = vld [vmem:[#allocation2 + $0x48] sm:$0xff]  ;;  %v1494_v22 = vpop.permute.xlu1 %1493 }
 0x23c   : > { %v9768_v50 = vsel %vm1583_vm5, %v1689_v8, %v1698_v56  ;;  %7400 = vmatmul.mubr.msk.bf16.gmra.mrb[12].mxu1 %vm457_vm0, %v2108_v18  ;;  %v6991_v36 = vcombine.low %v11548_v7, %v1478_v62  ;;  %v4624_v57 = vor.u32 %v4623_v60, %v4620_v21  ;;  %v4627_v32 = vshrl.u32 %v4568_v42, 16 }
 0x23d   : > { %11547 = vst [vmem:[#allocation58_spill] sm:$0xff] %v9768_v50  ;;  %v1703_v10 = vrot.slane %v1701_v25, 4  ;;  %v1706_v11 = vrot.slane %v1704_v59, 5  ;;  %v4630_v49 = vshll.u32 %v4568_v42, 16  ;;  %v1753_v58 = vmul.bf16 %v9774_v45, %v9716_v4 }
 0x23e   : > { %v1710_v8 = vshrl.u32 %v6991_v36, 16  ;;  %v1713_v17 = vshll.u32 %v6991_v36, 16  ;;  %v1502_v27 = vrot.slane %v1494_v22, %v9003_v41  ;;  %v4625_v51 = vsel %vm2028_vm4, %v4615_v23, %v4624_v57  ;;  %v9787_v36 = vld [vmem:[#allocation2 + $0x50] sm:$0xff] }
 0x23f   : > { %v1707_v6 = vor.u32 %v1706_v11, %v1703_v10  ;;  %v4629_v25 = vrot.slane %v4627_v32, 3  ;;  %v4632_v59 = vrot.slane %v4630_v49, 4  ;;  %v2110_v2 = vshrl.u32 %v1753_v58, 16  ;;  %7562 = vmatmul.mubr.msk.bf16.gmra.mrb[4].mxu0 %vm457_vm0, %v4625_v51  ;;  %v9791_v32 = vld [vmem:[#allocation2 + $0x40] sm:$0xff] }
 0x240   : > { %v1712_v18 = vrot.slane %v1710_v8, 4  ;;  %v1715_v21 = vrot.slane %v1713_v17, 5  ;;  %v2113_v60 = vshll.u32 %v1753_v58, 16  ;;  %v11550_v10 = vrot.slane %v9502_v26, %v9003_v41 }
 0x241   : > { %v9781_v62 = vsel %vm1583_vm5, %v1698_v56, %v1707_v6  ;;  %v4633_v42 = vor.u32 %v4632_v59, %v4629_v25  ;;  %v2112_v7 = vrot.slane %v2110_v2, 3  ;;  %v1754_v23 = vmul.bf16 %v9787_v36, %v9736_v39  ;;  %v9793_v56 = vld [vmem:[#allocation2 + $0x48] sm:$0xff] }
 0x242   : > { %11549 = vst [vmem:[#allocation59_spill] sm:$0xff] %v9781_v62  ;;  %v6992_v11 = vcombine.low %v11550_v10, %v1502_v27  ;;  %v9795_v49 = vor.u32 %v1715_v21, %v1712_v18  ;;  %v2115_v22 = vrot.slane %v2113_v60, 4  ;;  %v4569_v58 = vmul.bf16 %v9791_v32, %v9670_v29 }
 0x243   : > { %v4570_v8 = vmul.bf16 %v9793_v56, %v9687_v12  ;;  %v4634_v41 = vsel %vm2028_vm4, %v4624_v57, %v4633_v42  ;;  %v2119_v27 = vshrl.u32 %v1754_v23, 16  ;;  %v2122_v59 = vshll.u32 %v1754_v23, 16  ;;  %v9816_v23 = vld [vmem:[#allocation2 + $0x50] sm:$0xff] }
 0x244   : > { %v1719_v26 = vshrl.u32 %v6992_v11, 16  ;;  %v1722_v17 = vshll.u32 %v6992_v11, 16  ;;  %v9804_v51 = vsel %vm1583_vm5, %v1707_v6, %v9795_v49  ;;  %7565 = vmatprep.mubr.msk.bf16.mxu0 %vm457_vm0, %v4634_v41  ;;  %v2116_v25 = vor.u32 %v2115_v22, %v2112_v7  ;;  %v9812_v41 = vld [vmem:[#allocation2 + $0x58] sm:$0xff] }
 0x245   : > { %11551 = vst [vmem:[#allocation60_spill] sm:$0xff] %v9804_v51  ;;  %v4636_v2 = vshrl.u32 %v4569_v58, 16  ;;  %v2121_v60 = vrot.slane %v2119_v27, 3  ;;  %v4639_v10 = vshll.u32 %v4569_v58, 16  ;;  %v2124_v57 = vrot.slane %v2122_v59, 4 }
 0x246   : > { %v1721_v18 = vrot.slane %v1719_v26, 4  ;;  %v1724_v21 = vrot.slane %v1722_v17, 5  ;;  %v2117_v12 = vsel %vm2028_vm4, %v9757_v35, %v2116_v25  ;;  %v4645_v11 = vshrl.u32 %v4570_v8, 16  ;;  %v9818_v26 = vld [vmem:[#allocation2 + $0x60] sm:$0xff] }
 0x247   : > { %v4638_v29 = vrot.slane %v4636_v2, 3  ;;  %7403 = vmatprep.mubr.msk.bf16.mxu1 %vm457_vm0, %v2117_v12  ;;  %v4641_v6 = vrot.slane %v4639_v10, 4  ;;  %v4648_v47 = vshll.u32 %v4570_v8, 16  ;;  %v1755_v7 = vmul.bf16 %v9812_v41, %v9751_v38 }
 0x248   : > { %v9810_v34 = vor.u32 %v1724_v21, %v1721_v18  ;;  %v2125_v22 = vor.u32 %v2124_v57, %v2121_v60  ;;  %v4647_v58 = vrot.slane %v4645_v11, 3  ;;  %v1756_v35 = vmul.bf16 %v9818_v26, %v9768_v50 }
 0x249   : > { %v4571_v12 = vmul.bf16 %v9816_v23, %v9699_v24  ;;  %v4642_v17 = vor.u32 %v4641_v6, %v4638_v29  ;;  %v4650_v27 = vrot.slane %v4648_v47, 4  ;;  %v2128_v8 = vshrl.u32 %v1755_v7, 16  ;;  %v9828_v6 = vld [vmem:[#allocation2 + $0x58] sm:$0xff] }
 0x24a   : > { %11552 = vst [vmem:[#allocation61_spill] sm:$0xff] %v9810_v34  ;;  %v2131_v59 = vshll.u32 %v1755_v7, 16  ;;  %v2126_v2 = vsel %vm2028_vm4, %v2116_v25, %v2125_v22  ;;  %v2137_v18 = vshrl.u32 %v1756_v35, 16  ;;  %v2140_v21 = vshll.u32 %v1756_v35, 16 }
 0x24b   : > { %v4654_v10 = vshrl.u32 %v4571_v12, 16  ;;  %7404 = vmatmul.mubr.msk.bf16.gmra.mrb[16].mxu1 %vm457_vm0, %v2126_v2  ;;  %v4643_v60 = vsel %vm2028_vm4, %v4633_v42, %v4642_v17  ;;  %v4651_v57 = vor.u32 %v4650_v27, %v4647_v58  ;;  %v2130_v11 = vrot.slane %v2128_v8, 3  ;;  %v9833_v2 = vld [vmem:[#allocation2 + $0x68] sm:$0xff]  ;;  %v9837_v58 = vld [vmem:[#allocation2 + $0x60] sm:$0xff] }
 0x24c   : > { %v2133_v0 = vrot.slane %v2131_v59, 4  ;;  %7566 = vmatmul.mubr.msk.bf16.gmra.mrb[8].mxu0 %vm457_vm0, %v4643_v60  ;;  %v2139_v16 = vrot.slane %v2137_v18, 3  ;;  %v2142_v24 = vrot.slane %v2140_v21, 4  ;;  %v4657_v47 = vshll.u32 %v4571_v12, 16  ;;  %11553 = vst [vmem:[#allocation62_spill] sm:$0xff] %v9837_v58  ;;  %v9840_v12 = vld [vmem:[#allocation2 + $0x70] sm:$0xff] }
 0x24d   : > { %v4656_v29 = vrot.slane %v4654_v10, 3  ;;  %v4652_v25 = vsel %vm2028_vm4, %v4642_v17, %v4651_v57  ;;  %v4572_v35 = vmul.bf16 %v9828_v6, %v9716_v4  ;;  %v1757_v42 = vmul.bf16 %v9833_v2, %v9781_v62 }
 0x24e   : > { %v2134_v7 = vor.u32 %v2133_v0, %v2130_v11  ;;  %7569 = vmatprep.mubr.msk.bf16.mxu0 %vm457_vm0, %v4652_v25  ;;  %v2143_v27 = vor.u32 %v2142_v24, %v2139_v16  ;;  %v4659_v8 = vrot.slane %v4657_v47, 4  ;;  %v1758_v17 = vmul.bf16 %v9840_v12, %v9804_v51 }
 0x24f   : > { %v4573_v0 = vmul.bf16 %v9837_v58, %v9736_v39  ;;  %v4663_v18 = vshrl.u32 %v4572_v35, 16  ;;  %v4666_v21 = vshll.u32 %v4572_v35, 16  ;;  %v2146_v10 = vshrl.u32 %v1757_v42, 16 }
 0x250   : > { %v2135_v59 = vsel %vm2028_vm4, %v2125_v22, %v2134_v7  ;;  %v2144_v60 = vsel %vm2028_vm4, %v2134_v7, %v2143_v27  ;;  %v4660_v11 = vor.u32 %v4659_v8, %v4656_v29  ;;  %v2149_v16 = vshll.u32 %v1757_v42, 16  ;;  %v9850_v22 = vld [vmem:[#allocation2 + $0x68] sm:$0xff]  ;;  %v8190_v8 = vld [vmem:[#allocation2 + $0x80] sm:$0xf] }
 0x251   : > { %7407 = vmatprep.mubr.msk.bf16.mxu1 %vm457_vm0, %v2135_v59  ;;  %v2155_v24 = vshrl.u32 %v1758_v17, 16  ;;  %v4665_v47 = vrot.slane %v4663_v18, 3  ;;  %v4668_v25 = vrot.slane %v4666_v21, 4  ;;  %v2148_v4 = vrot.slane %v2146_v10, 3 }
 0x252   : > { %v2158_v53 = vshll.u32 %v1758_v17, 16  ;;  %v4661_v15 = vsel %vm2028_vm4, %v4651_v57, %v4660_v11  ;;  %v2151_v5 = vrot.slane %v2149_v16, 4  ;;  %v4672_v58 = vshrl.u32 %v4573_v0, 16 }
 0x253   : > { %v2157_v39 = vrot.slane %v2155_v24, 3  ;;  %7408 = vmatmul.mubr.msk.bf16.gmra.mrb[20].mxu1 %vm457_vm0, %v2144_v60  ;;  %v4669_v35 = vor.u32 %v4668_v25, %v4665_v47  ;;  %v4675_v52 = vshll.u32 %v4573_v0, 16  ;;  %v4574_v29 = vmul.bf16 %v9850_v22, %v9751_v38  ;;  %v9871_v47 = vld [vmem:[#allocation2 + $0x70] sm:$0xff]  ;;  %v9885_v38 = vld [vmem:[#allocation2 + $0x80] sm:$0xff] }
 0x254   : > { %v2160_v59 = vrot.slane %v2158_v53, 4  ;;  %7570 = vmatmul.mubr.msk.bf16.gmra.mrb[12].mxu0 %vm457_vm0, %v4661_v15  ;;  %v2152_v7 = vor.u32 %v2151_v5, %v2148_v4  ;;  %v4674_v42 = vrot.slane %v4672_v58, 3  ;;  %v9859_v57 = vsel %vm1583_vm5, %v9795_v49, %v9810_v34  ;;  %v9865_v5 = vld [vmem:[#allocation2 + $0x78] sm:$0xff] }
 0x255   : > { %11554 = vst [vmem:[#allocation63_spill] sm:$0xff] %v9859_v57  ;;  %v1760_v17 = vmul.bf16 %v8190_v8, %v9810_v34  ;;  %v4670_v18 = vsel %vm2028_vm4, %v4660_v11, %v4669_v35  ;;  %v4677_v53 = vrot.slane %v4675_v52, 4  ;;  %v4681_v0 = vshrl.u32 %v4574_v29, 16 }
 0x256   : > { %v2161_v21 = vor.u32 %v2160_v59, %v2157_v39  ;;  %7573 = vmatprep.mubr.msk.bf16.mxu0 %vm457_vm0, %v4670_v18  ;;  %v2153_v10 = vsel %vm2028_vm4, %v2143_v27, %v2152_v7  ;;  %v4684_v15 = vshll.u32 %v4574_v29, 16  ;;  %v1759_v4 = vmul.bf16 %v9865_v5, %v9859_v57  ;;  %v9873_v27 = vld [vmem:[#allocation2 + $0x78] sm:$0xff] }
 0x257   : > { %v2173_v49 = vshrl.u32 %v1760_v17, 16  ;;  %7411 = vmatprep.mubr.msk.bf16.mxu1 %vm457_vm0, %v2153_v10  ;;  %v4678_v58 = vor.u32 %v4677_v53, %v4674_v42  ;;  %v4683_v60 = vrot.slane %v4681_v0, 3  ;;  %v2176_v16 = vshll.u32 %v1760_v17, 16 }
 0x258   : > { %v2162_v39 = vsel %vm2028_vm4, %v2152_v7, %v2161_v21  ;;  %v4686_v52 = vrot.slane %v4684_v15, 4  ;;  %v2164_v11 = vshrl.u32 %v1759_v4, 16  ;;  %v2167_v24 = vshll.u32 %v1759_v4, 16 }
 0x259   : > { %v2175_v25 = vrot.slane %v2173_v49, 3  ;;  %v4575_v59 = vmul.bf16 %v9871_v47, %v9768_v50  ;;  %v4576_v29 = vmul.bf16 %v9873_v27, %v9781_v62  ;;  %v3032_v42 = vshrl.u32 %v9362_v9, 16 }
 0x25a   : > { %v4687_v8 = vor.u32 %v4686_v52, %v4683_v60  ;;  %v2166_v17 = vrot.slane %v2164_v11, 3  ;;  %v2169_v18 = vrot.slane %v2167_v24, 4  ;;  %v2178_v7 = vrot.slane %v2176_v16, 4 }
 0x25b   : > { %7412 = vmatmul.mubr.msk.bf16.gmra.mrb[24].mxu1 %vm457_vm0, %v2162_v39  ;;  %v4679_v53 = vsel %vm2028_vm4, %v4669_v35, %v4678_v58  ;;  %v4690_v0 = vshrl.u32 %v4575_v59, 16  ;;  %v4693_v10 = vshll.u32 %v4575_v59, 16  ;;  %v4699_v15 = vshrl.u32 %v4576_v29, 16  ;;  %v9891_v59 = vld [vmem:[#allocation2 + $0x88] sm:$0xff] }
 0x25c   : > { %7574 = vmatmul.mubr.msk.bf16.gmra.mrb[16].mxu0 %vm457_vm0, %v4679_v53  ;;  %v4688_v4 = vsel %vm2028_vm4, %v4678_v58, %v4687_v8  ;;  %v2170_v49 = vor.u32 %v2169_v18, %v2166_v17  ;;  %v4702_v50 = vshll.u32 %v4576_v29, 16  ;;  %v3035_v62 = vshll.u32 %v9362_v9, 16 }
 0x25d   : > { %7577 = vmatprep.mubr.msk.bf16.mxu0 %vm457_vm0, %v4688_v4  ;;  %v4692_v60 = vrot.slane %v4690_v0, 3  ;;  %v4695_v16 = vrot.slane %v4693_v10, 4  ;;  %v4701_v39 = vrot.slane %v4699_v15, 3  ;;  %v4577_v35 = vmul.bf16 %v9885_v38, %v9804_v51  ;;  %v11555_v15 = vld [vmem:[#allocation42_spill] sm:$0xff] }
 0x25e   : > { %v2171_v52 = vsel %vm2028_vm4, %v2161_v21, %v2170_v49  ;;  %v2179_v11 = vor.u32 %v2178_v7, %v2175_v25  ;;  %v4704_v24 = vrot.slane %v4702_v50, 4  ;;  %v4578_v17 = vmul.bf16 %v9891_v59, %v9859_v57  ;;  %v11556_v25 = vld [vmem:[#allocation43_spill] sm:$0xff] }
 0x25f   : > { %7415 = vmatprep.mubr.msk.bf16.mxu1 %vm457_vm0, %v2171_v52  ;;  %v4696_v58 = vor.u32 %v4695_v16, %v4692_v60  ;;  %v4708_v9 = vshrl.u32 %v4577_v35, 16  ;;  %v4711_v29 = vshll.u32 %v4577_v35, 16  ;;  %v3034_v53 = vrot.slane %v3032_v42, 4  ;;  %v9903_v52 = vld [vmem:[#allocation2 + $0x90] sm:$0xf]  ;;  %v11557_v42 = vld [vmem:[#allocation35_spill] sm:$0xff] }
 0x260   : > { %v4705_v18 = vor.u32 %v4704_v24, %v4701_v39  ;;  %v3037_v0 = vrot.slane %v3035_v62, 5  ;;  %v4717_v10 = vshrl.u32 %v4578_v17, 16  ;;  %v2990_v4 = vmul.bf16 %v9604_v46, %v11555_v15 }
 0x261   : > { %v2180_v21 = vsel %vm2028_vm4, %v2170_v49, %v2179_v11  ;;  %v4720_v50 = vshll.u32 %v4578_v17, 16  ;;  %v2991_v7 = vmul.bf16 %v9664_v44, %v11556_v25  ;;  %v4697_v60 = vsel %vm2028_vm4, %v4687_v8, %v4696_v58  ;;  %v11558_v25 = vld [vmem:[#allocation36_spill] sm:$0xff] }
 0x262   : > { %v4710_v16 = vrot.slane %v4708_v9, 3  ;;  %v4713_v35 = vrot.slane %v4711_v29, 4  ;;  %v4706_v62 = vsel %vm2028_vm4, %v4696_v58, %v4705_v18  ;;  %v4719_v49 = vrot.slane %v4717_v10, 3 }
 0x263   : > { %7416 = vmatmul.mubr.msk.bf16.gmra.mrb[28].mxu1 %vm457_vm0, %v2180_v21  ;;  %v4722_v39 = vrot.slane %v4720_v50, 4  ;;  %v4579_v11 = vmul.bf16 %v9903_v52, %v9810_v34  ;;  %v3038_v24 = vor.u32 %v3037_v0, %v3034_v53  ;;  %v3041_v8 = vshrl.u32 %v2990_v4, 16  ;;  %v11559_v0 = vld [vmem:[#allocation37_spill] sm:$0xff] }
 0x264   : > { %7421 = vmatprep.mubr.msk.bf16.mxu1 %vm457_vm0, %v11557_v42  ;;  %7578 = vmatmul.mubr.msk.bf16.gmra.mrb[20].mxu0 %vm457_vm0, %v4697_v60  ;;  %v3044_v9 = vshll.u32 %v2990_v4, 16  ;;  %v3050_v29 = vshrl.u32 %v2991_v7, 16  ;;  %v3053_v17 = vshll.u32 %v2991_v7, 16  ;;  %v4714_v21 = vor.u32 %v4713_v35, %v4710_v16 }
 0x265   : > { %7581 = vmatprep.mubr.msk.bf16.mxu0 %vm457_vm0, %v4706_v62  ;;  %v4726_v57 = vshrl.u32 %v4579_v11, 16  ;;  %v4729_v51 = vshll.u32 %v4579_v11, 16  ;;  %v4723_v42 = vor.u32 %v4722_v39, %v4719_v49  ;;  %v3039_v60 = vsel %vm1583_vm5, %v11558_v25, %v3038_v24 }
 0x266   : > { %v3043_v58 = vrot.slane %v3041_v8, 4  ;;  %v3046_v10 = vrot.slane %v3044_v9, 5  ;;  %v3052_v50 = vrot.slane %v3050_v29, 4  ;;  %v3055_v15 = vrot.slane %v3053_v17, 5  ;;  %v8193_v29 = vld [vmem:[#allocation2 + $0x10] sm:$0xf0] }
 0x267   : > { %v2992_v34 = vmul.bf16 %v9682_v1, %v9368_v43  ;;  %v3638_v53 = vsel %vm1863_vm1, %v9643_v61, 0  ;;  %v4715_v4 = vsel %vm2028_vm4, %v4705_v18, %v4714_v21  ;;  %v4728_v7 = vrot.slane %v4726_v57, 3 }
 0x268   : > { %v4731_v16 = vrot.slane %v4729_v51, 4  ;;  %v2993_v25 = vmul.bf16 %v9709_v63, %v9390_v48  ;;  %v4724_v35 = vsel %vm2028_vm4, %v4714_v21, %v4723_v42  ;;  %v3047_v62 = vor.u32 %v3046_v10, %v3043_v58  ;;  %v8192_v51 = vld [vmem:[#allocation2 + $0x18] sm:$0xff] }
 0x269   : > { %v3056_v61 = vor.u32 %v3055_v15, %v3052_v50  ;;  %v3059_v49 = vshrl.u32 %v2992_v34, 16  ;;  %v3062_v39 = vshll.u32 %v2992_v34, 16  ;;  %v4999_v8 = vrot.slane %v8192_v51, 4 }
 0x26a   : > { %v4732_v11 = vor.u32 %v4731_v16, %v4728_v7  ;;  %v3068_v18 = vshrl.u32 %v2993_v25, 16  ;;  %v3071_v57 = vshll.u32 %v2993_v25, 16  ;;  %v3048_v9 = vsel %vm1583_vm5, %v3038_v24, %v3047_v62 }
 0x26b   : > { %7422 = vmatmul.mubr.msk.bf16.vlgmr.msra.gmra.mrb[0].mxu1 %vm457_vm0, %v11559_v0  ;;  %v4998_v17 = vrot.slane %v8193_v29, 4  ;;  %v3061_v0 = vrot.slane %v3059_v49, 4  ;;  %v3064_v21 = vrot.slane %v3062_v39, 5  ;;  %v2994_v58 = vmul.bf16 %v9731_v13, %v9400_v55 }
 0x26c   : > { %7425 = vmatprep.mubr.msk.bf16.mxu1 %vm457_vm0, %v3039_v60  ;;  %7582 = vmatmul.mubr.msk.bf16.gmra.mrb[24].mxu0 %vm457_vm0, %v4715_v4  ;;  %v3057_v60 = vsel %vm1583_vm5, %v3047_v62, %v3056_v61  ;;  %v4733_v34 = vsel %vm2028_vm4, %v4723_v42, %v4732_v11  ;;  %v3070_v15 = vrot.slane %v3068_v18, 4  ;;  %v3073_v10 = vrot.slane %v3071_v57, 5 }
 0x26d   : > { %7585 = vmatprep.mubr.msk.bf16.mxu0 %vm457_vm0, %v4724_v35  ;;  %7454 = vmatpush3.bf16.msra.mxu1 %v3638_v53  ;;  %v2995_v50 = vmul.bf16 %v9774_v45, %v9427_v54  ;;  %v5000_v24 = vsel %vm1002_vm3, %v4998_v17, %v4999_v8  ;;  %v5001_v53 = vrot.slane %v9604_v46, 4  ;;  %v3065_v4 = vor.u32 %v3064_v21, %v3061_v0 }
 0x26e   : > { %v3077_v7 = vshrl.u32 %v2994_v58, 16  ;;  %v3080_v16 = vshll.u32 %v2994_v58, 16  ;;  %v3074_v25 = vor.u32 %v3073_v10, %v3070_v15  ;;  %v5003_v62 = vrot.slane %v9705_v19, 4 }
 0x26f   : > { %v3086_v42 = vshrl.u32 %v2995_v50, 16  ;;  %v3089_v35 = vshll.u32 %v2995_v50, 16  ;;  %v5002_v49 = vsel %vm1002_vm3, %v4999_v8, %v5001_v53  ;;  %v5496_v39 = vsel %vm1863_vm1, %v9726_v3, 0 }
 0x270   : > { %v3066_v11 = vsel %vm1583_vm5, %v3056_v61, %v3065_v4  ;;  %v3079_v18 = vrot.slane %v3077_v7, 4  ;;  %v3082_v57 = vrot.slane %v3080_v16, 5  ;;  %v2996_v46 = vmul.bf16 %v9787_v36, %v9443_v30 }
 0x271   : > { %v3075_v51 = vsel %vm1583_vm5, %v3065_v4, %v3074_v25  ;;  %v3091_v29 = vrot.slane %v3089_v35, 5  ;;  %v2997_v17 = vmul.bf16 %v9812_v41, %v9460_v31  ;;  %v5004_v3 = vsel %vm1002_vm3, %v5001_v53, %v5003_v62 }
 0x272   : > { %v5005_v61 = vrot.slane %v9746_v40, 4  ;;  %v3083_v8 = vor.u32 %v3082_v57, %v3079_v18  ;;  %v3098_v0 = vshll.u32 %v2996_v46, 16  ;;  %v5007_v15 = vrot.slane %v9761_v20, 4 }
 0x273   : > { %7426 = vmatmul.mubr.msk.bf16.gmra.mrb[4].mxu1 %vm457_vm0, %v3048_v9  ;;  %v3088_v9 = vrot.slane %v3086_v42, 4  ;;  %v3104_v58 = vshrl.u32 %v2997_v17, 16  ;;  %v2998_v53 = vmul.bf16 %v9818_v26, %v9484_v14  ;;  %v2999_v35 = vmul.bf16 %v9833_v2, %v9497_v37 }
 0x274   : > { %7429 = vmatprep.mubr.msk.bf16.mxu1 %vm457_vm0, %v3057_v60  ;;  %7586 = vmatmul.mubr.msk.bf16.gmra.mrb[28].mxu0 %vm457_vm0, %v4733_v34  ;;  %v3095_v60 = vshrl.u32 %v2996_v46, 16  ;;  %v3107_v34 = vshll.u32 %v2997_v17, 16  ;;  %v5006_v10 = vsel %vm1002_vm3, %v5003_v62, %v5005_v61  ;;  %v3084_v50 = vsel %vm1583_vm5, %v3074_v25, %v3083_v8 }
 0x275   : > { %7591 = vmatprep.mubr.msk.bf16.mxu0 %vm457_vm0, %v5000_v24  ;;  %v3092_v21 = vor.u32 %v3091_v29, %v3088_v9  ;;  %v3100_v4 = vrot.slane %v3098_v0, 5  ;;  %v3106_v16 = vrot.slane %v3104_v58, 4  ;;  %v5008_v25 = vsel %vm1002_vm3, %v5005_v61, %v5007_v15 }
 0x276   : > { %v3097_v24 = vrot.slane %v3095_v60, 4  ;;  %v3109_v42 = vrot.slane %v3107_v34, 5  ;;  %v5009_v62 = vrot.slane %v9791_v32, 4  ;;  %v3122_v57 = vshrl.u32 %v2999_v35, 16 }
 0x277   : > { %v3093_v7 = vsel %vm1583_vm5, %v3083_v8, %v3092_v21  ;;  %v3125_v46 = vshll.u32 %v2999_v35, 16  ;;  %v3000_v61 = vmul.bf16 %v9840_v12, %v9514_v28  ;;  %v3001_v58 = vmul.bf16 %v9865_v5, %v9536_v33 }
 0x278   : > { %v3110_v18 = vor.u32 %v3109_v42, %v3106_v16  ;;  %v5010_v9 = vsel %vm1002_vm3, %v5007_v15, %v5009_v62  ;;  %v3124_v60 = vrot.slane %v3122_v57, 4  ;;  %v5013_v34 = vrot.slane %v9816_v23, 4  ;;  %v2393_v42 = vld [vmem:[#allocation2 + $0x80] sm:$0x1f] }
 0x279   : > { %v3127_v0 = vrot.slane %v3125_v46, 5 }
 0x27b   : > { %7430 = vmatmul.mubr.msk.bf16.gmra.mrb[8].mxu1 %vm457_vm0, %v3066_v11  ;;  %v3116_v11 = vshll.u32 %v2998_v53, 16 }
 0x27c   : > { %7433 = vmatprep.mubr.msk.bf16.mxu1 %vm457_vm0, %v3075_v51  ;;  %7592 = vmatmul.mubr.msk.bf16.vlgmr.msra.gmra.mrb[0].mxu0 %vm457_vm0, %v5002_v49  ;;  %v3101_v49 = vor.u32 %v3100_v4, %v3097_v24  ;;  %v5011_v51 = vrot.slane %v9793_v56, 4  ;;  %v3128_v24 = vor.u32 %v3127_v0, %v3124_v60  ;;  %v3140_v4 = vshrl.u32 %v3001_v58, 16 }
 0x27d   : > { %7624 = vmatpush3.bf16.msra.mxu0 %v5496_v39  ;;  %7595 = vmatprep.mubr.msk.bf16.mxu0 %vm457_vm0, %v5004_v3  ;;  %v3113_v39 = vshrl.u32 %v2998_v53, 16  ;;  %v3118_v3 = vrot.slane %v3116_v11, 5  ;;  %v3143_v53 = vshll.u32 %v3001_v58, 16 }
 0x27e   : > { %v3102_v29 = vsel %vm1583_vm5, %v3092_v21, %v3101_v49  ;;  %v3111_v8 = vsel %vm1583_vm5, %v3101_v49, %v3110_v18  ;;  %v5012_v21 = vsel %vm1002_vm3, %v5009_v62, %v5011_v51  ;;  %v5014_v16 = vsel %vm1002_vm3, %v5011_v51, %v5013_v34  ;;  %v11560_v62 = vld [vmem:[#allocation44_spill] sm:$0xff] }
 0x27f   : > { %v3115_v17 = vrot.slane %v3113_v39, 4  ;;  %v3002_v39 = vmul.bf16 %v11560_v62, %v2393_v42  ;;  %v3142_v57 = vrot.slane %v3140_v4, 4  ;;  %v3145_v46 = vrot.slane %v3143_v53, 5 }
 0x280   : > { %v5019_v4 = vrot.slane %v9850_v22, 4 }
 0x281   : > { %v3119_v15 = vor.u32 %v3118_v3, %v3115_v17  ;;  %v11562_v3 = vld [vmem:[#allocation62_spill] sm:$0xff]  ;;  %v3149_v58 = vshrl.u32 %v3002_v39, 16 }
 0x283   : > { %7434 = vmatmul.mubr.msk.bf16.gmra.mrb[12].mxu1 %vm457_vm0, %v3084_v50  ;;  %v3134_v50 = vshll.u32 %v3000_v61, 16  ;;  %v3120_v35 = vsel %vm1583_vm5, %v3110_v18, %v3119_v15  ;;  %v3129_v11 = vsel %vm1583_vm5, %v3119_v15, %v3128_v24  ;;  %v3401_v18 = vld [vmem:[#allocation2 + $0x8] sm:$0xf8]  ;;  %v3146_v15 = vor.u32 %v3145_v46, %v3142_v57  ;;  %v8195_v57 = vld [vmem:[#allocation2 + $0x20] sm:$0xff] }
 0x284   : > { %7437 = vmatprep.mubr.msk.bf16.mxu1 %vm457_vm0, %v3093_v7  ;;  %7596 = vmatmul.mubr.msk.bf16.gmra.mrb[4].mxu0 %vm457_vm0, %v5006_v10  ;;  %v3131_v10 = vshrl.u32 %v3000_v61, 16  ;;  %v5015_v7 = vrot.slane %v9828_v6, 4  ;;  %v5017_v61 = vrot.slane %v11562_v3, 4  ;;  %v11566_v46 = vld [vmem:[#allocation48_spill] sm:$0xff] }
 0x285   : > { %7599 = vmatprep.mubr.msk.bf16.mxu0 %vm457_vm0, %v5008_v25  ;;  %v3136_v49 = vrot.slane %v3134_v50, 5 }
 0x286   : > { %v3133_v25 = vrot.slane %v3131_v10, 4  ;;  %v5016_v51 = vsel %vm1002_vm3, %v5013_v34, %v5015_v7  ;;  %v5018_v53 = vsel %vm1002_vm3, %v5015_v7, %v5017_v61  ;;  %v11564_v34 = vld [vmem:[#allocation47_spill] sm:$0xff]  ;;  %v5020_v7 = vsel %vm1002_vm3, %v5017_v61, %v5019_v4 }
 0x288   : > { %v3137_v0 = vor.u32 %v3136_v49, %v3133_v25 }
 0x28a   : > { %v3147_v25 = vsel %vm1583_vm5, %v3137_v0, %v3146_v15 }
 0x28b   : > { %7438 = vmatmul.mubr.msk.bf16.gmra.mrb[16].mxu1 %vm457_vm0, %v3102_v29  ;;  %v11561_v29 = vld [vmem:[#allocation46_spill] sm:$0xff] }
 0x28c   : > { %7441 = vmatprep.mubr.msk.bf16.mxu1 %vm457_vm0, %v3111_v8  ;;  %7600 = vmatmul.mubr.msk.bf16.gmra.mrb[8].mxu0 %vm457_vm0, %v5010_v9  ;;  %v8194_v9 = vld [vmem:[#allocation2 + $0x10] sm:$0xff]  ;;  %v11563_v8 = vld [vmem:[#allocation45_spill] sm:$0xff] }
 0x28d   : > { %7603 = vmatprep.mubr.msk.bf16.mxu0 %vm457_vm0, %v5012_v21  ;;  %v3419_v17 = vmul.bf16 %v8194_v9, %v11561_v29  ;;  %v3418_v60 = vmul.bf16 %v3401_v18, %v11563_v8  ;;  %v3152_v21 = vshll.u32 %v3002_v39, 16  ;;  %v3138_v9 = vsel %vm1583_vm5, %v3128_v24, %v3137_v0 }
 0x28e   : > { %v3151_v29 = vrot.slane %v3149_v58, 4  ;;  %v5021_v8 = vrot.slane %v9871_v47, 4 }
 0x28f   : > { %v3446_v10 = vshrl.u32 %v3419_v17, 16  ;;  %v3449_v50 = vshll.u32 %v3419_v17, 16  ;;  %v3441_v42 = vshll.u32 %v3418_v60, 16  ;;  %v3421_v17 = vmul.bf16 %v8195_v57, %v11566_v46  ;;  %v11567_v57 = vld [vmem:[#allocation50_spill] sm:$0xff] }
 0x291   : > { %v3448_v49 = vrot.slane %v3446_v10, 3  ;;  %v3451_v39 = vrot.slane %v3449_v50, 4  ;;  %v3443_v18 = vrot.slane %v3441_v42, 4  ;;  %v3464_v10 = vshrl.u32 %v3421_v17, 16 }
 0x292   : > { %v3467_v50 = vshll.u32 %v3421_v17, 16 }
 0x293   : > { %7442 = vmatmul.mubr.msk.bf16.gmra.mrb[20].mxu1 %vm457_vm0, %v3120_v35  ;;  %v11565_v35 = vld [vmem:[#allocation49_spill] sm:$0xff] }
 0x294   : > { %7445 = vmatprep.mubr.msk.bf16.mxu1 %vm457_vm0, %v3129_v11  ;;  %7604 = vmatmul.mubr.msk.bf16.gmra.mrb[12].mxu0 %vm457_vm0, %v5014_v16  ;;  %v3438_v16 = vshrl.u32 %v3418_v60, 16  ;;  %v3420_v11 = vmul.bf16 %v11565_v35, %v11564_v34  ;;  %v5023_v34 = vrot.slane %v9873_v27, 4 }
 0x295   : > { %7607 = vmatprep.mubr.msk.bf16.mxu0 %vm457_vm0, %v5016_v51  ;;  %v3154_v51 = vrot.slane %v3152_v21, 5  ;;  %v3452_v21 = vor.u32 %v3451_v39, %v3448_v49 }
 0x296   : > { %v3440_v24 = vrot.slane %v3438_v16, 3  ;;  %v3455_v58 = vshrl.u32 %v3420_v11, 16  ;;  %v3458_v0 = vshll.u32 %v3420_v11, 16  ;;  %v3422_v16 = vmul.bf16 %v9664_v44, %v11567_v57 }
 0x297   : > { %v3155_v60 = vor.u32 %v3154_v51, %v3151_v29  ;;  %v3466_v11 = vrot.slane %v3464_v10, 3  ;;  %v3469_v29 = vrot.slane %v3467_v50, 4  ;;  %v11568_v51 = vld [vmem:[#allocation51_spill] sm:$0xff]  ;;  %v11569_v10 = vld [vmem:[#allocation52_spill] sm:$0xff] }
 0x298   : > { %v3444_v35 = vor.u32 %v3443_v18, %v3440_v24  ;;  %v3457_v61 = vrot.slane %v3455_v58, 3  ;;  %v3423_v49 = vmul.bf16 %v9682_v1, %v11568_v51  ;;  %v3473_v39 = vshrl.u32 %v3422_v16, 16 }
 0x299   : > { %v3476_v46 = vshll.u32 %v3422_v16, 16  ;;  %v3470_v17 = vor.u32 %v3469_v29, %v3466_v11  ;;  %v5027_v18 = vrot.slane %v9891_v59, 4 }
 0x29a   : > { %v3453_v42 = vsel %vm2028_vm4, %v3444_v35, %v3452_v21  ;;  %v3485_v24 = vshll.u32 %v3423_v49, 16  ;;  %v3475_v58 = vrot.slane %v3473_v39, 3  ;;  %v11573_v39 = vld [vmem:[#allocation55_spill] sm:$0xff] }
 0x29b   : > { %7446 = vmatmul.mubr.msk.bf16.gmra.mrb[24].mxu1 %vm457_vm0, %v3138_v9  ;;  %v5022_v9 = vsel %vm1002_vm3, %v5019_v4, %v5021_v8  ;;  %v5025_v4 = vrot.slane %v9885_v38, 4 }
 0x29c   : > { %7449 = vmatprep.mubr.msk.bf16.mxu1 %vm457_vm0, %v3147_v25  ;;  %7608 = vmatmul.mubr.msk.bf16.gmra.mrb[16].mxu0 %vm457_vm0, %v5018_v53  ;;  %v3156_v53 = vsel %vm1583_vm5, %v3146_v15, %v3155_v60  ;;  %v3460_v25 = vrot.slane %v3458_v0, 4  ;;  %v5024_v15 = vsel %vm1002_vm3, %v5021_v8, %v5023_v34  ;;  %v3478_v0 = vrot.slane %v3476_v46, 4 }
 0x29d   : > { %7611 = vmatprep.mubr.msk.bf16.mxu0 %vm457_vm0, %v5020_v7  ;;  %v3482_v7 = vshrl.u32 %v3423_v49, 16  ;;  %v5026_v1 = vsel %vm1002_vm3, %v5023_v34, %v5025_v4  ;;  %v3424_v8 = vmul.bf16 %v9709_v63, %v11569_v10  ;;  %v11571_v34 = vld [vmem:[#allocation41_spill] sm:$0xff]  ;;  %v5029_v63 = vrot.slane %v9903_v52, 4  ;;  %v11575_v10 = vld [vmem:[#allocation43_spill] sm:$0xff] }
 0x29e   : > { %v3461_v44 = vor.u32 %v3460_v25, %v3457_v61  ;;  %v5279_v25 = vmul.bf16 %v9705_v19, %v11571_v34  ;;  %v3479_v57 = vor.u32 %v3478_v0, %v3475_v58  ;;  %v3427_v19 = vmul.bf16 %v9787_v36, %v11573_v39 }
 0x29f   : > { %v3484_v35 = vrot.slane %v3482_v7, 3  ;;  %v3491_v16 = vshrl.u32 %v3424_v8, 16 }
 0x2a0   : > { %v3462_v60 = vsel %vm2028_vm4, %v3452_v21, %v3461_v44  ;;  %v3471_v50 = vsel %vm2028_vm4, %v3461_v44, %v3470_v17  ;;  %v5028_v21 = vsel %vm1002_vm3, %v5025_v4, %v5027_v18  ;;  %v5325_v49 = vshll.u32 %v5279_v25, 16 }
 0x2a1   : > { %v5030_v4 = vsel %vm1002_vm3, %v5027_v18, %v5029_v63  ;;  %v3480_v46 = vsel %vm2028_vm4, %v3470_v17, %v3479_v57  ;;  %v3493_v7 = vrot.slane %v3491_v16, 3 }
 0x2a2   : > { %v5327_v17 = vrot.slane %v5325_v49, 5 }
 0x2a3   : > { %7450 = vmatmul.mubr.msk.bf16.gmra.mrb[28].mxu1 %vm457_vm0, %v3156_v53  ;;  %v11570_v53 = vld [vmem:[#allocation53_spill] sm:$0xff] }
 0x2a4   : > { %7455 = vmatprep.mubr.msk.bf16.mxu1 %vm457_vm0, %v3453_v42  ;;  %7612 = vmatmul.mubr.msk.bf16.gmra.mrb[20].mxu0 %vm457_vm0, %v5022_v9  ;;  %v3487_v9 = vrot.slane %v3485_v24, 4  ;;  %v3425_v61 = vmul.bf16 %v9731_v13, %v11570_v53  ;;  %v3494_v42 = vshll.u32 %v3424_v8, 16  ;;  %v5322_v13 = vshrl.u32 %v5279_v25, 16  ;;  %v11574_v24 = vld [vmem:[#allocation42_spill] sm:$0xff] }
 0x2a5   : > { %7615 = vmatprep.mubr.msk.bf16.mxu0 %vm457_vm0, %v5024_v15  ;;  %v11572_v15 = vld [vmem:[#allocation54_spill] sm:$0xff] }
 0x2a6   : > { %v3488_v11 = vor.u32 %v3487_v9, %v3484_v35  ;;  %v3500_v29 = vshrl.u32 %v3425_v61, 16  ;;  %v3503_v51 = vshll.u32 %v3425_v61, 16  ;;  %v3426_v44 = vmul.bf16 %v9774_v45, %v11572_v15  ;;  %v11576_v8 = vld [vmem:[#allocation38_spill] sm:$0xff] }
 0x2a7   : > { %v3496_v52 = vrot.slane %v3494_v42, 4  ;;  %v5281_v45 = vmul.bf16 %v9761_v20, %v11575_v10  ;;  %v5324_v36 = vrot.slane %v5322_v13, 4  ;;  %v3521_v35 = vshll.u32 %v3427_v19, 16 }
 0x2a8   : > { %v3502_v58 = vrot.slane %v3500_v29, 3  ;;  %v3505_v0 = vrot.slane %v3503_v51, 4  ;;  %v3509_v18 = vshrl.u32 %v3426_v44, 16  ;;  %v11577_v29 = vld [vmem:[#allocation56_spill] sm:$0xff] }
 0x2a9   : > { %v3497_v9 = vor.u32 %v3496_v52, %v3493_v7  ;;  %v5340_v34 = vshrl.u32 %v5281_v45, 16  ;;  %v5343_v25 = vshll.u32 %v5281_v45, 16  ;;  %v5328_v20 = vor.u32 %v5327_v17, %v5324_v36  ;;  %v11579_v52 = vld [vmem:[#allocation40_spill] sm:$0xff] }
 0x2aa   : > { %v3511_v63 = vrot.slane %v3509_v18, 3  ;;  %v3523_v42 = vrot.slane %v3521_v35, 4  ;;  %v3428_v51 = vmul.bf16 %v9812_v41, %v11577_v29  ;;  %v5282_v7 = vmul.bf16 %v9791_v32, %v9368_v43  ;;  %v11580_v41 = vld [vmem:[#allocation39_spill] sm:$0xff] }
 0x2ab   : > { %7456 = vmatmul.mubr.msk.bf16.vlgmr.msra.gmra.mrb[0].mxu1 %vm457_vm0, %v3462_v60  ;;  %v3489_v60 = vsel %vm2028_vm4, %v3479_v57, %v3488_v11  ;;  %v3498_v13 = vsel %vm2028_vm4, %v3488_v11, %v3497_v9  ;;  %v5329_v11 = vsel %vm1583_vm5, %v11580_v41, %v5328_v20  ;;  %v11582_v35 = vld [vmem:[#allocation59_spill] sm:$0xff] }
 0x2ac   : > { %7459 = vmatprep.mubr.msk.bf16.mxu1 %vm457_vm0, %v3471_v50  ;;  %7616 = vmatmul.mubr.msk.bf16.gmra.mrb[24].mxu0 %vm457_vm0, %v5026_v1  ;;  %v5280_v1 = vmul.bf16 %v9746_v40, %v11574_v24  ;;  %v3512_v40 = vshll.u32 %v3426_v44, 16  ;;  %v3518_v50 = vshrl.u32 %v3427_v19, 16  ;;  %v11578_v44 = vld [vmem:[#allocation57_spill] sm:$0xff]  ;;  %v5342_v19 = vrot.slane %v5340_v34, 4 }
 0x2ad   : > { %7619 = vmatprep.mubr.msk.bf16.mxu0 %vm457_vm0, %v5028_v21  ;;  %v3506_v21 = vor.u32 %v3505_v0, %v3502_v58  ;;  %v3530_v0 = vshll.u32 %v3428_v51, 16  ;;  %v5349_v45 = vshrl.u32 %v5282_v7, 16  ;;  %v5352_v36 = vshll.u32 %v5282_v7, 16 }
 0x2ae   : > { %v5331_v53 = vshrl.u32 %v5280_v1, 16  ;;  %v5334_v61 = vshll.u32 %v5280_v1, 16  ;;  %v3514_v57 = vrot.slane %v3512_v40, 4  ;;  %v3520_v16 = vrot.slane %v3518_v50, 3 }
 0x2af   : > { %v3507_v39 = vsel %vm2028_vm4, %v3497_v9, %v3506_v21  ;;  %v3431_v9 = vmul.bf16 %v9840_v12, %v11582_v35 }
 0x2b0   : > { %v5333_v49 = vrot.slane %v5331_v53, 4  ;;  %v5336_v15 = vrot.slane %v5334_v61, 5  ;;  %v3515_v24 = vor.u32 %v3514_v57, %v3511_v63  ;;  %v3524_v1 = vor.u32 %v3523_v42, %v3520_v16 }
 0x2b1   : > { %v3532_v61 = vrot.slane %v3530_v0, 4  ;;  %v5351_v57 = vrot.slane %v5349_v45, 4  ;;  %v5354_v16 = vrot.slane %v5352_v36, 5  ;;  %v5286_v45 = vmul.bf16 %v11562_v3, %v9443_v30 }
 0x2b2   : > { %v5337_v58 = vor.u32 %v5336_v15, %v5333_v49  ;;  %v3516_v50 = vsel %vm2028_vm4, %v3506_v21, %v3515_v24 }
 0x2b3   : > { %7460 = vmatmul.mubr.msk.bf16.gmra.mrb[4].mxu1 %vm457_vm0, %v3480_v46  ;;  %v5345_v46 = vrot.slane %v5343_v25, 5  ;;  %v5385_v3 = vshrl.u32 %v5286_v45, 16 }
 0x2b4   : > { %7463 = vmatprep.mubr.msk.bf16.mxu1 %vm457_vm0, %v3489_v60  ;;  %7620 = vmatmul.mubr.msk.bf16.gmra.mrb[28].mxu0 %vm457_vm0, %v5030_v4  ;;  %v3429_v4 = vmul.bf16 %v9818_v26, %v11578_v44  ;;  %v5283_v26 = vmul.bf16 %v9793_v56, %v9390_v48  ;;  %v3527_v60 = vshrl.u32 %v3428_v51, 16  ;;  %v3525_v48 = vsel %vm2028_vm4, %v3515_v24, %v3524_v1  ;;  %v8196_v24 = vld [vmem:[#allocation2 + $0x80] sm:$0xff] }
 0x2b5   : > { %7625 = vmatprep.mubr.msk.bf16.mxu0 %vm457_vm0, %v11576_v8  ;;  %v5346_v32 = vor.u32 %v5345_v46, %v5342_v19  ;;  %v11581_v8 = vld [vmem:[#allocation58_spill] sm:$0xff]  ;;  %v5338_v53 = vsel %vm1583_vm5, %v5328_v20, %v5337_v58  ;;  %v5285_v20 = vmul.bf16 %v9828_v6, %v9427_v54  ;;  %v3554_v51 = vshrl.u32 %v3431_v9, 16 }
 0x2b6   : > { %v3536_v10 = vshrl.u32 %v3429_v4, 16  ;;  %v3539_v43 = vshll.u32 %v3429_v4, 16  ;;  %v5358_v17 = vshrl.u32 %v5283_v26, 16  ;;  %v5361_v18 = vshll.u32 %v5283_v26, 16 }
 0x2b7   : > { %v3430_v40 = vmul.bf16 %v9833_v2, %v11581_v8  ;;  %v3529_v56 = vrot.slane %v3527_v60, 3  ;;  %v5347_v63 = vsel %vm1583_vm5, %v5337_v58, %v5346_v32  ;;  %v5284_v2 = vmul.bf16 %v9816_v23, %v9400_v55  ;;  %v11584_v60 = vld [vmem:[#allocation63_spill] sm:$0xff] }
 0x2b8   : > { %v3538_v34 = vrot.slane %v3536_v10, 3  ;;  %v3541_v25 = vrot.slane %v3539_v43, 4  ;;  %v5360_v21 = vrot.slane %v5358_v17, 4  ;;  %v5363_v12 = vrot.slane %v5361_v18, 5 }
 0x2b9   : > { %v3545_v42 = vshrl.u32 %v3430_v40, 16  ;;  %v3548_v29 = vshll.u32 %v3430_v40, 16  ;;  %v3533_v49 = vor.u32 %v3532_v61, %v3529_v56  ;;  %v5355_v44 = vor.u32 %v5354_v16, %v5351_v57  ;;  %v8197_v57 = vld [vmem:[#allocation2 + $0x88] sm:$0xf] }
 0x2ba   : > { %v3542_v15 = vor.u32 %v3541_v25, %v3538_v34  ;;  %v5367_v4 = vshrl.u32 %v5284_v2, 16  ;;  %v5370_v55 = vshll.u32 %v5284_v2, 16  ;;  %v5364_v23 = vor.u32 %v5363_v12, %v5360_v21  ;;  %v11585_v16 = vld [vmem:[#allocation61_spill] sm:$0xff] }
 0x2bb   : > { %7464 = vmatmul.mubr.msk.bf16.gmra.mrb[8].mxu1 %vm457_vm0, %v3498_v13  ;;  %v3557_v13 = vshll.u32 %v3431_v9, 16  ;;  %v5376_v19 = vshrl.u32 %v5285_v20, 16  ;;  %v5379_v46 = vshll.u32 %v5285_v20, 16  ;;  %v3550_v7 = vrot.slane %v3548_v29, 4 }
 0x2bc   : > { %7467 = vmatprep.mubr.msk.bf16.mxu1 %vm457_vm0, %v3507_v39  ;;  %7626 = vmatmul.mubr.msk.bf16.vlgmr.msra.gmra.mrb[0].mxu0 %vm457_vm0, %v11579_v52  ;;  %v3547_v39 = vrot.slane %v3545_v42, 3  ;;  %v3556_v52 = vrot.slane %v3554_v51, 3  ;;  %v3534_v6 = vsel %vm2028_vm4, %v3524_v1, %v3533_v49  ;;  %v3543_v26 = vsel %vm2028_vm4, %v3533_v49, %v3542_v15 }
 0x2bd   : > { %7629 = vmatprep.mubr.msk.bf16.mxu0 %vm457_vm0, %v5329_v11  ;;  %v3559_v41 = vrot.slane %v3557_v13, 4  ;;  %v11583_v11 = vld [vmem:[#allocation60_spill] sm:$0xff]  ;;  %v3433_v58 = vmul.bf16 %v8196_v24, %v11584_v60  ;;  %v5356_v0 = vsel %vm1583_vm5, %v5346_v32, %v5355_v44  ;;  %v5369_v10 = vrot.slane %v5367_v4, 4 }
 0x2be   : > { %v3432_v54 = vmul.bf16 %v9865_v5, %v11583_v11  ;;  %v5372_v43 = vrot.slane %v5370_v55, 5  ;;  %v5365_v5 = vsel %vm1583_vm5, %v5355_v44, %v5364_v23  ;;  %v5378_v1 = vrot.slane %v5376_v19, 4 }
 0x2bf   : > { %v5381_v36 = vrot.slane %v5379_v46, 5  ;;  %v5287_v17 = vmul.bf16 %v9850_v22, %v9460_v31  ;;  %v3551_v18 = vor.u32 %v3550_v7, %v3547_v39  ;;  %v3560_v32 = vor.u32 %v3559_v41, %v3556_v52 }
 0x2c0   : > { %v3563_v8 = vshrl.u32 %v3432_v54, 16  ;;  %v3566_v40 = vshll.u32 %v3432_v54, 16  ;;  %v5373_v30 = vor.u32 %v5372_v43, %v5369_v10  ;;  %v5388_v56 = vshll.u32 %v5286_v45, 16 }
 0x2c1   : > { %v5382_v35 = vor.u32 %v5381_v36, %v5378_v1  ;;  %v5394_v9 = vshrl.u32 %v5287_v17, 16  ;;  %v3552_v61 = vsel %vm2028_vm4, %v3542_v15, %v3551_v18  ;;  %v3561_v34 = vsel %vm2028_vm4, %v3551_v18, %v3560_v32 }
 0x2c2   : > { %v3565_v25 = vrot.slane %v3563_v8, 3  ;;  %v3568_v31 = vrot.slane %v3566_v40, 4  ;;  %v3434_v2 = vmul.bf16 %v8197_v57, %v11585_v16  ;;  %v5374_v21 = vsel %vm1583_vm5, %v5364_v23, %v5373_v30 }
 0x2c3   : > { %7468 = vmatmul.mubr.msk.bf16.gmra.mrb[12].mxu1 %vm457_vm0, %v3516_v50  ;;  %v3572_v50 = vshrl.u32 %v3433_v58, 16  ;;  %v5387_v12 = vrot.slane %v5385_v3, 4  ;;  %v5390_v42 = vrot.slane %v5388_v56, 5  ;;  %v5288_v20 = vmul.bf16 %v9871_v47, %v9484_v14 }
 0x2c4   : > { %7471 = vmatprep.mubr.msk.bf16.mxu1 %vm457_vm0, %v3525_v48  ;;  %7630 = vmatmul.mubr.msk.bf16.gmra.mrb[4].mxu0 %vm457_vm0, %v5338_v53  ;;  %v3575_v48 = vshll.u32 %v3433_v58, 16  ;;  %v5397_v53 = vshll.u32 %v5287_v17, 16  ;;  %v5383_v29 = vsel %vm1583_vm5, %v5373_v30, %v5382_v35  ;;  %v5396_v51 = vrot.slane %v5394_v9, 4 }
 0x2c5   : > { %7633 = vmatprep.mubr.msk.bf16.mxu0 %vm457_vm0, %v5347_v63  ;;  %v3574_v22 = vrot.slane %v3572_v50, 3  ;;  %v5289_v49 = vmul.bf16 %v9873_v27, %v9497_v37  ;;  %v3569_v15 = vor.u32 %v3568_v31, %v3565_v25  ;;  %v3581_v4 = vshrl.u32 %v3434_v2, 16 }
 0x2c6   : > { %v3577_v63 = vrot.slane %v3575_v48, 4  ;;  %v5399_v13 = vrot.slane %v5397_v53, 5  ;;  %v3584_v55 = vshll.u32 %v3434_v2, 16  ;;  %v5391_v23 = vor.u32 %v5390_v42, %v5387_v12 }
 0x2c7   : > { %v5403_v39 = vshrl.u32 %v5288_v20, 16  ;;  %v5406_v14 = vshll.u32 %v5288_v20, 16  ;;  %v5412_v19 = vshrl.u32 %v5289_v49, 16  ;;  %v5415_v46 = vshll.u32 %v5289_v49, 16 }
 0x2c8   : > { %v3578_v44 = vor.u32 %v3577_v63, %v3574_v22  ;;  %v5400_v47 = vor.u32 %v5399_v13, %v5396_v51  ;;  %v3570_v7 = vsel %vm2028_vm4, %v3560_v32, %v3569_v15  ;;  %v3583_v41 = vrot.slane %v3581_v4, 3  ;;  %v10154_v51 = vld [vmem:[%s11394_s6] ss:$0 sm:$0xff] }
 0x2c9   : > { %v3586_v11 = vrot.slane %v3584_v55, 4  ;;  %v5392_v37 = vsel %vm1583_vm5, %v5382_v35, %v5391_v23  ;;  %v5405_v27 = vrot.slane %v5403_v39, 4  ;;  %v5408_v54 = vrot.slane %v5406_v14, 5 }
 0x2ca   : > { %v3579_v52 = vsel %vm2028_vm4, %v3569_v15, %v3578_v44  ;;  %v5414_v24 = vrot.slane %v5412_v19, 4  ;;  %v5417_v60 = vrot.slane %v5415_v46, 5  ;;  %v5291_v58 = vmul.bf16 %v9891_v59, %v9536_v33 }
 0x2cb   : > { %7472 = vmatmul.mubr.msk.bf16.gmra.mrb[16].mxu1 %vm457_vm0, %v3534_v6  ;;  %v5290_v6 = vmul.bf16 %v9885_v38, %v9514_v28  ;;  %v5409_v10 = vor.u32 %v5408_v54, %v5405_v27  ;;  %v5275_v38 = vld [vmem:[#allocation2 + $0x90] sm:$0x1f] }
 0x2cc   : > { %7475 = vmatprep.mubr.msk.bf16.mxu1 %vm457_vm0, %v3543_v26  ;;  %7634 = vmatmul.mubr.msk.bf16.gmra.mrb[8].mxu0 %vm457_vm0, %v5356_v0  ;;  %v5401_v26 = vsel %vm1583_vm5, %v5391_v23, %v5400_v47  ;;  %v3587_v0 = vor.u32 %v3586_v11, %v3583_v41  ;;  %v5430_v1 = vshrl.u32 %v5291_v58, 16  ;;  %v5433_v28 = vshll.u32 %v5291_v58, 16 }
 0x2cd   : > { %7637 = vmatprep.mubr.msk.bf16.mxu0 %vm457_vm0, %v5365_v5  ;;  %v5421_v43 = vshrl.u32 %v5290_v6, 16  ;;  %v5424_v45 = vshll.u32 %v5290_v6, 16  ;;  %v5418_v5 = vor.u32 %v5417_v60, %v5414_v24  ;;  %v5410_v17 = vsel %vm1583_vm5, %v5400_v47, %v5409_v10 }
 0x2ce   : > { %v3588_v36 = vsel %vm2028_vm4, %v3578_v44, %v3587_v0  ;;  %v5292_v33 = vmul.bf16 %v5275_v38, %v11560_v62  ;;  %v5432_v8 = vrot.slane %v5430_v1, 4  ;;  %v5435_v40 = vrot.slane %v5433_v28, 5 }
 0x2cf   : > { %v5423_v18 = vrot.slane %v5421_v43, 4  ;;  %v5426_v32 = vrot.slane %v5424_v45, 5  ;;  %v5419_v59 = vsel %vm1583_vm5, %v5409_v10, %v5418_v5 }
 0x2d0   : > { %v5439_v48 = vshrl.u32 %v5292_v33, 16  ;;  %v5442_v30 = vshll.u32 %v5292_v33, 16  ;;  %v5436_v3 = vor.u32 %v5435_v40, %v5432_v8 }
 0x2d1   : > { %v5427_v50 = vor.u32 %v5426_v32, %v5423_v18 }
 0x2d2   : > { %v5441_v35 = vrot.slane %v5439_v48, 4  ;;  %v5444_v9 = vrot.slane %v5442_v30, 5 }
 0x2d3   : > { %7476 = vmatmul.mubr.msk.bf16.gmra.mrb[20].mxu1 %vm457_vm0, %v3552_v61  ;;  %v5428_v56 = vsel %vm1583_vm5, %v5418_v5, %v5427_v50  ;;  %v5437_v62 = vsel %vm1583_vm5, %v5427_v50, %v5436_v3 }
 0x2d4   : > { %7479 = vmatprep.mubr.msk.bf16.mxu1 %vm457_vm0, %v3561_v34  ;;  %7638 = vmatmul.mubr.msk.bf16.gmra.mrb[12].mxu0 %vm457_vm0, %v5374_v21  ;;  %v5445_v53 = vor.u32 %v5444_v9, %v5441_v35  ;;  %v6610_v34 = vld [vmem:[%s11395_s7] sm:$0xf] }
 0x2d5   : > { %7641 = vmatprep.mubr.msk.bf16.mxu0 %vm457_vm0, %v5383_v29  ;;  %7956 = vmatprep.subr.msk.bf16.mxu1 %vm1002_vm3, %v6610_v34  ;;  %v6669_v25 = vsel %vm1002_vm3, %v6610_v34, 0 }
 0x2d6   : > { %v5446_v61 = vsel %vm1583_vm5, %v5436_v3, %v5445_v53  ;;  %7658 = vmatpush3.bf16.msra.mxu1 %v6669_v25 }
 0x2db   : > { %7480 = vmatmul.mubr.msk.bf16.gmra.mrb[24].mxu1 %vm457_vm0, %v3570_v7 }
 0x2dc   : > { %7483 = vmatprep.mubr.msk.bf16.mxu1 %vm457_vm0, %v3579_v52  ;;  %7642 = vmatmul.mubr.msk.bf16.gmra.mrb[16].mxu0 %vm457_vm0, %v5392_v37 }
 0x2dd   : > { %7645 = vmatprep.mubr.msk.bf16.mxu0 %vm457_vm0, %v5401_v26 }
 0x2e3   : > { %7484 = vmatmul.mubr.msk.bf16.gmra.mrb[28].mxu1 %vm457_vm0, %v3588_v36 }
 0x2e4   : > { %7646 = vmatmul.mubr.msk.bf16.gmra.mrb[20].mxu0 %vm457_vm0, %v5410_v17 }
 0x2e5   : > { %7649 = vmatprep.mubr.msk.bf16.mxu0 %vm457_vm0, %v5419_v59 }
 0x2ec   : > { %7650 = vmatmul.mubr.msk.bf16.gmra.mrb[24].mxu0 %vm457_vm0, %v5428_v56 }
 0x2ed   : > { %7653 = vmatprep.mubr.msk.bf16.mxu0 %vm457_vm0, %v5437_v62 }
 0x2f4   : > { %7654 = vmatmul.mubr.msk.bf16.gmra.mrb[28].mxu0 %vm457_vm0, %v5446_v61 }
 0x37e   : > { %v7457_v31 = vpop.f32.mrb[0].mxu1 }
 0x37f   : > { %v3674_v22 = vpop.f32.mrb[1].mxu1 }
 0x380   : > { %v7458_v63 = vpop.f32.mrb[2].mxu1 }
 0x381   : > { %v3677_v57 = vpop.f32.mrb[3].mxu1 }
 0x386   : > { %v7461_v16 = vpop.f32.mrb[4].mxu1 }
 0x387   : > { %v3690_v2 = vpop.f32.mrb[5].mxu1 }
 0x388   : > { %v7462_v21 = vpop.f32.mrb[6].mxu1 }
 0x389   : > { %v3693_v12 = vpop.f32.mrb[7].mxu1 }
 0x38e   : > { %v10147_v42 = vpop.f32.mrb[8].mxu1 }
 0x38f   : > { %v10149_v20 = vpop.f32.mrb[9].mxu1  ;;  %v7627_v29 = vpop.f32.mrb[0].mxu0 }
 0x390   : > { %v10156_v13 = vpop.f32.mrb[10].mxu1  ;;  %v7691_v49 = vadd.f32 %v7627_v29, %v7457_v31  ;;  %v5532_v15 = vpop.f32.mrb[1].mxu0 }
 0x391   : > { %v10158_v44 = vpop.f32.mrb[11].mxu1  ;;  %v7692_v4 = vadd.f32 %v5532_v15, %v3674_v22  ;;  %v7628_v55 = vpop.f32.mrb[2].mxu0 }
 0x392   : > { %v5700_v23 = vadd.f32 %v7691_v49, %v10154_v51  ;;  %v7693_v39 = vadd.f32 %v7628_v55, %v7458_v63  ;;  %v5535_v14 = vpop.f32.mrb[3].mxu0  ;;  %v11462_v49 = vmov -1.0  }
 0x393   : > { %v5698_v47 = vadd.f32 %v7692_v4, %v10154_v51  ;;  %v7694_v19 = vadd.f32 %v5535_v14, %v3677_v57 }
 0x394   : > { %v5764_v46 = vmul.f32 0.70710677, %v5700_v23  ;;  %v5701_v7 = vadd.f32 %v7693_v39, %v10154_v51  ;;  %v10186_v8 = vmul.f32 0.5, %v5700_v23 }
 0x395   : > { %v5762_v52 = vmul.f32 0.70710677, %v5698_v47  ;;  %v5699_v37 = vadd.f32 %v7694_v19, %v10154_v51 }
 0x396   : > { %v5860_v41 = vand.u32 2147483647, %v5764_v46  ;;  %v10163_v11 = vmul.f32 0.70710677, %v5701_v7  ;;  %v10166_v54 = vpop.f32.mrb[12].mxu1  ;;  %vm5796_vm7 = vcmp.ge.f32.partialorder %v5764_v46, 0.0 }
 0x397   : > { %v5858_v27 = vand.u32 2147483647, %v5762_v52  ;;  %v10168_v26 = vpop.f32.mrb[13].mxu1  ;;  %v10173_v0 = vmul.f32 0.70710677, %v5699_v37  ;;  %v7631_v43 = vpop.f32.mrb[4].mxu0 }
 0x398   : > { %v5892_v6 = vmul.f32 0.3275911, %v5860_v41  ;;  %v10171_v60 = vand.u32 2147483647, %v10163_v11  ;;  %v10175_v10 = vpop.f32.mrb[14].mxu1  ;;  %v5548_v28 = vpop.f32.mrb[5].mxu0  ;;  %v7695_v40 = vadd.f32 %v7631_v43, %v7461_v16 }
 0x399   : > { %v5890_v24 = vmul.f32 0.3275911, %v5858_v27  ;;  %v10178_v1 = vpop.f32.mrb[15].mxu1  ;;  %v10181_v38 = vand.u32 2147483647, %v10173_v0  ;;  %v7632_v36 = vpop.f32.mrb[6].mxu0  ;;  %v7696_v50 = vadd.f32 %v5548_v28, %v3690_v2 }
 0x39a   : > { %v5924_v58 = vadd.f32 1.0, %v5892_v6  ;;  %v5893_v5 = vmul.f32 0.3275911, %v10171_v60  ;;  %v5551_v18 = vpop.f32.mrb[7].mxu0  ;;  %v6308_v32 = vsub.f32 0.0, %v5860_v41  ;;  %v6306_v3 = vsub.f32 0.0, %v5858_v27 }
 0x39b   : > { %v5922_v45 = vadd.f32 1.0, %v5890_v24  ;;  %v5891_v33 = vmul.f32 0.3275911, %v10181_v38  ;;  %v7697_v35 = vadd.f32 %v7632_v36, %v7462_v21  ;;  %vm5794_vm8 = vcmp.ge.f32.partialorder %v5762_v52, 0.0 }
 0x39c   : > { %8038 = vrcp.f32 %v5924_v58  ;;  %v5925_v17 = vadd.f32 1.0, %v5893_v5  ;;  %v10195_v53 = vadd.f32 %v7695_v40, %v10154_v51  ;;  %v10198_v61 = vadd.f32 %v7696_v50, %v10154_v51 }
 0x39d   : > { %8040 = vrcp.f32 %v5922_v45  ;;  %v5923_v56 = vadd.f32 1.0, %v5891_v33  ;;  %v7698_v34 = vadd.f32 %v5551_v18, %v3693_v12  ;;  %v6340_v22 = vmul.f32 %v6308_v32, %v5860_v41 }
 0x39e   : > { %v10184_v59 = vpop.f32.mrb[16].mxu1  ;;  %8042 = vrcp.f32 %v5925_v17  ;;  %v10205_v63 = vadd.f32 %v7697_v35, %v10154_v51  ;;  %v10212_v2 = vmul.f32 0.5, %v5698_v47  ;;  %v10214_v21 = vmul.f32 0.5, %v5701_v7 }
 0x39f   : > { %11586 = vst [vmem:[#allocation35_spill] sm:$0xff] %v10184_v59  ;;  %v10188_v48 = vpop.f32.mrb[17].mxu1  ;;  %v7635_v30 = vpop.f32.mrb[8].mxu0  ;;  %8044 = vrcp.f32 %v5923_v56  ;;  %v10217_v12 = vmul.f32 0.70710677, %v10195_v53  ;;  %v10224_v15 = vsel %vm5796_vm7, 1.0, %v11462_v49  ;;  %v6338_v4 = vmul.f32 %v6306_v3, %v5858_v27 }
 0x3a0   : > { %11587 = vst [vmem:[#allocation36_spill] sm:$0xff] %v10188_v48  ;;  %v10190_v9 = vpop.f32.mrb[18].mxu1  ;;  %v10192_v62 = vpop.f32.mrb[9].mxu0  ;;  %v10208_v57 = vadd.f32 %v7635_v30, %v10147_v42  ;;  %v10220_v29 = vmul.f32 0.70710677, %v10198_v61  ;;  %vm5797_vm9 = vcmp.ge.f32.partialorder %v10163_v11, 0.0 }
 0x3a1   : > { %11588 = vst [vmem:[#allocation37_spill] sm:$0xff] %v10190_v9  ;;  %v10200_v25 = vpop.f32.mrb[19].mxu1  ;;  %v10202_v31 = vpop.f32.mrb[10].mxu0  ;;  %v10228_v42 = vmul.f32 0.70710677, %v10205_v63  ;;  %v10232_v55 = vsel %vm5794_vm8, 1.0, %v11462_v49 }
 0x3a2   : > { %11589 = vst [vmem:[#allocation44_spill] sm:$0xff] %v10200_v25  ;;  %v10210_v16 = vpop.f32.mrb[11].mxu0  ;;  %v10234_v23 = vmul.f32 0.5, %v5699_v37  ;;  %v10237_v39 = vand.u32 2147483647, %v10217_v12  ;;  %v6309_v46 = vsub.f32 0.0, %v10171_v60 }
 0x3a3   : > { %v10240_v14 = vand.u32 2147483647, %v10220_v29  ;;  %v6374_v19 = vmul.f32 1.442695, %v6340_v22  ;;  %v10246_v7 = vand.u32 2147483647, %v10228_v42 }
 0x3a4   : > { %v10254_v37 = vsel %vm5797_vm9, 1.0, %v11462_v49  ;;  %v6307_v27 = vsub.f32 0.0, %v10181_v38  ;;  %v5896_v6 = vmul.f32 0.3275911, %v10237_v39  ;;  %v6370_v58 = vmul.f32 1.442695, %v6338_v4 }
 0x3a5   : > { %v5894_v43 = vmul.f32 0.3275911, %v10240_v14  ;;  %vm5795_vm10 = vcmp.ge.f32.partialorder %v10173_v0, 0.0  ;;  %v6341_v32 = vmul.f32 %v6309_v46, %v10171_v60  ;;  %v5897_v40 = vmul.f32 0.3275911, %v10246_v7 }
 0x3a6   : > { %v10242_v47 = vpop.eup %8038  ;;  %v10248_v41 = vpop.f32.mrb[20].mxu1  ;;  %v5928_v5 = vadd.f32 1.0, %v5896_v6  ;;  %v6339_v56 = vmul.f32 %v6307_v27, %v10181_v38  ;;  %vm5800_vm11 = vcmp.ge.f32.partialorder %v10217_v12, 0.0  ;;  %vm5798_vm12 = vcmp.ge.f32.partialorder %v10220_v29, 0.0 }
 0x3a7   : > { %11590 = vst [vmem:[#allocation46_spill] sm:$0xff] %v10248_v41  ;;  %v10250_v52 = vpop.eup %8040  ;;  %v6020_v11 = vmul.f32 1.0614054, %v10242_v47  ;;  %v10261_v28 = vpop.f32.mrb[21].mxu1  ;;  %v5926_v33 = vadd.f32 1.0, %v5894_v43  ;;  %v5929_v46 = vadd.f32 1.0, %v5897_v40 }
 0x3a8   : > { %v6018_v24 = vmul.f32 1.0614054, %v10250_v52  ;;  %11591 = vst [vmem:[#allocation62_spill] sm:$0xff] %v10261_v28  ;;  %v10263_v36 = vpop.f32.mrb[12].mxu0  ;;  %v10265_v17 = vpop.eup %8042  ;;  %8046 = vrcp.f32 %v5928_v5  ;;  %v10290_v5 = vsel %vm5795_vm10, 1.0, %v11462_v49  ;;  %v11605_v25 = vmov -1.0  }
 0x3a9   : > { %v6052_v45 = vadd.f32 -1.4531521, %v6020_v11  ;;  %v10269_v50 = vpop.f32.mrb[22].mxu1  ;;  %v6021_v3 = vmul.f32 1.0614054, %v10265_v17  ;;  %v10276_v22 = vpop.f32.mrb[13].mxu0  ;;  %8048 = vrcp.f32 %v5926_v33  ;;  %v10282_v11 = vadd.f32 %v7698_v34, %v10154_v51 }
 0x3aa   : > { %v6050_v18 = vadd.f32 -1.4531521, %v6018_v24  ;;  %11592 = vst [vmem:[#allocation45_spill] sm:$0xff] %v10269_v50  ;;  %v10274_v35 = vpop.f32.mrb[23].mxu1  ;;  %v10278_v4 = vpop.eup %8044  ;;  %8050 = vpow2.f32 %v6374_v19  ;;  %v6372_v19 = vmul.f32 1.442695, %v6339_v56 }
 0x3ab   : > { %v6084_v30 = vmul.f32 %v10242_v47, %v6052_v45  ;;  %11593 = vst [vmem:[#allocation47_spill] sm:$0xff] %v10274_v35  ;;  %v10284_v6 = vpop.f32.mrb[14].mxu0  ;;  %v6053_v43 = vadd.f32 -1.4531521, %v6021_v3  ;;  %v6019_v38 = vmul.f32 1.0614054, %v10278_v4  ;;  %8052 = vrcp.f32 %v5929_v46 }
 0x3ac   : > { %v6082_v60 = vmul.f32 %v10250_v52, %v6050_v18  ;;  %v6376_v45 = vmul.f32 1.442695, %v6341_v32  ;;  %v10292_v18 = vpop.f32.mrb[15].mxu0  ;;  %8054 = vpow2.f32 %v6370_v58  ;;  %v10301_v32 = vmul.f32 0.70710677, %v10282_v11 }
 0x3ad   : > { %v6116_v24 = vadd.f32 1.4214138, %v6084_v30  ;;  %v6085_v34 = vmul.f32 %v10265_v17, %v6053_v43  ;;  %v6051_v40 = vadd.f32 -1.4531521, %v6019_v38  ;;  %v10310_v46 = vadd.f32 %v10192_v62, %v10149_v20 }
 0x3ae   : > { %v6114_v27 = vadd.f32 1.4214138, %v6082_v60  ;;  %v10296_v30 = vpop.f32.mrb[24].mxu1  ;;  %8056 = vpow2.f32 %v6376_v45  ;;  %v10318_v56 = vmul.f32 0.5, %v10195_v53  ;;  %v10326_v20 = vmul.f32 0.5, %v10198_v61 }
 0x3af   : > { %v6148_v33 = vmul.f32 %v10242_v47, %v6116_v24  ;;  %11594 = vst [vmem:[#allocation49_spill] sm:$0xff] %v10296_v30  ;;  %v10298_v3 = vpop.f32.mrb[16].mxu0  ;;  %v10303_v0 = vpop.f32.mrb[25].mxu1  ;;  %v6117_v35 = vadd.f32 1.4214138, %v6085_v34  ;;  %v6083_v24 = vmul.f32 %v10278_v4, %v6051_v40  ;;  %8058 = vpow2.f32 %v6372_v19 }
 0x3b0   : > { %11595 = vst [vmem:[#allocation48_spill] sm:$0xff] %v10298_v3  ;;  %11596 = vst [vmem:[#allocation50_spill] sm:$0xff] %v10303_v0  ;;  %v10305_v60 = vpop.f32.mrb[17].mxu0  ;;  %v10312_v43 = vpop.f32.mrb[26].mxu1  ;;  %v6146_v58 = vmul.f32 %v10250_v52, %v6114_v27  ;;  %v10321_v0 = vand.u32 2147483647, %v10301_v32 }
 0x3b1   : > { %11597 = vst [vmem:[#allocation51_spill] sm:$0xff] %v10305_v60  ;;  %v6180_v49 = vadd.f32 -0.28449672, %v6148_v33  ;;  %11598 = vst [vmem:[#allocation52_spill] sm:$0xff] %v10312_v43  ;;  %v10314_v38 = vpop.f32.mrb[18].mxu0  ;;  %v6149_v34 = vmul.f32 %v10265_v17, %v6117_v35  ;;  %v10328_v62 = vpop.f32.mrb[27].mxu1 }
 0x3b2   : > { %11599 = vst [vmem:[#allocation53_spill] sm:$0xff] %v10314_v38  ;;  %v6115_v40 = vadd.f32 1.4214138, %v6083_v24  ;;  %11600 = vst [vmem:[#allocation41_spill] sm:$0xff] %v10328_v62  ;;  %v10330_v43 = vpop.f32.mrb[19].mxu0  ;;  %v10334_v53 = vmul.f32 0.5, %v10205_v63  ;;  %v10337_v45 = vpop.eup %8046 }
 0x3b3   : > { %v6212_v33 = vmul.f32 %v10242_v47, %v6180_v49  ;;  %11601 = vst [vmem:[#allocation54_spill] sm:$0xff] %v10330_v43  ;;  %v5895_v27 = vmul.f32 0.3275911, %v10321_v0  ;;  %v6181_v35 = vadd.f32 -0.28449672, %v6149_v34  ;;  %v6312_v61 = vsub.f32 0.0, %v10237_v39  ;;  %v10341_v30 = vpop.eup %8048 }
 0x3b4   : > { %11602 = vst [vmem:[#allocation55_spill] sm:$0xff] %v10334_v53  ;;  %v6147_v24 = vmul.f32 %v10278_v4, %v6115_v40  ;;  %v6178_v62 = vadd.f32 -0.28449672, %v6146_v58  ;;  %v6024_v19 = vmul.f32 1.0614054, %v10337_v45  ;;  %v8051_v43 = vpop.eup %8050  ;;  %v10355_v58 = vsel %vm5800_vm11, 1.0, %v11605_v25 }
 0x3b5   : > { %v6244_v49 = vadd.f32 0.2548296, %v6212_v33  ;;  %v5927_v50 = vadd.f32 1.0, %v5895_v27  ;;  %v6213_v28 = vmul.f32 %v10265_v17, %v6181_v35  ;;  %v6022_v33 = vmul.f32 1.0614054, %v10341_v30 }
 0x3b6   : > { %v6179_v41 = vadd.f32 -0.28449672, %v6147_v24  ;;  %v10348_v34 = vpop.f32.mrb[28].mxu1  ;;  %v6056_v38 = vadd.f32 -1.4531521, %v6024_v19  ;;  %v6310_v27 = vsub.f32 0.0, %v10240_v14  ;;  %v6210_v12 = vmul.f32 %v10250_v52, %v6178_v62 }
 0x3b7   : > { %v6276_v63 = vmul.f32 %v10242_v47, %v6244_v49  ;;  %11603 = vst [vmem:[#allocation42_spill] sm:$0xff] %v10348_v34  ;;  %v10350_v40 = vpop.f32.mrb[20].mxu0  ;;  %8060 = vrcp.f32 %v5927_v50  ;;  %v10358_v47 = vpop.f32.mrb[29].mxu1  ;;  %v6245_v24 = vadd.f32 0.2548296, %v6213_v28  ;;  %v6344_v34 = vmul.f32 %v6312_v61, %v10237_v39 }
 0x3b8   : > { %11604 = vst [vmem:[#allocation43_spill] sm:$0xff] %v10350_v40  ;;  %11606 = vst [vmem:[#allocation38_spill] sm:$0xff] %v10358_v47  ;;  %v10360_v49 = vpop.eup %8052  ;;  %v6054_v9 = vadd.f32 -1.4531521, %v6022_v33  ;;  %v10363_v40 = vpop.f32.mrb[30].mxu1  ;;  %v6088_v48 = vmul.f32 %v10337_v45, %v6056_v38  ;;  %v10370_v50 = vadd.f32 %v10208_v57, %v10154_v51  ;;  %v6211_v28 = vmul.f32 %v10278_v4, %v6179_v41 }
 0x3b9   : > { %v6436_v35 = vmul.f32 %v8051_v43, %v6276_v63  ;;  %11607 = vst [vmem:[#allocation56_spill] sm:$0xff] %v10363_v40  ;;  %v8055_v60 = vpop.eup %8054  ;;  %v6025_v19 = vmul.f32 1.0614054, %v10360_v49  ;;  %v6277_v43 = vmul.f32 %v10265_v17, %v6245_v24  ;;  %v6342_v33 = vmul.f32 %v6310_v27, %v10240_v14 }
 0x3ba   : > { %v6086_v39 = vmul.f32 %v10341_v30, %v6054_v9  ;;  %v8057_v61 = vpop.eup %8056  ;;  %v6120_v63 = vadd.f32 1.4214138, %v6088_v48  ;;  %v6313_v38 = vsub.f32 0.0, %v10246_v7  ;;  %v6382_v3 = vmul.f32 1.442695, %v6344_v34 }
 0x3bb   : > { %v6468_v47 = vsub.f32 1.0, %v6436_v35  ;;  %v6057_v62 = vadd.f32 -1.4531521, %v6025_v19  ;;  %v6437_v53 = vmul.f32 %v8057_v61, %v6277_v43  ;;  %v8059_v59 = vpop.eup %8058  ;;  %v6242_v35 = vadd.f32 0.2548296, %v6210_v12  ;;  %v10391_v61 = vpop.f32.mrb[31].mxu1 }
 0x3bc   : > { %v6118_v57 = vadd.f32 1.4214138, %v6086_v39  ;;  %v6152_v17 = vmul.f32 %v10337_v45, %v6120_v63  ;;  %v10381_v9 = vmul.f32 0.70710677, %v10370_v50  ;;  %v6243_v24 = vadd.f32 0.2548296, %v6211_v28 }
 0x3bd   : > { %v6500_v40 = vmul.f32 %v6468_v47, %v10224_v15  ;;  %v6089_v41 = vmul.f32 %v10360_v49, %v6057_v62  ;;  %v6469_v48 = vsub.f32 1.0, %v6437_v53  ;;  %v10386_v14 = vsel %vm5798_vm12, 1.0, %v11605_v25  ;;  %11608 = vst [vmem:[#allocation57_spill] sm:$0xff] %v10391_v61  ;;  %v10393_v53 = vpop.f32.mrb[21].mxu0 }
 0x3be   : > { %v6150_v15 = vmul.f32 %v10341_v30, %v6118_v57  ;;  %v6184_v34 = vadd.f32 -0.28449672, %v6152_v17  ;;  %v6378_v27 = vmul.f32 1.442695, %v6342_v33  ;;  %v6345_v39 = vmul.f32 %v6313_v38, %v10246_v7 }
 0x3bf   : > { %v6121_v47 = vadd.f32 1.4214138, %v6089_v41  ;;  %v6532_v12 = vadd.f32 1.0, %v6500_v40  ;;  %v6501_v19 = vmul.f32 %v6469_v48, %v10254_v37  ;;  %v6274_v29 = vmul.f32 %v10250_v52, %v6242_v35 }
 0x3c0   : > { %v6182_v43 = vadd.f32 -0.28449672, %v6150_v15  ;;  %8062 = vpow2.f32 %v6382_v3  ;;  %v5868_v33 = vand.u32 2147483647, %v10381_v9  ;;  %v6275_v40 = vmul.f32 %v10278_v4, %v6243_v24 }
 0x3c1   : > { %v10395_v28 = vpop.eup %8060  ;;  %v6153_v63 = vmul.f32 %v10360_v49, %v6121_v47  ;;  %v6533_v62 = vadd.f32 1.0, %v6501_v19  ;;  %v6311_v7 = vsub.f32 0.0, %v10321_v0  ;;  %v6216_v38 = vmul.f32 %v10337_v45, %v6184_v34  ;;  %v10415_v34 = vpop.f32.mrb[22].mxu0 }
 0x3c2   : > { %v6023_v37 = vmul.f32 1.0614054, %v10395_v28  ;;  %v5900_v57 = vmul.f32 0.3275911, %v5868_v33  ;;  %v5706_v17 = vadd.f32 %v10310_v46, %v10154_v51  ;;  %v7701_v52 = vadd.f32 %v10202_v31, %v10156_v13 }
 0x3c3   : > { %v10409_v3 = vmul.f32 %v6532_v12, %v10186_v8  ;;  %v10412_v35 = vmul.f32 %v6533_v62, %v10214_v21  ;;  %v6214_v4 = vmul.f32 %v10341_v30, %v6182_v43  ;;  %v6434_v48 = vmul.f32 %v8055_v60, %v6274_v29 }
 0x3c4   : > { %v6055_v41 = vadd.f32 -1.4531521, %v6023_v37  ;;  %8064 = vpow2.f32 %v6378_v27  ;;  %v6185_v24 = vadd.f32 -0.28449672, %v6153_v63  ;;  %v5932_v15 = vadd.f32 1.0, %v5900_v57 }
 0x3c5   : > { %11609 = vst [vmem:[#allocation40_spill] sm:$0xff] %v10409_v3  ;;  %11610 = vst [vmem:[#allocation39_spill] sm:$0xff] %v10412_v35  ;;  %v6435_v47 = vmul.f32 %v8059_v59, %v6275_v40  ;;  %v6384_v13 = vmul.f32 1.442695, %v6345_v39  ;;  %v6248_v31 = vadd.f32 0.2548296, %v6216_v38  ;;  %v6343_v21 = vmul.f32 %v6311_v7, %v10321_v0 }
 0x3c6   : > { %v6087_v8 = vmul.f32 %v10395_v28, %v6055_v41  ;;  %vm5801_vm13 = vcmp.ge.f32.partialorder %v10228_v42, 0.0  ;;  %8066 = vrcp.f32 %v5932_v15  ;;  %v6246_v12 = vadd.f32 0.2548296, %v6214_v4  ;;  %v10430_v39 = vpop.f32.mrb[23].mxu0 }
 0x3c7   : > { %v10422_v27 = vmul.f32 0.70710677, %v5706_v17  ;;  %v6466_v19 = vsub.f32 1.0, %v6434_v48  ;;  %v6217_v43 = vmul.f32 %v10360_v49, %v6185_v24  ;;  %v10426_v29 = vadd.f32 %v7701_v52, %v10154_v51 }
 0x3c8   : > { %v6119_v60 = vadd.f32 1.4214138, %v6087_v8  ;;  %v7702_v59 = vadd.f32 %v10210_v16, %v10158_v44  ;;  %v6467_v63 = vsub.f32 1.0, %v6435_v47  ;;  %8068 = vpow2.f32 %v6384_v13 }
 0x3c9   : > { %v10434_v62 = vand.u32 2147483647, %v10422_v27  ;;  %v6280_v37 = vmul.f32 %v10337_v45, %v6248_v31  ;;  %v10440_v7 = vsel %vm5801_vm13, 1.0, %v11605_v25  ;;  %v6380_v38 = vmul.f32 1.442695, %v6343_v21 }
 0x3ca   : > { %v6151_v0 = vmul.f32 %v10395_v28, %v6119_v60  ;;  %v8063_v40 = vpop.eup %8062  ;;  %v6316_v57 = vsub.f32 0.0, %v5868_v33  ;;  %v6278_v44 = vmul.f32 %v10341_v30, %v6246_v12  ;;  %v10444_v16 = vmul.f32 0.5, %v10282_v11 }
 0x3cb   : > { %vm5799_vm14 = vcmp.ge.f32.partialorder %v10301_v32, 0.0  ;;  %v5898_v52 = vmul.f32 0.3275911, %v10434_v62  ;;  %v6498_v4 = vmul.f32 %v6466_v19, %v10232_v55  ;;  %v6249_v41 = vadd.f32 0.2548296, %v6217_v43 }
 0x3cc   : > { %vm5804_vm15 = vcmp.ge.f32.partialorder %v10381_v9, 0.0  ;;  %v10451_v42 = vmul.f32 0.70710677, %v10426_v29  ;;  %v6499_v45 = vmul.f32 %v6467_v63, %v10290_v5  ;;  %v6183_v48 = vadd.f32 -0.28449672, %v6151_v0 }
 0x3cd   : > { %v10455_v30 = vmul.f32 0.5, %v10370_v50  ;;  %v5930_v11 = vadd.f32 1.0, %v5898_v52  ;;  %v6440_v15 = vmul.f32 %v8063_v40, %v6280_v37  ;;  %8070 = vpow2.f32 %v6380_v38 }
 0x3ce   : > { %v8065_v24 = vpop.eup %8064  ;;  %v6348_v47 = vmul.f32 %v6316_v57, %v5868_v33  ;;  %v10458_v13 = vand.u32 2147483647, %v10451_v42  ;;  %v10463_v9 = vsel %vm5799_vm14, 1.0, %v11605_v25  ;;  %v10466_v5 = vsel %vm5804_vm15, 1.0, %v11605_v25  ;;  %v10484_v57 = vpop.f32.mrb[24].mxu0 }
 0x3cf   : > { %v6438_v55 = vmul.f32 %v8065_v24, %v6278_v44  ;;  %8072 = vrcp.f32 %v5930_v11  ;;  %v6530_v8 = vadd.f32 1.0, %v6498_v4  ;;  %v6281_v31 = vmul.f32 %v10360_v49, %v6249_v41  ;;  %v10508_v24 = vpop.f32.mrb[25].mxu0 }
 0x3d0   : > { %v10468_v50 = vpop.eup %8066  ;;  %v10471_v21 = vmul.f32 0.5, %v5706_v17  ;;  %v5901_v33 = vmul.f32 0.3275911, %v10458_v13  ;;  %v6531_v12 = vadd.f32 1.0, %v6499_v45  ;;  %v6215_v60 = vmul.f32 %v10395_v28, %v6183_v48 }
 0x3d1   : > { %v6028_v32 = vmul.f32 1.0614054, %v10468_v50  ;;  %v10477_v19 = vadd.f32 %v7702_v59, %v10154_v51  ;;  %v6472_v43 = vsub.f32 1.0, %v6440_v15  ;;  %v6390_v63 = vmul.f32 1.442695, %v6348_v47 }
 0x3d2   : > { %v5933_v0 = vadd.f32 1.0, %v5901_v33  ;;  %v7703_v40 = vadd.f32 %v10263_v36, %v10166_v54  ;;  %v8069_v37 = vpop.eup %8068  ;;  %v6470_v49 = vsub.f32 1.0, %v6438_v55  ;;  %v7704_v59 = vadd.f32 %v10276_v22, %v10168_v26 }
 0x3d3   : > { %v6060_v17 = vadd.f32 -1.4531521, %v6028_v32  ;;  %v10482_v38 = vmul.f32 0.70710677, %v10477_v19  ;;  %v6441_v44 = vmul.f32 %v8069_v37, %v6281_v31  ;;  %v10492_v4 = vmul.f32 %v6530_v8, %v10212_v2 }
 0x3d4   : > { %8074 = vrcp.f32 %v5933_v0  ;;  %v10487_v52 = vadd.f32 %v7703_v40, %v10154_v51  ;;  %v6247_v54 = vadd.f32 0.2548296, %v6215_v60  ;;  %v10499_v45 = vmul.f32 %v6531_v12, %v10234_v23 }
 0x3d5   : > { %v6092_v36 = vmul.f32 %v10468_v50, %v6060_v17  ;;  %v10496_v41 = vand.u32 2147483647, %v10482_v38  ;;  %v6504_v48 = vmul.f32 %v6472_v43, %v10355_v58  ;;  %vm5802_vm1 = vcmp.ge.f32.partialorder %v10422_v27, 0.0 }
 0x3d6   : > { %v10504_v11 = vmul.f32 0.70710677, %v10487_v52  ;;  %8076 = vpow2.f32 %v6390_v63  ;;  %v6314_v2 = vsub.f32 0.0, %v10434_v62  ;;  %v6502_v47 = vmul.f32 %v6470_v49, %v10386_v14 }
 0x3d7   : > { %v6124_v26 = vadd.f32 1.4214138, %v6092_v36  ;;  %v5899_v22 = vmul.f32 0.3275911, %v10496_v41  ;;  %v8071_v15 = vpop.eup %8070  ;;  %v6473_v23 = vsub.f32 1.0, %v6441_v44  ;;  %v7705_v58 = vadd.f32 %v10284_v6, %v10175_v10  ;;  %v10550_v36 = vpop.f32.mrb[26].mxu0 }
 0x3d8   : > { %v10512_v55 = vand.u32 2147483647, %v10504_v11  ;;  %v6279_v31 = vmul.f32 %v10395_v28, %v6247_v54  ;;  %v10521_v60 = vadd.f32 %v7704_v59, %v10154_v51  ;;  %v6536_v32 = vadd.f32 1.0, %v6504_v48 }
 0x3d9   : > { %v10516_v8 = vpop.eup %8072  ;;  %v6156_v33 = vmul.f32 %v10468_v50, %v6124_v26  ;;  %v5931_v12 = vadd.f32 1.0, %v5899_v22  ;;  %v10526_v14 = vsel %vm5802_vm1, 1.0, %v11605_v25  ;;  %v6346_v6 = vmul.f32 %v6314_v2, %v10434_v62 }
 0x3da   : > { %v6026_v43 = vmul.f32 1.0614054, %v10516_v8  ;;  %v5904_v10 = vmul.f32 0.3275911, %v10512_v55  ;;  %v10532_v28 = vmul.f32 0.5, %v10426_v29  ;;  %v6317_v63 = vsub.f32 0.0, %v10458_v13 }
 0x3db   : > { %8078 = vrcp.f32 %v5931_v12  ;;  %v6534_v0 = vadd.f32 1.0, %v6502_v47  ;;  %v6505_v40 = vmul.f32 %v6473_v23, %v10440_v7  ;;  %v6439_v27 = vmul.f32 %v8071_v15, %v6279_v31  ;;  %v11614_v12 = vld [vmem:[#allocation48_spill] sm:$0xff] }
 0x3dc   : > { %v6058_v37 = vadd.f32 -1.4531521, %v6026_v43  ;;  %v5936_v49 = vadd.f32 1.0, %v5904_v10  ;;  %v6188_v17 = vadd.f32 -0.28449672, %v6156_v33  ;;  %v10540_v59 = vadd.f32 %v7705_v58, %v10154_v51  ;;  %v11613_v33 = vld [vmem:[#allocation35_spill] sm:$0xff] }
 0x3dd   : > { %v10537_v44 = vmul.f32 0.70710677, %v10521_v60  ;;  %v10545_v29 = vmul.f32 %v6536_v32, %v10318_v56  ;;  %v7706_v7 = vadd.f32 %v10292_v18, %v10178_v1  ;;  %v6386_v48 = vmul.f32 1.442695, %v6346_v6 }
 0x3de   : > { %v10542_v62 = vpop.eup %8074  ;;  %v6090_v54 = vmul.f32 %v10516_v8, %v6058_v37  ;;  %8080 = vrcp.f32 %v5936_v49  ;;  %vm5805_vm2 = vcmp.ge.f32.partialorder %v10451_v42, 0.0  ;;  %v6349_v2 = vmul.f32 %v6317_v63, %v10458_v13 }
 0x3df   : > { %11611 = vst [vmem:[#allocation58_spill] sm:$0xff] %v10545_v29  ;;  %v6029_v26 = vmul.f32 1.0614054, %v10542_v62  ;;  %v10556_v22 = vmul.f32 %v6534_v0, %v10326_v20  ;;  %v6537_v56 = vadd.f32 1.0, %v6505_v40  ;;  %v10559_v47 = vand.u32 2147483647, %v10537_v44 }
 0x3e0   : > { %v6122_v15 = vadd.f32 1.4214138, %v6090_v54  ;;  %v8077_v23 = vpop.eup %8076  ;;  %v6471_v58 = vsub.f32 1.0, %v6439_v27  ;;  %v6220_v1 = vmul.f32 %v10468_v50, %v6188_v17  ;;  %v10563_v31 = vmul.f32 0.70710677, %v10540_v59  ;;  %v11615_v0 = vld [vmem:[#allocation55_spill] sm:$0xff] }
 0x3e1   : > { %11612 = vst [vmem:[#allocation59_spill] sm:$0xff] %v10556_v22  ;;  %v6061_v18 = vadd.f32 -1.4531521, %v6029_v26  ;;  %v10567_v13 = vsel %vm5805_vm2, 1.0, %v11605_v25  ;;  %v5902_v20 = vmul.f32 0.3275911, %v10559_v47  ;;  %v7707_v32 = vadd.f32 %v11614_v12, %v11613_v33 }
 0x3e2   : > { %v6154_v42 = vmul.f32 %v10516_v8, %v6122_v15  ;;  %v6392_v10 = vmul.f32 1.442695, %v6349_v2  ;;  %v6315_v6 = vsub.f32 0.0, %v10496_v41  ;;  %v10575_v63 = vand.u32 2147483647, %v10563_v31 }
 0x3e3   : > { %v6093_v43 = vmul.f32 %v10542_v62, %v6061_v18  ;;  %v10578_v40 = vmul.f32 %v6537_v56, %v11615_v0  ;;  %8082 = vpow2.f32 %v6386_v48  ;;  %vm5803_vm3 = vcmp.ge.f32.partialorder %v10482_v38, 0.0 }
 0x3e4   : > { %v5934_v37 = vadd.f32 1.0, %v5902_v20  ;;  %v6503_v27 = vmul.f32 %v6471_v58, %v10463_v9  ;;  %v6252_v17 = vadd.f32 0.2548296, %v6220_v1  ;;  %v5905_v26 = vmul.f32 0.3275911, %v10575_v63 }
 0x3e5   : > { %11616 = vst [vmem:[#allocation60_spill] sm:$0xff] %v10578_v40  ;;  %v10581_v49 = vpop.eup %8078  ;;  %v6125_v54 = vadd.f32 1.4214138, %v6093_v43  ;;  %v6186_v2 = vadd.f32 -0.28449672, %v6154_v42  ;;  %v10587_v18 = vadd.f32 %v7706_v7, %v10154_v51  ;;  %v10590_v48 = vmul.f32 0.5, %v10477_v19 }
 0x3e6   : > { %v6027_v15 = vmul.f32 1.0614054, %v10581_v49  ;;  %8084 = vrcp.f32 %v5934_v37  ;;  %v6347_v56 = vmul.f32 %v6315_v6, %v10496_v41  ;;  %v5937_v20 = vadd.f32 1.0, %v5905_v26  ;;  %v10602_v42 = vpop.f32.mrb[27].mxu0 }
 0x3e7   : > { %8086 = vpow2.f32 %v6392_v10  ;;  %v6157_v9 = vmul.f32 %v10542_v62, %v6125_v54  ;;  %v10599_v58 = vsel %vm5803_vm3, 1.0, %v11605_v25  ;;  %v6320_v7 = vsub.f32 0.0, %v10512_v55 }
 0x3e8   : > { %v10593_v33 = vpop.eup %8080  ;;  %v6059_v1 = vadd.f32 -1.4531521, %v6027_v15  ;;  %v6535_v12 = vadd.f32 1.0, %v6503_v27  ;;  %vm5808_vm4 = vcmp.ge.f32.partialorder %v10504_v11, 0.0  ;;  %8088 = vrcp.f32 %v5937_v20 }
 0x3e9   : > { %v6032_v19 = vmul.f32 1.0614054, %v10593_v33  ;;  %v6284_v41 = vmul.f32 %v10468_v50, %v6252_v17  ;;  %v6218_v43 = vmul.f32 %v10516_v8, %v6186_v2  ;;  %v10610_v38 = vmul.f32 0.70710677, %v10587_v18 }
 0x3ea   : > { %v6091_v10 = vmul.f32 %v10581_v49, %v6059_v1  ;;  %v6388_v6 = vmul.f32 1.442695, %v6347_v56  ;;  %v10613_v0 = vmul.f32 0.5, %v10487_v52  ;;  %v10616_v27 = vadd.f32 %v7707_v32, %v10154_v51  ;;  %v10632_v32 = vpop.f32.mrb[28].mxu0 }
 0x3eb   : > { %v6064_v37 = vadd.f32 -1.4531521, %v6032_v19  ;;  %v6189_v54 = vadd.f32 -0.28449672, %v6157_v9  ;;  %v6352_v15 = vmul.f32 %v6320_v7, %v10512_v55  ;;  %v6318_v50 = vsub.f32 0.0, %v10559_v47  ;;  %v10638_v7 = vpop.f32.mrb[29].mxu0 }
 0x3ec   : > { %v6123_v26 = vadd.f32 1.4214138, %v6091_v10  ;;  %v10621_v17 = vmul.f32 %v6535_v12, %v10444_v16  ;;  %v10626_v2 = vsel %vm5808_vm4, 1.0, %v11605_v25  ;;  %v10630_v56 = vand.u32 2147483647, %v10610_v38  ;;  %v10644_v10 = vpop.f32.mrb[30].mxu0 }
 0x3ed   : > { %v6096_v52 = vmul.f32 %v10593_v33, %v6064_v37  ;;  %v8083_v20 = vpop.eup %8082  ;;  %v6444_v9 = vmul.f32 %v8077_v23, %v6284_v41  ;;  %v6250_v55 = vadd.f32 0.2548296, %v6218_v43  ;;  %v10636_v16 = vmul.f32 0.70710677, %v10616_v27  ;;  %11618 = vst [vmem:[#allocation61_spill] sm:$0xff] %v10644_v10  ;;  %v10650_v46 = vpop.f32.mrb[31].mxu0 }
 0x3ee   : > { %11617 = vst [vmem:[#allocation63_spill] sm:$0xff] %v10621_v17  ;;  %v6155_v1 = vmul.f32 %v10581_v49, %v6123_v26  ;;  %8090 = vpow2.f32 %v6388_v6  ;;  %v10641_v12 = vmul.f32 0.5, %v10521_v60  ;;  %v5903_v19 = vmul.f32 0.3275911, %v10630_v56  ;;  %11619 = vst [vmem:[#allocation35_spill] sm:$0xff] %v10650_v46 }
 0x3ef   : > { %v6128_v11 = vadd.f32 1.4214138, %v6096_v52  ;;  %v6221_v23 = vmul.f32 %v10542_v62, %v6189_v54  ;;  %v6398_v43 = vmul.f32 1.442695, %v6352_v15  ;;  %v6350_v26 = vmul.f32 %v6318_v50, %v10559_v47 }
 0x3f0   : > { %v10646_v37 = vpop.eup %8084  ;;  %v6187_v41 = vadd.f32 -0.28449672, %v6155_v1  ;;  %v5935_v52 = vadd.f32 1.0, %v5903_v19  ;;  %v10655_v29 = vand.u32 2147483647, %v10636_v16  ;;  %v6476_v17 = vsub.f32 1.0, %v6444_v9 }
 0x3f1   : > { %v8087_v40 = vpop.eup %8086  ;;  %v6160_v6 = vmul.f32 %v10593_v33, %v6128_v11  ;;  %v6030_v60 = vmul.f32 1.0614054, %v10646_v37  ;;  %vm5806_vm5 = vcmp.ge.f32.partialorder %v10537_v44, 0.0  ;;  %v10659_v54 = vmul.f32 0.5, %v10540_v59  ;;  %v11621_v44 = vld [vmem:[#allocation51_spill] sm:$0xff] }
 0x3f2   : > { %vm5809_vm6 = vcmp.ge.f32.partialorder %v10563_v31, 0.0  ;;  %v10662_v47 = vpop.eup %8088  ;;  %v6282_v15 = vmul.f32 %v10516_v8, %v6250_v55  ;;  %v6321_v1 = vsub.f32 0.0, %v10575_v63  ;;  %8092 = vrcp.f32 %v5935_v52 }
 0x3f3   : > { %v6062_v50 = vadd.f32 -1.4531521, %v6030_v60  ;;  %v6253_v11 = vadd.f32 0.2548296, %v6221_v23  ;;  %8094 = vpow2.f32 %v6398_v43  ;;  %v6394_v19 = vmul.f32 1.442695, %v6350_v26 }
 0x3f4   : > { %v6033_v9 = vmul.f32 1.0614054, %v10662_v47  ;;  %v6219_v22 = vmul.f32 %v10581_v49, %v6187_v41  ;;  %v6192_v46 = vadd.f32 -0.28449672, %v6160_v6  ;;  %v5908_v61 = vmul.f32 0.3275911, %v10655_v29 }
 0x3f5   : > { %v6094_v59 = vmul.f32 %v10646_v37, %v6062_v50  ;;  %v6508_v10 = vmul.f32 %v6476_v17, %v10466_v5  ;;  %v10674_v8 = vsel %vm5806_vm5, 1.0, %v11605_v25  ;;  %v10679_v55 = vsel %vm5809_vm6, 1.0, %v11605_v25  ;;  %v11620_v17 = vld [vmem:[#allocation36_spill] sm:$0xff] }
 0x3f6   : > { %v6065_v23 = vadd.f32 -1.4531521, %v6033_v9  ;;  %v6442_v43 = vmul.f32 %v8083_v20, %v6282_v15  ;;  %v6353_v26 = vmul.f32 %v6321_v1, %v10575_v63  ;;  %v5940_v6 = vadd.f32 1.0, %v5908_v61 }
 0x3f7   : > { %v6126_v41 = vadd.f32 1.4214138, %v6094_v59  ;;  %v6285_v60 = vmul.f32 %v10542_v62, %v6253_v11  ;;  %8096 = vpow2.f32 %v6394_v19  ;;  %v7708_v52 = vadd.f32 %v11621_v44, %v11620_v17  ;;  %v11622_v11 = vld [vmem:[#allocation37_spill] sm:$0xff]  ;;  %v11624_v59 = vld [vmem:[#allocation44_spill] sm:$0xff] }
 0x3f8   : > { %v6097_v5 = vmul.f32 %v10662_v47, %v6065_v23  ;;  %v8091_v50 = vpop.eup %8090  ;;  %v6251_v3 = vadd.f32 0.2548296, %v6219_v22  ;;  %v6224_v31 = vmul.f32 %v10593_v33, %v6192_v46  ;;  %8098 = vrcp.f32 %v5940_v6  ;;  %v11623_v19 = vld [vmem:[#allocation53_spill] sm:$0xff]  ;;  %v11625_v22 = vld [vmem:[#allocation54_spill] sm:$0xff] }
 0x3f9   : > { %v6158_v35 = vmul.f32 %v10646_v37, %v6126_v41  ;;  %v6540_v20 = vadd.f32 1.0, %v6508_v10  ;;  %v10689_v63 = vmul.f32 0.5, %v10587_v18  ;;  %v10692_v61 = vadd.f32 %v7708_v52, %v10154_v51 }
 0x3fa   : > { %v6129_v15 = vadd.f32 1.4214138, %v6097_v5  ;;  %v6474_v62 = vsub.f32 1.0, %v6442_v43  ;;  %v6400_v1 = vmul.f32 1.442695, %v6353_v26  ;;  %v7709_v9 = vadd.f32 %v11623_v19, %v11622_v11 }
 0x3fb   : > { %v7710_v23 = vadd.f32 %v11625_v22, %v11624_v59  ;;  %v6445_v46 = vmul.f32 %v8087_v40, %v6285_v60  ;;  %v6190_v17 = vadd.f32 -0.28449672, %v6158_v35  ;;  %vm5807_vm7 = vcmp.ge.f32.partialorder %v10610_v38, 0.0 }
 0x3fc   : > { %v6161_v41 = vmul.f32 %v10662_v47, %v6129_v15  ;;  %v10700_v10 = vpop.eup %8092  ;;  %v6283_v18 = vmul.f32 %v10581_v49, %v6251_v3  ;;  %v6256_v6 = vadd.f32 0.2548296, %v6224_v31  ;;  %v6319_v43 = vsub.f32 0.0, %v10630_v56 }
 0x3fd   : > { %v10705_v26 = vmul.f32 0.70710677, %v10692_v61  ;;  %v8095_v5 = vpop.eup %8094  ;;  %v10708_v44 = vmul.f32 %v6540_v20, %v10455_v30  ;;  %v6031_v35 = vmul.f32 1.0614054, %v10700_v10  ;;  %v10712_v60 = vadd.f32 %v7709_v9, %v10154_v51 }
 0x3fe   : > { %v6193_v40 = vadd.f32 -0.28449672, %v6161_v41  ;;  %v6506_v52 = vmul.f32 %v6474_v62, %v10526_v14  ;;  %8100 = vpow2.f32 %v6400_v1  ;;  %v6324_v3 = vsub.f32 0.0, %v10655_v29 }
 0x3ff   : > { %v10717_v49 = vand.u32 2147483647, %v10705_v26  ;;  %v6477_v31 = vsub.f32 1.0, %v6445_v46  ;;  %v6222_v15 = vmul.f32 %v10646_v37, %v6190_v17  ;;  %v10723_v30 = vsel %vm5807_vm7, 1.0, %v11605_v25 }
 0x400   : > { %v6063_v20 = vadd.f32 -1.4531521, %v6031_v35  ;;  %v6443_v11 = vmul.f32 %v8091_v50, %v6283_v18  ;;  %v6288_v51 = vmul.f32 %v10593_v33, %v6256_v6  ;;  %v6351_v14 = vmul.f32 %v6319_v43, %v10630_v56  ;;  %v10740_v56 = vld [vmem:[%s11394_s6] ss:$0 sm:$0xff] }
 0x401   : > { %v5906_v62 = vmul.f32 0.3275911, %v10717_v49  ;;  %v8097_v1 = vpop.eup %8096  ;;  %v6225_v19 = vmul.f32 %v10662_v47, %v6193_v40  ;;  %vm5812_vm8 = vcmp.ge.f32.partialorder %v10636_v16, 0.0  ;;  %v10732_v59 = vmul.f32 0.70710677, %v10712_v60 }
 0x402   : > { %v6095_v9 = vmul.f32 %v10700_v10, %v6063_v20  ;;  %v10734_v38 = vpop.eup %8098  ;;  %v6538_v22 = vadd.f32 1.0, %v6506_v52  ;;  %v6356_v50 = vmul.f32 %v6324_v3, %v10655_v29  ;;  %v10743_v46 = vadd.f32 %v10740_v56, %v7710_v23 }
 0x403   : > { %v5938_v33 = vadd.f32 1.0, %v5906_v62  ;;  %v6509_v17 = vmul.f32 %v6477_v31, %v10567_v13  ;;  %v6254_v41 = vadd.f32 0.2548296, %v6222_v15  ;;  %v6036_v6 = vmul.f32 1.0614054, %v10734_v38 }
 0x404   : > { %v6127_v18 = vadd.f32 1.4214138, %v6095_v9  ;;  %v6475_v43 = vsub.f32 1.0, %v6443_v11  ;;  %v6448_v40 = vmul.f32 %v8095_v5, %v6288_v51  ;;  %v6396_v35 = vmul.f32 1.442695, %v6351_v14 }
 0x405   : > { %8102 = vrcp.f32 %v5938_v33  ;;  %v6257_v29 = vadd.f32 0.2548296, %v6225_v19  ;;  %v6068_v3 = vadd.f32 -1.4531521, %v6036_v6  ;;  %v10749_v20 = vand.u32 2147483647, %v10732_v59 }
 0x406   : > { %v6159_v52 = vmul.f32 %v10700_v10, %v6127_v18  ;;  %v10752_v23 = vmul.f32 0.5, %v10616_v27  ;;  %v10757_v13 = vsel %vm5812_vm8, 1.0, %v11605_v25  ;;  %v6406_v31 = vmul.f32 1.442695, %v6356_v50 }
 0x407   : > { %v10760_v5 = vmul.f32 0.70710677, %v10743_v46  ;;  %v6541_v15 = vadd.f32 1.0, %v6509_v17  ;;  %v6286_v11 = vmul.f32 %v10646_v37, %v6254_v41  ;;  %v6100_v51 = vmul.f32 %v10734_v38, %v6068_v3 }
 0x408   : > { %v5909_v14 = vmul.f32 0.3275911, %v10749_v20  ;;  %v8101_v62 = vpop.eup %8100  ;;  %v10766_v27 = vmul.f32 %v6538_v22, %v10471_v21  ;;  %v6480_v19 = vsub.f32 1.0, %v6448_v40  ;;  %8104 = vpow2.f32 %v6396_v35  ;;  %v11627_v40 = vld [vmem:[#allocation43_spill] sm:$0xff] }
 0x409   : > { %v10769_v16 = vand.u32 2147483647, %v10760_v5  ;;  %v6507_v9 = vmul.f32 %v6475_v43, %v10599_v58  ;;  %v6289_v50 = vmul.f32 %v10662_v47, %v6257_v29  ;;  %v6191_v33 = vadd.f32 -0.28449672, %v6159_v52  ;;  %v11626_v43 = vld [vmem:[#allocation46_spill] sm:$0xff] }
 0x40a   : > { %v5941_v17 = vadd.f32 1.0, %v5909_v14  ;;  %v6132_v37 = vadd.f32 1.4214138, %v6100_v51  ;;  %8106 = vpow2.f32 %v6406_v31  ;;  %v6322_v41 = vsub.f32 0.0, %v10717_v49  ;;  %v11628_v31 = vld [vmem:[#allocation62_spill] sm:$0xff] }
 0x40b   : > { %v5907_v18 = vmul.f32 0.3275911, %v10769_v16  ;;  %v10776_v21 = vmul.f32 %v6541_v15, %v10532_v28  ;;  %v6446_v22 = vmul.f32 %v8097_v1, %v6286_v11  ;;  %v10779_v6 = vmul.f32 0.5, %v10692_v61 }
 0x40c   : > { %8108 = vrcp.f32 %v5941_v17  ;;  %v6512_v58 = vmul.f32 %v6480_v19, %v10626_v2  ;;  %vm5810_vm9 = vcmp.ge.f32.partialorder %v10705_v26, 0.0  ;;  %v7711_v35 = vadd.f32 %v11627_v40, %v11626_v43  ;;  %v11629_v26 = vld [vmem:[#allocation45_spill] sm:$0xff] }
 0x40d   : > { %v5939_v47 = vadd.f32 1.0, %v5907_v18  ;;  %v6539_v29 = vadd.f32 1.0, %v6507_v9  ;;  %v6449_v52 = vmul.f32 %v8101_v62, %v6289_v50  ;;  %v6223_v3 = vmul.f32 %v10700_v10, %v6191_v33 }
 0x40e   : > { %v7712_v28 = vadd.f32 %v10393_v53, %v11628_v31  ;;  %v6164_v61 = vmul.f32 %v10734_v38, %v6132_v37  ;;  %v6354_v15 = vmul.f32 %v6322_v41, %v10717_v49  ;;  %v10793_v2 = vadd.f32 %v10740_v56, %v7711_v35 }
 0x40f   : > { %v10788_v1 = vpop.eup %8102  ;;  %v7713_v11 = vadd.f32 %v10415_v34, %v11629_v26  ;;  %v6478_v51 = vsub.f32 1.0, %v6446_v22  ;;  %v10798_v14 = vsel %vm5810_vm9, 1.0, %v11605_v25  ;;  %8110 = vrcp.f32 %v5939_v47 }
 0x410   : > { %v6034_v62 = vmul.f32 1.0614054, %v10788_v1  ;;  %v6544_v53 = vadd.f32 1.0, %v6512_v58  ;;  %vm5813_vm10 = vcmp.ge.f32.partialorder %v10732_v59, 0.0  ;;  %v10803_v19 = vmul.f32 0.70710677, %v10793_v2 }
 0x411   : > { %v10806_v49 = vadd.f32 %v10740_v56, %v7712_v28  ;;  %v6481_v9 = vsub.f32 1.0, %v6449_v52  ;;  %v6255_v50 = vadd.f32 0.2548296, %v6223_v3  ;;  %v10809_v34 = vadd.f32 %v10740_v56, %v7713_v11 }
 0x412   : > { %v6066_v33 = vadd.f32 -1.4531521, %v6034_v62  ;;  %v8105_v17 = vpop.eup %8104  ;;  %v10812_v37 = vmul.f32 %v6539_v29, %v10590_v48  ;;  %v6196_v41 = vadd.f32 -0.28449672, %v6164_v61  ;;  %v6402_v18 = vmul.f32 1.442695, %v6354_v15 }
 0x413   : > { %v10815_v22 = vand.u32 2147483647, %v10803_v19  ;;  %v6510_v58 = vmul.f32 %v6478_v51, %v10674_v8  ;;  %v10820_v43 = vmul.f32 0.5, %v10712_v60  ;;  %v6325_v40 = vsub.f32 0.0, %v10749_v20 }
 0x414   : > { %v6098_v47 = vmul.f32 %v10788_v1, %v6066_v33  ;;  %v8107_v35 = vpop.eup %8106  ;;  %v10824_v52 = vmul.f32 %v6544_v53, %v10613_v0  ;;  %v10829_v48 = vsel %vm5813_vm10, 1.0, %v11605_v25  ;;  %v10833_v8 = vmul.f32 0.70710677, %v10806_v49 }
 0x415   : > { %v5912_v29 = vmul.f32 0.3275911, %v10815_v22  ;;  %v6513_v60 = vmul.f32 %v6481_v9, %v10679_v55  ;;  %v6287_v31 = vmul.f32 %v10700_v10, %v6255_v50  ;;  %v10840_v0 = vmul.f32 0.70710677, %v10809_v34 }
 0x416   : > { %v10835_v3 = vpop.eup %8108  ;;  %v6130_v28 = vadd.f32 1.4214138, %v6098_v47  ;;  %v6228_v61 = vmul.f32 %v10734_v38, %v6196_v41  ;;  %8112 = vpow2.f32 %v6402_v18  ;;  %v6542_v26 = vadd.f32 1.0, %v6510_v58 }
 0x417   : > { %v6037_v59 = vmul.f32 1.0614054, %v10835_v3  ;;  %v5944_v15 = vadd.f32 1.0, %v5912_v29  ;;  %v6357_v51 = vmul.f32 %v6325_v40, %v10749_v20  ;;  %v6323_v62 = vsub.f32 0.0, %v10769_v16 }
 0x418   : > { %v6162_v11 = vmul.f32 %v10788_v1, %v6130_v28  ;;  %vm5811_vm11 = vcmp.ge.f32.partialorder %v10760_v5, 0.0  ;;  %v10849_v10 = vand.u32 2147483647, %v10833_v8  ;;  %v6545_v9 = vadd.f32 1.0, %v6513_v60 }
 0x419   : > { %v6069_v55 = vadd.f32 -1.4531521, %v6037_v59  ;;  %8114 = vrcp.f32 %v5944_v15  ;;  %v10851_v53 = vpop.eup %8110  ;;  %v6447_v50 = vmul.f32 %v8105_v17, %v6287_v31  ;;  %v10854_v41 = vand.u32 2147483647, %v10840_v0 }
 0x41a   : > { %v6194_v33 = vadd.f32 -0.28449672, %v6162_v11  ;;  %v6260_v18 = vadd.f32 0.2548296, %v6228_v61  ;;  %v6035_v58 = vmul.f32 1.0614054, %v10851_v53  ;;  %v10860_v40 = vmul.f32 %v6542_v26, %v10641_v12 }
 0x41b   : > { %v6101_v20 = vmul.f32 %v10835_v3, %v6069_v55  ;;  %v5910_v47 = vmul.f32 0.3275911, %v10849_v10  ;;  %v6408_v29 = vmul.f32 1.442695, %v6357_v51  ;;  %v10863_v28 = vmul.f32 0.5, %v10743_v46 }
 0x41c   : > { %v6355_v17 = vmul.f32 %v6323_v62, %v10769_v16  ;;  %v6226_v60 = vmul.f32 %v10788_v1, %v6194_v33  ;;  %v6067_v59 = vadd.f32 -1.4531521, %v6035_v58  ;;  %v10868_v15 = vmul.f32 %v6545_v9, %v10659_v54  ;;  %v11630_v54 = vld [vmem:[#allocation47_spill] sm:$0xff]  ;;  %v11631_v58 = vld [vmem:[#allocation49_spill] sm:$0xff] }
 0x41d   : > { %v6133_v31 = vadd.f32 1.4214138, %v6101_v20  ;;  %v5942_v61 = vadd.f32 1.0, %v5910_v47  ;;  %v6479_v11 = vsub.f32 1.0, %v6447_v50  ;;  %v10873_v12 = vsel %vm5811_vm11, 1.0, %v11605_v25 }
 0x41e   : > { %v5913_v26 = vmul.f32 0.3275911, %v10854_v41  ;;  %v6292_v46 = vmul.f32 %v10734_v38, %v6260_v18  ;;  %v6099_v51 = vmul.f32 %v10851_v53, %v6067_v59  ;;  %v6404_v62 = vmul.f32 1.442695, %v6355_v17  ;;  %v11632_v17 = vld [vmem:[#allocation50_spill] sm:$0xff] }
 0x41f   : > { %v6165_v16 = vmul.f32 %v10835_v3, %v6133_v31  ;;  %8116 = vrcp.f32 %v5942_v61  ;;  %v7714_v9 = vadd.f32 %v10430_v39, %v11630_v54  ;;  %v6258_v33 = vadd.f32 0.2548296, %v6226_v60 }
 0x420   : > { %8118 = vpow2.f32 %v6408_v29  ;;  %v5945_v55 = vadd.f32 1.0, %v5913_v26  ;;  %v8113_v50 = vpop.eup %8112  ;;  %v6131_v5 = vadd.f32 1.4214138, %v6099_v51  ;;  %v10882_v20 = vmul.f32 0.5, %v10793_v2 }
 0x421   : > { %v7715_v38 = vadd.f32 %v10484_v57, %v11631_v58  ;;  %v6511_v18 = vmul.f32 %v6479_v11, %v10723_v30  ;;  %v6328_v47 = vsub.f32 0.0, %v10815_v22  ;;  %v10889_v29 = vadd.f32 %v10740_v56, %v7714_v9 }
 0x422   : > { %v7716_v31 = vadd.f32 %v10508_v24, %v11632_v17  ;;  %v6452_v60 = vmul.f32 %v8107_v35, %v6292_v46  ;;  %v6197_v59 = vadd.f32 -0.28449672, %v6165_v16  ;;  %vm5816_vm12 = vcmp.ge.f32.partialorder %v10803_v19, 0.0 }
 0x423   : > { %v10893_v39 = vpop.eup %8114  ;;  %8120 = vrcp.f32 %v5945_v55  ;;  %v6163_v2 = vmul.f32 %v10851_v53, %v6131_v5  ;;  %v10899_v30 = vadd.f32 %v10740_v56, %v7715_v38  ;;  %v6290_v61 = vmul.f32 %v10788_v1, %v6258_v33 }
 0x424   : > { %8122 = vpow2.f32 %v6404_v62  ;;  %v6040_v57 = vmul.f32 1.0614054, %v10893_v39  ;;  %v10903_v11 = vmul.f32 0.5, %v10806_v49  ;;  %v6326_v24 = vsub.f32 0.0, %v10849_v10 }
 0x425   : > { %v10907_v35 = vmul.f32 0.70710677, %v10889_v29  ;;  %v6543_v19 = vadd.f32 1.0, %v6511_v18  ;;  %v10910_v26 = vsel %vm5816_vm12, 1.0, %v11605_v25  ;;  %v6360_v16 = vmul.f32 %v6328_v47, %v10815_v22 }
 0x426   : > { %v6072_v46 = vadd.f32 -1.4531521, %v6040_v57  ;;  %v6484_v51 = vsub.f32 1.0, %v6452_v60  ;;  %v6229_v62 = vmul.f32 %v10835_v3, %v6197_v59  ;;  %v6329_v1 = vsub.f32 0.0, %v10854_v41 }
 0x427   : > { %v10916_v49 = vand.u32 2147483647, %v10907_v35  ;;  %v6195_v55 = vadd.f32 -0.28449672, %v6163_v2  ;;  %v10920_v9 = vmul.f32 0.5, %v10809_v34  ;;  %v6450_v22 = vmul.f32 %v8113_v50, %v6290_v61 }
 0x428   : > { %v6104_v54 = vmul.f32 %v10893_v39, %v6072_v46  ;;  %v10923_v33 = vmul.f32 0.70710677, %v10899_v30  ;;  %vm5814_vm13 = vcmp.ge.f32.partialorder %v10833_v8, 0.0  ;;  %v6358_v58 = vmul.f32 %v6326_v24, %v10849_v10 }
 0x429   : > { %v10925_v5 = vpop.eup %8116  ;;  %v5911_v38 = vmul.f32 0.3275911, %v10916_v49  ;;  %v10931_v47 = vmul.f32 %v6543_v19, %v10689_v63  ;;  %v6414_v60 = vmul.f32 1.442695, %v6360_v16  ;;  %v6516_v59 = vmul.f32 %v6484_v51, %v10757_v13 }
 0x42a   : > { %v8119_v18 = vpop.eup %8118  ;;  %v6136_v17 = vadd.f32 1.4214138, %v6104_v54  ;;  %v6038_v34 = vmul.f32 1.0614054, %v10925_v5  ;;  %v6261_v2 = vadd.f32 0.2548296, %v6229_v62  ;;  %v6361_v57 = vmul.f32 %v6329_v1, %v10854_v41 }
 0x42b   : > { %v5943_v50 = vadd.f32 1.0, %v5911_v38  ;;  %v6227_v61 = vmul.f32 %v10851_v53, %v6195_v55  ;;  %v10939_v46 = vand.u32 2147483647, %v10923_v33  ;;  %v6482_v19 = vsub.f32 1.0, %v6450_v22 }
 0x42c   : > { %v6168_v10 = vmul.f32 %v10893_v39, %v6136_v17  ;;  %v6070_v24 = vadd.f32 -1.4531521, %v6038_v34  ;;  %v6410_v16 = vmul.f32 1.442695, %v6358_v58  ;;  %v10944_v54 = vadd.f32 %v10740_v56, %v7716_v31 }
 0x42d   : > { %v10941_v63 = vpop.eup %8120  ;;  %8124 = vrcp.f32 %v5943_v50  ;;  %v5916_v1 = vmul.f32 0.3275911, %v10939_v46  ;;  %v6548_v55 = vadd.f32 1.0, %v6516_v59  ;;  %vm5817_vm14 = vcmp.ge.f32.partialorder %v10840_v0, 0.0 }
 0x42e   : > { %11633 = vst [vmem:[#allocation48_spill] sm:$0xff] %v10944_v54  ;;  %v8123_v13 = vpop.eup %8122  ;;  %v6200_v51 = vadd.f32 -0.28449672, %v6168_v10  ;;  %v6102_v41 = vmul.f32 %v10925_v5, %v6070_v24  ;;  %v6041_v62 = vmul.f32 1.0614054, %v10941_v63  ;;  %8126 = vpow2.f32 %v6414_v60 }
 0x42f   : > { %v6416_v38 = vmul.f32 1.442695, %v6361_v57  ;;  %v6293_v22 = vmul.f32 %v10835_v3, %v6261_v2  ;;  %v6259_v58 = vadd.f32 0.2548296, %v6227_v61  ;;  %v5948_v34 = vadd.f32 1.0, %v5916_v1  ;;  %v11635_v1 = vld [vmem:[#allocation52_spill] sm:$0xff] }
 0x430   : > { %v6073_v17 = vadd.f32 -1.4531521, %v6041_v62  ;;  %v6514_v31 = vmul.f32 %v6482_v19, %v10798_v14  ;;  %v10955_v50 = vsel %vm5814_vm13, 1.0, %v11605_v25  ;;  %8128 = vpow2.f32 %v6410_v16 }
 0x431   : > { %v10958_v10 = vmul.f32 0.70710677, %v10944_v54  ;;  %v6232_v60 = vmul.f32 %v10893_v39, %v6200_v51  ;;  %v6134_v0 = vadd.f32 1.4214138, %v6102_v41  ;;  %8130 = vrcp.f32 %v5948_v34 }
 0x432   : > { %v6105_v59 = vmul.f32 %v10941_v63, %v6073_v17  ;;  %v10963_v3 = vmul.f32 %v6548_v55, %v10752_v23  ;;  %v10966_v14 = vsel %vm5817_vm14, 1.0, %v11605_v25  ;;  %8132 = vpow2.f32 %v6416_v38 }
 0x433   : > { %v5882_v8 = vand.u32 2147483647, %v10958_v10  ;;  %v6453_v2 = vmul.f32 %v8119_v18, %v6293_v22  ;;  %v6291_v57 = vmul.f32 %v10851_v53, %v6259_v58  ;;  %v6327_v24 = vsub.f32 0.0, %v10916_v49  ;;  %v11637_v58 = vld [vmem:[#allocation42_spill] sm:$0xff] }
 0x434   : > { %v6137_v61 = vadd.f32 1.4214138, %v6105_v59  ;;  %v10972_v19 = vmul.f32 0.5, %v10889_v29  ;;  %vm5815_vm15 = vcmp.ge.f32.partialorder %v10907_v35, 0.0  ;;  %v10976_v23 = vmul.f32 0.5, %v10899_v30  ;;  %v11636_v29 = vld [vmem:[#allocation41_spill] sm:$0xff] }
 0x435   : > { %v5914_v16 = vmul.f32 0.3275911, %v5882_v8  ;;  %v6546_v51 = vadd.f32 1.0, %v6514_v31  ;;  %v6264_v41 = vadd.f32 0.2548296, %v6232_v60  ;;  %v6166_v62 = vmul.f32 %v10925_v5, %v6134_v0 }
 0x436   : > { %11634 = vst [vmem:[#allocation55_spill] sm:$0xff] %v10976_v23  ;;  %v7717_v18 = vadd.f32 %v10550_v36, %v11635_v1  ;;  %v6169_v55 = vmul.f32 %v10941_v63, %v6137_v61  ;;  %v7718_v22 = vadd.f32 %v10602_v42, %v11636_v29  ;;  %v7719_v30 = vadd.f32 %v10632_v32, %v11637_v58 }
 0x437   : > { %v10981_v53 = vpop.eup %8124  ;;  %v5946_v38 = vadd.f32 1.0, %v5914_v16  ;;  %v6485_v17 = vsub.f32 1.0, %v6453_v2  ;;  %v6451_v34 = vmul.f32 %v8123_v13, %v6291_v57  ;;  %v6359_v31 = vmul.f32 %v6327_v24, %v10916_v49 }
 0x438   : > { %v10990_v60 = vadd.f32 %v10740_v56, %v7717_v18  ;;  %v8127_v0 = vpop.eup %8126  ;;  %v10995_v36 = vsel %vm5815_vm15, 1.0, %v11605_v25  ;;  %v6039_v59 = vmul.f32 1.0614054, %v10981_v53  ;;  %v6332_v42 = vsub.f32 0.0, %v10939_v46 }
 0x439   : > { %8134 = vrcp.f32 %v5946_v38  ;;  %v6296_v32 = vmul.f32 %v10893_v39, %v6264_v41  ;;  %v6198_v2 = vadd.f32 -0.28449672, %v6166_v62  ;;  %vm5820_vm1 = vcmp.ge.f32.partialorder %v10923_v33, 0.0 }
 0x43a   : > { %v11002_v49 = vadd.f32 %v10740_v56, %v7718_v22  ;;  %v11004_v13 = vpop.eup %8128  ;;  %v11007_v57 = vmul.f32 %v6546_v51, %v10779_v6  ;;  %v6201_v35 = vadd.f32 -0.28449672, %v6169_v55  ;;  %v6071_v61 = vadd.f32 -1.4531521, %v6039_v59 }
 0x43b   : > { %v11010_v24 = vmul.f32 0.70710677, %v10990_v60  ;;  %v11012_v16 = vpop.eup %8130  ;;  %v6517_v39 = vmul.f32 %v6485_v17, %v10829_v48  ;;  %v6483_v41 = vsub.f32 1.0, %v6451_v34  ;;  %v6412_v62 = vmul.f32 1.442695, %v6359_v31 }
 0x43c   : > { %11638 = vst [vmem:[#allocation36_spill] sm:$0xff] %v11002_v49  ;;  %v6330_v1 = vsub.f32 0.0, %v5882_v8  ;;  %v8133_v18 = vpop.eup %8132  ;;  %v6103_v38 = vmul.f32 %v10981_v53, %v6071_v61  ;;  %v6044_v29 = vmul.f32 1.0614054, %v11012_v16  ;;  %v6364_v6 = vmul.f32 %v6332_v42, %v10939_v46 }
 0x43d   : > { %v11019_v51 = vand.u32 2147483647, %v11010_v24  ;;  %v6456_v55 = vmul.f32 %v8127_v0, %v6296_v32  ;;  %v6230_v22 = vmul.f32 %v10925_v5, %v6198_v2  ;;  %v11025_v48 = vsel %vm5820_vm1, 1.0, %v11605_v25 }
 0x43e   : > { %v11028_v58 = vmul.f32 0.70710677, %v11002_v49  ;;  %v6233_v17 = vmul.f32 %v10941_v63, %v6201_v35  ;;  %v6135_v34 = vadd.f32 1.4214138, %v6103_v38  ;;  %v6076_v31 = vadd.f32 -1.4531521, %v6044_v29 }
 0x43f   : > { %v5917_v46 = vmul.f32 0.3275911, %v11019_v51  ;;  %v6549_v59 = vadd.f32 1.0, %v6517_v39  ;;  %v6515_v42 = vmul.f32 %v6483_v41, %v10873_v12  ;;  %8136 = vpow2.f32 %v6412_v62 }
 0x440   : > { %v6362_v0 = vmul.f32 %v6330_v1, %v5882_v8  ;;  %v6167_v32 = vmul.f32 %v10981_v53, %v6135_v34  ;;  %v6108_v33 = vmul.f32 %v11012_v16, %v6076_v31  ;;  %v6422_v2 = vmul.f32 1.442695, %v6364_v6 }
 0x441   : > { %v5949_v61 = vadd.f32 1.0, %v5917_v46  ;;  %v6488_v54 = vsub.f32 1.0, %v6456_v55  ;;  %v6262_v49 = vadd.f32 0.2548296, %v6230_v22  ;;  %v5883_v23 = vand.u32 2147483647, %v11028_v58 }
 0x442   : > { %v11037_v35 = vadd.f32 %v10740_v56, %v7719_v30  ;;  %v6265_v39 = vadd.f32 0.2548296, %v6233_v17  ;;  %v6199_v29 = vadd.f32 -0.28449672, %v6167_v32  ;;  %v6140_v12 = vadd.f32 1.4214138, %v6108_v33 }
 0x443   : > { %v11039_v38 = vpop.eup %8134  ;;  %8138 = vrcp.f32 %v5949_v61  ;;  %v6547_v8 = vadd.f32 1.0, %v6515_v42  ;;  %vm5818_vm2 = vcmp.ge.f32.partialorder %v10958_v10, 0.0  ;;  %v6418_v62 = vmul.f32 1.442695, %v6362_v0 }
 0x444   : > { %v6042_v41 = vmul.f32 1.0614054, %v11039_v38  ;;  %v6231_v1 = vmul.f32 %v10981_v53, %v6199_v29  ;;  %v6172_v6 = vmul.f32 %v11012_v16, %v6140_v12  ;;  %8140 = vpow2.f32 %v6422_v2  ;;  %v11639_v12 = vld [vmem:[#allocation38_spill] sm:$0xff] }
 0x445   : > { %v5915_v55 = vmul.f32 0.3275911, %v5883_v23  ;;  %v6520_v30 = vmul.f32 %v6488_v54, %v10910_v26  ;;  %v6294_v22 = vmul.f32 %v10925_v5, %v6262_v49  ;;  %v11048_v34 = vmul.f32 0.70710677, %v11037_v35 }
 0x446   : > { %v6074_v17 = vadd.f32 -1.4531521, %v6042_v41  ;;  %v6297_v31 = vmul.f32 %v10941_v63, %v6265_v39  ;;  %v6263_v46 = vadd.f32 0.2548296, %v6231_v1  ;;  %v6204_v42 = vadd.f32 -0.28449672, %v6172_v6 }
 0x447   : > { %v5947_v32 = vadd.f32 1.0, %v5915_v55  ;;  %v11052_v0 = vmul.f32 %v6549_v59, %v10820_v43  ;;  %8142 = vpow2.f32 %v6418_v62  ;;  %v11056_v2 = vand.u32 2147483647, %v11048_v34 }
 0x448   : > { %v6106_v33 = vmul.f32 %v11039_v38, %v6074_v17  ;;  %v11059_v26 = vmul.f32 %v6547_v8, %v10863_v28  ;;  %v11064_v5 = vsel %vm5818_vm2, 1.0, %v11605_v25  ;;  %v6333_v63 = vsub.f32 0.0, %v11019_v51 }
 0x449   : > { %8144 = vrcp.f32 %v5947_v32  ;;  %v8137_v54 = vpop.eup %8136  ;;  %v6552_v43 = vadd.f32 1.0, %v6520_v30  ;;  %v6236_v49 = vmul.f32 %v11012_v16, %v6204_v42  ;;  %v5920_v61 = vmul.f32 0.3275911, %v11056_v2 }
 0x44a   : > { %v6138_v59 = vadd.f32 1.4214138, %v6106_v33  ;;  %v6454_v39 = vmul.f32 %v11004_v13, %v6294_v22  ;;  %v6457_v29 = vmul.f32 %v8133_v18, %v6297_v31  ;;  %v6295_v28 = vmul.f32 %v10981_v53, %v6263_v46  ;;  %v11640_v31 = vld [vmem:[#allocation39_spill] sm:$0xff] }
 0x44b   : > { %v7720_v10 = vadd.f32 %v10638_v7, %v11639_v12  ;;  %v6331_v41 = vsub.f32 0.0, %v5883_v23  ;;  %v5952_v62 = vadd.f32 1.0, %v5920_v61  ;;  %v6594_v1 = vpack.c.bf16 %v10499_v45, %v10492_v4 }
 0x44c   : > { %v6170_v8 = vmul.f32 %v11039_v38, %v6138_v59  ;;  %vm5821_vm3 = vcmp.ge.f32.partialorder %v11010_v24, 0.0  ;;  %v6365_v55 = vmul.f32 %v6333_v63, %v11019_v51  ;;  %vm6618_vm4 = vcmask 64512   ;;  %v11641_v51 = vld [vmem:[#allocation40_spill] sm:$0xff] }
 0x44d   : > { %v11076_v6 = vpop.eup %8138  ;;  %v11081_v13 = vadd.f32 %v10740_v56, %v7720_v10  ;;  %v6268_v53 = vadd.f32 0.2548296, %v6236_v49  ;;  %8146 = vrcp.f32 %v5952_v62  ;;  %7659 = vmatprep.mubr.msk.bf16.mxu1 %vm6618_vm4, %v6594_v1  ;;  %v6486_v22 = vsub.f32 1.0, %v6454_v39  ;;  %v11643_v63 = vld [vmem:[#allocation56_spill] sm:$0xff]  ;;  %v11644_v49 = vld [vmem:[#allocation61_spill] sm:$0xff] }
 0x44e   : > { %v6202_v18 = vadd.f32 -0.28449672, %v6170_v8  ;;  %v6045_v7 = vmul.f32 1.0614054, %v11076_v6  ;;  %v8141_v30 = vpop.eup %8140  ;;  %v6489_v4 = vsub.f32 1.0, %v6457_v29  ;;  %v6455_v45 = vmul.f32 %v8137_v54, %v6295_v28 }
 0x44f   : > { %v11086_v17 = vmul.f32 0.70710677, %v11081_v13  ;;  %v11642_v46 = vpack.c.bf16 %v11640_v31, %v11641_v51  ;;  %v6363_v33 = vmul.f32 %v6331_v41, %v5883_v23  ;;  %v7721_v59 = vadd.f32 %v11644_v49, %v11643_v63  ;;  %v11646_v51 = vld [vmem:[#allocation35_spill] sm:$0xff] }
 0x450   : > { %v6234_v42 = vmul.f32 %v11039_v38, %v6202_v18  ;;  %v6077_v32 = vadd.f32 -1.4531521, %v6045_v7  ;;  %v11096_v61 = vmul.f32 %v6552_v43, %v10882_v20  ;;  %v11099_v54 = vmul.f32 0.5, %v10990_v60 }
 0x451   : > { %7660 = vmatmul.mubr.msk.bf16.vlgmr.msra.gmra.mrb[32].mxu1 %vm6618_vm4, %v11642_v46  ;;  %v6424_v39 = vmul.f32 1.442695, %v6365_v55  ;;  %v11102_v29 = vand.u32 2147483647, %v11086_v17  ;;  %v8143_v28 = vpop.eup %8142  ;;  %v6300_v12 = vmul.f32 %v11012_v16, %v6268_v53  ;;  %v11108_v23 = vsel %vm5821_vm3, 1.0, %v11605_v25 }
 0x452   : > { %v6109_v10 = vmul.f32 %v11076_v6, %v6077_v32  ;;  %v11112_v20 = vadd.f32 %v10740_v56, %v7721_v59  ;;  %v6518_v60 = vmul.f32 %v6486_v22, %v10955_v50  ;;  %v6487_v8 = vsub.f32 1.0, %v6455_v45  ;;  %v11645_v45 = vld [vmem:[#allocation57_spill] sm:$0xff] }
 0x453   : > { %v11114_v43 = vpop.eup %8144  ;;  %v6266_v41 = vadd.f32 0.2548296, %v6234_v42  ;;  %v5918_v62 = vmul.f32 0.3275911, %v11102_v29  ;;  %v6521_v16 = vmul.f32 %v6489_v4, %v10966_v14  ;;  %v6420_v55 = vmul.f32 1.442695, %v6363_v33 }
 0x454   : > { %v6141_v1 = vadd.f32 1.4214138, %v6109_v10  ;;  %v6043_v24 = vmul.f32 1.0614054, %v11114_v43  ;;  %8148 = vpow2.f32 %v6424_v39  ;;  %v6336_v53 = vsub.f32 0.0, %v11056_v2 }
 0x455   : > { %v5950_v18 = vadd.f32 1.0, %v5918_v62  ;;  %v11122_v7 = vmul.f32 0.70710677, %v11112_v20  ;;  %v6460_v31 = vmul.f32 %v8141_v30, %v6300_v12  ;;  %v7722_v46 = vadd.f32 %v11646_v51, %v11645_v45 }
 0x456   : > { %v6173_v50 = vmul.f32 %v11076_v6, %v6141_v1  ;;  %v6075_v22 = vadd.f32 -1.4531521, %v6043_v24  ;;  %v6550_v42 = vadd.f32 1.0, %v6518_v60  ;;  %v6519_v14 = vmul.f32 %v6487_v8, %v10995_v36  ;;  %v11647_v60 = vld [vmem:[#allocation59_spill] sm:$0xff] }
 0x457   : > { %v6298_v4 = vmul.f32 %v11039_v38, %v6266_v41  ;;  %8150 = vrcp.f32 %v5950_v18  ;;  %v11129_v32 = vpop.eup %8146  ;;  %v6553_v33 = vadd.f32 1.0, %v6521_v16  ;;  %v6368_v59 = vmul.f32 %v6336_v53, %v11056_v2  ;;  %v11648_v8 = vld [vmem:[#allocation63_spill] sm:$0xff] }
 0x458   : > { %v6205_v63 = vadd.f32 -0.28449672, %v6173_v50  ;;  %v6107_v49 = vmul.f32 %v11114_v43, %v6075_v22  ;;  %8152 = vpow2.f32 %v6420_v55  ;;  %v6048_v30 = vmul.f32 1.0614054, %v11129_v32  ;;  %v11649_v50 = vld [vmem:[#allocation58_spill] sm:$0xff]  ;;  %v11650_v22 = vld [vmem:[#allocation60_spill] sm:$0xff] }
 0x459   : > { %v11135_v39 = vand.u32 2147483647, %v11122_v7  ;;  %v11138_v12 = vadd.f32 %v10740_v56, %v7722_v46  ;;  %v6492_v36 = vsub.f32 1.0, %v6460_v31  ;;  %v6596_v41 = vpack.c.bf16 %v11648_v8, %v11647_v60 }
 0x45a   : > { %v6237_v38 = vmul.f32 %v11076_v6, %v6205_v63  ;;  %v6139_v10 = vadd.f32 1.4214138, %v6107_v49  ;;  %v6551_v62 = vadd.f32 1.0, %v6519_v14  ;;  %v6458_v16 = vmul.f32 %v8143_v28, %v6298_v4 }
 0x45b   : > { %v6080_v1 = vadd.f32 -1.4531521, %v6048_v30  ;;  %v5921_v24 = vmul.f32 0.3275911, %v11135_v39  ;;  %v11145_v2 = vmul.f32 %v6550_v42, %v10903_v11  ;;  %v11149_v56 = vmul.f32 0.70710677, %v11138_v12  ;;  %7663 = vmatprep.mubr.msk.bf16.mxu1 %vm6618_vm4, %v6596_v41 }
 0x45c   : > { %v6269_v55 = vadd.f32 0.2548296, %v6237_v38  ;;  %v6171_v53 = vmul.f32 %v11114_v43, %v6139_v10  ;;  %v11153_v18 = vmul.f32 %v6553_v33, %v10920_v9  ;;  %v6597_v45 = vpack.c.bf16 %v11650_v22, %v11649_v50 }
 0x45d   : > { %v6112_v31 = vmul.f32 %v11129_v32, %v6080_v1  ;;  %v5953_v28 = vadd.f32 1.0, %v5921_v24  ;;  %v6524_v11 = vmul.f32 %v6492_v36, %v11025_v48  ;;  %v6430_v42 = vmul.f32 1.442695, %v6368_v59 }
 0x45e   : > { %v6301_v51 = vmul.f32 %v11076_v6, %v6269_v55  ;;  %v6203_v46 = vadd.f32 -0.28449672, %v6171_v53  ;;  %v8149_v14 = vpop.eup %8148  ;;  %v11161_v4 = vmul.f32 %v6551_v62, %v10972_v19  ;;  %v6490_v63 = vsub.f32 1.0, %v6458_v16  ;;  %7664 = vmatmul.mubr.msk.bf16.gmra.mrb[36].mxu1 %vm6618_vm4, %v6597_v45 }
 0x45f   : > { %v6144_v49 = vadd.f32 1.4214138, %v6112_v31  ;;  %8154 = vrcp.f32 %v5953_v28  ;;  %v11166_v30 = vand.u32 2147483647, %v11149_v56  ;;  %v6598_v48 = vpack.c.bf16 %v10812_v37, %v10766_v27 }
 0x460   : > { %v6461_v9 = vmul.f32 %v8149_v14, %v6301_v51  ;;  %v6235_v33 = vmul.f32 %v11114_v43, %v6203_v46  ;;  %v6334_v19 = vsub.f32 0.0, %v11102_v29  ;;  %v6599_v36 = vpack.c.bf16 %v10776_v21, %v10708_v44 }
 0x461   : > { %v11170_v6 = vpop.eup %8150  ;;  %v6176_v59 = vmul.f32 %v11129_v32, %v6144_v49  ;;  %v6600_v38 = vpack.c.bf16 %v10931_v47, %v10860_v40  ;;  %v6556_v60 = vadd.f32 1.0, %v6524_v11  ;;  %7667 = vmatprep.mubr.msk.bf16.mxu1 %vm6618_vm4, %v6598_v48  ;;  %v5919_v37 = vmul.f32 0.3275911, %v11166_v30  ;;  %v11653_v49 = vld [vmem:[#allocation36_spill] sm:$0xff] }
 0x462   : > { %v8153_v10 = vpop.eup %8152  ;;  %v6493_v8 = vsub.f32 1.0, %v6461_v9  ;;  %v6267_v41 = vadd.f32 0.2548296, %v6235_v33  ;;  %v6046_v62 = vmul.f32 1.0614054, %v11170_v6  ;;  %v6601_v16 = vpack.c.bf16 %v10868_v15, %v10824_v52 }
 0x463   : > { %v6208_v27 = vadd.f32 -0.28449672, %v6176_v59  ;;  %v6602_v44 = vpack.c.bf16 %v11059_v26, %v11007_v57  ;;  %v6522_v21 = vmul.f32 %v6490_v63, %v11064_v5  ;;  %v6337_v24 = vsub.f32 0.0, %v11135_v39 }
 0x464   : > { %v6525_v40 = vmul.f32 %v6493_v8, %v11108_v23  ;;  %v6299_v47 = vmul.f32 %v11114_v43, %v6267_v41  ;;  %v6078_v1 = vadd.f32 -1.4531521, %v6046_v62  ;;  %v5951_v55 = vadd.f32 1.0, %v5919_v37 }
 0x465   : > { %v6603_v53 = vpack.c.bf16 %v11052_v0, %v10963_v3  ;;  %v6604_v31 = vpack.c.bf16 %v11161_v4, %v11145_v2  ;;  %vm5819_vm5 = vcmp.ge.f32.partialorder %v11028_v58, 0.0  ;;  %v6240_v26 = vmul.f32 %v11129_v32, %v6208_v27  ;;  %v11651_v3 = vld [vmem:[#allocation55_spill] sm:$0xff] }
 0x466   : > { %v6557_v52 = vadd.f32 1.0, %v6525_v40  ;;  %v6459_v15 = vmul.f32 %v8153_v10, %v6299_v47  ;;  %v6110_v57 = vmul.f32 %v11170_v6, %v6078_v1  ;;  %v6366_v5 = vmul.f32 %v6334_v19, %v11102_v29  ;;  %7668 = vmatmul.mubr.msk.bf16.gmra.mrb[40].mxu1 %vm6618_vm4, %v6599_v36 }
 0x467   : > { %8156 = vrcp.f32 %v5951_v55  ;;  %v6605_v23 = vpack.c.bf16 %v11153_v18, %v11096_v61  ;;  %v11201_v0 = vmul.f32 %v6556_v60, %v11651_v3  ;;  %7671 = vmatprep.mubr.msk.bf16.mxu1 %vm6618_vm4, %v6600_v38  ;;  %v6554_v50 = vadd.f32 1.0, %v6522_v21 }
 0x468   : > { %v11204_v43 = vmul.f32 %v6557_v52, %v11099_v54  ;;  %v6491_v58 = vsub.f32 1.0, %v6459_v15  ;;  %v6142_v2 = vadd.f32 1.4214138, %v6110_v57  ;;  %v5851_v29 = vsel %vm5819_vm5, 1.0, %v11605_v25  ;;  %v11652_v54 = vld [vmem:[#allocation48_spill] sm:$0xff] }
 0x469   : > { %v8155_v28 = vpop.eup %8154  ;;  %8158 = vpow2.f32 %v6430_v42  ;;  %v6369_v22 = vmul.f32 %v6337_v24, %v11135_v39  ;;  %v5754_v14 = vmul.f32 0.5, %v11652_v54  ;;  %v6272_v4 = vadd.f32 0.2548296, %v6240_v26 }
 0x46a   : > { %v6523_v45 = vmul.f32 %v6491_v58, %v5851_v29  ;;  %v6174_v11 = vmul.f32 %v11170_v6, %v6142_v2  ;;  %v6049_v51 = vmul.f32 1.0614054, %v8155_v28  ;;  %v6607_v46 = vpack.c.bf16 %v11204_v43, %v11201_v0 }
 0x46b   : > { %v6426_v63 = vmul.f32 1.442695, %v6366_v5  ;;  %v5755_v9 = vmul.f32 0.5, %v11653_v49  ;;  %v6432_v19 = vmul.f32 1.442695, %v6369_v22  ;;  %v6335_v42 = vsub.f32 0.0, %v11166_v30 }
 0x46c   : > { %v6555_v33 = vadd.f32 1.0, %v6523_v45  ;;  %v6206_v48 = vadd.f32 -0.28449672, %v6174_v11  ;;  %v6081_v59 = vadd.f32 -1.4531521, %v6049_v51  ;;  %v6586_v39 = vmul.f32 %v6554_v50, %v5754_v14 }
 0x46d   : > { %8160 = vpow2.f32 %v6426_v63  ;;  %v6304_v10 = vmul.f32 %v11129_v32, %v6272_v4  ;;  %v6367_v27 = vmul.f32 %v6335_v42, %v11166_v30  ;;  %vm5824_vm6 = vcmp.ge.f32.partialorder %v11048_v34, 0.0 }
 0x46e   : > { %v6587_v36 = vmul.f32 %v6555_v33, %v5755_v9  ;;  %v6113_v38 = vmul.f32 %v8155_v28, %v6081_v59  ;;  %7672 = vmatmul.mubr.msk.bf16.gmra.mrb[44].mxu1 %vm6618_vm4, %v6601_v16  ;;  %v6238_v60 = vmul.f32 %v11170_v6, %v6206_v48  ;;  %8162 = vpow2.f32 %v6432_v19 }
 0x46f   : > { %7675 = vmatprep.mubr.msk.bf16.mxu1 %vm6618_vm4, %v6602_v44  ;;  %v6428_v16 = vmul.f32 1.442695, %v6367_v27  ;;  %v5856_v2 = vsel %vm5824_vm6, 1.0, %v11605_v25  ;;  %vm5825_vm7 = vcmp.ge.f32.partialorder %v11122_v7, 0.0  ;;  %vm5822_vm8 = vcmp.ge.f32.partialorder %v11086_v17, 0.0 }
 0x470   : > { %v6145_v8 = vadd.f32 1.4214138, %v6113_v38  ;;  %v6606_v41 = vpack.c.bf16 %v6587_v36, %v6586_v39  ;;  %v6270_v1 = vadd.f32 0.2548296, %v6238_v60  ;;  %v5760_v7 = vmul.f32 0.5, %v11037_v35  ;;  %v11654_v38 = vld [vmem:[#allocation4_spill] sm:$0xff] }
 0x471   : > { %v8157_v62 = vpop.eup %8156  ;;  %8164 = vpow2.f32 %v6428_v16  ;;  %v5761_v54 = vmul.f32 0.5, %v11112_v20  ;;  %v5854_v63 = vsel %vm5822_vm8, 1.0, %v11605_v25  ;;  %vm5823_vm9 = vcmp.ge.f32.partialorder %v11149_v56, 0.0 }
 0x472   : > { %v6177_v37 = vmul.f32 %v8155_v28, %v6145_v8  ;;  %v6047_v21 = vmul.f32 1.0614054, %v8157_v62  ;;  %v6302_v15 = vmul.f32 %v11170_v6, %v6270_v1  ;;  %v5857_v6 = vsel %vm5825_vm7, 1.0, %v11605_v25 }
 0x473   : > { %v8159_v40 = vpop.eup %8158  ;;  %v5855_v48 = vsel %vm5823_vm9, 1.0, %v11605_v25  ;;  %v5758_v59 = vmul.f32 0.5, %v11081_v13  ;;  %v5759_v56 = vmul.f32 0.5, %v11138_v12  ;;  %v11249_v25 = vld [vmem:[%s11396_s8] ss:$0 sm:$0xff] }
 0x474   : > { %v6464_v47 = vmul.f32 %v8159_v40, %v6304_v10  ;;  %v6209_v24 = vadd.f32 -0.28449672, %v6177_v37  ;;  %v6079_v55 = vadd.f32 -1.4531521, %v6047_v21  ;;  %v11656_v37 = vld [vmem:[#allocation6_spill] sm:$0xff]  ;;  %v11657_v40 = vld [vmem:[#allocation5_spill] sm:$0xff] }
 0x476   : > { %v6241_v52 = vmul.f32 %v8155_v28, %v6209_v24  ;;  %v6111_v32 = vmul.f32 %v8157_v62, %v6079_v55  ;;  %7676 = vmatmul.mubr.msk.bf16.gmra.mrb[48].mxu1 %vm6618_vm4, %v6603_v53  ;;  %v6496_v44 = vsub.f32 1.0, %v6464_v47 }
 0x477   : > { %7679 = vmatprep.mubr.msk.bf16.mxu1 %vm6618_vm4, %v6604_v31  ;;  %v8161_v30 = vpop.eup %8160 }
 0x478   : > { %v6273_v57 = vadd.f32 0.2548296, %v6241_v52  ;;  %v6143_v26 = vadd.f32 1.4214138, %v6111_v32  ;;  %v8163_v58 = vpop.eup %8162  ;;  %v6528_v50 = vmul.f32 %v6496_v44, %v5856_v2  ;;  %v6462_v34 = vmul.f32 %v8161_v30, %v6302_v15  ;;  %v11658_v32 = vld [vmem:[#allocation9_spill] sm:$0xff]  ;;  %v11661_v2 = vld [vmem:[#allocation8_spill] sm:$0xff] }
 0x47a   : > { %v6305_v5 = vmul.f32 %v8155_v28, %v6273_v57  ;;  %v6175_v3 = vmul.f32 %v8157_v62, %v6143_v26  ;;  %v6560_v31 = vadd.f32 1.0, %v6528_v50  ;;  %v6494_v28 = vsub.f32 1.0, %v6462_v34  ;;  %v11659_v26 = vld [vmem:[#allocation7_spill] sm:$0xff] }
 0x47b   : > { %v8165_v17 = vpop.eup %8164 }
 0x47c   : > { %v6465_v29 = vmul.f32 %v8163_v58, %v6305_v5  ;;  %v6207_v53 = vadd.f32 -0.28449672, %v6175_v3  ;;  %v6592_v61 = vmul.f32 %v6560_v31, %v5760_v7  ;;  %v6526_v18 = vmul.f32 %v6494_v28, %v5854_v63  ;;  %v11660_v3 = vld [vmem:[#allocation10_spill] sm:$0xff] }
 0x47e   : > { %v6497_v22 = vsub.f32 1.0, %v6465_v29  ;;  %v6239_v45 = vmul.f32 %v8157_v62, %v6207_v53  ;;  %7680 = vmatmul.mubr.msk.bf16.gmra.mrb[52].mxu1 %vm6618_vm4, %v6605_v23  ;;  %v6558_v35 = vadd.f32 1.0, %v6526_v18 }
 0x47f   : > { %7683 = vmatprep.mubr.msk.bf16.mxu1 %vm6618_vm4, %v6606_v41  ;;  %v11655_v41 = vld [vmem:[#allocation3_spill] sm:$0xff] }
 0x480   : > { %v6529_v11 = vmul.f32 %v6497_v22, %v5857_v6  ;;  %v6271_v51 = vadd.f32 0.2548296, %v6239_v45  ;;  %v6590_v42 = vmul.f32 %v6558_v35, %v5758_v59  ;;  %v11662_v6 = vld [vmem:[#allocation13_spill] sm:$0xff]  ;;  %v11667_v59 = vld [vmem:[#allocation15_spill] sm:$0xff] }
 0x482   : > { %v6561_v14 = vadd.f32 1.0, %v6529_v11  ;;  %v6303_v4 = vmul.f32 %v8157_v62, %v6271_v51  ;;  %v11663_v51 = vld [vmem:[#allocation11_spill] sm:$0xff] }
 0x484   : > { %v6593_v23 = vmul.f32 %v6561_v14, %v5761_v54  ;;  %v6463_v49 = vmul.f32 %v8165_v17, %v6303_v4  ;;  %v11664_v14 = vld [vmem:[#allocation14_spill] sm:$0xff]  ;;  %v11665_v17 = vld [vmem:[#allocation12_spill] sm:$0xff] }
 0x486   : > { %v6495_v9 = vsub.f32 1.0, %v6463_v49  ;;  %v6609_v33 = vpack.c.bf16 %v6593_v23, %v6592_v61  ;;  %7684 = vmatmul.mubr.msk.bf16.gmra.mrb[56].mxu1 %vm6618_vm4, %v6607_v46 }
 0x488   : > { %v6527_v20 = vmul.f32 %v6495_v9, %v5855_v48 }
 0x48a   : > { %v6559_v19 = vadd.f32 1.0, %v6527_v20 }
 0x48c   : > { %v6591_v39 = vmul.f32 %v6559_v19, %v5759_v56 }
 0x48e   : > { %v6608_v36 = vpack.c.bf16 %v6591_v39, %v6590_v42  ;;  %v11668_v42 = vld [vmem:[#allocation18_spill] sm:$0xff] }
 0x490   : > { %7687 = vmatprep.mubr.msk.bf16.mxu1 %vm6618_vm4, %v6608_v36  ;;  %v11669_v36 = vld [vmem:[#allocation16_spill] sm:$0xff] }
 0x491   : > { %7688 = vmatmul.mubr.msk.bf16.gmra.mrb[60].mxu1 %vm6618_vm4, %v6609_v33  ;;  %v11666_v33 = vld [vmem:[#allocation17_spill] sm:$0xff] }
 0x524   : > { %v7661_v0 = vpop.f32.mrb[32].mxu1 }
 0x525   : > { %v6714_v43 = vadd.f32 %v7661_v0, %v11249_v25  ;;  %v6705_v46 = vpop.f32.mrb[33].mxu1 }
 0x526   : > { %v6706_v13 = vadd.f32 %v11249_v25, %v6705_v46  ;;  %v7662_v12 = vpop.f32.mrb[34].mxu1 }
 0x527   : > { %v6834_v10 = vadd.f32 %v6714_v43, %v11654_v38  ;;  %v6717_v60 = vadd.f32 %v7662_v12, %v11249_v25  ;;  %v6708_v8 = vpop.f32.mrb[35].mxu1 }
 0x528   : > { %v6832_v62 = vadd.f32 %v6706_v13, %v11655_v41  ;;  %v6709_v27 = vadd.f32 %v11249_v25, %v6708_v8 }
 0x529   : > { %6866 = vst.msk [vmem:[%s11256_s21 + $0x10] sm:$0xff] %vm457_vm0, %v6834_v10  ;;  %v6835_v21 = vadd.f32 %v6717_v60, %v11656_v37  ;;  %v11670_v10 = vld [vmem:[#allocation21_spill] sm:$0xff] }
 0x52a   : > { %6864 = vst.msk [vmem:[%s11256_s21] sm:$0xff] %vm457_vm0, %v6832_v62  ;;  %v6833_v47 = vadd.f32 %v6709_v27, %v11657_v40  ;;  %v11671_v62 = vld [vmem:[#allocation19_spill] sm:$0xff] }
 0x52b   : > { %6867 = vst.msk [vmem:[%s11256_s21 + $0x18] sm:$0xff] %vm457_vm0, %v6835_v21  ;;  %v11672_v21 = vld [vmem:[#allocation22_spill] sm:$0xff] }
 0x52c   : > { %6865 = vst.msk [vmem:[%s11256_s21 + $0x8] sm:$0xff] %vm457_vm0, %v6833_v47  ;;  %v11673_v47 = vld [vmem:[#allocation20_spill] sm:$0xff] }
 0x531   : > { %v7665_v1 = vpop.f32.mrb[36].mxu1 }
 0x532   : > { %v6730_v24 = vadd.f32 %v7665_v1, %v11249_v25  ;;  %v6721_v55 = vpop.f32.mrb[37].mxu1 }
 0x533   : > { %v6722_v16 = vadd.f32 %v11249_v25, %v6721_v55  ;;  %v7666_v52 = vpop.f32.mrb[38].mxu1 }
 0x534   : > { %v6838_v44 = vadd.f32 %v6730_v24, %v11658_v32  ;;  %v6733_v15 = vadd.f32 %v7666_v52, %v11249_v25  ;;  %v6724_v57 = vpop.f32.mrb[39].mxu1 }
 0x535   : > { %v6836_v30 = vadd.f32 %v6722_v16, %v11659_v26  ;;  %v6725_v5 = vadd.f32 %v11249_v25, %v6724_v57 }
 0x536   : > { %6870 = vst.msk [vmem:[%s11256_s21 + $0x30] sm:$0xff] %vm457_vm0, %v6838_v44  ;;  %v6839_v58 = vadd.f32 %v6733_v15, %v11660_v3  ;;  %v11674_v44 = vld [vmem:[#allocation25_spill] sm:$0xff] }
 0x537   : > { %6868 = vst.msk [vmem:[%s11256_s21 + $0x20] sm:$0xff] %vm457_vm0, %v6836_v30  ;;  %v6837_v50 = vadd.f32 %v6725_v5, %v11661_v2  ;;  %v11675_v30 = vld [vmem:[#allocation23_spill] sm:$0xff] }
 0x538   : > { %6871 = vst.msk [vmem:[%s11256_s21 + $0x38] sm:$0xff] %vm457_vm0, %v6839_v58  ;;  %v11676_v58 = vld [vmem:[#allocation26_spill] sm:$0xff] }
 0x539   : > { %6869 = vst.msk [vmem:[%s11256_s21 + $0x28] sm:$0xff] %vm457_vm0, %v6837_v50  ;;  %v7669_v34 = vpop.f32.mrb[40].mxu1  ;;  %v11677_v50 = vld [vmem:[#allocation24_spill] sm:$0xff] }
 0x53a   : > { %v6746_v29 = vadd.f32 %v7669_v34, %v11249_v25  ;;  %v6737_v53 = vpop.f32.mrb[41].mxu1 }
 0x53b   : > { %v6738_v22 = vadd.f32 %v11249_v25, %v6737_v53  ;;  %v7670_v45 = vpop.f32.mrb[42].mxu1 }
 0x53c   : > { %v6842_v31 = vadd.f32 %v6746_v29, %v11662_v6  ;;  %v6749_v28 = vadd.f32 %v7670_v45, %v11249_v25  ;;  %v6740_v11 = vpop.f32.mrb[43].mxu1 }
 0x53d   : > { %v6840_v7 = vadd.f32 %v6738_v22, %v11663_v51  ;;  %v6741_v54 = vadd.f32 %v11249_v25, %v6740_v11 }
 0x53e   : > { %6874 = vst.msk [vmem:[%s11256_s21 + $0x50] sm:$0xff] %vm457_vm0, %v6842_v31  ;;  %v6843_v4 = vadd.f32 %v6749_v28, %v11664_v14  ;;  %v11678_v31 = vld [vmem:[#allocation29_spill] sm:$0xff] }
 0x53f   : > { %6872 = vst.msk [vmem:[%s11256_s21 + $0x40] sm:$0xff] %vm457_vm0, %v6840_v7  ;;  %v6841_v63 = vadd.f32 %v6741_v54, %v11665_v17  ;;  %v11679_v7 = vld [vmem:[#allocation27_spill] sm:$0xff] }
 0x540   : > { %6875 = vst.msk [vmem:[%s11256_s21 + $0x58] sm:$0xff] %vm457_vm0, %v6843_v4  ;;  %v11680_v4 = vld [vmem:[#allocation30_spill] sm:$0xff] }
 0x541   : > { %6873 = vst.msk [vmem:[%s11256_s21 + $0x48] sm:$0xff] %vm457_vm0, %v6841_v63  ;;  %v7673_v61 = vpop.f32.mrb[44].mxu1  ;;  %v11681_v63 = vld [vmem:[#allocation28_spill] sm:$0xff] }
 0x542   : > { %v6762_v18 = vadd.f32 %v7673_v61, %v11249_v25  ;;  %v6753_v23 = vpop.f32.mrb[45].mxu1 }
 0x543   : > { %v6754_v49 = vadd.f32 %v11249_v25, %v6753_v23  ;;  %v7674_v9 = vpop.f32.mrb[46].mxu1 }
 0x544   : > { %v6846_v48 = vadd.f32 %v6762_v18, %v11666_v33  ;;  %v6765_v35 = vadd.f32 %v7674_v9, %v11249_v25  ;;  %v6756_v20 = vpop.f32.mrb[47].mxu1 }
 0x545   : > { %v6844_v56 = vadd.f32 %v6754_v49, %v11667_v59  ;;  %v6757_v19 = vadd.f32 %v11249_v25, %v6756_v20 }
 0x546   : > { %6878 = vst.msk [vmem:[%s11256_s21 + $0x70] sm:$0xff] %vm457_vm0, %v6846_v48  ;;  %v6847_v39 = vadd.f32 %v6765_v35, %v11668_v42  ;;  %v11682_v48 = vld [vmem:[#allocation33_spill] sm:$0xff] }
 0x547   : > { %6876 = vst.msk [vmem:[%s11256_s21 + $0x60] sm:$0xff] %vm457_vm0, %v6844_v56  ;;  %v6845_v0 = vadd.f32 %v6757_v19, %v11669_v36  ;;  %v11683_v56 = vld [vmem:[#allocation31_spill] sm:$0xff] }
 0x548   : > { %6879 = vst.msk [vmem:[%s11256_s21 + $0x78] sm:$0xff] %vm457_vm0, %v6847_v39  ;;  %v11684_v39 = vld [vmem:[#allocation34_spill] sm:$0xff] }
 0x549   : > { %6877 = vst.msk [vmem:[%s11256_s21 + $0x68] sm:$0xff] %vm457_vm0, %v6845_v0  ;;  %v7677_v43 = vpop.f32.mrb[48].mxu1  ;;  %v11685_v0 = vld [vmem:[#allocation32_spill] sm:$0xff] }
 0x54a   : > { %v6778_v46 = vadd.f32 %v7677_v43, %v11249_v25  ;;  %v6769_v13 = vpop.f32.mrb[49].mxu1 }
 0x54b   : > { %v6770_v12 = vadd.f32 %v11249_v25, %v6769_v13  ;;  %v7678_v38 = vpop.f32.mrb[50].mxu1 }
 0x54c   : > { %v6850_v60 = vadd.f32 %v6778_v46, %v11670_v10  ;;  %v6781_v8 = vadd.f32 %v7678_v38, %v11249_v25  ;;  %v6772_v41 = vpop.f32.mrb[51].mxu1 }
 0x54d   : > { %v6848_v27 = vadd.f32 %v6770_v12, %v11671_v62  ;;  %v6773_v37 = vadd.f32 %v11249_v25, %v6772_v41 }
 0x54e   : > { %6882 = vst.msk [vmem:[%s11256_s21 + $0x90] sm:$0xff] %vm457_vm0, %v6850_v60  ;;  %v6851_v40 = vadd.f32 %v6781_v8, %v11672_v21 }
 0x54f   : > { %6880 = vst.msk [vmem:[%s11256_s21 + $0x80] sm:$0xff] %vm457_vm0, %v6848_v27  ;;  %v6849_v1 = vadd.f32 %v6773_v37, %v11673_v47 }
 0x550   : > { %6883 = vst.msk [vmem:[%s11256_s21 + $0x98] sm:$0xff] %vm457_vm0, %v6851_v40 }
 0x551   : > { %6881 = vst.msk [vmem:[%s11256_s21 + $0x88] sm:$0xff] %vm457_vm0, %v6849_v1  ;;  %v7681_v24 = vpop.f32.mrb[52].mxu1 }
 0x552   : > { %v6794_v55 = vadd.f32 %v7681_v24, %v11249_v25  ;;  %v6785_v16 = vpop.f32.mrb[53].mxu1 }
 0x553   : > { %v6786_v52 = vadd.f32 %v11249_v25, %v6785_v16  ;;  %v7682_v32 = vpop.f32.mrb[54].mxu1 }
 0x554   : > { %v6854_v15 = vadd.f32 %v6794_v55, %v11674_v44  ;;  %v6797_v57 = vadd.f32 %v7682_v32, %v11249_v25  ;;  %v6788_v26 = vpop.f32.mrb[55].mxu1 }
 0x555   : > { %v6852_v5 = vadd.f32 %v6786_v52, %v11675_v30  ;;  %v6789_v3 = vadd.f32 %v11249_v25, %v6788_v26 }
 0x556   : > { %6886 = vst.msk [vmem:[%s11256_s21 + $0xb0] sm:$0xff] %vm457_vm0, %v6854_v15  ;;  %v6855_v2 = vadd.f32 %v6797_v57, %v11676_v58 }
 0x557   : > { %6884 = vst.msk [vmem:[%s11256_s21 + $0xa0] sm:$0xff] %vm457_vm0, %v6852_v5  ;;  %v6853_v34 = vadd.f32 %v6789_v3, %v11677_v50 }
 0x558   : > { %6887 = vst.msk [vmem:[%s11256_s21 + $0xb8] sm:$0xff] %vm457_vm0, %v6855_v2 }
 0x559   : > { %6885 = vst.msk [vmem:[%s11256_s21 + $0xa8] sm:$0xff] %vm457_vm0, %v6853_v34  ;;  %v7685_v29 = vpop.f32.mrb[56].mxu1 }
 0x55a   : > { %v6810_v53 = vadd.f32 %v7685_v29, %v11249_v25  ;;  %v6801_v22 = vpop.f32.mrb[57].mxu1 }
 0x55b   : > { %v6802_v45 = vadd.f32 %v11249_v25, %v6801_v22  ;;  %v7686_v6 = vpop.f32.mrb[58].mxu1 }
 0x55c   : > { %v6858_v28 = vadd.f32 %v6810_v53, %v11678_v31  ;;  %v6813_v11 = vadd.f32 %v7686_v6, %v11249_v25  ;;  %v6804_v51 = vpop.f32.mrb[59].mxu1 }
 0x55d   : > { %v6856_v54 = vadd.f32 %v6802_v45, %v11679_v7  ;;  %v6805_v14 = vadd.f32 %v11249_v25, %v6804_v51 }
 0x55e   : > { %6890 = vst.msk [vmem:[%s11256_s21 + $0xd0] sm:$0xff] %vm457_vm0, %v6858_v28  ;;  %v6859_v17 = vadd.f32 %v6813_v11, %v11680_v4 }
 0x55f   : > { %6888 = vst.msk [vmem:[%s11256_s21 + $0xc0] sm:$0xff] %vm457_vm0, %v6856_v54  ;;  %v6857_v61 = vadd.f32 %v6805_v14, %v11681_v63 }
 0x560   : > { %6891 = vst.msk [vmem:[%s11256_s21 + $0xd8] sm:$0xff] %vm457_vm0, %v6859_v17 }
 0x561   : > { %6889 = vst.msk [vmem:[%s11256_s21 + $0xc8] sm:$0xff] %vm457_vm0, %v6857_v61 }
 0x564   : > { %v7689_v18 = vpop.f32.mrb[60].mxu1 }
 0x565   : > { %v6826_v23 = vadd.f32 %v7689_v18, %v11249_v25  ;;  %v6817_v49 = vpop.f32.mrb[61].mxu1 }
 0x566   : > { %v6818_v9 = vadd.f32 %v11249_v25, %v6817_v49  ;;  %v7690_v33 = vpop.f32.mrb[62].mxu1 }
 0x567   : > { %v6862_v35 = vadd.f32 %v6826_v23, %v11682_v48  ;;  %v6829_v20 = vadd.f32 %v7690_v33, %v11249_v25  ;;  %v6820_v59 = vpop.f32.mrb[63].mxu1 }
 0x568   : > { %v6860_v19 = vadd.f32 %v6818_v9, %v11683_v56  ;;  %v6821_v42 = vadd.f32 %v11249_v25, %v6820_v59 }
 0x569   : > { %6894 = vst.msk [vmem:[%s11256_s21 + $0xf0] sm:$0xff] %vm457_vm0, %v6862_v35  ;;  %v6863_v36 = vadd.f32 %v6829_v20, %v11684_v39 }
 0x56a   : > { %6892 = vst.msk [vmem:[%s11256_s21 + $0xe0] sm:$0xff] %vm457_vm0, %v6860_v19  ;;  %v6861_v43 = vadd.f32 %v6821_v42, %v11685_v0 }
 0x56b   : > { %6895 = vst.msk [vmem:[%s11256_s21 + $0xf8] sm:$0xff] %vm457_vm0, %v6863_v36 }
 0x56c   : > { %6893 = vst.msk [vmem:[%s11256_s21 + $0xe8] sm:$0xff] %vm457_vm0, %v6861_v43 }
 0x56d PF: > { %s19_s30 = sadd.s32 1, %s8205_s30  }
 0x56e   : > { %p16_p4 = scmp.ge.s32.totalorder %s19_s30, 4  }
 0x570   :  { %18 = sbr.rel (!%p16_p4) target bundleno = 1 (0x1), region = 97 }

</bundles_post_ra>
